<compile_context>
chip_gen: v7x
topology: tpu7x:2x2x1
jax: 0.10.0
libtpu: 0.0.40
codegen_flags: <defaults>
</compile_context>

<pallas_src>
import jax
import jax.numpy as jnp
from jax.experimental import pallas as pl
from jax.experimental.pallas import tpu as pltpu

LANE = 128
SUBLANE = 8


def _round_up(x, m):
    return (x + m - 1) // m * m


def basic_block_forward(x_nchw, conv1_w, conv2_w, bn1, bn2, *, stride=1, eps=1e-5):
    """Fused BasicBlock forward.

    x_nchw:  (N, C, H, W) float32 (PyTorch layout)
    conv*_w: (C_out, C_in, 3, 3) float32 (PyTorch OIHW layout, bias-free)
    bn1/bn2: (gamma, beta, running_mean, running_var) tuples, inference-mode BN.
    """
    N, c_in, H, W = x_nchw.shape
    c_out = conv1_w.shape[0]
    assert conv1_w.shape == (c_out, c_in, 3, 3)
    assert conv2_w.shape == (c_out, c_out, 3, 3)
    if stride != 1 or c_in != c_out:
        # TODO(synk): option-A (strided subsample + channel zero-pad) and
        # option-B (1x1 conv + BN) downsampling shortcuts are not implemented;
        # only the identity-shortcut configuration is supported here.
        raise NotImplementedError("only stride=1 with in_planes == planes")

    f32 = jnp.float32
    cp = _round_up(max(c_in, c_out), LANE)       # lane-dense channel padding
    hp, wp = H + 2, W + 2                        # zero-padded spatial frame
    p = hp * wp                                  # rows of the flattened frame
    p_pad = _round_up(p, SUBLANE)                # sublane-aligned matmul M dim
    m = wp + 1                                   # max |tap shift| (margin rows)
    r = _round_up(p_pad + 2 * m, SUBLANE)        # rows incl. zero margins
    # flat-row shift of each of the 9 conv taps: (dh-1)*wp + (dw-1)
    shifts = tuple((dh - 1) * wp + (dw - 1) for dh in range(3) for dw in range(3))

    # --- image: NHWC, zero-pad bottom/right by 2, flatten, add zero margins ---
    x_nhwc = jnp.transpose(x_nchw.astype(f32), (0, 2, 3, 1))
    x_flat = jnp.pad(x_nhwc, ((0, 0), (0, 2), (0, 2), (0, 0))).reshape(N, p, c_in)
    x_marg = jnp.pad(x_flat, ((0, 0), (m, r - p - m), (0, cp - c_in)))  # (N, r, cp)

    # --- weights: OIHW -> (9 taps, C_in, C_out), zero-padded to (9, cp, cp) ---
    def prep_w(w, cin):
        taps = jnp.transpose(w.astype(f32), (2, 3, 1, 0)).reshape(9, cin, c_out)
        return jnp.pad(taps, ((0, 0), (0, cp - cin), (0, cp - c_out)))

    w1 = prep_w(conv1_w, c_in)
    w2 = prep_w(conv2_w, c_out)

    # --- fold inference BatchNorm into per-channel scale/bias (hoisted) ---
    def fold_bn(bn):
        gamma, beta, mean, var = (v.astype(f32) for v in bn)
        scale = gamma * jax.lax.rsqrt(var + eps)
        bias = beta - mean * scale
        return jnp.pad(scale, (0, cp - c_out)), jnp.pad(bias, (0, cp - c_out))

    s1, b1 = fold_bn(bn1)
    s2, b2 = fold_bn(bn2)
    bn_packed = jnp.stack([s1, b1, s2, b2])                       # (4, cp)

    # --- validity mask for rows of the flattened frame (1 = real pixel) ---
    rows = jnp.arange(p_pad, dtype=jnp.int32)
    mask = (((rows % wp) < W) & (rows < H * wp)).astype(f32)[:, None]   # (p_pad, 1)

    def kernel(mask_ref, x_ref, w1_ref, w2_ref, bn_ref, out_ref, y_scr, acc_scr):
        mask_v = mask_ref[...]                                    # (p_pad, 1)

        def accumulate_conv(get_patch, w_ref):
            acc_scr[...] = jnp.dot(get_patch(shifts[0]), w_ref[0],
                                   preferred_element_type=jnp.float32)
            for t in range(1, 9):
                acc_scr[...] += jnp.dot(get_patch(shifts[t]), w_ref[t],
                                        preferred_element_type=jnp.float32)

        # conv1 + bn1 + relu; mask so zero-padding rows stay exactly zero.
        accumulate_conv(lambda s: x_ref[0, m + s:m + s + p_pad, :], w1_ref)
        y = jnp.maximum(acc_scr[...] * bn_ref[0:1, :] + bn_ref[1:2, :], 0.0) * mask_v

        # stage the intermediate activation into a zero-margined VMEM frame.
        y_scr[0:m, :] = jnp.zeros((m, cp), jnp.float32)
        y_scr[m:m + p_pad, :] = y
        y_scr[m + p_pad:r, :] = jnp.zeros((r - m - p_pad, cp), jnp.float32)

        # conv2 + bn2 + identity shortcut + relu, single fused lane-dense store.
        accumulate_conv(lambda s: y_scr[m + s:m + s + p_pad, :], w2_ref)
        out = (acc_scr[...] * bn_ref[2:3, :] + bn_ref[3:4, :]
               + x_ref[0, m:m + p_pad, :])
        out_ref[0, :, :] = jnp.maximum(out, 0.0)

    out_flat = pl.pallas_call(
        kernel,
        out_shape=jax.ShapeDtypeStruct((N, p_pad, cp), jnp.float32),
        grid_spec=pltpu.PrefetchScalarGridSpec(
            num_scalar_prefetch=0,
            grid=(N,),
            in_specs=[
                pl.BlockSpec((p_pad, 1), lambda n: (0, 0)),        # mask (resident)
                pl.BlockSpec((1, r, cp), lambda n: (n, 0, 0)),     # image n
                pl.BlockSpec((9, cp, cp), lambda n: (0, 0, 0)),    # conv1 taps
                pl.BlockSpec((9, cp, cp), lambda n: (0, 0, 0)),    # conv2 taps
                pl.BlockSpec((4, cp), lambda n: (0, 0)),           # folded BN
            ],
            out_specs=pl.BlockSpec((1, p_pad, cp), lambda n: (n, 0, 0)),
            scratch_shapes=[
                pltpu.VMEM((r, cp), jnp.float32),        # margined intermediate
                pltpu.VMEM((p_pad, cp), jnp.float32),    # matmul accumulator
            ],
        ),
        compiler_params=pltpu.CompilerParams(
            dimension_semantics=("parallel",)),          # megacore on v7x
    )(mask, x_marg, w1, w2, bn_packed)

    out = out_flat[:, :p, :].reshape(N, hp, wp, cp)[:, :H, :W, :c_out]
    return jnp.transpose(out, (0, 3, 1, 2))


def _reference_basic_block(x, w1, w2, bn1, bn2, eps=1e-5):
    def conv3x3(inp, w):
        return jax.lax.conv_general_dilated(
            inp, w, window_strides=(1, 1), padding=((1, 1), (1, 1)),
            dimension_numbers=("NCHW", "OIHW", "NCHW"),
            precision=jax.lax.Precision.HIGHEST)

    def bn(inp, params):
        gamma, beta, mean, var = params
        inv = (gamma * jax.lax.rsqrt(var + eps))[None, :, None, None]
        return (inp - mean[None, :, None, None]) * inv + beta[None, :, None, None]

    out = jax.nn.relu(bn(conv3x3(x, w1), bn1))
    out = bn(conv3x3(out, w2), bn2)
    return jax.nn.relu(out + x)


if __name__ == "__main__":
    key = jax.random.PRNGKey(0)
    ks = jax.random.split(key, 5)

    N, C, H, W = 2, 16, 16, 16          # BasicBlock(in_planes=16, planes=16, stride=1)
    x = jax.random.normal(ks[0], (N, C, H, W), dtype=jnp.float32)

    fan_in = 9 * C
    w1 = jax.random.normal(ks[1], (C, C, 3, 3), jnp.float32) * jnp.sqrt(2.0 / fan_in)
    w2 = jax.random.normal(ks[2], (C, C, 3, 3), jnp.float32) * jnp.sqrt(2.0 / fan_in)

    def make_bn(k):
        k1, k2, k3, k4 = jax.random.split(k, 4)
        gamma = 1.0 + 0.1 * jax.random.normal(k1, (C,), jnp.float32)
        beta = 0.1 * jax.random.normal(k2, (C,), jnp.float32)
        mean = 0.1 * jax.random.normal(k3, (C,), jnp.float32)
        var = jax.random.uniform(k4, (C,), jnp.float32, minval=0.5, maxval=1.5)
        return (gamma, beta, mean, var)

    bn1 = make_bn(ks[3])
    bn2 = make_bn(ks[4])

    out = basic_block_forward(x, w1, w2, bn1, bn2)
    jax.block_until_ready(out)

    ref = _reference_basic_block(x, w1, w2, bn1, bn2)
    assert out.shape == (N, C, H, W)
    assert bool(jnp.allclose(out, ref, atol=1e-1, rtol=5e-2)), \
        float(jnp.max(jnp.abs(out - ref)))

    print("KERNEL_OK")
</pallas_src>

<mosaic_0001>
module attributes {stable_mosaic.version = 11 : i64} {
  func.func @kernel(%arg0: i32, %arg1: memref<328x1xf32, #tpu.memory_space<vmem>>, %arg2: memref<1x368x128xf32, #tpu.memory_space<vmem>>, %arg3: memref<9x128x128xf32, #tpu.memory_space<vmem>>, %arg4: memref<9x128x128xf32, #tpu.memory_space<vmem>>, %arg5: memref<4x128xf32, #tpu.memory_space<vmem>>, %arg6: memref<1x328x128xf32, #tpu.memory_space<vmem>>, %arg7: memref<368x128xf32, #tpu.memory_space<vmem>>, %arg8: memref<328x128xf32, #tpu.memory_space<vmem>>) attributes {dimension_semantics = [#tpu.dimension_semantics<parallel>], iteration_bounds = array<i64: 2>, scalar_prefetch = 0 : i64, scratch_operands = 2 : i64, tpu.core_type = #tpu.core_type<tc>, window_params = [{pipeline_mode = #tpu.pipeline_mode<synchronous>, transform_indices = @transform_0, window_bounds = array<i64: 328, 1>}, {transform_indices = @transform_1, window_bounds = array<i64: 1, 368, 128>}, {pipeline_mode = #tpu.pipeline_mode<synchronous>, transform_indices = @transform_2, window_bounds = array<i64: 9, 128, 128>}, {pipeline_mode = #tpu.pipeline_mode<synchronous>, transform_indices = @transform_3, window_bounds = array<i64: 9, 128, 128>}, {pipeline_mode = #tpu.pipeline_mode<synchronous>, transform_indices = @transform_4, window_bounds = array<i64: 4, 128>}, {transform_indices = @transform_5, window_bounds = array<i64: 1, 328, 128>}]} {
    %c0 = arith.constant 0 : index
    %c0_0 = arith.constant 0 : index
    %0 = vector.load %arg1[%c0, %c0_0] : memref<328x1xf32, #tpu.memory_space<vmem>>, vector<328x1xf32>
    %c0_1 = arith.constant 0 : index
    %c0_2 = arith.constant 0 : index
    %c0_3 = arith.constant 0 : index
    %1 = vector.load %arg2[%c0_1, %c0_2, %c0_3] : memref<1x368x128xf32, #tpu.memory_space<vmem>>, vector<1x328x128xf32>
    %2 = vector.shape_cast %1 : vector<1x328x128xf32> to vector<328x128xf32>
    %c0_4 = arith.constant 0 : index
    %c0_5 = arith.constant 0 : index
    %c0_6 = arith.constant 0 : index
    %3 = vector.load %arg3[%c0_4, %c0_5, %c0_6] : memref<9x128x128xf32, #tpu.memory_space<vmem>>, vector<1x128x128xf32>
    %4 = vector.shape_cast %3 : vector<1x128x128xf32> to vector<128x128xf32>
    %cst = arith.constant dense<0.000000e+00> : vector<328x128xf32>
    %5 = tpu.matmul %2, %4, %cst {dimension_numbers = #tpu.dot_dimension_numbers<[1], [0], [0], [1], [0, 0, 1, 1], [], []>} : vector<328x128xf32>, vector<128x128xf32>, vector<328x128xf32> -> vector<328x128xf32>
    %c0_7 = arith.constant 0 : index
    %c0_8 = arith.constant 0 : index
    %6 = vector.load %arg8[%c0_7, %c0_8] : memref<328x128xf32, #tpu.memory_space<vmem>>, vector<328x128xf32>
    tpu.vector_store %arg8[%c0_7, %c0_8], %5 {strides = array<i32>} : memref<328x128xf32, #tpu.memory_space<vmem>>, vector<328x128xf32>,
    %c0_9 = arith.constant 0 : index
    %c0_10 = arith.constant 0 : index
    %7 = vector.load %arg8[%c0_9, %c0_10] : memref<328x128xf32, #tpu.memory_space<vmem>>, vector<328x128xf32>
    %c0_11 = arith.constant 0 : index
    %c1 = arith.constant 1 : index
    %c0_12 = arith.constant 0 : index
    %8 = vector.load %arg2[%c0_11, %c1, %c0_12] : memref<1x368x128xf32, #tpu.memory_space<vmem>>, vector<1x328x128xf32>
    %9 = vector.shape_cast %8 : vector<1x328x128xf32> to vector<328x128xf32>
    %c1_13 = arith.constant 1 : index
    %c0_14 = arith.constant 0 : index
    %c0_15 = arith.constant 0 : index
    %10 = vector.load %arg3[%c1_13, %c0_14, %c0_15] : memref<9x128x128xf32, #tpu.memory_space<vmem>>, vector<1x128x128xf32>
    %11 = vector.shape_cast %10 : vector<1x128x128xf32> to vector<128x128xf32>
    %cst_16 = arith.constant dense<0.000000e+00> : vector<328x128xf32>
    %12 = tpu.matmul %9, %11, %cst_16 {dimension_numbers = #tpu.dot_dimension_numbers<[1], [0], [0], [1], [0, 0, 1, 1], [], []>} : vector<328x128xf32>, vector<128x128xf32>, vector<328x128xf32> -> vector<328x128xf32>
    %13 = arith.addf %7, %12 : vector<328x128xf32>
    %c0_17 = arith.constant 0 : index
    %c0_18 = arith.constant 0 : index
    %14 = vector.load %arg8[%c0_17, %c0_18] : memref<328x128xf32, #tpu.memory_space<vmem>>, vector<328x128xf32>
    tpu.vector_store %arg8[%c0_17, %c0_18], %13 {strides = array<i32>} : memref<328x128xf32, #tpu.memory_space<vmem>>, vector<328x128xf32>,
    %c0_19 = arith.constant 0 : index
    %c0_20 = arith.constant 0 : index
    %15 = vector.load %arg8[%c0_19, %c0_20] : memref<328x128xf32, #tpu.memory_space<vmem>>, vector<328x128xf32>
    %c0_21 = arith.constant 0 : index
    %c2 = arith.constant 2 : index
    %c0_22 = arith.constant 0 : index
    %16 = vector.load %arg2[%c0_21, %c2, %c0_22] : memref<1x368x128xf32, #tpu.memory_space<vmem>>, vector<1x328x128xf32>
    %17 = vector.shape_cast %16 : vector<1x328x128xf32> to vector<328x128xf32>
    %c2_23 = arith.constant 2 : index
    %c0_24 = arith.constant 0 : index
    %c0_25 = arith.constant 0 : index
    %18 = vector.load %arg3[%c2_23, %c0_24, %c0_25] : memref<9x128x128xf32, #tpu.memory_space<vmem>>, vector<1x128x128xf32>
    %19 = vector.shape_cast %18 : vector<1x128x128xf32> to vector<128x128xf32>
    %cst_26 = arith.constant dense<0.000000e+00> : vector<328x128xf32>
    %20 = tpu.matmul %17, %19, %cst_26 {dimension_numbers = #tpu.dot_dimension_numbers<[1], [0], [0], [1], [0, 0, 1, 1], [], []>} : vector<328x128xf32>, vector<128x128xf32>, vector<328x128xf32> -> vector<328x128xf32>
    %21 = arith.addf %15, %20 : vector<328x128xf32>
    %c0_27 = arith.constant 0 : index
    %c0_28 = arith.constant 0 : index
    %22 = vector.load %arg8[%c0_27, %c0_28] : memref<328x128xf32, #tpu.memory_space<vmem>>, vector<328x128xf32>
    tpu.vector_store %arg8[%c0_27, %c0_28], %21 {strides = array<i32>} : memref<328x128xf32, #tpu.memory_space<vmem>>, vector<328x128xf32>,
    %c0_29 = arith.constant 0 : index
    %c0_30 = arith.constant 0 : index
    %23 = vector.load %arg8[%c0_29, %c0_30] : memref<328x128xf32, #tpu.memory_space<vmem>>, vector<328x128xf32>
    %c0_31 = arith.constant 0 : index
    %c18 = arith.constant 18 : index
    %c0_32 = arith.constant 0 : index
    %24 = vector.load %arg2[%c0_31, %c18, %c0_32] : memref<1x368x128xf32, #tpu.memory_space<vmem>>, vector<1x328x128xf32>
    %25 = vector.shape_cast %24 : vector<1x328x128xf32> to vector<328x128xf32>
    %c3 = arith.constant 3 : index
    %c0_33 = arith.constant 0 : index
    %c0_34 = arith.constant 0 : index
    %26 = vector.load %arg3[%c3, %c0_33, %c0_34] : memref<9x128x128xf32, #tpu.memory_space<vmem>>, vector<1x128x128xf32>
    %27 = vector.shape_cast %26 : vector<1x128x128xf32> to vector<128x128xf32>
    %cst_35 = arith.constant dense<0.000000e+00> : vector<328x128xf32>
    %28 = tpu.matmul %25, %27, %cst_35 {dimension_numbers = #tpu.dot_dimension_numbers<[1], [0], [0], [1], [0, 0, 1, 1], [], []>} : vector<328x128xf32>, vector<128x128xf32>, vector<328x128xf32> -> vector<328x128xf32>
    %29 = arith.addf %23, %28 : vector<328x128xf32>
    %c0_36 = arith.constant 0 : index
    %c0_37 = arith.constant 0 : index
    %30 = vector.load %arg8[%c0_36, %c0_37] : memref<328x128xf32, #tpu.memory_space<vmem>>, vector<328x128xf32>
    tpu.vector_store %arg8[%c0_36, %c0_37], %29 {strides = array<i32>} : memref<328x128xf32, #tpu.memory_space<vmem>>, vector<328x128xf32>,
    %c0_38 = arith.constant 0 : index
    %c0_39 = arith.constant 0 : index
    %31 = vector.load %arg8[%c0_38, %c0_39] : memref<328x128xf32, #tpu.memory_space<vmem>>, vector<328x128xf32>
    %c0_40 = arith.constant 0 : index
    %c19 = arith.constant 19 : index
    %c0_41 = arith.constant 0 : index
    %32 = vector.load %arg2[%c0_40, %c19, %c0_41] : memref<1x368x128xf32, #tpu.memory_space<vmem>>, vector<1x328x128xf32>
    %33 = vector.shape_cast %32 : vector<1x328x128xf32> to vector<328x128xf32>
    %c4 = arith.constant 4 : index
    %c0_42 = arith.constant 0 : index
    %c0_43 = arith.constant 0 : index
    %34 = vector.load %arg3[%c4, %c0_42, %c0_43] : memref<9x128x128xf32, #tpu.memory_space<vmem>>, vector<1x128x128xf32>
    %35 = vector.shape_cast %34 : vector<1x128x128xf32> to vector<128x128xf32>
    %cst_44 = arith.constant dense<0.000000e+00> : vector<328x128xf32>
    %36 = tpu.matmul %33, %35, %cst_44 {dimension_numbers = #tpu.dot_dimension_numbers<[1], [0], [0], [1], [0, 0, 1, 1], [], []>} : vector<328x128xf32>, vector<128x128xf32>, vector<328x128xf32> -> vector<328x128xf32>
    %37 = arith.addf %31, %36 : vector<328x128xf32>
    %c0_45 = arith.constant 0 : index
    %c0_46 = arith.constant 0 : index
    %38 = vector.load %arg8[%c0_45, %c0_46] : memref<328x128xf32, #tpu.memory_space<vmem>>, vector<328x128xf32>
    tpu.vector_store %arg8[%c0_45, %c0_46], %37 {strides = array<i32>} : memref<328x128xf32, #tpu.memory_space<vmem>>, vector<328x128xf32>,
    %c0_47 = arith.constant 0 : index
    %c0_48 = arith.constant 0 : index
    %39 = vector.load %arg8[%c0_47, %c0_48] : memref<328x128xf32, #tpu.memory_space<vmem>>, vector<328x128xf32>
    %c0_49 = arith.constant 0 : index
    %c20 = arith.constant 20 : index
    %c0_50 = arith.constant 0 : index
    %40 = vector.load %arg2[%c0_49, %c20, %c0_50] : memref<1x368x128xf32, #tpu.memory_space<vmem>>, vector<1x328x128xf32>
    %41 = vector.shape_cast %40 : vector<1x328x128xf32> to vector<328x128xf32>
    %c5 = arith.constant 5 : index
    %c0_51 = arith.constant 0 : index
    %c0_52 = arith.constant 0 : index
    %42 = vector.load %arg3[%c5, %c0_51, %c0_52] : memref<9x128x128xf32, #tpu.memory_space<vmem>>, vector<1x128x128xf32>
    %43 = vector.shape_cast %42 : vector<1x128x128xf32> to vector<128x128xf32>
    %cst_53 = arith.constant dense<0.000000e+00> : vector<328x128xf32>
    %44 = tpu.matmul %41, %43, %cst_53 {dimension_numbers = #tpu.dot_dimension_numbers<[1], [0], [0], [1], [0, 0, 1, 1], [], []>} : vector<328x128xf32>, vector<128x128xf32>, vector<328x128xf32> -> vector<328x128xf32>
    %45 = arith.addf %39, %44 : vector<328x128xf32>
    %c0_54 = arith.constant 0 : index
    %c0_55 = arith.constant 0 : index
    %46 = vector.load %arg8[%c0_54, %c0_55] : memref<328x128xf32, #tpu.memory_space<vmem>>, vector<328x128xf32>
    tpu.vector_store %arg8[%c0_54, %c0_55], %45 {strides = array<i32>} : memref<328x128xf32, #tpu.memory_space<vmem>>, vector<328x128xf32>,
    %c0_56 = arith.constant 0 : index
    %c0_57 = arith.constant 0 : index
    %47 = vector.load %arg8[%c0_56, %c0_57] : memref<328x128xf32, #tpu.memory_space<vmem>>, vector<328x128xf32>
    %c0_58 = arith.constant 0 : index
    %c36 = arith.constant 36 : index
    %c0_59 = arith.constant 0 : index
    %48 = vector.load %arg2[%c0_58, %c36, %c0_59] : memref<1x368x128xf32, #tpu.memory_space<vmem>>, vector<1x328x128xf32>
    %49 = vector.shape_cast %48 : vector<1x328x128xf32> to vector<328x128xf32>
    %c6 = arith.constant 6 : index
    %c0_60 = arith.constant 0 : index
    %c0_61 = arith.constant 0 : index
    %50 = vector.load %arg3[%c6, %c0_60, %c0_61] : memref<9x128x128xf32, #tpu.memory_space<vmem>>, vector<1x128x128xf32>
    %51 = vector.shape_cast %50 : vector<1x128x128xf32> to vector<128x128xf32>
    %cst_62 = arith.constant dense<0.000000e+00> : vector<328x128xf32>
    %52 = tpu.matmul %49, %51, %cst_62 {dimension_numbers = #tpu.dot_dimension_numbers<[1], [0], [0], [1], [0, 0, 1, 1], [], []>} : vector<328x128xf32>, vector<128x128xf32>, vector<328x128xf32> -> vector<328x128xf32>
    %53 = arith.addf %47, %52 : vector<328x128xf32>
    %c0_63 = arith.constant 0 : index
    %c0_64 = arith.constant 0 : index
    %54 = vector.load %arg8[%c0_63, %c0_64] : memref<328x128xf32, #tpu.memory_space<vmem>>, vector<328x128xf32>
    tpu.vector_store %arg8[%c0_63, %c0_64], %53 {strides = array<i32>} : memref<328x128xf32, #tpu.memory_space<vmem>>, vector<328x128xf32>,
    %c0_65 = arith.constant 0 : index
    %c0_66 = arith.constant 0 : index
    %55 = vector.load %arg8[%c0_65, %c0_66] : memref<328x128xf32, #tpu.memory_space<vmem>>, vector<328x128xf32>
    %c0_67 = arith.constant 0 : index
    %c37 = arith.constant 37 : index
    %c0_68 = arith.constant 0 : index
    %56 = vector.load %arg2[%c0_67, %c37, %c0_68] : memref<1x368x128xf32, #tpu.memory_space<vmem>>, vector<1x328x128xf32>
    %57 = vector.shape_cast %56 : vector<1x328x128xf32> to vector<328x128xf32>
    %c7 = arith.constant 7 : index
    %c0_69 = arith.constant 0 : index
    %c0_70 = arith.constant 0 : index
    %58 = vector.load %arg3[%c7, %c0_69, %c0_70] : memref<9x128x128xf32, #tpu.memory_space<vmem>>, vector<1x128x128xf32>
    %59 = vector.shape_cast %58 : vector<1x128x128xf32> to vector<128x128xf32>
    %cst_71 = arith.constant dense<0.000000e+00> : vector<328x128xf32>
    %60 = tpu.matmul %57, %59, %cst_71 {dimension_numbers = #tpu.dot_dimension_numbers<[1], [0], [0], [1], [0, 0, 1, 1], [], []>} : vector<328x128xf32>, vector<128x128xf32>, vector<328x128xf32> -> vector<328x128xf32>
    %61 = arith.addf %55, %60 : vector<328x128xf32>
    %c0_72 = arith.constant 0 : index
    %c0_73 = arith.constant 0 : index
    %62 = vector.load %arg8[%c0_72, %c0_73] : memref<328x128xf32, #tpu.memory_space<vmem>>, vector<328x128xf32>
    tpu.vector_store %arg8[%c0_72, %c0_73], %61 {strides = array<i32>} : memref<328x128xf32, #tpu.memory_space<vmem>>, vector<328x128xf32>,
    %c0_74 = arith.constant 0 : index
    %c0_75 = arith.constant 0 : index
    %63 = vector.load %arg8[%c0_74, %c0_75] : memref<328x128xf32, #tpu.memory_space<vmem>>, vector<328x128xf32>
    %c0_76 = arith.constant 0 : index
    %c38 = arith.constant 38 : index
    %c0_77 = arith.constant 0 : index
    %64 = vector.load %arg2[%c0_76, %c38, %c0_77] : memref<1x368x128xf32, #tpu.memory_space<vmem>>, vector<1x328x128xf32>
    %65 = vector.shape_cast %64 : vector<1x328x128xf32> to vector<328x128xf32>
    %c8 = arith.constant 8 : index
    %c0_78 = arith.constant 0 : index
    %c0_79 = arith.constant 0 : index
    %66 = vector.load %arg3[%c8, %c0_78, %c0_79] : memref<9x128x128xf32, #tpu.memory_space<vmem>>, vector<1x128x128xf32>
    %67 = vector.shape_cast %66 : vector<1x128x128xf32> to vector<128x128xf32>
    %cst_80 = arith.constant dense<0.000000e+00> : vector<328x128xf32>
    %68 = tpu.matmul %65, %67, %cst_80 {dimension_numbers = #tpu.dot_dimension_numbers<[1], [0], [0], [1], [0, 0, 1, 1], [], []>} : vector<328x128xf32>, vector<128x128xf32>, vector<328x128xf32> -> vector<328x128xf32>
    %69 = arith.addf %63, %68 : vector<328x128xf32>
    %c0_81 = arith.constant 0 : index
    %c0_82 = arith.constant 0 : index
    %70 = vector.load %arg8[%c0_81, %c0_82] : memref<328x128xf32, #tpu.memory_space<vmem>>, vector<328x128xf32>
    tpu.vector_store %arg8[%c0_81, %c0_82], %69 {strides = array<i32>} : memref<328x128xf32, #tpu.memory_space<vmem>>, vector<328x128xf32>,
    %c0_83 = arith.constant 0 : index
    %c0_84 = arith.constant 0 : index
    %71 = vector.load %arg8[%c0_83, %c0_84] : memref<328x128xf32, #tpu.memory_space<vmem>>, vector<328x128xf32>
    %c0_85 = arith.constant 0 : index
    %c0_86 = arith.constant 0 : index
    %72 = vector.load %arg5[%c0_85, %c0_86] : memref<4x128xf32, #tpu.memory_space<vmem>>, vector<1x128xf32>
    %73 = vector.broadcast %72 : vector<1x128xf32> to vector<328x128xf32>
    %74 = arith.mulf %71, %73 : vector<328x128xf32>
    %c1_87 = arith.constant 1 : index
    %c0_88 = arith.constant 0 : index
    %75 = vector.load %arg5[%c1_87, %c0_88] : memref<4x128xf32, #tpu.memory_space<vmem>>, vector<1x128xf32>
    %76 = vector.broadcast %75 : vector<1x128xf32> to vector<328x128xf32>
    %77 = arith.addf %74, %76 : vector<328x128xf32>
    %cst_89 = arith.constant 0.000000e+00 : f32
    %78 = vector.broadcast %cst_89 : f32 to vector<328x128xf32>
    %79 = arith.maximumf %77, %78 : vector<328x128xf32>
    %80 = vector.broadcast %0 : vector<328x1xf32> to vector<328x128xf32>
    %81 = arith.mulf %79, %80 : vector<328x128xf32>
    %cst_90 = arith.constant 0.000000e+00 : f32
    %82 = vector.broadcast %cst_90 : f32 to vector<19x128xf32>
    %c0_91 = arith.constant 0 : index
    %c0_92 = arith.constant 0 : index
    %83 = vector.load %arg7[%c0_91, %c0_92] : memref<368x128xf32, #tpu.memory_space<vmem>>, vector<19x128xf32>
    tpu.vector_store %arg7[%c0_91, %c0_92], %82 {strides = array<i32>} : memref<368x128xf32, #tpu.memory_space<vmem>>, vector<19x128xf32>,
    %c19_93 = arith.constant 19 : index
    %c0_94 = arith.constant 0 : index
    %84 = vector.load %arg7[%c19_93, %c0_94] : memref<368x128xf32, #tpu.memory_space<vmem>>, vector<328x128xf32>
    tpu.vector_store %arg7[%c19_93, %c0_94], %81 {strides = array<i32>} : memref<368x128xf32, #tpu.memory_space<vmem>>, vector<328x128xf32>,
    %cst_95 = arith.constant 0.000000e+00 : f32
    %85 = vector.broadcast %cst_95 : f32 to vector<21x128xf32>
    %c347 = arith.constant 347 : index
    %c0_96 = arith.constant 0 : index
    %86 = vector.load %arg7[%c347, %c0_96] : memref<368x128xf32, #tpu.memory_space<vmem>>, vector<21x128xf32>
    tpu.vector_store %arg7[%c347, %c0_96], %85 {strides = array<i32>} : memref<368x128xf32, #tpu.memory_space<vmem>>, vector<21x128xf32>,
    %c0_97 = arith.constant 0 : index
    %c0_98 = arith.constant 0 : index
    %87 = vector.load %arg7[%c0_97, %c0_98] : memref<368x128xf32, #tpu.memory_space<vmem>>, vector<328x128xf32>
    %c0_99 = arith.constant 0 : index
    %c0_100 = arith.constant 0 : index
    %c0_101 = arith.constant 0 : index
    %88 = vector.load %arg4[%c0_99, %c0_100, %c0_101] : memref<9x128x128xf32, #tpu.memory_space<vmem>>, vector<1x128x128xf32>
    %89 = vector.shape_cast %88 : vector<1x128x128xf32> to vector<128x128xf32>
    %cst_102 = arith.constant dense<0.000000e+00> : vector<328x128xf32>
    %90 = tpu.matmul %87, %89, %cst_102 {dimension_numbers = #tpu.dot_dimension_numbers<[1], [0], [0], [1], [0, 0, 1, 1], [], []>} : vector<328x128xf32>, vector<128x128xf32>, vector<328x128xf32> -> vector<328x128xf32>
    %c0_103 = arith.constant 0 : index
    %c0_104 = arith.constant 0 : index
    %91 = vector.load %arg8[%c0_103, %c0_104] : memref<328x128xf32, #tpu.memory_space<vmem>>, vector<328x128xf32>
    tpu.vector_store %arg8[%c0_103, %c0_104], %90 {strides = array<i32>} : memref<328x128xf32, #tpu.memory_space<vmem>>, vector<328x128xf32>,
    %c0_105 = arith.constant 0 : index
    %c0_106 = arith.constant 0 : index
    %92 = vector.load %arg8[%c0_105, %c0_106] : memref<328x128xf32, #tpu.memory_space<vmem>>, vector<328x128xf32>
    %c1_107 = arith.constant 1 : index
    %c0_108 = arith.constant 0 : index
    %93 = vector.load %arg7[%c1_107, %c0_108] : memref<368x128xf32, #tpu.memory_space<vmem>>, vector<328x128xf32>
    %c1_109 = arith.constant 1 : index
    %c0_110 = arith.constant 0 : index
    %c0_111 = arith.constant 0 : index
    %94 = vector.load %arg4[%c1_109, %c0_110, %c0_111] : memref<9x128x128xf32, #tpu.memory_space<vmem>>, vector<1x128x128xf32>
    %95 = vector.shape_cast %94 : vector<1x128x128xf32> to vector<128x128xf32>
    %cst_112 = arith.constant dense<0.000000e+00> : vector<328x128xf32>
    %96 = tpu.matmul %93, %95, %cst_112 {dimension_numbers = #tpu.dot_dimension_numbers<[1], [0], [0], [1], [0, 0, 1, 1], [], []>} : vector<328x128xf32>, vector<128x128xf32>, vector<328x128xf32> -> vector<328x128xf32>
    %97 = arith.addf %92, %96 : vector<328x128xf32>
    %c0_113 = arith.constant 0 : index
    %c0_114 = arith.constant 0 : index
    %98 = vector.load %arg8[%c0_113, %c0_114] : memref<328x128xf32, #tpu.memory_space<vmem>>, vector<328x128xf32>
    tpu.vector_store %arg8[%c0_113, %c0_114], %97 {strides = array<i32>} : memref<328x128xf32, #tpu.memory_space<vmem>>, vector<328x128xf32>,
    %c0_115 = arith.constant 0 : index
    %c0_116 = arith.constant 0 : index
    %99 = vector.load %arg8[%c0_115, %c0_116] : memref<328x128xf32, #tpu.memory_space<vmem>>, vector<328x128xf32>
    %c2_117 = arith.constant 2 : index
    %c0_118 = arith.constant 0 : index
    %100 = vector.load %arg7[%c2_117, %c0_118] : memref<368x128xf32, #tpu.memory_space<vmem>>, vector<328x128xf32>
    %c2_119 = arith.constant 2 : index
    %c0_120 = arith.constant 0 : index
    %c0_121 = arith.constant 0 : index
    %101 = vector.load %arg4[%c2_119, %c0_120, %c0_121] : memref<9x128x128xf32, #tpu.memory_space<vmem>>, vector<1x128x128xf32>
    %102 = vector.shape_cast %101 : vector<1x128x128xf32> to vector<128x128xf32>
    %cst_122 = arith.constant dense<0.000000e+00> : vector<328x128xf32>
    %103 = tpu.matmul %100, %102, %cst_122 {dimension_numbers = #tpu.dot_dimension_numbers<[1], [0], [0], [1], [0, 0, 1, 1], [], []>} : vector<328x128xf32>, vector<128x128xf32>, vector<328x128xf32> -> vector<328x128xf32>
    %104 = arith.addf %99, %103 : vector<328x128xf32>
    %c0_123 = arith.constant 0 : index
    %c0_124 = arith.constant 0 : index
    %105 = vector.load %arg8[%c0_123, %c0_124] : memref<328x128xf32, #tpu.memory_space<vmem>>, vector<328x128xf32>
    tpu.vector_store %arg8[%c0_123, %c0_124], %104 {strides = array<i32>} : memref<328x128xf32, #tpu.memory_space<vmem>>, vector<328x128xf32>,
    %c0_125 = arith.constant 0 : index
    %c0_126 = arith.constant 0 : index
    %106 = vector.load %arg8[%c0_125, %c0_126] : memref<328x128xf32, #tpu.memory_space<vmem>>, vector<328x128xf32>
    %c18_127 = arith.constant 18 : index
    %c0_128 = arith.constant 0 : index
    %107 = vector.load %arg7[%c18_127, %c0_128] : memref<368x128xf32, #tpu.memory_space<vmem>>, vector<328x128xf32>
    %c3_129 = arith.constant 3 : index
    %c0_130 = arith.constant 0 : index
    %c0_131 = arith.constant 0 : index
    %108 = vector.load %arg4[%c3_129, %c0_130, %c0_131] : memref<9x128x128xf32, #tpu.memory_space<vmem>>, vector<1x128x128xf32>
    %109 = vector.shape_cast %108 : vector<1x128x128xf32> to vector<128x128xf32>
    %cst_132 = arith.constant dense<0.000000e+00> : vector<328x128xf32>
    %110 = tpu.matmul %107, %109, %cst_132 {dimension_numbers = #tpu.dot_dimension_numbers<[1], [0], [0], [1], [0, 0, 1, 1], [], []>} : vector<328x128xf32>, vector<128x128xf32>, vector<328x128xf32> -> vector<328x128xf32>
    %111 = arith.addf %106, %110 : vector<328x128xf32>
    %c0_133 = arith.constant 0 : index
    %c0_134 = arith.constant 0 : index
    %112 = vector.load %arg8[%c0_133, %c0_134] : memref<328x128xf32, #tpu.memory_space<vmem>>, vector<328x128xf32>
    tpu.vector_store %arg8[%c0_133, %c0_134], %111 {strides = array<i32>} : memref<328x128xf32, #tpu.memory_space<vmem>>, vector<328x128xf32>,
    %c0_135 = arith.constant 0 : index
    %c0_136 = arith.constant 0 : index
    %113 = vector.load %arg8[%c0_135, %c0_136] : memref<328x128xf32, #tpu.memory_space<vmem>>, vector<328x128xf32>
    %c19_137 = arith.constant 19 : index
    %c0_138 = arith.constant 0 : index
    %114 = vector.load %arg7[%c19_137, %c0_138] : memref<368x128xf32, #tpu.memory_space<vmem>>, vector<328x128xf32>
    %c4_139 = arith.constant 4 : index
    %c0_140 = arith.constant 0 : index
    %c0_141 = arith.constant 0 : index
    %115 = vector.load %arg4[%c4_139, %c0_140, %c0_141] : memref<9x128x128xf32, #tpu.memory_space<vmem>>, vector<1x128x128xf32>
    %116 = vector.shape_cast %115 : vector<1x128x128xf32> to vector<128x128xf32>
    %cst_142 = arith.constant dense<0.000000e+00> : vector<328x128xf32>
    %117 = tpu.matmul %114, %116, %cst_142 {dimension_numbers = #tpu.dot_dimension_numbers<[1], [0], [0], [1], [0, 0, 1, 1], [], []>} : vector<328x128xf32>, vector<128x128xf32>, vector<328x128xf32> -> vector<328x128xf32>
    %118 = arith.addf %113, %117 : vector<328x128xf32>
    %c0_143 = arith.constant 0 : index
    %c0_144 = arith.constant 0 : index
    %119 = vector.load %arg8[%c0_143, %c0_144] : memref<328x128xf32, #tpu.memory_space<vmem>>, vector<328x128xf32>
    tpu.vector_store %arg8[%c0_143, %c0_144], %118 {strides = array<i32>} : memref<328x128xf32, #tpu.memory_space<vmem>>, vector<328x128xf32>,
    %c0_145 = arith.constant 0 : index
    %c0_146 = arith.constant 0 : index
    %120 = vector.load %arg8[%c0_145, %c0_146] : memref<328x128xf32, #tpu.memory_space<vmem>>, vector<328x128xf32>
    %c20_147 = arith.constant 20 : index
    %c0_148 = arith.constant 0 : index
    %121 = vector.load %arg7[%c20_147, %c0_148] : memref<368x128xf32, #tpu.memory_space<vmem>>, vector<328x128xf32>
    %c5_149 = arith.constant 5 : index
    %c0_150 = arith.constant 0 : index
    %c0_151 = arith.constant 0 : index
    %122 = vector.load %arg4[%c5_149, %c0_150, %c0_151] : memref<9x128x128xf32, #tpu.memory_space<vmem>>, vector<1x128x128xf32>
    %123 = vector.shape_cast %122 : vector<1x128x128xf32> to vector<128x128xf32>
    %cst_152 = arith.constant dense<0.000000e+00> : vector<328x128xf32>
    %124 = tpu.matmul %121, %123, %cst_152 {dimension_numbers = #tpu.dot_dimension_numbers<[1], [0], [0], [1], [0, 0, 1, 1], [], []>} : vector<328x128xf32>, vector<128x128xf32>, vector<328x128xf32> -> vector<328x128xf32>
    %125 = arith.addf %120, %124 : vector<328x128xf32>
    %c0_153 = arith.constant 0 : index
    %c0_154 = arith.constant 0 : index
    %126 = vector.load %arg8[%c0_153, %c0_154] : memref<328x128xf32, #tpu.memory_space<vmem>>, vector<328x128xf32>
    tpu.vector_store %arg8[%c0_153, %c0_154], %125 {strides = array<i32>} : memref<328x128xf32, #tpu.memory_space<vmem>>, vector<328x128xf32>,
    %c0_155 = arith.constant 0 : index
    %c0_156 = arith.constant 0 : index
    %127 = vector.load %arg8[%c0_155, %c0_156] : memref<328x128xf32, #tpu.memory_space<vmem>>, vector<328x128xf32>
    %c36_157 = arith.constant 36 : index
    %c0_158 = arith.constant 0 : index
    %128 = vector.load %arg7[%c36_157, %c0_158] : memref<368x128xf32, #tpu.memory_space<vmem>>, vector<328x128xf32>
    %c6_159 = arith.constant 6 : index
    %c0_160 = arith.constant 0 : index
    %c0_161 = arith.constant 0 : index
    %129 = vector.load %arg4[%c6_159, %c0_160, %c0_161] : memref<9x128x128xf32, #tpu.memory_space<vmem>>, vector<1x128x128xf32>
    %130 = vector.shape_cast %129 : vector<1x128x128xf32> to vector<128x128xf32>
    %cst_162 = arith.constant dense<0.000000e+00> : vector<328x128xf32>
    %131 = tpu.matmul %128, %130, %cst_162 {dimension_numbers = #tpu.dot_dimension_numbers<[1], [0], [0], [1], [0, 0, 1, 1], [], []>} : vector<328x128xf32>, vector<128x128xf32>, vector<328x128xf32> -> vector<328x128xf32>
    %132 = arith.addf %127, %131 : vector<328x128xf32>
    %c0_163 = arith.constant 0 : index
    %c0_164 = arith.constant 0 : index
    %133 = vector.load %arg8[%c0_163, %c0_164] : memref<328x128xf32, #tpu.memory_space<vmem>>, vector<328x128xf32>
    tpu.vector_store %arg8[%c0_163, %c0_164], %132 {strides = array<i32>} : memref<328x128xf32, #tpu.memory_space<vmem>>, vector<328x128xf32>,
    %c0_165 = arith.constant 0 : index
    %c0_166 = arith.constant 0 : index
    %134 = vector.load %arg8[%c0_165, %c0_166] : memref<328x128xf32, #tpu.memory_space<vmem>>, vector<328x128xf32>
    %c37_167 = arith.constant 37 : index
    %c0_168 = arith.constant 0 : index
    %135 = vector.load %arg7[%c37_167, %c0_168] : memref<368x128xf32, #tpu.memory_space<vmem>>, vector<328x128xf32>
    %c7_169 = arith.constant 7 : index
    %c0_170 = arith.constant 0 : index
    %c0_171 = arith.constant 0 : index
    %136 = vector.load %arg4[%c7_169, %c0_170, %c0_171] : memref<9x128x128xf32, #tpu.memory_space<vmem>>, vector<1x128x128xf32>
    %137 = vector.shape_cast %136 : vector<1x128x128xf32> to vector<128x128xf32>
    %cst_172 = arith.constant dense<0.000000e+00> : vector<328x128xf32>
    %138 = tpu.matmul %135, %137, %cst_172 {dimension_numbers = #tpu.dot_dimension_numbers<[1], [0], [0], [1], [0, 0, 1, 1], [], []>} : vector<328x128xf32>, vector<128x128xf32>, vector<328x128xf32> -> vector<328x128xf32>
    %139 = arith.addf %134, %138 : vector<328x128xf32>
    %c0_173 = arith.constant 0 : index
    %c0_174 = arith.constant 0 : index
    %140 = vector.load %arg8[%c0_173, %c0_174] : memref<328x128xf32, #tpu.memory_space<vmem>>, vector<328x128xf32>
    tpu.vector_store %arg8[%c0_173, %c0_174], %139 {strides = array<i32>} : memref<328x128xf32, #tpu.memory_space<vmem>>, vector<328x128xf32>,
    %c0_175 = arith.constant 0 : index
    %c0_176 = arith.constant 0 : index
    %141 = vector.load %arg8[%c0_175, %c0_176] : memref<328x128xf32, #tpu.memory_space<vmem>>, vector<328x128xf32>
    %c38_177 = arith.constant 38 : index
    %c0_178 = arith.constant 0 : index
    %142 = vector.load %arg7[%c38_177, %c0_178] : memref<368x128xf32, #tpu.memory_space<vmem>>, vector<328x128xf32>
    %c8_179 = arith.constant 8 : index
    %c0_180 = arith.constant 0 : index
    %c0_181 = arith.constant 0 : index
    %143 = vector.load %arg4[%c8_179, %c0_180, %c0_181] : memref<9x128x128xf32, #tpu.memory_space<vmem>>, vector<1x128x128xf32>
    %144 = vector.shape_cast %143 : vector<1x128x128xf32> to vector<128x128xf32>
    %cst_182 = arith.constant dense<0.000000e+00> : vector<328x128xf32>
    %145 = tpu.matmul %142, %144, %cst_182 {dimension_numbers = #tpu.dot_dimension_numbers<[1], [0], [0], [1], [0, 0, 1, 1], [], []>} : vector<328x128xf32>, vector<128x128xf32>, vector<328x128xf32> -> vector<328x128xf32>
    %146 = arith.addf %141, %145 : vector<328x128xf32>
    %c0_183 = arith.constant 0 : index
    %c0_184 = arith.constant 0 : index
    %147 = vector.load %arg8[%c0_183, %c0_184] : memref<328x128xf32, #tpu.memory_space<vmem>>, vector<328x128xf32>
    tpu.vector_store %arg8[%c0_183, %c0_184], %146 {strides = array<i32>} : memref<328x128xf32, #tpu.memory_space<vmem>>, vector<328x128xf32>,
    %c0_185 = arith.constant 0 : index
    %c0_186 = arith.constant 0 : index
    %148 = vector.load %arg8[%c0_185, %c0_186] : memref<328x128xf32, #tpu.memory_space<vmem>>, vector<328x128xf32>
    %c2_187 = arith.constant 2 : index
    %c0_188 = arith.constant 0 : index
    %149 = vector.load %arg5[%c2_187, %c0_188] : memref<4x128xf32, #tpu.memory_space<vmem>>, vector<1x128xf32>
    %150 = vector.broadcast %149 : vector<1x128xf32> to vector<328x128xf32>
    %151 = arith.mulf %148, %150 : vector<328x128xf32>
    %c3_189 = arith.constant 3 : index
    %c0_190 = arith.constant 0 : index
    %152 = vector.load %arg5[%c3_189, %c0_190] : memref<4x128xf32, #tpu.memory_space<vmem>>, vector<1x128xf32>
    %153 = vector.broadcast %152 : vector<1x128xf32> to vector<328x128xf32>
    %154 = arith.addf %151, %153 : vector<328x128xf32>
    %c0_191 = arith.constant 0 : index
    %c19_192 = arith.constant 19 : index
    %c0_193 = arith.constant 0 : index
    %155 = vector.load %arg2[%c0_191, %c19_192, %c0_193] : memref<1x368x128xf32, #tpu.memory_space<vmem>>, vector<1x328x128xf32>
    %156 = vector.shape_cast %155 : vector<1x328x128xf32> to vector<328x128xf32>
    %157 = arith.addf %154, %156 : vector<328x128xf32>
    %cst_194 = arith.constant 0.000000e+00 : f32
    %158 = vector.broadcast %cst_194 : f32 to vector<328x128xf32>
    %159 = arith.maximumf %157, %158 : vector<328x128xf32>
    %c0_195 = arith.constant 0 : index
    %c0_196 = arith.constant 0 : index
    %c0_197 = arith.constant 0 : index
    %160 = vector.load %arg6[%c0_195, %c0_196, %c0_197] : memref<1x328x128xf32, #tpu.memory_space<vmem>>, vector<1x328x128xf32>
    %161 = vector.shape_cast %160 : vector<1x328x128xf32> to vector<328x128xf32>
    %162 = vector.shape_cast %159 : vector<328x128xf32> to vector<1x328x128xf32>
    tpu.vector_store %arg6[%c0_195, %c0_196, %c0_197], %162 {strides = array<i32>} : memref<1x328x128xf32, #tpu.memory_space<vmem>>, vector<1x328x128xf32>,
    return
  }
  func.func @transform_0(%arg0: i32) -> (i32, i32) {
    %c0_i32 = arith.constant 0 : i32
    %c0_i32_0 = arith.constant 0 : i32
    %c0_i32_1 = arith.constant 0 : i32
    return %c0_i32, %c0_i32_0 : i32, i32
  }
  func.func @transform_1(%arg0: i32) -> (i32, i32, i32) {
    %c0_i32 = arith.constant 0 : i32
    %c0_i32_0 = arith.constant 0 : i32
    %c0_i32_1 = arith.constant 0 : i32
    return %arg0, %c0_i32, %c0_i32_0 : i32, i32, i32
  }
  func.func @transform_2(%arg0: i32) -> (i32, i32, i32) {
    %c0_i32 = arith.constant 0 : i32
    %c0_i32_0 = arith.constant 0 : i32
    %c0_i32_1 = arith.constant 0 : i32
    %c0_i32_2 = arith.constant 0 : i32
    return %c0_i32, %c0_i32_0, %c0_i32_1 : i32, i32, i32
  }
  func.func @transform_3(%arg0: i32) -> (i32, i32, i32) {
    %c0_i32 = arith.constant 0 : i32
    %c0_i32_0 = arith.constant 0 : i32
    %c0_i32_1 = arith.constant 0 : i32
    %c0_i32_2 = arith.constant 0 : i32
    return %c0_i32, %c0_i32_0, %c0_i32_1 : i32, i32, i32
  }
  func.func @transform_4(%arg0: i32) -> (i32, i32) {
    %c0_i32 = arith.constant 0 : i32
    %c0_i32_0 = arith.constant 0 : i32
    %c0_i32_1 = arith.constant 0 : i32
    return %c0_i32, %c0_i32_0 : i32, i32
  }
  func.func @transform_5(%arg0: i32) -> (i32, i32, i32) {
    %c0_i32 = arith.constant 0 : i32
    %c0_i32_0 = arith.constant 0 : i32
    %c0_i32_1 = arith.constant 0 : i32
    return %arg0, %c0_i32, %c0_i32_0 : i32, i32, i32
  }
}

</mosaic_0001>

<bundles_post_ra>
// kernel: tpu_custom_call.1
= control target key start
LH: loop header
LB: loop body
LE: loop exit
PB: predicated region body
PF: predicated region fallthrough
CT: control target
= control target key end

     0   :  { %10 = vsyncpa [#allocation5], 0  ;;  %s18171_s0 = inlined_call_operand.vmem [shape: f32[328,1], index: 0, kind: input, shape index: {}]   ;;  %s18172_s1 = inlined_call_operand.hbm [shape: f32[2,368,128], index: 1, kind: input, shape index: {}]   ;;  %s18173_s2 = inlined_call_operand.hbm [shape: f32[9,128,128], index: 2, kind: input, shape index: {}]   ;;  %s18174_s3 = inlined_call_operand.hbm [shape: f32[9,128,128], index: 3, kind: input, shape index: {}]   ;;  %s18175_s4 = inlined_call_operand.vmem [shape: f32[4,128], index: 4, kind: input, shape index: {}]   ;;  %s18176_s5 = inlined_call_operand.hbm [shape: f32[2,328,128], index: 5, kind: output, shape index: {}]  }
   0x1   :  { %12 = vsyncpa [#allocation5 + $0x1], 0 }
   0x2   :  { %13 = vsyncpa [#allocation8], 0 }
   0x3   :  { %14 = vsyncpa [#allocation6], 0 }
   0x4   :  { %16 = vsyncpa [#allocation6 + $0x1], 0  ;;  %s14999_s18 = smov 0   ;;  %s15001_s19 = smov 0  }
   0x5   :  { %s15003_s20 = smov 0   ;;  %s15005_s21 = smov 0  }
   0x6 LB: > { %s15020_s22 = sadd.s32 4294967295, %s14955_s21   ;;  %s9135_s23 = sadd.s32 4294967294, %s14955_s21   ;;  %s14955_s21 = sphi %s15005_s21, %s18198_s21   ;;  %s14951_s20 = sphi %s15003_s20, %s18197_s20   ;;  %s14947_s19 = sphi %s15001_s19, %s18196_s19   ;;  %s14943_s18 = sphi %s14999_s18, %s18195_s18  }
   0x7   : > { %p63_p0 = scmp.ne.s32.totalorder %s14947_s19, %s14943_s18  ;;  %p18177_p1 = scmp.eq.s32.totalorder %s15020_s22, 0 }
   0x8   : > { %p156_p3 = scmp.eq.s32.totalorder %s9135_s23, 1  ;;  %p9136_p5 = scmp.ge.s32.totalorder %s14955_s21, 1 }
   0x9   : > { %p15029_p4 = por %p18177_p1, %p63_p0  ;;  %p163_p7 = scmp.lt.s32.totalorder %s14955_s21, 3 }
   0xa   : > { %p15034_p6 = por %p156_p3, %p63_p0  ;;  %s14957_s27 = smov [#allocation7]  }
   0xb   : > { %s18181_s24 = scalar_select %p15029_p4, 1, 0 }
   0xc   : > { %s18182_s25 = scalar_select %p15034_p6, 1, 0 }
   0xd   : > { %p15039_p8 = pnand %p9136_p5, %p163_p7  ;;  %s178_s28 = sshll.u32 %s14957_s27, 4  ;;  %s15043_s28 = int_to_ptr.vmem [resolvable:$true] %s178_s28 }
   0xe   : > { %s14958_s30 = smov [#allocation9]   ;;  %s14799_s9 = scalar_lea.hbm %s18173_s2, 18432 }
   0xf   : > { %p14728_p9 = pneg %p15039_p8  ;;  %s191_s6 = sshll.u32 %s14958_s30, 4  ;;  %s15054_s6 = int_to_ptr.vmem [resolvable:$true] %s191_s6 }
  0x10   : > { %p14800_p12 = scmp.ne.s32.totalorder %s18173_s2, %s14799_s9  ;;  %p14806_p5 = scmp.lt.u32.totalorder %s14799_s9, %s18173_s2 }
  0x11   : > { %p15050_p11 = pnand %p14728_p9, %p18177_p1 }
  0x13   : > { %p14801_p13 = pneg %p15050_p11 }
  0x15   : > { %p14802_p0 = pnand %p14801_p13, %p14800_p12 }
  0x17   : > { %p14803_p3 = pneg %p14802_p0 }
  0x19   : > { %p14808_p7 = pnand %p14806_p5, %p14803_p3 }
  0x1b   : > { %14811 = shalt.err (!%p14808_p7)
}
  0x1c   : > { %s14812_s14 = scalar_lea.vmem %s15043_s28, 18432  ;;  %p14820_p2 = scmp.lt.s32.totalorder %s15043_s28, %s15043_s28 }
  0x1d   : > { %p14813_p9 = scmp.ne.s32.totalorder %s15043_s28, %s14812_s14  ;;  %p14821_p12 = scmp.lt.s32.totalorder %s14812_s14, %s14812_s14 }
  0x1f   : > { %p14815_p10 = pnand %p14813_p9, %p14801_p13  ;;  %p14822_p0 = por %p14821_p12, %p14820_p2 }
  0x21   : > { %p14816_p1 = pneg %p14815_p10 }
  0x23   : > { %p14823_p6 = pnand %p14822_p0, %p14816_p1 }
  0x25   : > { %14826 = shalt.err (!%p14823_p6)
}
  0x26   : > { %s18178_s15 = smov 128   ;;  %s14960_s16 = smov 8  }
  0x27   : > { %14731 = dma.hbm_to_vmem [thread:$0]  (!%p15050_p11), %s18173_s2, 18432, %s15043_s28, [#allocation8], %s18178_s15, %s18178_s15, %s14960_s16  }
  0x28   : > { %s14827_s7 = scalar_lea.hbm %s18174_s3, 18432 }
  0x29   : > { %p14828_p1 = scmp.ne.s32.totalorder %s18174_s3, %s14827_s7  ;;  %p14834_p10 = scmp.lt.u32.totalorder %s14827_s7, %s18174_s3 }
  0x2b   : > { %p14830_p2 = pnand %p14828_p1, %p14801_p13 }
  0x2d   : > { %p14831_p6 = pneg %p14830_p2 }
  0x2f   : > { %p14836_p3 = pnand %p14834_p10, %p14831_p6 }
  0x31   : > { %14839 = shalt.err (!%p14836_p3)
}
  0x32   : > { %s14840_s28 = scalar_lea.vmem %s15054_s6, 18432  ;;  %p14848_p12 = scmp.lt.s32.totalorder %s15054_s6, %s15054_s6 }
  0x33   : > { %p14841_p5 = scmp.ne.s32.totalorder %s15054_s6, %s14840_s28  ;;  %p14849_p0 = scmp.lt.s32.totalorder %s14840_s28, %s14840_s28 }
  0x35   : > { %p14843_p7 = pnand %p14841_p5, %p14801_p13  ;;  %p14850_p1 = por %p14849_p0, %p14848_p12 }
  0x37   : > { %p14844_p9 = pneg %p14843_p7 }
  0x39   : > { %p14851_p2 = pnand %p14850_p1, %p14844_p9 }
  0x3b   : > { %14854 = shalt.err (!%p14851_p2)
}
  0x3c   : > { %14734 = dma.hbm_to_vmem [thread:$0]  (!%p15050_p11), %s18174_s3, 18432, %s15054_s6, [#allocation8], %s18178_s15, %s18178_s15, %s14960_s16  }
  0x3d   : > { %s15115_s29 = sadd.s32 1, %s14955_s21   ;;  %s50_s14 = sadd.s32 1, %s14951_s20 }
  0x3e   : > { %s47_s17 = ssub.s32 %s14955_s21, %s15115_s29  ;;  %p57_p13 = scmp.ne.s32.totalorder %s14951_s20, %s14947_s19 }
  0x3f   : > { %p48_p6 = scmp.eq.s32.totalorder %s47_s17, 0  ;;  %p58_p10 = scmp.eq.s32.totalorder %s14955_s21, 0 }
  0x40   : > { %p18185_p3 = scmp.eq.s32.totalorder %s15020_s22, 1  ;;  %p14745_p7 = scmp.lt.s32.totalorder %s14955_s21, 2 }
  0x41   : > { %s15131_s27 = scalar_select %p48_p6, %s14951_s20, %s50_s14  }
  0x42   : > { %p15125_p5 = por %p18185_p3, %p57_p13  ;;  %p59_p9 = por %p58_p10, %p57_p13 }
  0x43   : > { %s208_s30 = sand.u32 1, %s14951_s20   ;;  %s14712_s6 = smul.u32 5888, %s14955_s21 }
  0x44   : > { %s18186_s23 = scalar_select %p15125_p5, 1, 0 }
  0x45   : > { %s14711_s7 = smul.u32 368, %s208_s30  ;;  %p15135_p11 = pnand %p14745_p7, %p59_p9 }
  0x46   : > { %s15142_s11 = scalar_lea.hbm %s18172_s1, %s14712_s6  ;;  %s15146_s13 = scalar_lea.sflag [#allocation5], %s208_s30 }
  0x47   : > { %s212_s28 = scalar_lea.vmem [#allocation4], %s14711_s7  ;;  %s14855_s14 = scalar_lea.hbm %s15142_s11, 5888 }
  0x48   : > { %s219_s12 = sshll.u32 %s212_s28, 4  ;;  %p14856_p12 = scmp.ne.s32.totalorder %s15142_s11, %s14855_s14  ;;  %s15144_s12 = int_to_ptr.vmem [resolvable:$true] %s219_s12 }
  0x49   : > { %p14857_p0 = pneg %p15135_p11  ;;  %s14860_s9 = scalar_lea.hbm %s18172_s1, 11776 }
  0x4a   : > { %p14861_p13 = scmp.lt.u32.totalorder %s15142_s11, %s18172_s1  ;;  %p14862_p6 = scmp.lt.u32.totalorder %s14860_s9, %s14855_s14 }
  0x4b   : > { %p14858_p1 = pnand %p14857_p0, %p14856_p12  ;;  %p14864_p3 = scmp.lt.u32.totalorder %s14855_s14, %s15142_s11 }
  0x4c   : > { %p14863_p10 = por %p14862_p6, %p14861_p13 }
  0x4d   : > { %p14859_p2 = pneg %p14858_p1 }
  0x4e   : > { %p14865_p7 = por %p14864_p3, %p14863_p10 }
  0x50   : > { %p14866_p9 = pnand %p14865_p7, %p14859_p2 }
  0x52   : > { %14869 = shalt.err (!%p14866_p9)
}
  0x53   : > { %s14870_s30 = scalar_lea.vmem %s15144_s12, 5888  ;;  %s14961_s7 = smov [#allocation4]  }
  0x54   : > { %p14871_p12 = scmp.ne.s32.totalorder %s15144_s12, %s14870_s30  ;;  %s14875_s28 = sshll.u32 %s14961_s7, 4  ;;  %s14876_s28 = int_to_ptr.vmem [resolvable:$false] %s14875_s28 }
  0x55   : > { %s14877_s15 = scalar_lea.vmem %s14876_s28, 11776  ;;  %p14878_p4 = scmp.lt.s32.totalorder %s15144_s12, %s14876_s28 }
  0x56   : > { %p14873_p1 = pnand %p14871_p12, %p14857_p0  ;;  %p14879_p13 = scmp.lt.s32.totalorder %s14877_s15, %s14870_s30 }
  0x58   : > { %p14874_p5 = pneg %p14873_p1  ;;  %p14880_p6 = por %p14879_p13, %p14878_p4 }
  0x5a   : > { %p14881_p10 = pnand %p14880_p6, %p14874_p5 }
  0x5c   : > { %14884 = shalt.err (!%p14881_p10)
}
  0x5d   : > { %s18188_s14 = smov 128   ;;  %231 = sbr.rel (%p15039_p8) target bundleno = 3377 (0xd31), region = 40 }
  0x5e   : > { %14738 = dma.hbm_to_vmem [thread:$0]  (!%p15135_p11), %s15142_s11, 5888, %s15144_s12, %s15146_s13, %s18188_s14, %s18188_s14, %s14960_s16  }
  0x5f   : > { %s15180_s17 = sand.u32 (!%p15039_p8), 1, %s14947_s19   ;;  %p18189_p4 = scmp.ne.s32.totalorder (!%p15039_p8), %s18181_s24, 0 }
  0x60   : > { %s14713_s6 = smul.u32 (!%p15039_p8), 368, %s15180_s17  ;;  %s234_s9 = scalar_lea.sflag (!%p15039_p8), [#allocation5], %s15180_s17 }
  0x62   : > { %s15184_s10 = scalar_lea.vmem (!%p15039_p8), [#allocation4], %s14713_s6 }
  0x64   : > { %14930 = dma.done.wait (%p18189_p4), %s234_s9, 5888  }
  0x65   : > { %14932 = vsyncadd (%p18189_p4), %s234_s9, 4294961408  ;;  %p18190_p5 = scmp.eq.s32.totalorder %s15020_s22, 0 }
  0x67   : > { %14934 = dma.done.wait (%p18190_p5), [#allocation8], 36864   ;;  %p18191_p8 = pmov %p18190_p5 }
  0x68   : > { %v14962_v0 = vmov 0.0|0.0   ;;  %vm14963_vm0 = vmmov 0   ;;  %v14964_v1 = vmov 0.0   ;;  %v354_v2 = vld [vmem:[#allocation7] sm:$0xff]  ;;  %v355_v3 = vld [vmem:[#allocation7 + $0x8] sm:$0xff]  ;;  %v356_v4 = vld [vmem:[#allocation7 + $0x10] sm:$0xff] }
  0x69   : > { %14936 = vsyncadd (%p18191_p8), [#allocation8], 4294930432  ;;  %12967 = vmatprep.subr.bf16.mxu0 %v14962_v0  ;;  %10209 = vmatprep.mubr.msk.f32.mxu0 %vm14963_vm0, %v14964_v1  ;;  %4709 = vst [vmem:[#allocation2] sm:$0xff] %v14964_v1  ;;  %v12968_v5 = vpack.c.bf16 %v355_v3, %v354_v2  ;;  %v357_v6 = vld [vmem:[#allocation7 + $0x18] sm:$0xff]  ;;  %v358_v8 = vld [vmem:[#allocation7 + $0x20] sm:$0xff]  ;;  %s14714_s13 = smul.u32 328, %s15180_s17 }
  0x6a   : > { %4710 = vst [vmem:[#allocation2 + $0x8] sm:$0xff] %v14964_v1  ;;  %4711 = vst [vmem:[#allocation2 + $0x10] sm:$0x7] %v14964_v1  ;;  %13183 = vmatprep.subr.bf16.mxu1 %v14962_v0  ;;  %11604 = vmatprep.mubr.msk.f32.mxu1 %vm14963_vm0, %v14964_v1  ;;  %v12971_v7 = vpack.c.bf16 %v357_v6, %v356_v4  ;;  %v359_v9 = vld [vmem:[#allocation7 + $0x28] sm:$0xff]  ;;  %v360_v11 = vld [vmem:[#allocation7 + $0x30] sm:$0xff]  ;;  %s14715_s7 = smul.u32 5248, %s15020_s22 }
  0x6b   : > { %4753 = vst [vmem:[#allocation2 + $0x15b] sm:$0xff] %v14964_v1  ;;  %4754 = vst [vmem:[#allocation2 + $0x163] sm:$0xff] %v14964_v1  ;;  %12969 = vmatpush3.bf16.msra.mxu0 %v12968_v5  ;;  %v12974_v10 = vpack.c.bf16 %v359_v9, %v358_v8  ;;  %v361_v12 = vld [vmem:[#allocation7 + $0x38] sm:$0xff]  ;;  %v362_v14 = vld [vmem:[#allocation7 + $0x40] sm:$0xff]  ;;  %s17960_s30 = scalar_lea.vmem [#allocation10], %s14714_s13  ;;  %p18192_p0 = scmp.ne.s32.totalorder %s18186_s23, 0 }
  0x6c   : > { %4755 = vst [vmem:[#allocation2 + $0x16b] sm:$0x1f] %v14964_v1  ;;  %12970 = vmatprep.subr.bf16.mxu0 %v14962_v0  ;;  %v12977_v13 = vpack.c.bf16 %v361_v12, %v360_v11  ;;  %v363_v15 = vld [vmem:[#allocation7 + $0x48] sm:$0xff]  ;;  %v364_v17 = vld [vmem:[#allocation7 + $0x50] sm:$0xff]  ;;  %v365_v18 = vld [vmem:[#allocation7 + $0x58] sm:$0xff]  ;;  %s9043_s28 = sshll.u32 %s17960_s30, 4  ;;  %s18124_s6 = scalar_lea.hbm %s18176_s5, %s14715_s7  ;;  %s18126_s28 = int_to_ptr.vmem [resolvable:$true] %s9043_s28 }
  0x6d   : > { %v12980_v16 = vpack.c.bf16 %v363_v15, %v362_v14  ;;  %v12983_v19 = vpack.c.bf16 %v365_v18, %v364_v17  ;;  %v366_v20 = vld [vmem:[#allocation7 + $0x60] sm:$0xff]  ;;  %v367_v21 = vld [vmem:[#allocation7 + $0x68] sm:$0xff]  ;;  %v368_v23 = vld [vmem:[#allocation7 + $0x70] sm:$0xff]  ;;  %s14885_s22 = scalar_lea.vmem %s18126_s28, 5248  ;;  %s14966_s9 = smov [#allocation10]  }
  0x6e   : > { %v12986_v22 = vpack.c.bf16 %v367_v21, %v366_v20  ;;  %v369_v24 = vld [vmem:[#allocation7 + $0x78] sm:$0xff]  ;;  %v764_v26 = vld [vmem:[#allocation7 + $0x80] sm:$0xff]  ;;  %v765_v27 = vld [vmem:[#allocation7 + $0x88] sm:$0xff]  ;;  %p14886_p11 = scmp.ne.s32.totalorder %s18126_s28, %s14885_s22  ;;  %s14889_s24 = sshll.u32 %s14966_s9, 4  ;;  %s14890_s24 = int_to_ptr.vmem [resolvable:$false] %s14889_s24 }
  0x6f   : > { %12972 = vmatpush3.bf16.msra.mxu0 %v12971_v7  ;;  %v12989_v25 = vpack.c.bf16 %v369_v24, %v368_v23  ;;  %v313_v28 = vld [vmem:[%s15184_s10] sm:$0xff]  ;;  %v12992_v29 = vpack.c.bf16 %v765_v27, %v764_v26  ;;  %v767_v31 = vld [vmem:[#allocation7 + $0x98] sm:$0xff]  ;;  %v769_v35 = vld [vmem:[#allocation7 + $0xa8] sm:$0xff]  ;;  %s14891_s26 = scalar_lea.vmem %s14890_s24, 10496  ;;  %p14892_p7 = scmp.lt.s32.totalorder %s18126_s28, %s14890_s24 }
  0x70   : > { %12973 = vmatprep.subr.bf16.mxu0 %v14962_v0  ;;  %v766_v30 = vld [vmem:[#allocation7 + $0x90] sm:$0xff]  ;;  %v314_v32 = vld [vmem:[%s15184_s10 + $0x8] sm:$0xff]  ;;  %v768_v34 = vld [vmem:[#allocation7 + $0xa0] sm:$0xff]  ;;  %p14887_p2 = pnand %p14886_p11, %p18192_p0  ;;  %p14893_p9 = scmp.lt.s32.totalorder %s14891_s26, %s14885_s22 }
  0x71   : > { %v12995_v33 = vpack.c.bf16 %v767_v31, %v766_v30  ;;  %v315_v36 = vld [vmem:[%s15184_s10 + $0x10] sm:$0xff]  ;;  %v12998_v37 = vpack.c.bf16 %v769_v35, %v768_v34  ;;  %v771_v39 = vld [vmem:[#allocation7 + $0xb8] sm:$0xff]  ;;  %v773_v43 = vld [vmem:[#allocation7 + $0xc8] sm:$0xff] }
  0x72   : > { %v770_v38 = vld [vmem:[#allocation7 + $0xb0] sm:$0xff]  ;;  %v316_v40 = vld [vmem:[%s15184_s10 + $0x18] sm:$0xff]  ;;  %v772_v42 = vld [vmem:[#allocation7 + $0xc0] sm:$0xff]  ;;  %p14888_p3 = pneg %p14887_p2  ;;  %p14894_p12 = por %p14893_p9, %p14892_p7 }
  0x73   : > { %12975 = vmatpush3.bf16.msra.mxu0 %v12974_v10  ;;  %v13001_v41 = vpack.c.bf16 %v771_v39, %v770_v38  ;;  %v317_v44 = vld [vmem:[%s15184_s10 + $0x20] sm:$0xff]  ;;  %v13004_v45 = vpack.c.bf16 %v773_v43, %v772_v42  ;;  %v775_v47 = vld [vmem:[#allocation7 + $0xd8] sm:$0xff]  ;;  %v777_v51 = vld [vmem:[#allocation7 + $0xe8] sm:$0xff] }
  0x74   : > { %12976 = vmatprep.subr.bf16.mxu0 %v14962_v0  ;;  %v774_v46 = vld [vmem:[#allocation7 + $0xd0] sm:$0xff]  ;;  %v318_v48 = vld [vmem:[%s15184_s10 + $0x28] sm:$0xff]  ;;  %v776_v50 = vld [vmem:[#allocation7 + $0xe0] sm:$0xff]  ;;  %p14895_p1 = pnand %p14894_p12, %p14888_p3 }
  0x75   : > { %v13007_v49 = vpack.c.bf16 %v775_v47, %v774_v46  ;;  %v319_v52 = vld [vmem:[%s15184_s10 + $0x30] sm:$0xff]  ;;  %v13010_v53 = vpack.c.bf16 %v777_v51, %v776_v50  ;;  %v779_v55 = vld [vmem:[#allocation7 + $0xf8] sm:$0xff]  ;;  %v321_v58 = vld [vmem:[%s15184_s10 + $0x40] sm:$0xff] }
  0x76   : > { %v778_v54 = vld [vmem:[#allocation7 + $0xf0] sm:$0xff]  ;;  %v320_v56 = vld [vmem:[%s15184_s10 + $0x38] sm:$0xff]  ;;  %v322_v59 = vld [vmem:[%s15184_s10 + $0x48] sm:$0xff] }
  0x77   : > { %12978 = vmatpush3.bf16.msra.mxu0 %v12977_v13  ;;  %v13013_v57 = vpack.c.bf16 %v779_v55, %v778_v54  ;;  %v323_v60 = vld [vmem:[%s15184_s10 + $0x50] sm:$0xff]  ;;  %v324_v61 = vld [vmem:[%s15184_s10 + $0x58] sm:$0xff]  ;;  %v325_v62 = vld [vmem:[%s15184_s10 + $0x60] sm:$0xff] }
  0x78   : > { %12979 = vmatprep.subr.bf16.mxu0 %v14962_v0  ;;  %v326_v63 = vld [vmem:[%s15184_s10 + $0x68] sm:$0xff]  ;;  %v327_v2 = vld [vmem:[%s15184_s10 + $0x70] sm:$0xff]  ;;  %v328_v3 = vld [vmem:[%s15184_s10 + $0x78] sm:$0xff] }
  0x79   : > { %v329_v4 = vld [vmem:[%s15184_s10 + $0x80] sm:$0xff]  ;;  %v330_v5 = vld [vmem:[%s15184_s10 + $0x88] sm:$0xff]  ;;  %v331_v6 = vld [vmem:[%s15184_s10 + $0x90] sm:$0xff] }
  0x7a   : > { %v332_v7 = vld [vmem:[%s15184_s10 + $0x98] sm:$0xff]  ;;  %v333_v8 = vld [vmem:[%s15184_s10 + $0xa0] sm:$0xff]  ;;  %v334_v9 = vld [vmem:[%s15184_s10 + $0xa8] sm:$0xff] }
  0x7b   : > { %12981 = vmatpush3.bf16.msra.mxu0 %v12980_v16  ;;  %v335_v10 = vld [vmem:[%s15184_s10 + $0xb0] sm:$0xff]  ;;  %v336_v11 = vld [vmem:[%s15184_s10 + $0xb8] sm:$0xff]  ;;  %v337_v12 = vld [vmem:[%s15184_s10 + $0xc0] sm:$0xff] }
  0x7c   : > { %12982 = vmatprep.subr.bf16.mxu0 %v14962_v0  ;;  %v338_v13 = vld [vmem:[%s15184_s10 + $0xc8] sm:$0xff]  ;;  %v339_v14 = vld [vmem:[%s15184_s10 + $0xd0] sm:$0xff]  ;;  %v340_v15 = vld [vmem:[%s15184_s10 + $0xd8] sm:$0xff] }
  0x7d   : > { %v341_v16 = vld [vmem:[%s15184_s10 + $0xe0] sm:$0xff]  ;;  %v342_v17 = vld [vmem:[%s15184_s10 + $0xe8] sm:$0xff]  ;;  %v343_v18 = vld [vmem:[%s15184_s10 + $0xf0] sm:$0xff] }
  0x7e   : > { %v345_v20 = vld [vmem:[%s15184_s10 + $0x100] sm:$0xff]  ;;  %v346_v21 = vld [vmem:[%s15184_s10 + $0x108] sm:$0xff]  ;;  %v348_v23 = vld [vmem:[%s15184_s10 + $0x118] sm:$0xff] }
  0x7f   : > { %12984 = vmatpush3.bf16.msra.mxu0 %v12983_v19  ;;  %v344_v19 = vld [vmem:[%s15184_s10 + $0xf8] sm:$0xff]  ;;  %v349_v24 = vld [vmem:[%s15184_s10 + $0x120] sm:$0xff]  ;;  %v351_v26 = vld [vmem:[%s15184_s10 + $0x130] sm:$0xff] }
  0x80   : > { %12985 = vmatprep.subr.bf16.mxu0 %v14962_v0  ;;  %v352_v27 = vld [vmem:[%s15184_s10 + $0x138] sm:$0xff]  ;;  %v722_v31 = vld [vmem:[%s15184_s10 + $0x1] sm:$0xff]  ;;  %v723_v35 = vld [vmem:[%s15184_s10 + $0x9] sm:$0xff] }
  0x81   : > { %v1216_v30 = vld [vmem:[#allocation7 + $0x108] sm:$0xff]  ;;  %v1218_v34 = vld [vmem:[#allocation7 + $0x118] sm:$0xff] }
  0x82   : > { %v1220_v38 = vld [vmem:[#allocation7 + $0x128] sm:$0xff]  ;;  %v1222_v42 = vld [vmem:[#allocation7 + $0x138] sm:$0xff] }
  0x83   : > { %12987 = vmatpush3.bf16.msra.mxu0 %v12986_v22  ;;  %v347_v22 = vld [vmem:[%s15184_s10 + $0x110] sm:$0xff]  ;;  %v725_v43 = vld [vmem:[%s15184_s10 + $0x19] sm:$0xff]  ;;  %v726_v47 = vld [vmem:[%s15184_s10 + $0x21] sm:$0xff] }
  0x84   : > { %12988 = vmatprep.subr.bf16.mxu0 %v14962_v0  ;;  %v724_v39 = vld [vmem:[%s15184_s10 + $0x11] sm:$0xff]  ;;  %v727_v51 = vld [vmem:[%s15184_s10 + $0x29] sm:$0xff] }
  0x85   : > { %v1224_v46 = vld [vmem:[#allocation7 + $0x148] sm:$0xff]  ;;  %v1226_v50 = vld [vmem:[#allocation7 + $0x158] sm:$0xff] }
  0x86   : > { %v1228_v54 = vld [vmem:[#allocation7 + $0x168] sm:$0xff] }
  0x87   : > { %12990 = vmatpush3.bf16.msra.mxu0 %v12989_v25  ;;  %v350_v25 = vld [vmem:[%s15184_s10 + $0x128] sm:$0xff]  ;;  %v728_v55 = vld [vmem:[%s15184_s10 + $0x31] sm:$0xff] }
  0x88   : > { %12991 = vmatprep.subr.bf16.mxu0 %v14962_v0 }
  0x8a   : > { %10210 = vmatmul.mubr.f32.vlgmr.msra.gmra.mrb[0].mxu0 %v313_v28  ;;  %v353_v28 = vld [vmem:[%s15184_s10 + $0x140] sm:$0xff] }
  0x8b   : > { %12993 = vmatpush3.bf16.msra.mxu0 %v12992_v29  ;;  %10212 = vmatprep.mubr.msk.f32.mxu0 %vm14963_vm0, %v14964_v1  ;;  %v1215_v29 = vld [vmem:[#allocation7 + $0x100] sm:$0xff] }
  0x8c   : > { %12994 = vmatprep.subr.bf16.mxu0 %v14962_v0 }
  0x8e   : > { %10213 = vmatmul.mubr.f32.gmra.mrb[2].mxu0 %v314_v32  ;;  %v13016_v32 = vpack.c.bf16 %v1216_v30, %v1215_v29  ;;  %v760_v29 = vld [vmem:[%s15184_s10 + $0x131] sm:$0xff]  ;;  %v761_v30 = vld [vmem:[%s15184_s10 + $0x139] sm:$0xff] }
  0x8f   : > { %10215 = vmatprep.mubr.msk.f32.mxu0 %vm14963_vm0, %v14964_v1  ;;  %12996 = vmatpush3.bf16.msra.mxu0 %v12995_v33  ;;  %v1217_v33 = vld [vmem:[#allocation7 + $0x110] sm:$0xff] }
  0x90   : > { %12997 = vmatprep.subr.bf16.mxu0 %v14962_v0 }
  0x92   : > { %10216 = vmatmul.mubr.f32.gmra.mrb[4].mxu0 %v315_v36  ;;  %v13019_v36 = vpack.c.bf16 %v1218_v34, %v1217_v33  ;;  %v1667_v33 = vld [vmem:[#allocation7 + $0x188] sm:$0xff] }
  0x93   : > { %10218 = vmatprep.mubr.msk.f32.mxu0 %vm14963_vm0, %v14964_v1  ;;  %12999 = vmatpush3.bf16.msra.mxu0 %v12998_v37  ;;  %v1219_v37 = vld [vmem:[#allocation7 + $0x120] sm:$0xff] }
  0x94   : > { %13000 = vmatprep.subr.bf16.mxu0 %v14962_v0  ;;  %v1173_v34 = vld [vmem:[%s15184_s10 + $0x2] sm:$0xff] }
  0x96   : > { %10219 = vmatmul.mubr.f32.gmra.mrb[6].mxu0 %v316_v40  ;;  %v13022_v40 = vpack.c.bf16 %v1220_v38, %v1219_v37  ;;  %v1669_v37 = vld [vmem:[#allocation7 + $0x198] sm:$0xff] }
  0x97   : > { %10221 = vmatprep.mubr.msk.f32.mxu0 %vm14963_vm0, %v14964_v1  ;;  %13002 = vmatpush3.bf16.msra.mxu0 %v13001_v41  ;;  %v1221_v41 = vld [vmem:[#allocation7 + $0x130] sm:$0xff] }
  0x98   : > { %13003 = vmatprep.subr.bf16.mxu0 %v14962_v0  ;;  %v1174_v38 = vld [vmem:[%s15184_s10 + $0xa] sm:$0xff] }
  0x9a   : > { %10222 = vmatmul.mubr.f32.gmra.mrb[8].mxu0 %v317_v44  ;;  %v13025_v44 = vpack.c.bf16 %v1222_v42, %v1221_v41  ;;  %v1671_v41 = vld [vmem:[#allocation7 + $0x1a8] sm:$0xff] }
  0x9b   : > { %10224 = vmatprep.mubr.msk.f32.mxu0 %vm14963_vm0, %v14964_v1  ;;  %13005 = vmatpush3.bf16.msra.mxu0 %v13004_v45  ;;  %v1223_v45 = vld [vmem:[#allocation7 + $0x140] sm:$0xff] }
  0x9c   : > { %13006 = vmatprep.subr.bf16.mxu0 %v14962_v0  ;;  %v15484_v42 = vld [vmem:[%s15184_s10 + $0x12] sm:$0xff] }
  0x9e   : > { %10225 = vmatmul.mubr.f32.gmra.mrb[10].mxu0 %v318_v48  ;;  %v13028_v48 = vpack.c.bf16 %v1224_v46, %v1223_v45  ;;  %v1673_v45 = vld [vmem:[#allocation7 + $0x1b8] sm:$0xff] }
  0x9f   : > { %10227 = vmatprep.mubr.msk.f32.mxu0 %vm14963_vm0, %v14964_v1  ;;  %13008 = vmatpush3.bf16.msra.mxu0 %v13007_v49  ;;  %v1225_v49 = vld [vmem:[#allocation7 + $0x150] sm:$0xff] }
  0xa0   : > { %13009 = vmatprep.subr.bf16.mxu0 %v14962_v0  ;;  %v15491_v46 = vld [vmem:[%s15184_s10 + $0x1a] sm:$0xff] }
  0xa2   : > { %10228 = vmatmul.mubr.f32.gmra.mrb[12].mxu0 %v319_v52  ;;  %v13031_v52 = vpack.c.bf16 %v1226_v50, %v1225_v49  ;;  %v1675_v49 = vld [vmem:[#allocation7 + $0x1c8] sm:$0xff] }
  0xa3   : > { %10230 = vmatprep.mubr.msk.f32.mxu0 %vm14963_vm0, %v14964_v1  ;;  %13011 = vmatpush3.bf16.msra.mxu0 %v13010_v53  ;;  %v1227_v53 = vld [vmem:[#allocation7 + $0x160] sm:$0xff] }
  0xa4   : > { %13012 = vmatprep.subr.bf16.mxu0 %v14962_v0  ;;  %v15498_v50 = vld [vmem:[%s15184_s10 + $0x22] sm:$0xff] }
  0xa6   : > { %10231 = vmatmul.mubr.f32.gmra.mrb[14].mxu0 %v320_v56  ;;  %v13034_v56 = vpack.c.bf16 %v1228_v54, %v1227_v53  ;;  %v1677_v53 = vld [vmem:[#allocation7 + $0x1d8] sm:$0xff] }
  0xa7   : > { %10233 = vmatprep.mubr.msk.f32.mxu0 %vm14963_vm0, %v14964_v1  ;;  %13014 = vmatpush3.bf16.msra.mxu0 %v13013_v57  ;;  %v1229_v57 = vld [vmem:[#allocation7 + $0x170] sm:$0xff] }
  0xa8   : > { %13015 = vmatprep.subr.bf16.mxu0 %v14962_v0  ;;  %v15505_v54 = vld [vmem:[%s15184_s10 + $0x2a] sm:$0xff] }
  0xaa   : > { %10234 = vmatmul.mubr.f32.gmra.mrb[16].mxu0 %v321_v58  ;;  %v1230_v58 = vld [vmem:[#allocation7 + $0x178] sm:$0xff] }
  0xab   : > { %10236 = vmatprep.mubr.msk.f32.mxu0 %vm14963_vm0, %v14964_v1 }
  0xae   : > { %10237 = vmatmul.mubr.f32.gmra.mrb[18].mxu0 %v322_v59  ;;  %v729_v59 = vld [vmem:[%s15184_s10 + $0x39] sm:$0xff] }
  0xaf   : > { %10239 = vmatprep.mubr.msk.f32.mxu0 %vm14963_vm0, %v14964_v1 }
  0xb2   : > { %10240 = vmatmul.mubr.f32.gmra.mrb[20].mxu0 %v323_v60  ;;  %v13037_v60 = vpack.c.bf16 %v1230_v58, %v1229_v57  ;;  %v1679_v57 = vld [vmem:[#allocation7 + $0x1e8] sm:$0xff] }
  0xb3   : > { %10242 = vmatprep.mubr.msk.f32.mxu0 %vm14963_vm0, %v14964_v1  ;;  %v15512_v58 = vld [vmem:[%s15184_s10 + $0x32] sm:$0xff] }
  0xb6   : > { %10243 = vmatmul.mubr.f32.gmra.mrb[22].mxu0 %v324_v61  ;;  %v730_v61 = vld [vmem:[%s15184_s10 + $0x41] sm:$0xff] }
  0xb7   : > { %10245 = vmatprep.mubr.msk.f32.mxu0 %vm14963_vm0, %v14964_v1 }
  0xba   : > { %10246 = vmatmul.mubr.f32.gmra.mrb[24].mxu0 %v325_v62  ;;  %v731_v62 = vld [vmem:[%s15184_s10 + $0x49] sm:$0xff] }
  0xbb   : > { %10248 = vmatprep.mubr.msk.f32.mxu0 %vm14963_vm0, %v14964_v1 }
  0xbe   : > { %10249 = vmatmul.mubr.f32.gmra.mrb[26].mxu0 %v326_v63  ;;  %v732_v63 = vld [vmem:[%s15184_s10 + $0x51] sm:$0xff] }
  0xbf   : > { %10251 = vmatprep.mubr.msk.f32.mxu0 %vm14963_vm0, %v14964_v1 }
  0xc2   : > { %10252 = vmatmul.mubr.f32.gmra.mrb[28].mxu0 %v327_v2  ;;  %v733_v2 = vld [vmem:[%s15184_s10 + $0x59] sm:$0xff] }
  0xc3   : > { %10254 = vmatprep.mubr.msk.f32.mxu0 %vm14963_vm0, %v14964_v1 }
  0xc6   : > { %10255 = vmatmul.mubr.f32.gmra.mrb[30].mxu0 %v328_v3  ;;  %v734_v3 = vld [vmem:[%s15184_s10 + $0x61] sm:$0xff] }
  0xc7   : > { %10257 = vmatprep.mubr.msk.f32.mxu0 %vm14963_vm0, %v14964_v1 }
  0xca   : > { %10258 = vmatmul.mubr.f32.gmra.mrb[32].mxu0 %v329_v4  ;;  %v735_v4 = vld [vmem:[%s15184_s10 + $0x69] sm:$0xff] }
  0xcb   : > { %10260 = vmatprep.mubr.msk.f32.mxu0 %vm14963_vm0, %v14964_v1 }
  0xce   : > { %10261 = vmatmul.mubr.f32.gmra.mrb[34].mxu0 %v330_v5  ;;  %v736_v5 = vld [vmem:[%s15184_s10 + $0x71] sm:$0xff] }
  0xcf   : > { %10263 = vmatprep.mubr.msk.f32.mxu0 %vm14963_vm0, %v14964_v1 }
  0xd2   : > { %10264 = vmatmul.mubr.f32.gmra.mrb[36].mxu0 %v331_v6  ;;  %v737_v6 = vld [vmem:[%s15184_s10 + $0x79] sm:$0xff] }
  0xd3   : > { %10266 = vmatprep.mubr.msk.f32.mxu0 %vm14963_vm0, %v14964_v1 }
  0xd6   : > { %10267 = vmatmul.mubr.f32.gmra.mrb[38].mxu0 %v332_v7  ;;  %v738_v7 = vld [vmem:[%s15184_s10 + $0x81] sm:$0xff] }
  0xd7   : > { %10269 = vmatprep.mubr.msk.f32.mxu0 %vm14963_vm0, %v14964_v1 }
  0xda   : > { %10270 = vmatmul.mubr.f32.gmra.mrb[40].mxu0 %v333_v8  ;;  %v739_v8 = vld [vmem:[%s15184_s10 + $0x89] sm:$0xff] }
  0xdb   : > { %10272 = vmatprep.mubr.msk.f32.mxu0 %vm14963_vm0, %v14964_v1 }
  0xde   : > { %10273 = vmatmul.mubr.f32.gmra.mrb[42].mxu0 %v334_v9  ;;  %v740_v9 = vld [vmem:[%s15184_s10 + $0x91] sm:$0xff] }
  0xdf   : > { %10275 = vmatprep.mubr.msk.f32.mxu0 %vm14963_vm0, %v14964_v1 }
  0xe2   : > { %10276 = vmatmul.mubr.f32.gmra.mrb[44].mxu0 %v335_v10  ;;  %v741_v10 = vld [vmem:[%s15184_s10 + $0x99] sm:$0xff] }
  0xe3   : > { %10278 = vmatprep.mubr.msk.f32.mxu0 %vm14963_vm0, %v14964_v1 }
  0xe6   : > { %10279 = vmatmul.mubr.f32.gmra.mrb[46].mxu0 %v336_v11  ;;  %v742_v11 = vld [vmem:[%s15184_s10 + $0xa1] sm:$0xff] }
  0xe7   : > { %10281 = vmatprep.mubr.msk.f32.mxu0 %vm14963_vm0, %v14964_v1 }
  0xea   : > { %10282 = vmatmul.mubr.f32.gmra.mrb[48].mxu0 %v337_v12  ;;  %v743_v12 = vld [vmem:[%s15184_s10 + $0xa9] sm:$0xff] }
  0xeb   : > { %10284 = vmatprep.mubr.msk.f32.mxu0 %vm14963_vm0, %v14964_v1 }
  0xee   : > { %10285 = vmatmul.mubr.f32.gmra.mrb[50].mxu0 %v338_v13  ;;  %v744_v13 = vld [vmem:[%s15184_s10 + $0xb1] sm:$0xff] }
  0xef   : > { %10287 = vmatprep.mubr.msk.f32.mxu0 %vm14963_vm0, %v14964_v1 }
  0xf2   : > { %10288 = vmatmul.mubr.f32.gmra.mrb[52].mxu0 %v339_v14  ;;  %v745_v14 = vld [vmem:[%s15184_s10 + $0xb9] sm:$0xff] }
  0xf3   : > { %10290 = vmatprep.mubr.msk.f32.mxu0 %vm14963_vm0, %v14964_v1 }
  0xf6   : > { %10291 = vmatmul.mubr.f32.gmra.mrb[54].mxu0 %v340_v15  ;;  %v746_v15 = vld [vmem:[%s15184_s10 + $0xc1] sm:$0xff] }
  0xf7   : > { %10293 = vmatprep.mubr.msk.f32.mxu0 %vm14963_vm0, %v14964_v1 }
  0xfa   : > { %10294 = vmatmul.mubr.f32.gmra.mrb[56].mxu0 %v341_v16  ;;  %v747_v16 = vld [vmem:[%s15184_s10 + $0xc9] sm:$0xff] }
  0xfb   : > { %10296 = vmatprep.mubr.msk.f32.mxu0 %vm14963_vm0, %v14964_v1 }
  0xfe   : > { %10297 = vmatmul.mubr.f32.gmra.mrb[58].mxu0 %v342_v17  ;;  %v748_v17 = vld [vmem:[%s15184_s10 + $0xd1] sm:$0xff] }
  0xff   : > { %10299 = vmatprep.mubr.msk.f32.mxu0 %vm14963_vm0, %v14964_v1 }
 0x102   : > { %10300 = vmatmul.mubr.f32.gmra.mrb[60].mxu0 %v343_v18  ;;  %v749_v18 = vld [vmem:[%s15184_s10 + $0xd9] sm:$0xff] }
 0x103   : > { %10302 = vmatprep.mubr.msk.f32.mxu0 %vm14963_vm0, %v14964_v1 }
 0x106   : > { %10303 = vmatmul.mubr.f32.gmra.mrb[62].mxu0 %v344_v19  ;;  %v750_v19 = vld [vmem:[%s15184_s10 + $0xe1] sm:$0xff] }
 0x107   : > { %10305 = vmatprep.mubr.msk.f32.mxu0 %vm14963_vm0, %v14964_v1 }
 0x10a   : > { %10306 = vmatmul.mubr.f32.gmra.mrb[64].mxu0 %v345_v20  ;;  %v751_v20 = vld [vmem:[%s15184_s10 + $0xe9] sm:$0xff] }
 0x10b   : > { %10308 = vmatprep.mubr.msk.f32.mxu0 %vm14963_vm0, %v14964_v1 }
 0x10e   : > { %10309 = vmatmul.mubr.f32.gmra.mrb[66].mxu0 %v346_v21  ;;  %v752_v21 = vld [vmem:[%s15184_s10 + $0xf1] sm:$0xff] }
 0x10f   : > { %10311 = vmatprep.mubr.msk.f32.mxu0 %vm14963_vm0, %v14964_v1 }
 0x112   : > { %10312 = vmatmul.mubr.f32.gmra.mrb[68].mxu0 %v347_v22  ;;  %v753_v22 = vld [vmem:[%s15184_s10 + $0xf9] sm:$0xff] }
 0x113   : > { %10314 = vmatprep.mubr.msk.f32.mxu0 %vm14963_vm0, %v14964_v1 }
 0x116   : > { %10315 = vmatmul.mubr.f32.gmra.mrb[70].mxu0 %v348_v23  ;;  %v754_v23 = vld [vmem:[%s15184_s10 + $0x101] sm:$0xff] }
 0x117   : > { %10317 = vmatprep.mubr.msk.f32.mxu0 %vm14963_vm0, %v14964_v1 }
 0x11a   : > { %10318 = vmatmul.mubr.f32.gmra.mrb[72].mxu0 %v349_v24  ;;  %v755_v24 = vld [vmem:[%s15184_s10 + $0x109] sm:$0xff] }
 0x11b   : > { %10320 = vmatprep.mubr.msk.f32.mxu0 %vm14963_vm0, %v14964_v1 }
 0x11e   : > { %10321 = vmatmul.mubr.f32.gmra.mrb[74].mxu0 %v350_v25  ;;  %v756_v25 = vld [vmem:[%s15184_s10 + $0x111] sm:$0xff] }
 0x11f   : > { %10323 = vmatprep.mubr.msk.f32.mxu0 %vm14963_vm0, %v14964_v1 }
 0x122   : > { %10324 = vmatmul.mubr.f32.gmra.mrb[76].mxu0 %v351_v26  ;;  %v757_v26 = vld [vmem:[%s15184_s10 + $0x119] sm:$0xff] }
 0x123   : > { %10326 = vmatprep.mubr.msk.f32.mxu0 %vm14963_vm0, %v14964_v1 }
 0x126   : > { %10327 = vmatmul.mubr.f32.gmra.mrb[78].mxu0 %v352_v27  ;;  %v758_v27 = vld [vmem:[%s15184_s10 + $0x121] sm:$0xff] }
 0x127   : > { %10329 = vmatprep.mubr.msk.f32.mxu0 %vm14963_vm0, %v14964_v1 }
 0x12a   : > { %10330 = vmatmul.mubr.f32.gmra.mrb[80].mxu0 %v353_v28  ;;  %v759_v28 = vld [vmem:[%s15184_s10 + $0x129] sm:$0xff] }
 0x12b   : > { %10364 = vmatprep.mubr.msk.f32.mxu0 %vm14963_vm0, %v14964_v1 }
 0x12e   : > { %10365 = vmatmul.mubr.f32.vlgmr.msra.gmra.mrb[0].mxu0 %v722_v31  ;;  %v762_v31 = vld [vmem:[%s15184_s10 + $0x141] sm:$0xff] }
 0x12f   : > { %13017 = vmatpush3.bf16.msra.mxu0 %v13016_v32  ;;  %10367 = vmatprep.mubr.msk.f32.mxu0 %vm14963_vm0, %v14964_v1  ;;  %v1666_v32 = vld [vmem:[#allocation7 + $0x180] sm:$0xff] }
 0x130   : > { %13018 = vmatprep.subr.bf16.mxu0 %v14962_v0 }
 0x132   : > { %10368 = vmatmul.mubr.f32.gmra.mrb[2].mxu0 %v723_v35  ;;  %v13040_v35 = vpack.c.bf16 %v1667_v33, %v1666_v32  ;;  %v15709_v32 = vld [vmem:[%s15184_s10 + $0x132] sm:$0xff]  ;;  %v15715_v33 = vld [vmem:[%s15184_s10 + $0x13a] sm:$0xff] }
 0x133   : > { %10370 = vmatprep.mubr.msk.f32.mxu0 %vm14963_vm0, %v14964_v1  ;;  %13020 = vmatpush3.bf16.msra.mxu0 %v13019_v36  ;;  %v1668_v36 = vld [vmem:[#allocation7 + $0x190] sm:$0xff] }
 0x134   : > { %13021 = vmatprep.subr.bf16.mxu0 %v14962_v0 }
 0x136   : > { %10371 = vmatmul.mubr.f32.gmra.mrb[4].mxu0 %v724_v39  ;;  %v13043_v39 = vpack.c.bf16 %v1669_v37, %v1668_v36  ;;  %v2118_v36 = vld [vmem:[#allocation7 + $0x208] sm:$0xff] }
 0x137   : > { %10373 = vmatprep.mubr.msk.f32.mxu0 %vm14963_vm0, %v14964_v1  ;;  %13023 = vmatpush3.bf16.msra.mxu0 %v13022_v40  ;;  %v1670_v40 = vld [vmem:[#allocation7 + $0x1a0] sm:$0xff] }
 0x138   : > { %13024 = vmatprep.subr.bf16.mxu0 %v14962_v0 }
 0x13a   : > { %10374 = vmatmul.mubr.f32.gmra.mrb[6].mxu0 %v725_v43  ;;  %v13046_v43 = vpack.c.bf16 %v1671_v41, %v1670_v40  ;;  %v2121_v41 = vld [vmem:[#allocation7 + $0x220] sm:$0xff] }
 0x13b   : > { %10376 = vmatprep.mubr.msk.f32.mxu0 %vm14963_vm0, %v14964_v1  ;;  %13026 = vmatpush3.bf16.msra.mxu0 %v13025_v44  ;;  %v1672_v44 = vld [vmem:[#allocation7 + $0x1b0] sm:$0xff] }
 0x13c   : > { %13027 = vmatprep.subr.bf16.mxu0 %v14962_v0 }
 0x13e   : > { %10377 = vmatmul.mubr.f32.gmra.mrb[8].mxu0 %v726_v47  ;;  %v13049_v47 = vpack.c.bf16 %v1673_v45, %v1672_v44  ;;  %v2123_v45 = vld [vmem:[#allocation7 + $0x230] sm:$0xff] }
 0x13f   : > { %10379 = vmatprep.mubr.msk.f32.mxu0 %vm14963_vm0, %v14964_v1  ;;  %13029 = vmatpush3.bf16.msra.mxu0 %v13028_v48  ;;  %v1674_v48 = vld [vmem:[#allocation7 + $0x1c0] sm:$0xff] }
 0x140   : > { %13030 = vmatprep.subr.bf16.mxu0 %v14962_v0 }
 0x142   : > { %10380 = vmatmul.mubr.f32.gmra.mrb[10].mxu0 %v727_v51  ;;  %v13052_v51 = vpack.c.bf16 %v1675_v49, %v1674_v48  ;;  %v2125_v48 = vld [vmem:[#allocation7 + $0x240] sm:$0xff] }
 0x143   : > { %10382 = vmatprep.mubr.msk.f32.mxu0 %vm14963_vm0, %v14964_v1  ;;  %13032 = vmatpush3.bf16.msra.mxu0 %v13031_v52  ;;  %v1676_v52 = vld [vmem:[#allocation7 + $0x1d0] sm:$0xff] }
 0x144   : > { %13033 = vmatprep.subr.bf16.mxu0 %v14962_v0 }
 0x146   : > { %10383 = vmatmul.mubr.f32.gmra.mrb[12].mxu0 %v728_v55  ;;  %v13055_v55 = vpack.c.bf16 %v1677_v53, %v1676_v52  ;;  %v2129_v53 = vld [vmem:[#allocation7 + $0x260] sm:$0xff] }
 0x147   : > { %10385 = vmatprep.mubr.msk.f32.mxu0 %vm14963_vm0, %v14964_v1  ;;  %13035 = vmatpush3.bf16.msra.mxu0 %v13034_v56  ;;  %v1678_v56 = vld [vmem:[#allocation7 + $0x1e0] sm:$0xff] }
 0x148   : > { %13036 = vmatprep.subr.bf16.mxu0 %v14962_v0 }
 0x14a   : > { %10386 = vmatmul.mubr.f32.gmra.mrb[14].mxu0 %v729_v59  ;;  %v13058_v59 = vpack.c.bf16 %v1679_v57, %v1678_v56  ;;  %v2131_v56 = vld [vmem:[#allocation7 + $0x270] sm:$0xff]  ;;  %v2132_v57 = vld [vmem:[#allocation7 + $0x278] sm:$0xff] }
 0x14b   : > { %10388 = vmatprep.mubr.msk.f32.mxu0 %vm14963_vm0, %v14964_v1  ;;  %13038 = vmatpush3.bf16.msra.mxu0 %v13037_v60  ;;  %v1680_v60 = vld [vmem:[#allocation7 + $0x1f0] sm:$0xff] }
 0x14c   : > { %13039 = vmatprep.subr.bf16.mxu0 %v14962_v0 }
 0x14e   : > { %10389 = vmatmul.mubr.f32.gmra.mrb[16].mxu0 %v730_v61  ;;  %v1681_v61 = vld [vmem:[#allocation7 + $0x1f8] sm:$0xff] }
 0x14f   : > { %10391 = vmatprep.mubr.msk.f32.mxu0 %vm14963_vm0, %v14964_v1 }
 0x152   : > { %10392 = vmatmul.mubr.f32.gmra.mrb[18].mxu0 %v731_v62  ;;  %v15519_v62 = vld [vmem:[%s15184_s10 + $0x3a] sm:$0xff] }
 0x153   : > { %10394 = vmatprep.mubr.msk.f32.mxu0 %vm14963_vm0, %v14964_v1 }
 0x156   : > { %10395 = vmatmul.mubr.f32.gmra.mrb[20].mxu0 %v732_v63  ;;  %v13061_v63 = vpack.c.bf16 %v1681_v61, %v1680_v60  ;;  %v1664_v60 = vld [vmem:[%s15184_s10 + $0x152] sm:$0xff] }
 0x157   : > { %10397 = vmatprep.mubr.msk.f32.mxu0 %vm14963_vm0, %v14964_v1  ;;  %v2568_v61 = vld [vmem:[#allocation7 + $0x280] sm:$0xff] }
 0x15a   : > { %10398 = vmatmul.mubr.f32.gmra.mrb[22].mxu0 %v733_v2  ;;  %v15526_v2 = vld [vmem:[%s15184_s10 + $0x42] sm:$0xff] }
 0x15b   : > { %10400 = vmatprep.mubr.msk.f32.mxu0 %vm14963_vm0, %v14964_v1 }
 0x15e   : > { %10401 = vmatmul.mubr.f32.gmra.mrb[24].mxu0 %v734_v3  ;;  %v15533_v3 = vld [vmem:[%s15184_s10 + $0x4a] sm:$0xff] }
 0x15f   : > { %10403 = vmatprep.mubr.msk.f32.mxu0 %vm14963_vm0, %v14964_v1 }
 0x162   : > { %10404 = vmatmul.mubr.f32.gmra.mrb[26].mxu0 %v735_v4  ;;  %v15539_v4 = vld [vmem:[%s15184_s10 + $0x52] sm:$0xff] }
 0x163   : > { %10406 = vmatprep.mubr.msk.f32.mxu0 %vm14963_vm0, %v14964_v1 }
 0x166   : > { %10407 = vmatmul.mubr.f32.gmra.mrb[28].mxu0 %v736_v5  ;;  %v15545_v5 = vld [vmem:[%s15184_s10 + $0x5a] sm:$0xff] }
 0x167   : > { %10409 = vmatprep.mubr.msk.f32.mxu0 %vm14963_vm0, %v14964_v1 }
 0x16a   : > { %10410 = vmatmul.mubr.f32.gmra.mrb[30].mxu0 %v737_v6  ;;  %v15551_v6 = vld [vmem:[%s15184_s10 + $0x62] sm:$0xff] }
 0x16b   : > { %10412 = vmatprep.mubr.msk.f32.mxu0 %vm14963_vm0, %v14964_v1 }
 0x16e   : > { %10413 = vmatmul.mubr.f32.gmra.mrb[32].mxu0 %v738_v7  ;;  %v15557_v7 = vld [vmem:[%s15184_s10 + $0x6a] sm:$0xff] }
 0x16f   : > { %10415 = vmatprep.mubr.msk.f32.mxu0 %vm14963_vm0, %v14964_v1 }
 0x172   : > { %10416 = vmatmul.mubr.f32.gmra.mrb[34].mxu0 %v739_v8  ;;  %v15563_v8 = vld [vmem:[%s15184_s10 + $0x72] sm:$0xff] }
 0x173   : > { %10418 = vmatprep.mubr.msk.f32.mxu0 %vm14963_vm0, %v14964_v1 }
 0x176   : > { %10419 = vmatmul.mubr.f32.gmra.mrb[36].mxu0 %v740_v9  ;;  %v15569_v9 = vld [vmem:[%s15184_s10 + $0x7a] sm:$0xff] }
 0x177   : > { %10421 = vmatprep.mubr.msk.f32.mxu0 %vm14963_vm0, %v14964_v1 }
 0x17a   : > { %10422 = vmatmul.mubr.f32.gmra.mrb[38].mxu0 %v741_v10  ;;  %v15575_v10 = vld [vmem:[%s15184_s10 + $0x82] sm:$0xff] }
 0x17b   : > { %10424 = vmatprep.mubr.msk.f32.mxu0 %vm14963_vm0, %v14964_v1 }
 0x17e   : > { %10425 = vmatmul.mubr.f32.gmra.mrb[40].mxu0 %v742_v11  ;;  %v15581_v11 = vld [vmem:[%s15184_s10 + $0x8a] sm:$0xff] }
 0x17f   : > { %10427 = vmatprep.mubr.msk.f32.mxu0 %vm14963_vm0, %v14964_v1 }
 0x182   : > { %10428 = vmatmul.mubr.f32.gmra.mrb[42].mxu0 %v743_v12  ;;  %v15587_v12 = vld [vmem:[%s15184_s10 + $0x92] sm:$0xff] }
 0x183   : > { %10430 = vmatprep.mubr.msk.f32.mxu0 %vm14963_vm0, %v14964_v1 }
 0x186   : > { %10431 = vmatmul.mubr.f32.gmra.mrb[44].mxu0 %v744_v13  ;;  %v15593_v13 = vld [vmem:[%s15184_s10 + $0x9a] sm:$0xff] }
 0x187   : > { %10433 = vmatprep.mubr.msk.f32.mxu0 %vm14963_vm0, %v14964_v1 }
 0x18a   : > { %10434 = vmatmul.mubr.f32.gmra.mrb[46].mxu0 %v745_v14  ;;  %v15599_v14 = vld [vmem:[%s15184_s10 + $0xa2] sm:$0xff] }
 0x18b   : > { %10436 = vmatprep.mubr.msk.f32.mxu0 %vm14963_vm0, %v14964_v1 }
 0x18e   : > { %10437 = vmatmul.mubr.f32.gmra.mrb[48].mxu0 %v746_v15  ;;  %v15605_v15 = vld [vmem:[%s15184_s10 + $0xaa] sm:$0xff] }
 0x18f   : > { %10439 = vmatprep.mubr.msk.f32.mxu0 %vm14963_vm0, %v14964_v1 }
 0x192   : > { %10440 = vmatmul.mubr.f32.gmra.mrb[50].mxu0 %v747_v16  ;;  %v15611_v16 = vld [vmem:[%s15184_s10 + $0xb2] sm:$0xff] }
 0x193   : > { %10442 = vmatprep.mubr.msk.f32.mxu0 %vm14963_vm0, %v14964_v1 }
 0x196   : > { %10443 = vmatmul.mubr.f32.gmra.mrb[52].mxu0 %v748_v17  ;;  %v15617_v17 = vld [vmem:[%s15184_s10 + $0xba] sm:$0xff] }
 0x197   : > { %10445 = vmatprep.mubr.msk.f32.mxu0 %vm14963_vm0, %v14964_v1 }
 0x19a   : > { %10446 = vmatmul.mubr.f32.gmra.mrb[54].mxu0 %v749_v18  ;;  %v15623_v18 = vld [vmem:[%s15184_s10 + $0xc2] sm:$0xff] }
 0x19b   : > { %10448 = vmatprep.mubr.msk.f32.mxu0 %vm14963_vm0, %v14964_v1 }
 0x19e   : > { %10449 = vmatmul.mubr.f32.gmra.mrb[56].mxu0 %v750_v19  ;;  %v15629_v19 = vld [vmem:[%s15184_s10 + $0xca] sm:$0xff] }
 0x19f   : > { %10451 = vmatprep.mubr.msk.f32.mxu0 %vm14963_vm0, %v14964_v1 }
 0x1a2   : > { %10452 = vmatmul.mubr.f32.gmra.mrb[58].mxu0 %v751_v20  ;;  %v15635_v20 = vld [vmem:[%s15184_s10 + $0xd2] sm:$0xff] }
 0x1a3   : > { %10454 = vmatprep.mubr.msk.f32.mxu0 %vm14963_vm0, %v14964_v1 }
 0x1a6   : > { %10455 = vmatmul.mubr.f32.gmra.mrb[60].mxu0 %v752_v21  ;;  %v15641_v21 = vld [vmem:[%s15184_s10 + $0xda] sm:$0xff] }
 0x1a7   : > { %10457 = vmatprep.mubr.msk.f32.mxu0 %vm14963_vm0, %v14964_v1 }
 0x1aa   : > { %10458 = vmatmul.mubr.f32.gmra.mrb[62].mxu0 %v753_v22  ;;  %v15647_v22 = vld [vmem:[%s15184_s10 + $0xe2] sm:$0xff] }
 0x1ab   : > { %10460 = vmatprep.mubr.msk.f32.mxu0 %vm14963_vm0, %v14964_v1 }
 0x1ae   : > { %10461 = vmatmul.mubr.f32.gmra.mrb[64].mxu0 %v754_v23  ;;  %v15653_v23 = vld [vmem:[%s15184_s10 + $0xea] sm:$0xff] }
 0x1af   : > { %10463 = vmatprep.mubr.msk.f32.mxu0 %vm14963_vm0, %v14964_v1 }
 0x1b2   : > { %10464 = vmatmul.mubr.f32.gmra.mrb[66].mxu0 %v755_v24  ;;  %v15659_v24 = vld [vmem:[%s15184_s10 + $0xf2] sm:$0xff] }
 0x1b3   : > { %10466 = vmatprep.mubr.msk.f32.mxu0 %vm14963_vm0, %v14964_v1 }
 0x1b6   : > { %10467 = vmatmul.mubr.f32.gmra.mrb[68].mxu0 %v756_v25  ;;  %v15665_v25 = vld [vmem:[%s15184_s10 + $0xfa] sm:$0xff] }
 0x1b7   : > { %10469 = vmatprep.mubr.msk.f32.mxu0 %vm14963_vm0, %v14964_v1 }
 0x1ba   : > { %10470 = vmatmul.mubr.f32.gmra.mrb[70].mxu0 %v757_v26  ;;  %v15671_v26 = vld [vmem:[%s15184_s10 + $0x102] sm:$0xff] }
 0x1bb   : > { %10472 = vmatprep.mubr.msk.f32.mxu0 %vm14963_vm0, %v14964_v1 }
 0x1be   : > { %10473 = vmatmul.mubr.f32.gmra.mrb[72].mxu0 %v758_v27  ;;  %v15674_v27 = vld [vmem:[#allocation2] sm:$0xff] }
 0x1bf   : > { %10475 = vmatprep.mubr.msk.f32.mxu0 %vm14963_vm0, %v14964_v1 }
 0x1c2   : > { %10476 = vmatmul.mubr.f32.gmra.mrb[74].mxu0 %v759_v28  ;;  %v15679_v28 = vld [vmem:[%s15184_s10 + $0x10a] sm:$0xff] }
 0x1c3   : > { %10478 = vmatprep.mubr.msk.f32.mxu0 %vm14963_vm0, %v14964_v1 }
 0x1c6   : > { %10479 = vmatmul.mubr.f32.gmra.mrb[76].mxu0 %v760_v29  ;;  %v15691_v29 = vld [vmem:[%s15184_s10 + $0x11a] sm:$0xff] }
 0x1c7   : > { %10481 = vmatprep.mubr.msk.f32.mxu0 %vm14963_vm0, %v14964_v1 }
 0x1ca   : > { %10482 = vmatmul.mubr.f32.gmra.mrb[78].mxu0 %v761_v30  ;;  %v15697_v30 = vld [vmem:[%s15184_s10 + $0x122] sm:$0xff] }
 0x1cb   : > { %10484 = vmatprep.mubr.msk.f32.mxu0 %vm14963_vm0, %v14964_v1 }
 0x1ce   : > { %10485 = vmatmul.mubr.f32.gmra.mrb[80].mxu0 %v762_v31  ;;  %v15703_v31 = vld [vmem:[%s15184_s10 + $0x12a] sm:$0xff] }
 0x1cf   : > { %10519 = vmatprep.mubr.msk.f32.mxu0 %vm14963_vm0, %v14964_v1 }
 0x1d2   : > { %10520 = vmatmul.mubr.f32.vlgmr.msra.gmra.mrb[0].mxu0 %v1173_v34  ;;  %v15721_v34 = vld [vmem:[%s15184_s10 + $0x142] sm:$0xff] }
 0x1d3   : > { %13041 = vmatpush3.bf16.msra.mxu0 %v13040_v35  ;;  %10522 = vmatprep.mubr.msk.f32.mxu0 %vm14963_vm0, %v14964_v1  ;;  %v2117_v35 = vld [vmem:[#allocation7 + $0x200] sm:$0xff] }
 0x1d4   : > { %13042 = vmatprep.subr.bf16.mxu0 %v14962_v0  ;;  %v13064_v37 = vpack.c.bf16 %v2118_v36, %v2117_v35  ;;  %v2087_v35 = vld [vmem:[%s15184_s10 + $0x73] sm:$0xff]  ;;  %v2088_v36 = vld [vmem:[%s15184_s10 + $0x7b] sm:$0xff] }
 0x1d6   : > { %10523 = vmatmul.mubr.f32.gmra.mrb[2].mxu0 %v1174_v38  ;;  %v2119_v38 = vld [vmem:[#allocation7 + $0x210] sm:$0xff] }
 0x1d7   : > { %10525 = vmatprep.mubr.msk.f32.mxu0 %vm14963_vm0, %v14964_v1  ;;  %13044 = vmatpush3.bf16.msra.mxu0 %v13043_v39  ;;  %v2120_v39 = vld [vmem:[#allocation7 + $0x218] sm:$0xff] }
 0x1d8   : > { %13045 = vmatprep.subr.bf16.mxu0 %v14962_v0  ;;  %v13067_v40 = vpack.c.bf16 %v2120_v39, %v2119_v38  ;;  %v2090_v38 = vld [vmem:[%s15184_s10 + $0x8b] sm:$0xff]  ;;  %v2091_v39 = vld [vmem:[%s15184_s10 + $0x93] sm:$0xff] }
 0x1da   : > { %10526 = vmatmul.mubr.f32.gmra.mrb[4].mxu0 %v15484_v42 }
 0x1db   : > { %10528 = vmatprep.mubr.msk.f32.mxu0 %vm14963_vm0, %v14964_v1  ;;  %13047 = vmatpush3.bf16.msra.mxu0 %v13046_v43  ;;  %v2122_v43 = vld [vmem:[#allocation7 + $0x228] sm:$0xff] }
 0x1dc   : > { %13048 = vmatprep.subr.bf16.mxu0 %v14962_v0  ;;  %v13070_v44 = vpack.c.bf16 %v2122_v43, %v2121_v41  ;;  %v2093_v41 = vld [vmem:[%s15184_s10 + $0xa3] sm:$0xff]  ;;  %v2094_v43 = vld [vmem:[%s15184_s10 + $0xab] sm:$0xff] }
 0x1de   : > { %10529 = vmatmul.mubr.f32.gmra.mrb[6].mxu0 %v15491_v46 }
 0x1df   : > { %10531 = vmatprep.mubr.msk.f32.mxu0 %vm14963_vm0, %v14964_v1  ;;  %13050 = vmatpush3.bf16.msra.mxu0 %v13049_v47 }
 0x1e0   : > { %13051 = vmatprep.subr.bf16.mxu0 %v14962_v0 }
 0x1e2   : > { %10532 = vmatmul.mubr.f32.gmra.mrb[8].mxu0 %v15498_v50 }
 0x1e3   : > { %10534 = vmatprep.mubr.msk.f32.mxu0 %vm14963_vm0, %v14964_v1  ;;  %13053 = vmatpush3.bf16.msra.mxu0 %v13052_v51  ;;  %v2127_v51 = vld [vmem:[#allocation7 + $0x250] sm:$0xff] }
 0x1e4   : > { %13054 = vmatprep.subr.bf16.mxu0 %v14962_v0 }
 0x1e6   : > { %10535 = vmatmul.mubr.f32.gmra.mrb[10].mxu0 %v15505_v54 }
 0x1e7   : > { %10537 = vmatprep.mubr.msk.f32.mxu0 %vm14963_vm0, %v14964_v1  ;;  %13056 = vmatpush3.bf16.msra.mxu0 %v13055_v55 }
 0x1e8   : > { %13057 = vmatprep.subr.bf16.mxu0 %v14962_v0 }
 0x1ea   : > { %10538 = vmatmul.mubr.f32.gmra.mrb[12].mxu0 %v15512_v58 }
 0x1eb   : > { %10540 = vmatprep.mubr.msk.f32.mxu0 %vm14963_vm0, %v14964_v1  ;;  %13059 = vmatpush3.bf16.msra.mxu0 %v13058_v59  ;;  %v1663_v59 = vld [vmem:[%s15184_s10 + $0x14a] sm:$0xff] }
 0x1ec   : > { %13060 = vmatprep.subr.bf16.mxu0 %v14962_v0 }
 0x1ee   : > { %10541 = vmatmul.mubr.f32.gmra.mrb[14].mxu0 %v15519_v62 }
 0x1ef   : > { %10543 = vmatprep.mubr.msk.f32.mxu0 %vm14963_vm0, %v14964_v1  ;;  %13062 = vmatpush3.bf16.msra.mxu0 %v13061_v63  ;;  %v2075_v63 = vld [vmem:[%s15184_s10 + $0x13] sm:$0xff] }
 0x1f0   : > { %13063 = vmatprep.subr.bf16.mxu0 %v14962_v0 }
 0x1f2   : > { %10544 = vmatmul.mubr.f32.gmra.mrb[16].mxu0 %v15526_v2 }
 0x1f3   : > { %10546 = vmatprep.mubr.msk.f32.mxu0 %vm14963_vm0, %v14964_v1 }
 0x1f6   : > { %10547 = vmatmul.mubr.f32.gmra.mrb[18].mxu0 %v15533_v3 }
 0x1f7   : > { %10549 = vmatprep.mubr.msk.f32.mxu0 %vm14963_vm0, %v14964_v1 }
 0x1fa   : > { %10550 = vmatmul.mubr.f32.gmra.mrb[20].mxu0 %v15539_v4 }
 0x1fb   : > { %10552 = vmatprep.mubr.msk.f32.mxu0 %vm14963_vm0, %v14964_v1 }
 0x1fe   : > { %10553 = vmatmul.mubr.f32.gmra.mrb[22].mxu0 %v15545_v5 }
 0x1ff   : > { %10555 = vmatprep.mubr.msk.f32.mxu0 %vm14963_vm0, %v14964_v1 }
 0x202   : > { %10556 = vmatmul.mubr.f32.gmra.mrb[24].mxu0 %v15551_v6 }
 0x203   : > { %10558 = vmatprep.mubr.msk.f32.mxu0 %vm14963_vm0, %v14964_v1 }
 0x206   : > { %10559 = vmatmul.mubr.f32.gmra.mrb[26].mxu0 %v15557_v7 }
 0x207   : > { %10561 = vmatprep.mubr.msk.f32.mxu0 %vm14963_vm0, %v14964_v1 }
 0x20a   : > { %10562 = vmatmul.mubr.f32.gmra.mrb[28].mxu0 %v15563_v8 }
 0x20b   : > { %10564 = vmatprep.mubr.msk.f32.mxu0 %vm14963_vm0, %v14964_v1 }
 0x20e   : > { %10565 = vmatmul.mubr.f32.gmra.mrb[30].mxu0 %v15569_v9 }
 0x20f   : > { %10567 = vmatprep.mubr.msk.f32.mxu0 %vm14963_vm0, %v14964_v1 }
 0x212   : > { %10568 = vmatmul.mubr.f32.gmra.mrb[32].mxu0 %v15575_v10 }
 0x213   : > { %10570 = vmatprep.mubr.msk.f32.mxu0 %vm14963_vm0, %v14964_v1 }
 0x216   : > { %10571 = vmatmul.mubr.f32.gmra.mrb[34].mxu0 %v15581_v11 }
 0x217   : > { %10573 = vmatprep.mubr.msk.f32.mxu0 %vm14963_vm0, %v14964_v1 }
 0x21a   : > { %10574 = vmatmul.mubr.f32.gmra.mrb[36].mxu0 %v15587_v12 }
 0x21b   : > { %10576 = vmatprep.mubr.msk.f32.mxu0 %vm14963_vm0, %v14964_v1 }
 0x21e   : > { %10577 = vmatmul.mubr.f32.gmra.mrb[38].mxu0 %v15593_v13 }
 0x21f   : > { %10579 = vmatprep.mubr.msk.f32.mxu0 %vm14963_vm0, %v14964_v1 }
 0x222   : > { %10580 = vmatmul.mubr.f32.gmra.mrb[40].mxu0 %v15599_v14 }
 0x223   : > { %10582 = vmatprep.mubr.msk.f32.mxu0 %vm14963_vm0, %v14964_v1 }
 0x226   : > { %10583 = vmatmul.mubr.f32.gmra.mrb[42].mxu0 %v15605_v15 }
 0x227   : > { %10585 = vmatprep.mubr.msk.f32.mxu0 %vm14963_vm0, %v14964_v1 }
 0x22a   : > { %10586 = vmatmul.mubr.f32.gmra.mrb[44].mxu0 %v15611_v16 }
 0x22b   : > { %10588 = vmatprep.mubr.msk.f32.mxu0 %vm14963_vm0, %v14964_v1 }
 0x22e   : > { %10589 = vmatmul.mubr.f32.gmra.mrb[46].mxu0 %v15617_v17 }
 0x22f   : > { %10591 = vmatprep.mubr.msk.f32.mxu0 %vm14963_vm0, %v14964_v1 }
 0x232   : > { %10592 = vmatmul.mubr.f32.gmra.mrb[48].mxu0 %v15623_v18 }
 0x233   : > { %10594 = vmatprep.mubr.msk.f32.mxu0 %vm14963_vm0, %v14964_v1 }
 0x236   : > { %10595 = vmatmul.mubr.f32.gmra.mrb[50].mxu0 %v15629_v19 }
 0x237   : > { %10597 = vmatprep.mubr.msk.f32.mxu0 %vm14963_vm0, %v14964_v1 }
 0x23a   : > { %10598 = vmatmul.mubr.f32.gmra.mrb[52].mxu0 %v15635_v20 }
 0x23b   : > { %10600 = vmatprep.mubr.msk.f32.mxu0 %vm14963_vm0, %v14964_v1 }
 0x23e   : > { %10601 = vmatmul.mubr.f32.gmra.mrb[54].mxu0 %v15641_v21 }
 0x23f   : > { %10603 = vmatprep.mubr.msk.f32.mxu0 %vm14963_vm0, %v14964_v1 }
 0x242   : > { %10604 = vmatmul.mubr.f32.gmra.mrb[56].mxu0 %v15647_v22 }
 0x243   : > { %10606 = vmatprep.mubr.msk.f32.mxu0 %vm14963_vm0, %v14964_v1 }
 0x246   : > { %10607 = vmatmul.mubr.f32.gmra.mrb[58].mxu0 %v15653_v23 }
 0x247   : > { %10609 = vmatprep.mubr.msk.f32.mxu0 %vm14963_vm0, %v14964_v1 }
 0x24a   : > { %10610 = vmatmul.mubr.f32.gmra.mrb[60].mxu0 %v15659_v24 }
 0x24b   : > { %10612 = vmatprep.mubr.msk.f32.mxu0 %vm14963_vm0, %v14964_v1 }
 0x24e   : > { %10613 = vmatmul.mubr.f32.gmra.mrb[62].mxu0 %v15665_v25 }
 0x24f   : > { %10615 = vmatprep.mubr.msk.f32.mxu0 %vm14963_vm0, %v14964_v1  ;;  %v15685_v1 = vld [vmem:[%s15184_s10 + $0x112] sm:$0xff] }
 0x252   : > { %10616 = vmatmul.mubr.f32.gmra.mrb[64].mxu0 %v15671_v26 }
 0x253   : > { %10618 = vmatprep.mubr.msk.f32.mxu0 %vm14963_vm0, %v15674_v27 }
 0x256   : > { %10619 = vmatmul.mubr.f32.gmra.mrb[66].mxu0 %v15679_v28 }
 0x257   : > { %10621 = vmatprep.mubr.msk.f32.mxu0 %vm14963_vm0, %v15674_v27 }
 0x25a   : > { %10622 = vmatmul.mubr.f32.gmra.mrb[68].mxu0 %v15685_v1 }
 0x25b   : > { %10624 = vmatprep.mubr.msk.f32.mxu0 %vm14963_vm0, %v15674_v27 }
 0x25e   : > { %10625 = vmatmul.mubr.f32.gmra.mrb[70].mxu0 %v15691_v29 }
 0x25f   : > { %10627 = vmatprep.mubr.msk.f32.mxu0 %vm14963_vm0, %v15674_v27 }
 0x262   : > { %10628 = vmatmul.mubr.f32.gmra.mrb[72].mxu0 %v15697_v30 }
 0x263   : > { %10630 = vmatprep.mubr.msk.f32.mxu0 %vm14963_vm0, %v15674_v27 }
 0x266   : > { %10631 = vmatmul.mubr.f32.gmra.mrb[74].mxu0 %v15703_v31 }
 0x267   : > { %10633 = vmatprep.mubr.msk.f32.mxu0 %vm14963_vm0, %v15674_v27 }
 0x26a   : > { %10634 = vmatmul.mubr.f32.gmra.mrb[76].mxu0 %v15709_v32 }
 0x26b   : > { %10636 = vmatprep.mubr.msk.f32.mxu0 %vm14963_vm0, %v15674_v27 }
 0x26e   : > { %10637 = vmatmul.mubr.f32.gmra.mrb[78].mxu0 %v15715_v33 }
 0x26f   : > { %10639 = vmatprep.mubr.msk.f32.mxu0 %vm14963_vm0, %v15674_v27 }
 0x272   : > { %10640 = vmatmul.mubr.f32.gmra.mrb[80].mxu0 %v15721_v34 }
 0x273   : > { %10674 = vmatprep.mubr.msk.f32.mxu0 %vm14963_vm0, %v15674_v27 }
 0x276   : > { %10675 = vmatmul.mubr.f32.vlgmr.msra.gmra.mrb[0].mxu0 %v15484_v42  ;;  %v2124_v42 = vld [vmem:[#allocation7 + $0x238] sm:$0xff] }
 0x277   : > { %13065 = vmatpush3.bf16.msra.mxu0 %v13064_v37  ;;  %10677 = vmatprep.mubr.msk.f32.mxu0 %vm14963_vm0, %v15674_v27  ;;  %v13073_v47 = vpack.c.bf16 %v2124_v42, %v2123_v45  ;;  %v2089_v37 = vld [vmem:[%s15184_s10 + $0x83] sm:$0xff]  ;;  %v2096_v45 = vld [vmem:[%s15184_s10 + $0xbb] sm:$0xff] }
 0x278   : > { %13066 = vmatprep.subr.bf16.mxu0 %v14962_v0  ;;  %v2097_v42 = vld [vmem:[%s15184_s10 + $0xc3] sm:$0xff] }
 0x27a   : > { %10678 = vmatmul.mubr.f32.gmra.mrb[2].mxu0 %v15491_v46  ;;  %v2126_v46 = vld [vmem:[#allocation7 + $0x248] sm:$0xff] }
 0x27b   : > { %10680 = vmatprep.mubr.msk.f32.mxu0 %vm14963_vm0, %v15674_v27  ;;  %13068 = vmatpush3.bf16.msra.mxu0 %v13067_v40  ;;  %v13076_v49 = vpack.c.bf16 %v2126_v46, %v2125_v48  ;;  %v2092_v40 = vld [vmem:[%s15184_s10 + $0x9b] sm:$0xff]  ;;  %v2099_v48 = vld [vmem:[%s15184_s10 + $0xd3] sm:$0xff] }
 0x27c   : > { %13069 = vmatprep.subr.bf16.mxu0 %v14962_v0  ;;  %v2100_v46 = vld [vmem:[%s15184_s10 + $0xdb] sm:$0xff] }
 0x27e   : > { %10681 = vmatmul.mubr.f32.gmra.mrb[4].mxu0 %v15498_v50  ;;  %v2128_v50 = vld [vmem:[#allocation7 + $0x258] sm:$0xff] }
 0x27f   : > { %10683 = vmatprep.mubr.msk.f32.mxu0 %vm14963_vm0, %v15674_v27  ;;  %13071 = vmatpush3.bf16.msra.mxu0 %v13070_v44  ;;  %v13079_v52 = vpack.c.bf16 %v2128_v50, %v2127_v51  ;;  %v2095_v44 = vld [vmem:[%s15184_s10 + $0xb3] sm:$0xff]  ;;  %v2102_v51 = vld [vmem:[%s15184_s10 + $0xeb] sm:$0xff] }
 0x280   : > { %13072 = vmatprep.subr.bf16.mxu0 %v14962_v0  ;;  %v2103_v50 = vld [vmem:[%s15184_s10 + $0xf3] sm:$0xff] }
 0x282   : > { %10684 = vmatmul.mubr.f32.gmra.mrb[6].mxu0 %v15505_v54  ;;  %v2130_v54 = vld [vmem:[#allocation7 + $0x268] sm:$0xff] }
 0x283   : > { %10686 = vmatprep.mubr.msk.f32.mxu0 %vm14963_vm0, %v15674_v27  ;;  %13074 = vmatpush3.bf16.msra.mxu0 %v13073_v47  ;;  %v13082_v55 = vpack.c.bf16 %v2130_v54, %v2129_v53  ;;  %v2098_v47 = vld [vmem:[%s15184_s10 + $0xcb] sm:$0xff]  ;;  %v2105_v53 = vld [vmem:[%s15184_s10 + $0x103] sm:$0xff] }
 0x284   : > { %13075 = vmatprep.subr.bf16.mxu0 %v14962_v0  ;;  %v2106_v54 = vld [vmem:[%s15184_s10 + $0x10b] sm:$0xff] }
 0x286   : > { %10687 = vmatmul.mubr.f32.gmra.mrb[8].mxu0 %v15512_v58  ;;  %v13085_v58 = vpack.c.bf16 %v2132_v57, %v2131_v56  ;;  %v2108_v56 = vld [vmem:[%s15184_s10 + $0x11b] sm:$0xff]  ;;  %v2109_v57 = vld [vmem:[%s15184_s10 + $0x123] sm:$0xff] }
 0x287   : > { %10689 = vmatprep.mubr.msk.f32.mxu0 %vm14963_vm0, %v15674_v27  ;;  %13077 = vmatpush3.bf16.msra.mxu0 %v13076_v49  ;;  %v2101_v49 = vld [vmem:[%s15184_s10 + $0xe3] sm:$0xff] }
 0x288   : > { %13078 = vmatprep.subr.bf16.mxu0 %v14962_v0 }
 0x28a   : > { %10690 = vmatmul.mubr.f32.gmra.mrb[10].mxu0 %v15519_v62  ;;  %v2569_v62 = vld [vmem:[#allocation7 + $0x288] sm:$0xff] }
 0x28b   : > { %10692 = vmatprep.mubr.msk.f32.mxu0 %vm14963_vm0, %v15674_v27  ;;  %13080 = vmatpush3.bf16.msra.mxu0 %v13079_v52  ;;  %v2104_v52 = vld [vmem:[%s15184_s10 + $0xfb] sm:$0xff] }
 0x28c   : > { %13081 = vmatprep.subr.bf16.mxu0 %v14962_v0 }
 0x28e   : > { %10693 = vmatmul.mubr.f32.gmra.mrb[12].mxu0 %v15526_v2  ;;  %v13088_v2 = vpack.c.bf16 %v2569_v62, %v2568_v61  ;;  %v2113_v61 = vld [vmem:[%s15184_s10 + $0x143] sm:$0xff]  ;;  %v2114_v62 = vld [vmem:[%s15184_s10 + $0x14b] sm:$0xff] }
 0x28f   : > { %10695 = vmatprep.mubr.msk.f32.mxu0 %vm14963_vm0, %v15674_v27  ;;  %13083 = vmatpush3.bf16.msra.mxu0 %v13082_v55  ;;  %v2107_v55 = vld [vmem:[%s15184_s10 + $0x113] sm:$0xff] }
 0x290   : > { %13084 = vmatprep.subr.bf16.mxu0 %v14962_v0 }
 0x292   : > { %10696 = vmatmul.mubr.f32.gmra.mrb[14].mxu0 %v15533_v3  ;;  %v2570_v3 = vld [vmem:[#allocation7 + $0x290] sm:$0xff] }
 0x293   : > { %10698 = vmatprep.mubr.msk.f32.mxu0 %vm14963_vm0, %v15674_v27  ;;  %13086 = vmatpush3.bf16.msra.mxu0 %v13085_v58  ;;  %v2110_v58 = vld [vmem:[%s15184_s10 + $0x12b] sm:$0xff] }
 0x294   : > { %13087 = vmatprep.subr.bf16.mxu0 %v14962_v0 }
 0x296   : > { %10699 = vmatmul.mubr.f32.gmra.mrb[16].mxu0 %v15539_v4  ;;  %v2571_v4 = vld [vmem:[#allocation7 + $0x298] sm:$0xff] }
 0x297   : > { %10701 = vmatprep.mubr.msk.f32.mxu0 %vm14963_vm0, %v15674_v27 }
 0x29a   : > { %10702 = vmatmul.mubr.f32.gmra.mrb[18].mxu0 %v15545_v5  ;;  %v2076_v5 = vld [vmem:[%s15184_s10 + $0x1b] sm:$0xff] }
 0x29b   : > { %10704 = vmatprep.mubr.msk.f32.mxu0 %vm14963_vm0, %v15674_v27 }
 0x29e   : > { %10705 = vmatmul.mubr.f32.gmra.mrb[20].mxu0 %v15551_v6  ;;  %v13091_v6 = vpack.c.bf16 %v2571_v4, %v2570_v3  ;;  %v3020_v3 = vld [vmem:[#allocation7 + $0x308] sm:$0xff] }
 0x29f   : > { %10707 = vmatprep.mubr.msk.f32.mxu0 %vm14963_vm0, %v15674_v27  ;;  %v2526_v4 = vld [vmem:[%s15184_s10 + $0x14] sm:$0xff] }
 0x2a2   : > { %10708 = vmatmul.mubr.f32.gmra.mrb[22].mxu0 %v15557_v7  ;;  %v2572_v7 = vld [vmem:[#allocation7 + $0x2a0] sm:$0xff] }
 0x2a3   : > { %10710 = vmatprep.mubr.msk.f32.mxu0 %vm14963_vm0, %v15674_v27 }
 0x2a6   : > { %10711 = vmatmul.mubr.f32.gmra.mrb[24].mxu0 %v15563_v8  ;;  %v2573_v8 = vld [vmem:[#allocation7 + $0x2a8] sm:$0xff] }
 0x2a7   : > { %10713 = vmatprep.mubr.msk.f32.mxu0 %vm14963_vm0, %v15674_v27 }
 0x2aa   : > { %10714 = vmatmul.mubr.f32.gmra.mrb[26].mxu0 %v15569_v9  ;;  %v2077_v9 = vld [vmem:[%s15184_s10 + $0x23] sm:$0xff] }
 0x2ab   : > { %10716 = vmatprep.mubr.msk.f32.mxu0 %vm14963_vm0, %v15674_v27 }
 0x2ae   : > { %10717 = vmatmul.mubr.f32.gmra.mrb[28].mxu0 %v15575_v10  ;;  %v13094_v10 = vpack.c.bf16 %v2573_v8, %v2572_v7  ;;  %v3022_v7 = vld [vmem:[#allocation7 + $0x318] sm:$0xff] }
 0x2af   : > { %10719 = vmatprep.mubr.msk.f32.mxu0 %vm14963_vm0, %v15674_v27  ;;  %v2527_v8 = vld [vmem:[%s15184_s10 + $0x1c] sm:$0xff] }
 0x2b2   : > { %10720 = vmatmul.mubr.f32.gmra.mrb[30].mxu0 %v15581_v11  ;;  %v2574_v11 = vld [vmem:[#allocation7 + $0x2b0] sm:$0xff] }
 0x2b3   : > { %10722 = vmatprep.mubr.msk.f32.mxu0 %vm14963_vm0, %v15674_v27 }
 0x2b6   : > { %10723 = vmatmul.mubr.f32.gmra.mrb[32].mxu0 %v15587_v12  ;;  %v2575_v12 = vld [vmem:[#allocation7 + $0x2b8] sm:$0xff] }
 0x2b7   : > { %10725 = vmatprep.mubr.msk.f32.mxu0 %vm14963_vm0, %v15674_v27 }
 0x2ba   : > { %10726 = vmatmul.mubr.f32.gmra.mrb[34].mxu0 %v15593_v13  ;;  %v2078_v13 = vld [vmem:[%s15184_s10 + $0x2b] sm:$0xff] }
 0x2bb   : > { %10728 = vmatprep.mubr.msk.f32.mxu0 %vm14963_vm0, %v15674_v27 }
 0x2be   : > { %10729 = vmatmul.mubr.f32.gmra.mrb[36].mxu0 %v15599_v14  ;;  %v13097_v14 = vpack.c.bf16 %v2575_v12, %v2574_v11  ;;  %v3024_v11 = vld [vmem:[#allocation7 + $0x328] sm:$0xff] }
 0x2bf   : > { %10731 = vmatprep.mubr.msk.f32.mxu0 %vm14963_vm0, %v15674_v27  ;;  %v15996_v12 = vld [vmem:[%s15184_s10 + $0x24] sm:$0xff] }
 0x2c2   : > { %10732 = vmatmul.mubr.f32.gmra.mrb[38].mxu0 %v15605_v15  ;;  %v2576_v15 = vld [vmem:[#allocation7 + $0x2c0] sm:$0xff] }
 0x2c3   : > { %10734 = vmatprep.mubr.msk.f32.mxu0 %vm14963_vm0, %v15674_v27 }
 0x2c6   : > { %10735 = vmatmul.mubr.f32.gmra.mrb[40].mxu0 %v15611_v16  ;;  %v2577_v16 = vld [vmem:[#allocation7 + $0x2c8] sm:$0xff] }
 0x2c7   : > { %10737 = vmatprep.mubr.msk.f32.mxu0 %vm14963_vm0, %v15674_v27 }
 0x2ca   : > { %10738 = vmatmul.mubr.f32.gmra.mrb[42].mxu0 %v15617_v17  ;;  %v2079_v17 = vld [vmem:[%s15184_s10 + $0x33] sm:$0xff] }
 0x2cb   : > { %10740 = vmatprep.mubr.msk.f32.mxu0 %vm14963_vm0, %v15674_v27 }
 0x2ce   : > { %10741 = vmatmul.mubr.f32.gmra.mrb[44].mxu0 %v15623_v18  ;;  %v13100_v18 = vpack.c.bf16 %v2577_v16, %v2576_v15  ;;  %v3026_v15 = vld [vmem:[#allocation7 + $0x338] sm:$0xff] }
 0x2cf   : > { %10743 = vmatprep.mubr.msk.f32.mxu0 %vm14963_vm0, %v15674_v27  ;;  %v16003_v16 = vld [vmem:[%s15184_s10 + $0x2c] sm:$0xff] }
 0x2d2   : > { %10744 = vmatmul.mubr.f32.gmra.mrb[46].mxu0 %v15629_v19  ;;  %v2578_v19 = vld [vmem:[#allocation7 + $0x2d0] sm:$0xff] }
 0x2d3   : > { %10746 = vmatprep.mubr.msk.f32.mxu0 %vm14963_vm0, %v15674_v27 }
 0x2d6   : > { %10747 = vmatmul.mubr.f32.gmra.mrb[48].mxu0 %v15635_v20  ;;  %v2579_v20 = vld [vmem:[#allocation7 + $0x2d8] sm:$0xff] }
 0x2d7   : > { %10749 = vmatprep.mubr.msk.f32.mxu0 %vm14963_vm0, %v15674_v27 }
 0x2da   : > { %10750 = vmatmul.mubr.f32.gmra.mrb[50].mxu0 %v15641_v21  ;;  %v2080_v21 = vld [vmem:[%s15184_s10 + $0x3b] sm:$0xff] }
 0x2db   : > { %10752 = vmatprep.mubr.msk.f32.mxu0 %vm14963_vm0, %v15674_v27 }
 0x2de   : > { %10753 = vmatmul.mubr.f32.gmra.mrb[52].mxu0 %v15647_v22  ;;  %v13103_v22 = vpack.c.bf16 %v2579_v20, %v2578_v19  ;;  %v3028_v19 = vld [vmem:[#allocation7 + $0x348] sm:$0xff] }
 0x2df   : > { %10755 = vmatprep.mubr.msk.f32.mxu0 %vm14963_vm0, %v15674_v27  ;;  %v16010_v20 = vld [vmem:[%s15184_s10 + $0x34] sm:$0xff] }
 0x2e2   : > { %10756 = vmatmul.mubr.f32.gmra.mrb[54].mxu0 %v15653_v23  ;;  %v2580_v23 = vld [vmem:[#allocation7 + $0x2e0] sm:$0xff] }
 0x2e3   : > { %10758 = vmatprep.mubr.msk.f32.mxu0 %vm14963_vm0, %v15674_v27 }
 0x2e6   : > { %10759 = vmatmul.mubr.f32.gmra.mrb[56].mxu0 %v15659_v24  ;;  %v2581_v24 = vld [vmem:[#allocation7 + $0x2e8] sm:$0xff] }
 0x2e7   : > { %10761 = vmatprep.mubr.msk.f32.mxu0 %vm14963_vm0, %v15674_v27 }
 0x2ea   : > { %10762 = vmatmul.mubr.f32.gmra.mrb[58].mxu0 %v15665_v25  ;;  %v2081_v25 = vld [vmem:[%s15184_s10 + $0x43] sm:$0xff] }
 0x2eb   : > { %10764 = vmatprep.mubr.msk.f32.mxu0 %vm14963_vm0, %v15674_v27 }
 0x2ee   : > { %10765 = vmatmul.mubr.f32.gmra.mrb[60].mxu0 %v15671_v26  ;;  %v13106_v26 = vpack.c.bf16 %v2581_v24, %v2580_v23  ;;  %v3030_v23 = vld [vmem:[#allocation7 + $0x358] sm:$0xff] }
 0x2ef   : > { %10767 = vmatprep.mubr.msk.f32.mxu0 %vm14963_vm0, %v15674_v27  ;;  %v16017_v24 = vld [vmem:[%s15184_s10 + $0x3c] sm:$0xff] }
 0x2f2   : > { %10768 = vmatmul.mubr.f32.gmra.mrb[62].mxu0 %v15679_v28  ;;  %v2582_v28 = vld [vmem:[#allocation7 + $0x2f0] sm:$0xff] }
 0x2f3   : > { %10770 = vmatprep.mubr.msk.f32.mxu0 %vm14963_vm0, %v15674_v27 }
 0x2f6   : > { %10771 = vmatmul.mubr.f32.gmra.mrb[64].mxu0 %v15685_v1  ;;  %v2583_v1 = vld [vmem:[#allocation7 + $0x2f8] sm:$0xff] }
 0x2f7   : > { %10773 = vmatprep.mubr.msk.f32.mxu0 %vm14963_vm0, %v15674_v27 }
 0x2fa   : > { %10774 = vmatmul.mubr.f32.gmra.mrb[66].mxu0 %v15691_v29  ;;  %v2082_v29 = vld [vmem:[%s15184_s10 + $0x4b] sm:$0xff] }
 0x2fb   : > { %10776 = vmatprep.mubr.msk.f32.mxu0 %vm14963_vm0, %v15674_v27 }
 0x2fe   : > { %10777 = vmatmul.mubr.f32.gmra.mrb[68].mxu0 %v15697_v30  ;;  %v13109_v30 = vpack.c.bf16 %v2583_v1, %v2582_v28  ;;  %v3032_v28 = vld [vmem:[#allocation7 + $0x368] sm:$0xff] }
 0x2ff   : > { %10779 = vmatprep.mubr.msk.f32.mxu0 %vm14963_vm0, %v15674_v27  ;;  %v16024_v1 = vld [vmem:[%s15184_s10 + $0x44] sm:$0xff] }
 0x302   : > { %10780 = vmatmul.mubr.f32.gmra.mrb[70].mxu0 %v15703_v31  ;;  %v2083_v31 = vld [vmem:[%s15184_s10 + $0x53] sm:$0xff] }
 0x303   : > { %10782 = vmatprep.mubr.msk.f32.mxu0 %vm14963_vm0, %v15674_v27 }
 0x306   : > { %10783 = vmatmul.mubr.f32.gmra.mrb[72].mxu0 %v15709_v32  ;;  %v2084_v32 = vld [vmem:[%s15184_s10 + $0x5b] sm:$0xff] }
 0x307   : > { %10785 = vmatprep.mubr.msk.f32.mxu0 %vm14963_vm0, %v15674_v27 }
 0x30a   : > { %10786 = vmatmul.mubr.f32.gmra.mrb[74].mxu0 %v15715_v33  ;;  %v2085_v33 = vld [vmem:[%s15184_s10 + $0x63] sm:$0xff] }
 0x30b   : > { %10788 = vmatprep.mubr.msk.f32.mxu0 %vm14963_vm0, %v15674_v27 }
 0x30e   : > { %10789 = vmatmul.mubr.f32.gmra.mrb[76].mxu0 %v15721_v34  ;;  %v2086_v34 = vld [vmem:[%s15184_s10 + $0x6b] sm:$0xff] }
 0x30f   : > { %10791 = vmatprep.mubr.msk.f32.mxu0 %vm14963_vm0, %v15674_v27 }
 0x312   : > { %10792 = vmatmul.mubr.f32.gmra.mrb[78].mxu0 %v1663_v59  ;;  %v2111_v59 = vld [vmem:[%s15184_s10 + $0x133] sm:$0xff] }
 0x313   : > { %10794 = vmatprep.mubr.msk.f32.mxu0 %vm14963_vm0, %v15674_v27 }
 0x316   : > { %10795 = vmatmul.mubr.f32.gmra.mrb[80].mxu0 %v1664_v60  ;;  %v2112_v60 = vld [vmem:[%s15184_s10 + $0x13b] sm:$0xff] }
 0x317   : > { %10829 = vmatprep.mubr.msk.f32.mxu0 %vm14963_vm0, %v15674_v27 }
 0x31a   : > { %10830 = vmatmul.mubr.f32.vlgmr.msra.gmra.mrb[0].mxu0 %v2075_v63  ;;  %v2115_v63 = vld [vmem:[%s15184_s10 + $0x153] sm:$0xff] }
 0x31b   : > { %13089 = vmatpush3.bf16.msra.mxu0 %v13088_v2  ;;  %10832 = vmatprep.mubr.msk.f32.mxu0 %vm14963_vm0, %v15674_v27  ;;  %v3019_v2 = vld [vmem:[#allocation7 + $0x300] sm:$0xff] }
 0x31c   : > { %13090 = vmatprep.subr.bf16.mxu0 %v14962_v0 }
 0x31e   : > { %10833 = vmatmul.mubr.f32.gmra.mrb[2].mxu0 %v2076_v5  ;;  %v13112_v5 = vpack.c.bf16 %v3020_v3, %v3019_v2  ;;  %v16219_v2 = vld [vmem:[%s15184_s10 + $0x144] sm:$0xff]  ;;  %v16225_v3 = vld [vmem:[%s15184_s10 + $0x14c] sm:$0xff] }
 0x31f   : > { %10835 = vmatprep.mubr.msk.f32.mxu0 %vm14963_vm0, %v15674_v27  ;;  %13092 = vmatpush3.bf16.msra.mxu0 %v13091_v6  ;;  %v3021_v6 = vld [vmem:[#allocation7 + $0x310] sm:$0xff] }
 0x320   : > { %13093 = vmatprep.subr.bf16.mxu0 %v14962_v0 }
 0x322   : > { %10836 = vmatmul.mubr.f32.gmra.mrb[4].mxu0 %v2077_v9  ;;  %v13115_v9 = vpack.c.bf16 %v3022_v7, %v3021_v6  ;;  %v3471_v6 = vld [vmem:[#allocation7 + $0x388] sm:$0xff] }
 0x323   : > { %10838 = vmatprep.mubr.msk.f32.mxu0 %vm14963_vm0, %v15674_v27  ;;  %13095 = vmatpush3.bf16.msra.mxu0 %v13094_v10  ;;  %v3023_v10 = vld [vmem:[#allocation7 + $0x320] sm:$0xff] }
 0x324   : > { %13096 = vmatprep.subr.bf16.mxu0 %v14962_v0 }
 0x326   : > { %10839 = vmatmul.mubr.f32.gmra.mrb[6].mxu0 %v2078_v13  ;;  %v13118_v13 = vpack.c.bf16 %v3024_v11, %v3023_v10  ;;  %v3474_v11 = vld [vmem:[#allocation7 + $0x3a0] sm:$0xff] }
 0x327   : > { %10841 = vmatprep.mubr.msk.f32.mxu0 %vm14963_vm0, %v15674_v27  ;;  %13098 = vmatpush3.bf16.msra.mxu0 %v13097_v14  ;;  %v3025_v14 = vld [vmem:[#allocation7 + $0x330] sm:$0xff] }
 0x328   : > { %13099 = vmatprep.subr.bf16.mxu0 %v14962_v0 }
 0x32a   : > { %10842 = vmatmul.mubr.f32.gmra.mrb[8].mxu0 %v2079_v17  ;;  %v13121_v17 = vpack.c.bf16 %v3026_v15, %v3025_v14  ;;  %v3476_v15 = vld [vmem:[#allocation7 + $0x3b0] sm:$0xff] }
 0x32b   : > { %10844 = vmatprep.mubr.msk.f32.mxu0 %vm14963_vm0, %v15674_v27  ;;  %13101 = vmatpush3.bf16.msra.mxu0 %v13100_v18  ;;  %v3027_v18 = vld [vmem:[#allocation7 + $0x340] sm:$0xff] }
 0x32c   : > { %13102 = vmatprep.subr.bf16.mxu0 %v14962_v0 }
 0x32e   : > { %10845 = vmatmul.mubr.f32.gmra.mrb[10].mxu0 %v2080_v21  ;;  %v13124_v21 = vpack.c.bf16 %v3028_v19, %v3027_v18  ;;  %v3478_v18 = vld [vmem:[#allocation7 + $0x3c0] sm:$0xff] }
 0x32f   : > { %10847 = vmatprep.mubr.msk.f32.mxu0 %vm14963_vm0, %v15674_v27  ;;  %13104 = vmatpush3.bf16.msra.mxu0 %v13103_v22  ;;  %v3029_v22 = vld [vmem:[#allocation7 + $0x350] sm:$0xff] }
 0x330   : > { %13105 = vmatprep.subr.bf16.mxu0 %v14962_v0 }
 0x332   : > { %10848 = vmatmul.mubr.f32.gmra.mrb[12].mxu0 %v2081_v25  ;;  %v13127_v25 = vpack.c.bf16 %v3030_v23, %v3029_v22  ;;  %v3482_v23 = vld [vmem:[#allocation7 + $0x3e0] sm:$0xff] }
 0x333   : > { %10850 = vmatprep.mubr.msk.f32.mxu0 %vm14963_vm0, %v15674_v27  ;;  %13107 = vmatpush3.bf16.msra.mxu0 %v13106_v26  ;;  %v3031_v26 = vld [vmem:[#allocation7 + $0x360] sm:$0xff] }
 0x334   : > { %13108 = vmatprep.subr.bf16.mxu0 %v14962_v0 }
 0x336   : > { %10851 = vmatmul.mubr.f32.gmra.mrb[14].mxu0 %v2082_v29  ;;  %v13130_v29 = vpack.c.bf16 %v3032_v28, %v3031_v26  ;;  %v3484_v28 = vld [vmem:[#allocation7 + $0x3f0] sm:$0xff] }
 0x337   : > { %10853 = vmatprep.mubr.msk.f32.mxu0 %vm14963_vm0, %v15674_v27  ;;  %13110 = vmatpush3.bf16.msra.mxu0 %v13109_v30  ;;  %v3033_v30 = vld [vmem:[#allocation7 + $0x370] sm:$0xff] }
 0x338   : > { %13111 = vmatprep.subr.bf16.mxu0 %v14962_v0 }
 0x33a   : > { %10854 = vmatmul.mubr.f32.gmra.mrb[16].mxu0 %v2083_v31  ;;  %v3034_v31 = vld [vmem:[#allocation7 + $0x378] sm:$0xff] }
 0x33b   : > { %10856 = vmatprep.mubr.msk.f32.mxu0 %vm14963_vm0, %v15674_v27 }
 0x33e   : > { %10857 = vmatmul.mubr.f32.gmra.mrb[18].mxu0 %v2084_v32  ;;  %v16031_v32 = vld [vmem:[%s15184_s10 + $0x4c] sm:$0xff] }
 0x33f   : > { %10859 = vmatprep.mubr.msk.f32.mxu0 %vm14963_vm0, %v15674_v27 }
 0x342   : > { %10860 = vmatmul.mubr.f32.gmra.mrb[20].mxu0 %v2085_v33  ;;  %v13133_v33 = vpack.c.bf16 %v3034_v31, %v3033_v30  ;;  %v3017_v30 = vld [vmem:[%s15184_s10 + $0x164] sm:$0xff] }
 0x343   : > { %10862 = vmatprep.mubr.msk.f32.mxu0 %vm14963_vm0, %v15674_v27  ;;  %v3921_v31 = vld [vmem:[#allocation7 + $0x400] sm:$0xff] }
 0x346   : > { %10863 = vmatmul.mubr.f32.gmra.mrb[22].mxu0 %v2086_v34  ;;  %v16038_v34 = vld [vmem:[%s15184_s10 + $0x54] sm:$0xff] }
 0x347   : > { %10865 = vmatprep.mubr.msk.f32.mxu0 %vm14963_vm0, %v15674_v27 }
 0x34a   : > { %10866 = vmatmul.mubr.f32.gmra.mrb[24].mxu0 %v2087_v35  ;;  %v16045_v35 = vld [vmem:[%s15184_s10 + $0x5c] sm:$0xff] }
 0x34b   : > { %10868 = vmatprep.mubr.msk.f32.mxu0 %vm14963_vm0, %v15674_v27 }
 0x34e   : > { %10869 = vmatmul.mubr.f32.gmra.mrb[26].mxu0 %v2088_v36  ;;  %v16051_v36 = vld [vmem:[%s15184_s10 + $0x64] sm:$0xff] }
 0x34f   : > { %10871 = vmatprep.mubr.msk.f32.mxu0 %vm14963_vm0, %v15674_v27 }
 0x352   : > { %10872 = vmatmul.mubr.f32.gmra.mrb[28].mxu0 %v2089_v37  ;;  %v16057_v37 = vld [vmem:[%s15184_s10 + $0x6c] sm:$0xff] }
 0x353   : > { %10874 = vmatprep.mubr.msk.f32.mxu0 %vm14963_vm0, %v15674_v27 }
 0x356   : > { %10875 = vmatmul.mubr.f32.gmra.mrb[30].mxu0 %v2090_v38  ;;  %v16063_v38 = vld [vmem:[%s15184_s10 + $0x74] sm:$0xff] }
 0x357   : > { %10877 = vmatprep.mubr.msk.f32.mxu0 %vm14963_vm0, %v15674_v27 }
 0x35a   : > { %10878 = vmatmul.mubr.f32.gmra.mrb[32].mxu0 %v2091_v39  ;;  %v16069_v39 = vld [vmem:[%s15184_s10 + $0x7c] sm:$0xff] }
 0x35b   : > { %10880 = vmatprep.mubr.msk.f32.mxu0 %vm14963_vm0, %v15674_v27 }
 0x35e   : > { %10881 = vmatmul.mubr.f32.gmra.mrb[34].mxu0 %v2092_v40  ;;  %v16075_v40 = vld [vmem:[%s15184_s10 + $0x84] sm:$0xff] }
 0x35f   : > { %10883 = vmatprep.mubr.msk.f32.mxu0 %vm14963_vm0, %v15674_v27 }
 0x362   : > { %10884 = vmatmul.mubr.f32.gmra.mrb[36].mxu0 %v2093_v41  ;;  %v16081_v41 = vld [vmem:[%s15184_s10 + $0x8c] sm:$0xff] }
 0x363   : > { %10886 = vmatprep.mubr.msk.f32.mxu0 %vm14963_vm0, %v15674_v27 }
 0x366   : > { %10887 = vmatmul.mubr.f32.gmra.mrb[38].mxu0 %v2094_v43  ;;  %v16087_v43 = vld [vmem:[%s15184_s10 + $0x94] sm:$0xff] }
 0x367   : > { %10889 = vmatprep.mubr.msk.f32.mxu0 %vm14963_vm0, %v15674_v27 }
 0x36a   : > { %10890 = vmatmul.mubr.f32.gmra.mrb[40].mxu0 %v2095_v44  ;;  %v16093_v44 = vld [vmem:[%s15184_s10 + $0x9c] sm:$0xff] }
 0x36b   : > { %10892 = vmatprep.mubr.msk.f32.mxu0 %vm14963_vm0, %v15674_v27 }
 0x36e   : > { %10893 = vmatmul.mubr.f32.gmra.mrb[42].mxu0 %v2096_v45  ;;  %v16099_v45 = vld [vmem:[%s15184_s10 + $0xa4] sm:$0xff] }
 0x36f   : > { %10895 = vmatprep.mubr.msk.f32.mxu0 %vm14963_vm0, %v15674_v27 }
 0x372   : > { %10896 = vmatmul.mubr.f32.gmra.mrb[44].mxu0 %v2097_v42  ;;  %v16105_v42 = vld [vmem:[%s15184_s10 + $0xac] sm:$0xff] }
 0x373   : > { %10898 = vmatprep.mubr.msk.f32.mxu0 %vm14963_vm0, %v15674_v27 }
 0x376   : > { %10899 = vmatmul.mubr.f32.gmra.mrb[46].mxu0 %v2098_v47  ;;  %v16111_v47 = vld [vmem:[%s15184_s10 + $0xb4] sm:$0xff] }
 0x377   : > { %10901 = vmatprep.mubr.msk.f32.mxu0 %vm14963_vm0, %v15674_v27 }
 0x37a   : > { %10902 = vmatmul.mubr.f32.gmra.mrb[48].mxu0 %v2099_v48  ;;  %v16117_v48 = vld [vmem:[%s15184_s10 + $0xbc] sm:$0xff] }
 0x37b   : > { %10904 = vmatprep.mubr.msk.f32.mxu0 %vm14963_vm0, %v15674_v27 }
 0x37e   : > { %10905 = vmatmul.mubr.f32.gmra.mrb[50].mxu0 %v2100_v46  ;;  %v16123_v46 = vld [vmem:[%s15184_s10 + $0xc4] sm:$0xff] }
 0x37f   : > { %10907 = vmatprep.mubr.msk.f32.mxu0 %vm14963_vm0, %v15674_v27 }
 0x382   : > { %10908 = vmatmul.mubr.f32.gmra.mrb[52].mxu0 %v2101_v49  ;;  %v16129_v49 = vld [vmem:[%s15184_s10 + $0xcc] sm:$0xff] }
 0x383   : > { %10910 = vmatprep.mubr.msk.f32.mxu0 %vm14963_vm0, %v15674_v27 }
 0x386   : > { %10911 = vmatmul.mubr.f32.gmra.mrb[54].mxu0 %v2102_v51  ;;  %v16135_v51 = vld [vmem:[%s15184_s10 + $0xd4] sm:$0xff] }
 0x387   : > { %10913 = vmatprep.mubr.msk.f32.mxu0 %vm14963_vm0, %v15674_v27 }
 0x38a   : > { %10914 = vmatmul.mubr.f32.gmra.mrb[56].mxu0 %v2103_v50  ;;  %v16141_v50 = vld [vmem:[%s15184_s10 + $0xdc] sm:$0xff] }
 0x38b   : > { %10916 = vmatprep.mubr.msk.f32.mxu0 %vm14963_vm0, %v15674_v27 }
 0x38e   : > { %10917 = vmatmul.mubr.f32.gmra.mrb[58].mxu0 %v2104_v52  ;;  %v16147_v52 = vld [vmem:[%s15184_s10 + $0xe4] sm:$0xff] }
 0x38f   : > { %10919 = vmatprep.mubr.msk.f32.mxu0 %vm14963_vm0, %v15674_v27 }
 0x392   : > { %10920 = vmatmul.mubr.f32.gmra.mrb[60].mxu0 %v2105_v53  ;;  %v16153_v53 = vld [vmem:[%s15184_s10 + $0xec] sm:$0xff] }
 0x393   : > { %10922 = vmatprep.mubr.msk.f32.mxu0 %vm14963_vm0, %v15674_v27 }
 0x396   : > { %10923 = vmatmul.mubr.f32.gmra.mrb[62].mxu0 %v2106_v54  ;;  %v16159_v54 = vld [vmem:[%s15184_s10 + $0xf4] sm:$0xff] }
 0x397   : > { %10925 = vmatprep.mubr.msk.f32.mxu0 %vm14963_vm0, %v15674_v27 }
 0x39a   : > { %10926 = vmatmul.mubr.f32.gmra.mrb[64].mxu0 %v2107_v55  ;;  %v16165_v55 = vld [vmem:[%s15184_s10 + $0xfc] sm:$0xff] }
 0x39b   : > { %10928 = vmatprep.mubr.msk.f32.mxu0 %vm14963_vm0, %v15674_v27 }
 0x39e   : > { %10929 = vmatmul.mubr.f32.gmra.mrb[66].mxu0 %v2108_v56  ;;  %v16171_v56 = vld [vmem:[%s15184_s10 + $0x104] sm:$0xff] }
 0x39f   : > { %10931 = vmatprep.mubr.msk.f32.mxu0 %vm14963_vm0, %v15674_v27 }
 0x3a2   : > { %10932 = vmatmul.mubr.f32.gmra.mrb[68].mxu0 %v2109_v57  ;;  %v16177_v57 = vld [vmem:[%s15184_s10 + $0x10c] sm:$0xff] }
 0x3a3   : > { %10934 = vmatprep.mubr.msk.f32.mxu0 %vm14963_vm0, %v15674_v27 }
 0x3a6   : > { %10935 = vmatmul.mubr.f32.gmra.mrb[70].mxu0 %v2110_v58  ;;  %v16183_v58 = vld [vmem:[%s15184_s10 + $0x114] sm:$0xff] }
 0x3a7   : > { %10937 = vmatprep.mubr.msk.f32.mxu0 %vm14963_vm0, %v15674_v27 }
 0x3aa   : > { %10938 = vmatmul.mubr.f32.gmra.mrb[72].mxu0 %v2111_v59  ;;  %v16189_v59 = vld [vmem:[%s15184_s10 + $0x11c] sm:$0xff] }
 0x3ab   : > { %10940 = vmatprep.mubr.msk.f32.mxu0 %vm14963_vm0, %v15674_v27 }
 0x3ae   : > { %10941 = vmatmul.mubr.f32.gmra.mrb[74].mxu0 %v2112_v60  ;;  %v16195_v60 = vld [vmem:[%s15184_s10 + $0x124] sm:$0xff] }
 0x3af   : > { %10943 = vmatprep.mubr.msk.f32.mxu0 %vm14963_vm0, %v15674_v27 }
 0x3b2   : > { %10944 = vmatmul.mubr.f32.gmra.mrb[76].mxu0 %v2113_v61  ;;  %v16201_v61 = vld [vmem:[%s15184_s10 + $0x12c] sm:$0xff] }
 0x3b3   : > { %10946 = vmatprep.mubr.msk.f32.mxu0 %vm14963_vm0, %v15674_v27 }
 0x3b6   : > { %10947 = vmatmul.mubr.f32.gmra.mrb[78].mxu0 %v2114_v62  ;;  %v16207_v62 = vld [vmem:[%s15184_s10 + $0x134] sm:$0xff] }
 0x3b7   : > { %10949 = vmatprep.mubr.msk.f32.mxu0 %vm14963_vm0, %v15674_v27 }
 0x3ba   : > { %10950 = vmatmul.mubr.f32.gmra.mrb[80].mxu0 %v2115_v63  ;;  %v16213_v63 = vld [vmem:[%s15184_s10 + $0x13c] sm:$0xff] }
 0x3bb   : > { %10984 = vmatprep.mubr.msk.f32.mxu0 %vm14963_vm0, %v15674_v27 }
 0x3be   : > { %10985 = vmatmul.mubr.f32.vlgmr.msra.gmra.mrb[0].mxu0 %v2526_v4  ;;  %v16231_v4 = vld [vmem:[%s15184_s10 + $0x154] sm:$0xff] }
 0x3bf   : > { %13113 = vmatpush3.bf16.msra.mxu0 %v13112_v5  ;;  %10987 = vmatprep.mubr.msk.f32.mxu0 %vm14963_vm0, %v15674_v27  ;;  %v3470_v5 = vld [vmem:[#allocation7 + $0x380] sm:$0xff] }
 0x3c0   : > { %13114 = vmatprep.subr.bf16.mxu0 %v14962_v0  ;;  %v13136_v7 = vpack.c.bf16 %v3471_v6, %v3470_v5  ;;  %v3440_v5 = vld [vmem:[%s15184_s10 + $0x85] sm:$0xff]  ;;  %v14965_v6 = vmov 0  }
 0x3c1   : > { %14791 = vset.pattern.permute.xlu0 %v14965_v6  ;;  %14792 = vset.pattern.permute.xlu1 %v14965_v6  ;;  %v3462_v6 = vld [vmem:[%s15184_s10 + $0x135] sm:$0xff] }
 0x3c2   : > { %10988 = vmatmul.mubr.f32.gmra.mrb[2].mxu0 %v2527_v8  ;;  %v3472_v8 = vld [vmem:[#allocation7 + $0x390] sm:$0xff] }
 0x3c3   : > { %10990 = vmatprep.mubr.msk.f32.mxu0 %vm14963_vm0, %v15674_v27  ;;  %13116 = vmatpush3.bf16.msra.mxu0 %v13115_v9  ;;  %v3473_v9 = vld [vmem:[#allocation7 + $0x398] sm:$0xff] }
 0x3c4   : > { %13117 = vmatprep.subr.bf16.mxu0 %v14962_v0  ;;  %v13139_v10 = vpack.c.bf16 %v3473_v9, %v3472_v8  ;;  %v3441_v8 = vld [vmem:[%s15184_s10 + $0x8d] sm:$0xff] }
 0x3c5   : > { %v273_v9 = vld [vmem:[%s18171_s0 + $0x8] sm:$0xff] }
 0x3c6   : > { %10991 = vmatmul.mubr.f32.gmra.mrb[4].mxu0 %v15996_v12 }
 0x3c7   : > { %10993 = vmatprep.mubr.msk.f32.mxu0 %vm14963_vm0, %v15674_v27  ;;  %13119 = vmatpush3.bf16.msra.mxu0 %v13118_v13  ;;  %v3475_v13 = vld [vmem:[#allocation7 + $0x3a8] sm:$0xff] }
 0x3c8   : > { %13120 = vmatprep.subr.bf16.mxu0 %v14962_v0  ;;  %v13142_v14 = vpack.c.bf16 %v3475_v13, %v3474_v11  ;;  %v276_v11 = vld [vmem:[%s18171_s0 + $0x20] sm:$0xff] }
 0x3c9   : > { %v3443_v13 = vld [vmem:[%s15184_s10 + $0x9d] sm:$0xff] }
 0x3ca   : > { %10994 = vmatmul.mubr.f32.gmra.mrb[6].mxu0 %v16003_v16 }
 0x3cb   : > { %10996 = vmatprep.mubr.msk.f32.mxu0 %vm14963_vm0, %v15674_v27  ;;  %13122 = vmatpush3.bf16.msra.mxu0 %v13121_v17 }
 0x3cc   : > { %13123 = vmatprep.subr.bf16.mxu0 %v14962_v0 }
 0x3ce   : > { %10997 = vmatmul.mubr.f32.gmra.mrb[8].mxu0 %v16010_v20 }
 0x3cf   : > { %10999 = vmatprep.mubr.msk.f32.mxu0 %vm14963_vm0, %v15674_v27  ;;  %13125 = vmatpush3.bf16.msra.mxu0 %v13124_v21  ;;  %v3480_v21 = vld [vmem:[#allocation7 + $0x3d0] sm:$0xff] }
 0x3d0   : > { %13126 = vmatprep.subr.bf16.mxu0 %v14962_v0 }
 0x3d2   : > { %11000 = vmatmul.mubr.f32.gmra.mrb[10].mxu0 %v16017_v24 }
 0x3d3   : > { %11002 = vmatprep.mubr.msk.f32.mxu0 %vm14963_vm0, %v15674_v27  ;;  %13128 = vmatpush3.bf16.msra.mxu0 %v13127_v25  ;;  %v16257_v25 = vld [vmem:[#allocation2] sm:$0xff] }
 0x3d4   : > { %13129 = vmatprep.subr.bf16.mxu0 %v14962_v0 }
 0x3d6   : > { %11003 = vmatmul.mubr.f32.gmra.mrb[12].mxu0 %v16024_v1 }
 0x3d7   : > { %11005 = vmatprep.mubr.msk.f32.mxu0 %vm14963_vm0, %v15674_v27  ;;  %13131 = vmatpush3.bf16.msra.mxu0 %v13130_v29  ;;  %v3016_v29 = vld [vmem:[%s15184_s10 + $0x15c] sm:$0xff] }
 0x3d8   : > { %13132 = vmatprep.subr.bf16.mxu0 %v14962_v0 }
 0x3da   : > { %11006 = vmatmul.mubr.f32.gmra.mrb[14].mxu0 %v16031_v32 }
 0x3db   : > { %11008 = vmatprep.mubr.msk.f32.mxu0 %vm14963_vm0, %v15674_v27  ;;  %13134 = vmatpush3.bf16.msra.mxu0 %v13133_v33  ;;  %v3428_v33 = vld [vmem:[%s15184_s10 + $0x25] sm:$0xff] }
 0x3dc   : > { %13135 = vmatprep.subr.bf16.mxu0 %v14962_v0 }
 0x3de   : > { %11009 = vmatmul.mubr.f32.gmra.mrb[16].mxu0 %v16038_v34 }
 0x3df   : > { %11011 = vmatprep.mubr.msk.f32.mxu0 %vm14963_vm0, %v15674_v27 }
 0x3e2   : > { %11012 = vmatmul.mubr.f32.gmra.mrb[18].mxu0 %v16045_v35 }
 0x3e3   : > { %11014 = vmatprep.mubr.msk.f32.mxu0 %vm14963_vm0, %v15674_v27 }
 0x3e6   : > { %11015 = vmatmul.mubr.f32.gmra.mrb[20].mxu0 %v16051_v36 }
 0x3e7   : > { %11017 = vmatprep.mubr.msk.f32.mxu0 %vm14963_vm0, %v15674_v27 }
 0x3ea   : > { %11018 = vmatmul.mubr.f32.gmra.mrb[22].mxu0 %v16057_v37 }
 0x3eb   : > { %11020 = vmatprep.mubr.msk.f32.mxu0 %vm14963_vm0, %v15674_v27 }
 0x3ee   : > { %11021 = vmatmul.mubr.f32.gmra.mrb[24].mxu0 %v16063_v38 }
 0x3ef   : > { %11023 = vmatprep.mubr.msk.f32.mxu0 %vm14963_vm0, %v15674_v27 }
 0x3f2   : > { %11024 = vmatmul.mubr.f32.gmra.mrb[26].mxu0 %v16069_v39 }
 0x3f3   : > { %11026 = vmatprep.mubr.msk.f32.mxu0 %vm14963_vm0, %v15674_v27 }
 0x3f6   : > { %11027 = vmatmul.mubr.f32.gmra.mrb[28].mxu0 %v16075_v40 }
 0x3f7   : > { %11029 = vmatprep.mubr.msk.f32.mxu0 %vm14963_vm0, %v15674_v27 }
 0x3fa   : > { %11030 = vmatmul.mubr.f32.gmra.mrb[30].mxu0 %v16081_v41 }
 0x3fb   : > { %11032 = vmatprep.mubr.msk.f32.mxu0 %vm14963_vm0, %v15674_v27 }
 0x3fe   : > { %11033 = vmatmul.mubr.f32.gmra.mrb[32].mxu0 %v16087_v43 }
 0x3ff   : > { %11035 = vmatprep.mubr.msk.f32.mxu0 %vm14963_vm0, %v15674_v27 }
 0x402   : > { %11036 = vmatmul.mubr.f32.gmra.mrb[34].mxu0 %v16093_v44 }
 0x403   : > { %11038 = vmatprep.mubr.msk.f32.mxu0 %vm14963_vm0, %v15674_v27 }
 0x406   : > { %11039 = vmatmul.mubr.f32.gmra.mrb[36].mxu0 %v16099_v45 }
 0x407   : > { %11041 = vmatprep.mubr.msk.f32.mxu0 %vm14963_vm0, %v15674_v27 }
 0x40a   : > { %11042 = vmatmul.mubr.f32.gmra.mrb[38].mxu0 %v16105_v42 }
 0x40b   : > { %11044 = vmatprep.mubr.msk.f32.mxu0 %vm14963_vm0, %v15674_v27 }
 0x40e   : > { %11045 = vmatmul.mubr.f32.gmra.mrb[40].mxu0 %v16111_v47 }
 0x40f   : > { %11047 = vmatprep.mubr.msk.f32.mxu0 %vm14963_vm0, %v15674_v27 }
 0x412   : > { %11048 = vmatmul.mubr.f32.gmra.mrb[42].mxu0 %v16117_v48 }
 0x413   : > { %11050 = vmatprep.mubr.msk.f32.mxu0 %vm14963_vm0, %v15674_v27 }
 0x416   : > { %11051 = vmatmul.mubr.f32.gmra.mrb[44].mxu0 %v16123_v46 }
 0x417   : > { %11053 = vmatprep.mubr.msk.f32.mxu0 %vm14963_vm0, %v15674_v27 }
 0x41a   : > { %11054 = vmatmul.mubr.f32.gmra.mrb[46].mxu0 %v16129_v49 }
 0x41b   : > { %11056 = vmatprep.mubr.msk.f32.mxu0 %vm14963_vm0, %v15674_v27 }
 0x41e   : > { %11057 = vmatmul.mubr.f32.gmra.mrb[48].mxu0 %v16135_v51 }
 0x41f   : > { %11059 = vmatprep.mubr.msk.f32.mxu0 %vm14963_vm0, %v15674_v27 }
 0x422   : > { %11060 = vmatmul.mubr.f32.gmra.mrb[50].mxu0 %v16141_v50 }
 0x423   : > { %11062 = vmatprep.mubr.msk.f32.mxu0 %vm14963_vm0, %v15674_v27 }
 0x426   : > { %11063 = vmatmul.mubr.f32.gmra.mrb[52].mxu0 %v16147_v52 }
 0x427   : > { %11065 = vmatprep.mubr.msk.f32.mxu0 %vm14963_vm0, %v15674_v27 }
 0x42a   : > { %11066 = vmatmul.mubr.f32.gmra.mrb[54].mxu0 %v16153_v53 }
 0x42b   : > { %11068 = vmatprep.mubr.msk.f32.mxu0 %vm14963_vm0, %v15674_v27 }
 0x42e   : > { %11069 = vmatmul.mubr.f32.gmra.mrb[56].mxu0 %v16159_v54 }
 0x42f   : > { %11071 = vmatprep.mubr.msk.f32.mxu0 %vm14963_vm0, %v15674_v27 }
 0x432   : > { %11072 = vmatmul.mubr.f32.gmra.mrb[58].mxu0 %v16165_v55 }
 0x433   : > { %11074 = vmatprep.mubr.msk.f32.mxu0 %vm14963_vm0, %v15674_v27 }
 0x436   : > { %11075 = vmatmul.mubr.f32.gmra.mrb[60].mxu0 %v16171_v56 }
 0x437   : > { %11077 = vmatprep.mubr.msk.f32.mxu0 %vm14963_vm0, %v15674_v27 }
 0x43a   : > { %11078 = vmatmul.mubr.f32.gmra.mrb[62].mxu0 %v16177_v57 }
 0x43b   : > { %11080 = vmatprep.mubr.msk.f32.mxu0 %vm14963_vm0, %v15674_v27 }
 0x43e   : > { %11081 = vmatmul.mubr.f32.gmra.mrb[64].mxu0 %v16183_v58 }
 0x43f   : > { %11083 = vmatprep.mubr.msk.f32.mxu0 %vm14963_vm0, %v15674_v27 }
 0x442   : > { %11084 = vmatmul.mubr.f32.gmra.mrb[66].mxu0 %v16189_v59 }
 0x443   : > { %11086 = vmatprep.mubr.msk.f32.mxu0 %vm14963_vm0, %v15674_v27 }
 0x446   : > { %11087 = vmatmul.mubr.f32.gmra.mrb[68].mxu0 %v16195_v60 }
 0x447   : > { %11089 = vmatprep.mubr.msk.f32.mxu0 %vm14963_vm0, %v15674_v27 }
 0x44a   : > { %11090 = vmatmul.mubr.f32.gmra.mrb[70].mxu0 %v16201_v61 }
 0x44b   : > { %11092 = vmatprep.mubr.msk.f32.mxu0 %vm14963_vm0, %v15674_v27 }
 0x44e   : > { %11093 = vmatmul.mubr.f32.gmra.mrb[72].mxu0 %v16207_v62 }
 0x44f   : > { %11095 = vmatprep.mubr.msk.f32.mxu0 %vm14963_vm0, %v15674_v27 }
 0x452   : > { %11096 = vmatmul.mubr.f32.gmra.mrb[74].mxu0 %v16213_v63 }
 0x453   : > { %11098 = vmatprep.mubr.msk.f32.mxu0 %vm14963_vm0, %v15674_v27 }
 0x456   : > { %11099 = vmatmul.mubr.f32.gmra.mrb[76].mxu0 %v16219_v2 }
 0x457   : > { %11101 = vmatprep.mubr.msk.f32.mxu0 %vm14963_vm0, %v15674_v27 }
 0x45a   : > { %11102 = vmatmul.mubr.f32.gmra.mrb[78].mxu0 %v16225_v3 }
 0x45b   : > { %11104 = vmatprep.mubr.msk.f32.mxu0 %vm14963_vm0, %v15674_v27 }
 0x45e   : > { %11105 = vmatmul.mubr.f32.gmra.mrb[80].mxu0 %v16231_v4 }
 0x45f   : > { %11139 = vmatprep.mubr.msk.f32.mxu0 %vm14963_vm0, %v15674_v27 }
 0x462   : > { %11140 = vmatmul.mubr.f32.vlgmr.msra.gmra.mrb[0].mxu0 %v15996_v12  ;;  %v3477_v12 = vld [vmem:[#allocation7 + $0x3b8] sm:$0xff] }
 0x463   : > { %13137 = vmatpush3.bf16.msra.mxu0 %v13136_v7  ;;  %11142 = vmatprep.mubr.msk.f32.mxu0 %vm14963_vm0, %v15674_v27  ;;  %v13145_v17 = vpack.c.bf16 %v3477_v12, %v3476_v15  ;;  %v272_v7 = vld [vmem:[%s18171_s0] sm:$0xff]  ;;  %v278_v15 = vld [vmem:[%s18171_s0 + $0x30] sm:$0xff] }
 0x464   : > { %13138 = vmatprep.subr.bf16.mxu0 %v14962_v0  ;;  %4465 = vperm.xlu0 %14791, %v272_v7   ;;  %v3444_v12 = vld [vmem:[%s15184_s10 + $0xa5] sm:$0xff] }
 0x465   : > { %v311_v7 = vld [vmem:[%s18171_s0 + $0x138] sm:$0xff] }
 0x466   : > { %11143 = vmatmul.mubr.f32.gmra.mrb[2].mxu0 %v16003_v16  ;;  %v3479_v16 = vld [vmem:[#allocation7 + $0x3c8] sm:$0xff] }
 0x467   : > { %11145 = vmatprep.mubr.msk.f32.mxu0 %vm14963_vm0, %v15674_v27  ;;  %13140 = vmatpush3.bf16.msra.mxu0 %v13139_v10  ;;  %v13148_v19 = vpack.c.bf16 %v3479_v16, %v3478_v18  ;;  %v3442_v10 = vld [vmem:[%s15184_s10 + $0x95] sm:$0xff]  ;;  %v3445_v16 = vld [vmem:[%s15184_s10 + $0xad] sm:$0xff] }
 0x468   : > { %13141 = vmatprep.subr.bf16.mxu0 %v14962_v0  ;;  %4470 = vperm.xlu0 %14791, %v273_v9   ;;  %v280_v18 = vld [vmem:[%s18171_s0 + $0x40] sm:$0xff] }
 0x469   : > { %v3464_v9 = vld [vmem:[%s15184_s10 + $0x145] sm:$0xff] }
 0x46a   : > { %11146 = vmatmul.mubr.f32.gmra.mrb[4].mxu0 %v16010_v20  ;;  %v3481_v20 = vld [vmem:[#allocation7 + $0x3d8] sm:$0xff] }
 0x46b   : > { %11148 = vmatprep.mubr.msk.f32.mxu0 %vm14963_vm0, %v15674_v27  ;;  %13143 = vmatpush3.bf16.msra.mxu0 %v13142_v14  ;;  %v13151_v22 = vpack.c.bf16 %v3481_v20, %v3480_v21  ;;  %v274_v14 = vld [vmem:[%s18171_s0 + $0x10] sm:$0xff] }
 0x46c   : > { %13144 = vmatprep.subr.bf16.mxu0 %v14962_v0  ;;  %4485 = vperm.xlu0 %14791, %v276_v11   ;;  %v282_v21 = vld [vmem:[%s18171_s0 + $0x50] sm:$0xff] }
 0x46d   : > { %4475 = vperm.xlu1 %14792, %v274_v14   ;;  %v3446_v20 = vld [vmem:[%s15184_s10 + $0xb5] sm:$0xff]  ;;  %v3468_v14 = vld [vmem:[%s15184_s10 + $0x165] sm:$0xff] }
 0x46e   : > { %11149 = vmatmul.mubr.f32.gmra.mrb[6].mxu0 %v16017_v24  ;;  %v3483_v24 = vld [vmem:[#allocation7 + $0x3e8] sm:$0xff] }
 0x46f   : > { %11151 = vmatprep.mubr.msk.f32.mxu0 %vm14963_vm0, %v15674_v27  ;;  %13146 = vmatpush3.bf16.msra.mxu0 %v13145_v17  ;;  %v13154_v26 = vpack.c.bf16 %v3483_v24, %v3482_v23  ;;  %v275_v17 = vld [vmem:[%s18171_s0 + $0x18] sm:$0xff]  ;;  %v284_v23 = vld [vmem:[%s18171_s0 + $0x60] sm:$0xff] }
 0x470   : > { %13147 = vmatprep.subr.bf16.mxu0 %v14962_v0  ;;  %4495 = vperm.xlu0 %14791, %v278_v15   ;;  %v3447_v24 = vld [vmem:[%s15184_s10 + $0xbd] sm:$0xff]  ;;  %v3466_v11 = vld [vmem:[%s15184_s10 + $0x155] sm:$0xff]  ;;  %v3879_v15 = vld [vmem:[%s15184_s10 + $0x26] sm:$0xff] }
 0x471   : > { %4480 = vperm.xlu1 %14792, %v275_v17   ;;  %v3881_v17 = vld [vmem:[%s15184_s10 + $0x36] sm:$0xff] }
 0x472   : > { %11152 = vmatmul.mubr.f32.gmra.mrb[8].mxu0 %v16024_v1  ;;  %v3485_v1 = vld [vmem:[#allocation7 + $0x3f8] sm:$0xff] }
 0x473   : > { %11154 = vmatprep.mubr.msk.f32.mxu0 %vm14963_vm0, %v15674_v27  ;;  %13149 = vmatpush3.bf16.msra.mxu0 %v13148_v19  ;;  %v13157_v27 = vpack.c.bf16 %v3485_v1, %v3484_v28  ;;  %v277_v19 = vld [vmem:[%s18171_s0 + $0x28] sm:$0xff]  ;;  %v286_v28 = vld [vmem:[%s18171_s0 + $0x70] sm:$0xff] }
 0x474   : > { %13150 = vmatprep.subr.bf16.mxu0 %v14962_v0  ;;  %4505 = vperm.xlu0 %14791, %v280_v18   ;;  %v3448_v1 = vld [vmem:[%s15184_s10 + $0xc5] sm:$0xff] }
 0x475   : > { %4490 = vperm.xlu1 %14792, %v277_v19   ;;  %v3882_v18 = vld [vmem:[%s15184_s10 + $0x3e] sm:$0xff]  ;;  %v3884_v19 = vld [vmem:[%s15184_s10 + $0x4e] sm:$0xff] }
 0x476   : > { %11155 = vmatmul.mubr.f32.gmra.mrb[10].mxu0 %v16031_v32  ;;  %v3922_v32 = vld [vmem:[#allocation7 + $0x408] sm:$0xff] }
 0x477   : > { %11157 = vmatprep.mubr.msk.f32.mxu0 %vm14963_vm0, %v16257_v25  ;;  %13152 = vmatpush3.bf16.msra.mxu0 %v13151_v22  ;;  %v279_v22 = vld [vmem:[%s18171_s0 + $0x38] sm:$0xff] }
 0x478   : > { %13153 = vmatprep.subr.bf16.mxu0 %v14962_v0  ;;  %4515 = vperm.xlu0 %14791, %v282_v21   ;;  %v3885_v21 = vld [vmem:[%s15184_s10 + $0x56] sm:$0xff] }
 0x479   : > { %4500 = vperm.xlu1 %14792, %v279_v22   ;;  %v3887_v22 = vld [vmem:[%s15184_s10 + $0x66] sm:$0xff] }
 0x47a   : > { %11158 = vmatmul.mubr.f32.gmra.mrb[12].mxu0 %v16038_v34  ;;  %v13160_v34 = vpack.c.bf16 %v3922_v32, %v3921_v31  ;;  %v285_v31 = vld [vmem:[%s18171_s0 + $0x68] sm:$0xff]  ;;  %v290_v32 = vld [vmem:[%s18171_s0 + $0x90] sm:$0xff] }
 0x47b   : > { %11160 = vmatprep.mubr.msk.f32.mxu0 %vm14963_vm0, %v16257_v25  ;;  %13155 = vmatpush3.bf16.msra.mxu0 %v13154_v26  ;;  %v281_v26 = vld [vmem:[%s18171_s0 + $0x48] sm:$0xff] }
 0x47c   : > { %13156 = vmatprep.subr.bf16.mxu0 %v14962_v0  ;;  %4525 = vperm.xlu0 %14791, %v284_v23   ;;  %v4797_v23 = vld [vmem:[#allocation9] sm:$0xff] }
 0x47d   : > { %4510 = vperm.xlu1 %14792, %v281_v26   ;;  %v4799_v26 = vld [vmem:[#allocation9 + $0x10] sm:$0xff] }
 0x47e   : > { %11161 = vmatmul.mubr.f32.gmra.mrb[14].mxu0 %v16045_v35  ;;  %v3923_v35 = vld [vmem:[#allocation7 + $0x410] sm:$0xff] }
 0x47f   : > { %11163 = vmatprep.mubr.msk.f32.mxu0 %vm14963_vm0, %v16257_v25  ;;  %13158 = vmatpush3.bf16.msra.mxu0 %v13157_v27  ;;  %v283_v27 = vld [vmem:[%s18171_s0 + $0x58] sm:$0xff] }
 0x480   : > { %13159 = vmatprep.subr.bf16.mxu0 %v14962_v0  ;;  %4535 = vperm.xlu0 %14791, %v286_v28   ;;  %v3888_v28 = vld [vmem:[%s15184_s10 + $0x6e] sm:$0xff] }
 0x481   : > { %4520 = vperm.xlu1 %14792, %v283_v27   ;;  %v4800_v27 = vld [vmem:[#allocation9 + $0x18] sm:$0xff] }
 0x482   : > { %11164 = vmatmul.mubr.f32.gmra.mrb[16].mxu0 %v16051_v36  ;;  %v3924_v36 = vld [vmem:[#allocation7 + $0x418] sm:$0xff] }
 0x483   : > { %11166 = vmatprep.mubr.msk.f32.mxu0 %vm14963_vm0, %v16257_v25 }
 0x485   : > { %4530 = vperm.xlu1 %14792, %v285_v31   ;;  %v4802_v31 = vld [vmem:[#allocation9 + $0x28] sm:$0xff] }
 0x486   : > { %11167 = vmatmul.mubr.f32.gmra.mrb[18].mxu0 %v16057_v37  ;;  %v3429_v37 = vld [vmem:[%s15184_s10 + $0x2d] sm:$0xff] }
 0x487   : > { %11169 = vmatprep.mubr.msk.f32.mxu0 %vm14963_vm0, %v16257_v25 }
 0x48a   : > { %11170 = vmatmul.mubr.f32.gmra.mrb[20].mxu0 %v16063_v38  ;;  %v13163_v38 = vpack.c.bf16 %v3924_v36, %v3923_v35  ;;  %v292_v35 = vld [vmem:[%s18171_s0 + $0xa0] sm:$0xff] }
 0x48b   : > { %11172 = vmatprep.mubr.msk.f32.mxu0 %vm14963_vm0, %v16257_v25  ;;  %v3451_v36 = vld [vmem:[%s15184_s10 + $0xdd] sm:$0xff] }
 0x48e   : > { %11173 = vmatmul.mubr.f32.gmra.mrb[22].mxu0 %v16069_v39  ;;  %v3925_v39 = vld [vmem:[#allocation7 + $0x420] sm:$0xff] }
 0x48f   : > { %11175 = vmatprep.mubr.msk.f32.mxu0 %vm14963_vm0, %v16257_v25 }
 0x492   : > { %11176 = vmatmul.mubr.f32.gmra.mrb[24].mxu0 %v16075_v40  ;;  %v3926_v40 = vld [vmem:[#allocation7 + $0x428] sm:$0xff] }
 0x493   : > { %11178 = vmatprep.mubr.msk.f32.mxu0 %vm14963_vm0, %v16257_v25 }
 0x496   : > { %11179 = vmatmul.mubr.f32.gmra.mrb[26].mxu0 %v16081_v41  ;;  %v3430_v41 = vld [vmem:[%s15184_s10 + $0x35] sm:$0xff] }
 0x497   : > { %11181 = vmatprep.mubr.msk.f32.mxu0 %vm14963_vm0, %v16257_v25 }
 0x49a   : > { %11182 = vmatmul.mubr.f32.gmra.mrb[28].mxu0 %v16087_v43  ;;  %v13166_v43 = vpack.c.bf16 %v3926_v40, %v3925_v39  ;;  %v3452_v39 = vld [vmem:[%s15184_s10 + $0xe5] sm:$0xff] }
 0x49b   : > { %11184 = vmatprep.mubr.msk.f32.mxu0 %vm14963_vm0, %v16257_v25  ;;  %v291_v40 = vld [vmem:[%s18171_s0 + $0x98] sm:$0xff] }
 0x49e   : > { %11185 = vmatmul.mubr.f32.gmra.mrb[30].mxu0 %v16093_v44  ;;  %v3927_v44 = vld [vmem:[#allocation7 + $0x430] sm:$0xff] }
 0x49f   : > { %11187 = vmatprep.mubr.msk.f32.mxu0 %vm14963_vm0, %v16257_v25 }
 0x4a2   : > { %11188 = vmatmul.mubr.f32.gmra.mrb[32].mxu0 %v16099_v45  ;;  %v3928_v45 = vld [vmem:[#allocation7 + $0x438] sm:$0xff] }
 0x4a3   : > { %11190 = vmatprep.mubr.msk.f32.mxu0 %vm14963_vm0, %v16257_v25 }
 0x4a6   : > { %11191 = vmatmul.mubr.f32.gmra.mrb[34].mxu0 %v16105_v42  ;;  %v3431_v42 = vld [vmem:[%s15184_s10 + $0x3d] sm:$0xff] }
 0x4a7   : > { %11193 = vmatprep.mubr.msk.f32.mxu0 %vm14963_vm0, %v16257_v25 }
 0x4aa   : > { %11194 = vmatmul.mubr.f32.gmra.mrb[36].mxu0 %v16111_v47  ;;  %v13169_v47 = vpack.c.bf16 %v3928_v45, %v3927_v44  ;;  %v293_v44 = vld [vmem:[%s18171_s0 + $0xa8] sm:$0xff]  ;;  %v298_v45 = vld [vmem:[%s18171_s0 + $0xd0] sm:$0xff] }
 0x4ab   : > { %11196 = vmatprep.mubr.msk.f32.mxu0 %vm14963_vm0, %v16257_v25 }
 0x4ae   : > { %11197 = vmatmul.mubr.f32.gmra.mrb[38].mxu0 %v16117_v48  ;;  %v3929_v48 = vld [vmem:[#allocation7 + $0x440] sm:$0xff] }
 0x4af   : > { %11199 = vmatprep.mubr.msk.f32.mxu0 %vm14963_vm0, %v16257_v25 }
 0x4b2   : > { %11200 = vmatmul.mubr.f32.gmra.mrb[40].mxu0 %v16123_v46  ;;  %v3930_v46 = vld [vmem:[#allocation7 + $0x448] sm:$0xff] }
 0x4b3   : > { %11202 = vmatprep.mubr.msk.f32.mxu0 %vm14963_vm0, %v16257_v25 }
 0x4b6   : > { %11203 = vmatmul.mubr.f32.gmra.mrb[42].mxu0 %v16129_v49  ;;  %v3432_v49 = vld [vmem:[%s15184_s10 + $0x45] sm:$0xff] }
 0x4b7   : > { %11205 = vmatprep.mubr.msk.f32.mxu0 %vm14963_vm0, %v16257_v25 }
 0x4ba   : > { %11206 = vmatmul.mubr.f32.gmra.mrb[44].mxu0 %v16135_v51  ;;  %v13172_v51 = vpack.c.bf16 %v3930_v46, %v3929_v48  ;;  %v300_v48 = vld [vmem:[%s18171_s0 + $0xe0] sm:$0xff] }
 0x4bb   : > { %11208 = vmatprep.mubr.msk.f32.mxu0 %vm14963_vm0, %v16257_v25  ;;  %v3455_v46 = vld [vmem:[%s15184_s10 + $0xfd] sm:$0xff] }
 0x4be   : > { %11209 = vmatmul.mubr.f32.gmra.mrb[46].mxu0 %v16141_v50  ;;  %v3931_v50 = vld [vmem:[#allocation7 + $0x450] sm:$0xff] }
 0x4bf   : > { %11211 = vmatprep.mubr.msk.f32.mxu0 %vm14963_vm0, %v16257_v25 }
 0x4c2   : > { %11212 = vmatmul.mubr.f32.gmra.mrb[48].mxu0 %v16147_v52  ;;  %v3932_v52 = vld [vmem:[#allocation7 + $0x458] sm:$0xff] }
 0x4c3   : > { %11214 = vmatprep.mubr.msk.f32.mxu0 %vm14963_vm0, %v16257_v25 }
 0x4c6   : > { %11215 = vmatmul.mubr.f32.gmra.mrb[50].mxu0 %v16153_v53  ;;  %v3433_v53 = vld [vmem:[%s15184_s10 + $0x4d] sm:$0xff] }
 0x4c7   : > { %11217 = vmatprep.mubr.msk.f32.mxu0 %vm14963_vm0, %v16257_v25 }
 0x4ca   : > { %11218 = vmatmul.mubr.f32.gmra.mrb[52].mxu0 %v16159_v54  ;;  %v13175_v54 = vpack.c.bf16 %v3932_v52, %v3931_v50  ;;  %v3456_v50 = vld [vmem:[%s15184_s10 + $0x105] sm:$0xff] }
 0x4cb   : > { %11220 = vmatprep.mubr.msk.f32.mxu0 %vm14963_vm0, %v16257_v25  ;;  %v299_v52 = vld [vmem:[%s18171_s0 + $0xd8] sm:$0xff] }
 0x4ce   : > { %11221 = vmatmul.mubr.f32.gmra.mrb[54].mxu0 %v16165_v55  ;;  %v3933_v55 = vld [vmem:[#allocation7 + $0x460] sm:$0xff] }
 0x4cf   : > { %11223 = vmatprep.mubr.msk.f32.mxu0 %vm14963_vm0, %v16257_v25 }
 0x4d2   : > { %11224 = vmatmul.mubr.f32.gmra.mrb[56].mxu0 %v16171_v56  ;;  %v3934_v56 = vld [vmem:[#allocation7 + $0x468] sm:$0xff] }
 0x4d3   : > { %11226 = vmatprep.mubr.msk.f32.mxu0 %vm14963_vm0, %v16257_v25 }
 0x4d6   : > { %11227 = vmatmul.mubr.f32.gmra.mrb[58].mxu0 %v16177_v57  ;;  %v3434_v57 = vld [vmem:[%s15184_s10 + $0x55] sm:$0xff] }
 0x4d7   : > { %11229 = vmatprep.mubr.msk.f32.mxu0 %vm14963_vm0, %v16257_v25 }
 0x4da   : > { %11230 = vmatmul.mubr.f32.gmra.mrb[60].mxu0 %v16183_v58  ;;  %v13178_v58 = vpack.c.bf16 %v3934_v56, %v3933_v55  ;;  %v301_v55 = vld [vmem:[%s18171_s0 + $0xe8] sm:$0xff]  ;;  %v306_v56 = vld [vmem:[%s18171_s0 + $0x110] sm:$0xff] }
 0x4db   : > { %11232 = vmatprep.mubr.msk.f32.mxu0 %vm14963_vm0, %v16257_v25 }
 0x4de   : > { %11233 = vmatmul.mubr.f32.gmra.mrb[62].mxu0 %v16189_v59  ;;  %v3935_v59 = vld [vmem:[#allocation7 + $0x470] sm:$0xff] }
 0x4df   : > { %11235 = vmatprep.mubr.msk.f32.mxu0 %vm14963_vm0, %v16257_v25 }
 0x4e2   : > { %11236 = vmatmul.mubr.f32.gmra.mrb[64].mxu0 %v16195_v60  ;;  %v3936_v60 = vld [vmem:[#allocation7 + $0x478] sm:$0xff] }
 0x4e3   : > { %11238 = vmatprep.mubr.msk.f32.mxu0 %vm14963_vm0, %v16257_v25 }
 0x4e6   : > { %11239 = vmatmul.mubr.f32.gmra.mrb[66].mxu0 %v16201_v61  ;;  %v3435_v61 = vld [vmem:[%s15184_s10 + $0x5d] sm:$0xff] }
 0x4e7   : > { %11241 = vmatprep.mubr.msk.f32.mxu0 %vm14963_vm0, %v16257_v25 }
 0x4ea   : > { %11242 = vmatmul.mubr.f32.gmra.mrb[68].mxu0 %v16207_v62  ;;  %v13181_v62 = vpack.c.bf16 %v3936_v60, %v3935_v59  ;;  %v308_v59 = vld [vmem:[%s18171_s0 + $0x120] sm:$0xff] }
 0x4eb   : > { %11244 = vmatprep.mubr.msk.f32.mxu0 %vm14963_vm0, %v16257_v25  ;;  %v3459_v60 = vld [vmem:[%s15184_s10 + $0x11d] sm:$0xff] }
 0x4ee   : > { %11245 = vmatmul.mubr.f32.gmra.mrb[70].mxu0 %v16213_v63  ;;  %v3436_v63 = vld [vmem:[%s15184_s10 + $0x65] sm:$0xff] }
 0x4ef   : > { %11247 = vmatprep.mubr.msk.f32.mxu0 %vm14963_vm0, %v16257_v25 }
 0x4f2   : > { %11248 = vmatmul.mubr.f32.gmra.mrb[72].mxu0 %v16219_v2  ;;  %v3437_v2 = vld [vmem:[%s15184_s10 + $0x6d] sm:$0xff] }
 0x4f3   : > { %11250 = vmatprep.mubr.msk.f32.mxu0 %vm14963_vm0, %v16257_v25 }
 0x4f6   : > { %11251 = vmatmul.mubr.f32.gmra.mrb[74].mxu0 %v16225_v3  ;;  %v3438_v3 = vld [vmem:[%s15184_s10 + $0x75] sm:$0xff] }
 0x4f7   : > { %11253 = vmatprep.mubr.msk.f32.mxu0 %vm14963_vm0, %v16257_v25 }
 0x4fa   : > { %11254 = vmatmul.mubr.f32.gmra.mrb[76].mxu0 %v16231_v4  ;;  %v3439_v4 = vld [vmem:[%s15184_s10 + $0x7d] sm:$0xff] }
 0x4fb   : > { %11256 = vmatprep.mubr.msk.f32.mxu0 %vm14963_vm0, %v16257_v25 }
 0x4fe   : > { %11257 = vmatmul.mubr.f32.gmra.mrb[78].mxu0 %v3016_v29  ;;  %v288_v29 = vld [vmem:[%s18171_s0 + $0x80] sm:$0xff] }
 0x4ff   : > { %11259 = vmatprep.mubr.msk.f32.mxu0 %vm14963_vm0, %v16257_v25  ;;  %4545 = vperm.xlu0 %14791, %v288_v29   ;;  %v13187_v29 = vpack.c.bf16 %v4800_v27, %v4799_v26  ;;  %v3919_v26 = vld [vmem:[%s15184_s10 + $0x166] sm:$0xff] }
 0x502   : > { %11260 = vmatmul.mubr.f32.gmra.mrb[80].mxu0 %v3017_v30  ;;  %v3449_v30 = vld [vmem:[%s15184_s10 + $0xcd] sm:$0xff] }
 0x503   : > { %11294 = vmatprep.mubr.msk.f32.mxu0 %vm14963_vm0, %v16257_v25  ;;  %4555 = vperm.xlu0 %14791, %v290_v32   ;;  %v3889_v32 = vld [vmem:[%s15184_s10 + $0x76] sm:$0xff] }
 0x506   : > { %11295 = vmatmul.mubr.f32.vlgmr.msra.gmra.mrb[0].mxu0 %v3428_v33  ;;  %v3450_v33 = vld [vmem:[%s15184_s10 + $0xd5] sm:$0xff] }
 0x507   : > { %13161 = vmatpush3.bf16.msra.mxu0 %v13160_v34  ;;  %11297 = vmatprep.mubr.msk.f32.mxu0 %vm14963_vm0, %v16257_v25  ;;  %v287_v34 = vld [vmem:[%s18171_s0 + $0x78] sm:$0xff] }
 0x508   : > { %13162 = vmatprep.subr.bf16.mxu0 %v14962_v0  ;;  %4540 = vperm.xlu1 %14792, %v287_v34   ;;  %v4803_v34 = vld [vmem:[#allocation9 + $0x30] sm:$0xff] }
 0x509   : > { %4565 = vperm.xlu0 %14791, %v292_v35   ;;  %v4804_v35 = vld [vmem:[#allocation9 + $0x38] sm:$0xff] }
 0x50a   : > { %11298 = vmatmul.mubr.f32.gmra.mrb[2].mxu0 %v3429_v37  ;;  %v289_v37 = vld [vmem:[%s18171_s0 + $0x88] sm:$0xff] }
 0x50b   : > { %11300 = vmatprep.mubr.msk.f32.mxu0 %vm14963_vm0, %v16257_v25  ;;  %13164 = vmatpush3.bf16.msra.mxu0 %v13163_v38  ;;  %v294_v38 = vld [vmem:[%s18171_s0 + $0xb0] sm:$0xff] }
 0x50c   : > { %13165 = vmatprep.subr.bf16.mxu0 %v14962_v0  ;;  %4550 = vperm.xlu1 %14792, %v289_v37   ;;  %v13193_v37 = vpack.c.bf16 %v4804_v35, %v4803_v34 }
 0x50d   : > { %4575 = vperm.xlu0 %14791, %v294_v38   ;;  %v4805_v38 = vld [vmem:[#allocation9 + $0x40] sm:$0xff] }
 0x50e   : > { %11301 = vmatmul.mubr.f32.gmra.mrb[4].mxu0 %v3430_v41  ;;  %v296_v41 = vld [vmem:[%s18171_s0 + $0xc0] sm:$0xff] }
 0x50f   : > { %11303 = vmatprep.mubr.msk.f32.mxu0 %vm14963_vm0, %v16257_v25  ;;  %13167 = vmatpush3.bf16.msra.mxu0 %v13166_v43  ;;  %v3453_v43 = vld [vmem:[%s15184_s10 + $0xed] sm:$0xff] }
 0x510   : > { %13168 = vmatprep.subr.bf16.mxu0 %v14962_v0  ;;  %4560 = vperm.xlu1 %14792, %v291_v40   ;;  %v3891_v40 = vld [vmem:[%s15184_s10 + $0x86] sm:$0xff] }
 0x511   : > { %4585 = vperm.xlu0 %14791, %v296_v41  }
 0x512   : > { %11304 = vmatmul.mubr.f32.gmra.mrb[6].mxu0 %v3431_v42  ;;  %v3454_v42 = vld [vmem:[%s15184_s10 + $0xf5] sm:$0xff] }
 0x513   : > { %11306 = vmatprep.mubr.msk.f32.mxu0 %vm14963_vm0, %v16257_v25  ;;  %13170 = vmatpush3.bf16.msra.mxu0 %v13169_v47  ;;  %v295_v47 = vld [vmem:[%s18171_s0 + $0xb8] sm:$0xff] }
 0x514   : > { %13171 = vmatprep.subr.bf16.mxu0 %v14962_v0  ;;  %4570 = vperm.xlu1 %14792, %v293_v44   ;;  %v4808_v44 = vld [vmem:[#allocation9 + $0x58] sm:$0xff] }
 0x515   : > { %4595 = vperm.xlu0 %14791, %v298_v45   ;;  %v3892_v45 = vld [vmem:[%s15184_s10 + $0x8e] sm:$0xff] }
 0x516   : > { %11307 = vmatmul.mubr.f32.gmra.mrb[8].mxu0 %v3432_v49  ;;  %v297_v49 = vld [vmem:[%s18171_s0 + $0xc8] sm:$0xff] }
 0x517   : > { %11309 = vmatprep.mubr.msk.f32.mxu0 %vm14963_vm0, %v16257_v25  ;;  %13173 = vmatpush3.bf16.msra.mxu0 %v13172_v51  ;;  %v302_v51 = vld [vmem:[%s18171_s0 + $0xf0] sm:$0xff] }
 0x518   : > { %13174 = vmatprep.subr.bf16.mxu0 %v14962_v0  ;;  %4580 = vperm.xlu1 %14792, %v295_v47   ;;  %v3893_v47 = vld [vmem:[%s15184_s10 + $0x96] sm:$0xff] }
 0x519   : > { %4605 = vperm.xlu0 %14791, %v300_v48   ;;  %v3894_v48 = vld [vmem:[%s15184_s10 + $0x9e] sm:$0xff] }
 0x51a   : > { %11310 = vmatmul.mubr.f32.gmra.mrb[10].mxu0 %v3433_v53  ;;  %v304_v53 = vld [vmem:[%s18171_s0 + $0x100] sm:$0xff] }
 0x51b   : > { %11312 = vmatprep.mubr.msk.f32.mxu0 %vm14963_vm0, %v16257_v25  ;;  %13176 = vmatpush3.bf16.msra.mxu0 %v13175_v54  ;;  %v3457_v54 = vld [vmem:[%s15184_s10 + $0x10d] sm:$0xff] }
 0x51c   : > { %13177 = vmatprep.subr.bf16.mxu0 %v14962_v0  ;;  %4590 = vperm.xlu1 %14792, %v297_v49   ;;  %v3896_v49 = vld [vmem:[%s15184_s10 + $0xae] sm:$0xff] }
 0x51d   : > { %4615 = vperm.xlu0 %14791, %v302_v51   ;;  %v3897_v51 = vld [vmem:[%s15184_s10 + $0xb6] sm:$0xff] }
 0x51e   : > { %11313 = vmatmul.mubr.f32.gmra.mrb[12].mxu0 %v3434_v57  ;;  %v3458_v57 = vld [vmem:[%s15184_s10 + $0x115] sm:$0xff] }
 0x51f   : > { %11315 = vmatprep.mubr.msk.f32.mxu0 %vm14963_vm0, %v16257_v25  ;;  %13179 = vmatpush3.bf16.msra.mxu0 %v13178_v58  ;;  %v303_v58 = vld [vmem:[%s18171_s0 + $0xf8] sm:$0xff] }
 0x520   : > { %13180 = vmatprep.subr.bf16.mxu0 %v14962_v0  ;;  %4600 = vperm.xlu1 %14792, %v299_v52   ;;  %v3899_v52 = vld [vmem:[%s15184_s10 + $0xc6] sm:$0xff] }
 0x521   : > { %4625 = vperm.xlu0 %14791, %v304_v53   ;;  %v3900_v53 = vld [vmem:[%s15184_s10 + $0xce] sm:$0xff] }
 0x522   : > { %11316 = vmatmul.mubr.f32.gmra.mrb[14].mxu0 %v3435_v61  ;;  %v305_v61 = vld [vmem:[%s18171_s0 + $0x108] sm:$0xff] }
 0x523   : > { %11318 = vmatprep.mubr.msk.f32.mxu0 %vm14963_vm0, %v16257_v25  ;;  %13182 = vmatpush3.bf16.msra.mxu0 %v13181_v62  ;;  %v310_v62 = vld [vmem:[%s18171_s0 + $0x130] sm:$0xff] }
 0x524   : > { %4610 = vperm.xlu1 %14792, %v301_v55   ;;  %v4810_v55 = vld [vmem:[#allocation9 + $0x68] sm:$0xff] }
 0x525   : > { %4635 = vperm.xlu0 %14791, %v306_v56  }
 0x526   : > { %11319 = vmatmul.mubr.f32.gmra.mrb[16].mxu0 %v3436_v63  ;;  %v3460_v63 = vld [vmem:[%s15184_s10 + $0x125] sm:$0xff] }
 0x527   : > { %11321 = vmatprep.mubr.msk.f32.mxu0 %vm14963_vm0, %v16257_v25 }
 0x528   : > { %4620 = vperm.xlu1 %14792, %v303_v58   ;;  %v4811_v58 = vld [vmem:[#allocation9 + $0x70] sm:$0xff] }
 0x529   : > { %4645 = vperm.xlu0 %14791, %v308_v59   ;;  %v4812_v59 = vld [vmem:[#allocation9 + $0x78] sm:$0xff] }
 0x52a   : > { %11322 = vmatmul.mubr.f32.gmra.mrb[18].mxu0 %v3437_v2  ;;  %v307_v2 = vld [vmem:[%s18171_s0 + $0x118] sm:$0xff] }
 0x52b   : > { %11324 = vmatprep.mubr.msk.f32.mxu0 %vm14963_vm0, %v16257_v25 }
 0x52c   : > { %4630 = vperm.xlu1 %14792, %v305_v61   ;;  %v3902_v61 = vld [vmem:[%s15184_s10 + $0xde] sm:$0xff] }
 0x52d   : > { %4655 = vperm.xlu0 %14791, %v310_v62   ;;  %v3903_v62 = vld [vmem:[%s15184_s10 + $0xe6] sm:$0xff] }
 0x52e   : > { %11325 = vmatmul.mubr.f32.gmra.mrb[20].mxu0 %v3438_v3  ;;  %v312_v3 = vld [vmem:[%s18171_s0 + $0x140] sm:$0xff] }
 0x52f   : > { %11327 = vmatprep.mubr.msk.f32.mxu0 %vm14963_vm0, %v16257_v25 }
 0x530   : > { %4640 = vperm.xlu1 %14792, %v307_v2   ;;  %v5207_v2 = vld [vmem:[#allocation9 + $0x80] sm:$0xff] }
 0x531   : > { %4665 = vperm.xlu0 %14791, %v312_v3   ;;  %v5208_v3 = vld [vmem:[#allocation9 + $0x88] sm:$0xff] }
 0x532   : > { %11328 = vmatmul.mubr.f32.gmra.mrb[22].mxu0 %v3439_v4  ;;  %v3461_v4 = vld [vmem:[%s15184_s10 + $0x12d] sm:$0xff] }
 0x533   : > { %11330 = vmatprep.mubr.msk.f32.mxu0 %vm14963_vm0, %v16257_v25 }
 0x536   : > { %11331 = vmatmul.mubr.f32.gmra.mrb[24].mxu0 %v3440_v5  ;;  %v309_v5 = vld [vmem:[%s18171_s0 + $0x128] sm:$0xff] }
 0x537   : > { %11333 = vmatprep.mubr.msk.f32.mxu0 %vm14963_vm0, %v16257_v25  ;;  %4650 = vperm.xlu1 %14792, %v309_v5   ;;  %v13208_v5 = vpack.c.bf16 %v5208_v3, %v5207_v2 }
 0x53a   : > { %11334 = vmatmul.mubr.f32.gmra.mrb[26].mxu0 %v3441_v8  ;;  %v3463_v8 = vld [vmem:[%s15184_s10 + $0x13d] sm:$0xff] }
 0x53b   : > { %11336 = vmatprep.mubr.msk.f32.mxu0 %vm14963_vm0, %v16257_v25  ;;  %4660 = vperm.xlu1 %14792, %v311_v7   ;;  %v3907_v7 = vld [vmem:[%s15184_s10 + $0x106] sm:$0xff] }
 0x53e   : > { %11337 = vmatmul.mubr.f32.gmra.mrb[28].mxu0 %v3442_v10  ;;  %v3465_v10 = vld [vmem:[%s15184_s10 + $0x14d] sm:$0xff] }
 0x53f   : > { %11339 = vmatprep.mubr.msk.f32.mxu0 %vm14963_vm0, %v16257_v25 }
 0x542   : > { %11340 = vmatmul.mubr.f32.gmra.mrb[30].mxu0 %v3443_v13  ;;  %v3467_v13 = vld [vmem:[%s15184_s10 + $0x15d] sm:$0xff] }
 0x543   : > { %11342 = vmatprep.mubr.msk.f32.mxu0 %vm14963_vm0, %v16257_v25 }
 0x546   : > { %11343 = vmatmul.mubr.f32.gmra.mrb[32].mxu0 %v3444_v12  ;;  %v3880_v12 = vld [vmem:[%s15184_s10 + $0x2e] sm:$0xff] }
 0x547   : > { %11345 = vmatprep.mubr.msk.f32.mxu0 %vm14963_vm0, %v16257_v25 }
 0x54a   : > { %11346 = vmatmul.mubr.f32.gmra.mrb[34].mxu0 %v3445_v16  ;;  %v3883_v16 = vld [vmem:[%s15184_s10 + $0x46] sm:$0xff] }
 0x54b   : > { %11348 = vmatprep.mubr.msk.f32.mxu0 %vm14963_vm0, %v16257_v25 }
 0x54e   : > { %11349 = vmatmul.mubr.f32.gmra.mrb[36].mxu0 %v3446_v20  ;;  %v3886_v20 = vld [vmem:[%s15184_s10 + $0x5e] sm:$0xff] }
 0x54f   : > { %11351 = vmatprep.mubr.msk.f32.mxu0 %vm14963_vm0, %v16257_v25 }
 0x552   : > { %11352 = vmatmul.mubr.f32.gmra.mrb[38].mxu0 %v3447_v24  ;;  %v4798_v24 = vld [vmem:[#allocation9 + $0x8] sm:$0xff] }
 0x553   : > { %11354 = vmatprep.mubr.msk.f32.mxu0 %vm14963_vm0, %v16257_v25 }
 0x556   : > { %11355 = vmatmul.mubr.f32.gmra.mrb[40].mxu0 %v3448_v1  ;;  %v13184_v1 = vpack.c.bf16 %v4798_v24, %v4797_v23  ;;  %v3917_v23 = vld [vmem:[%s15184_s10 + $0x156] sm:$0xff]  ;;  %v3918_v24 = vld [vmem:[%s15184_s10 + $0x15e] sm:$0xff] }
 0x557   : > { %11357 = vmatprep.mubr.msk.f32.mxu0 %vm14963_vm0, %v16257_v25 }
 0x558   : > { %13185 = vmatpush3.bf16.msra.mxu1 %v13184_v1  ;;  %v5214_v1 = vld [vmem:[#allocation9 + $0xb8] sm:$0xff] }
 0x559   : > { %13186 = vmatprep.subr.bf16.mxu1 %v14962_v0 }
 0x55a   : > { %11358 = vmatmul.mubr.f32.gmra.mrb[42].mxu0 %v3449_v30  ;;  %v4801_v30 = vld [vmem:[#allocation9 + $0x20] sm:$0xff] }
 0x55b   : > { %11360 = vmatprep.mubr.msk.f32.mxu0 %vm14963_vm0, %v16257_v25 }
 0x55c   : > { %13188 = vmatpush3.bf16.msra.mxu1 %v13187_v29  ;;  %v5215_v29 = vld [vmem:[#allocation9 + $0xc0] sm:$0xff] }
 0x55d   : > { %13189 = vmatprep.subr.bf16.mxu1 %v14962_v0 }
 0x55e   : > { %11361 = vmatmul.mubr.f32.gmra.mrb[44].mxu0 %v3450_v33  ;;  %v13190_v33 = vpack.c.bf16 %v4802_v31, %v4801_v30  ;;  %v5216_v30 = vld [vmem:[#allocation9 + $0xc8] sm:$0xff] }
 0x55f   : > { %11363 = vmatprep.mubr.msk.f32.mxu0 %vm14963_vm0, %v16257_v25  ;;  %v13220_v31 = vpack.c.bf16 %v5216_v30, %v5215_v29 }
 0x560   : > { %13191 = vmatpush3.bf16.msra.mxu1 %v13190_v33  ;;  %v5218_v33 = vld [vmem:[#allocation9 + $0xd8] sm:$0xff] }
 0x561   : > { %13192 = vmatprep.subr.bf16.mxu1 %v14962_v0 }
 0x562   : > { %11364 = vmatmul.mubr.f32.gmra.mrb[46].mxu0 %v3451_v36  ;;  %v3890_v36 = vld [vmem:[%s15184_s10 + $0x7e] sm:$0xff] }
 0x563   : > { %11366 = vmatprep.mubr.msk.f32.mxu0 %vm14963_vm0, %v16257_v25 }
 0x564   : > { %13194 = vmatpush3.bf16.msra.mxu1 %v13193_v37 }
 0x565   : > { %13195 = vmatprep.subr.bf16.mxu1 %v14962_v0 }
 0x566   : > { %11367 = vmatmul.mubr.f32.gmra.mrb[48].mxu0 %v3452_v39  ;;  %v4806_v39 = vld [vmem:[#allocation9 + $0x48] sm:$0xff] }
 0x567   : > { %11369 = vmatprep.mubr.msk.f32.mxu0 %vm14963_vm0, %v16257_v25  ;;  %v13196_v41 = vpack.c.bf16 %v4806_v39, %v4805_v38 }
 0x569   : > { %13197 = vmatpush3.bf16.msra.mxu1 %v13196_v41 }
 0x56a   : > { %11370 = vmatmul.mubr.f32.gmra.mrb[50].mxu0 %v3453_v43  ;;  %v4807_v43 = vld [vmem:[#allocation9 + $0x50] sm:$0xff]  ;;  %13198 = vmatprep.subr.bf16.mxu1 %v14962_v0 }
 0x56b   : > { %11372 = vmatprep.mubr.msk.f32.mxu0 %vm14963_vm0, %v16257_v25 }
 0x56e   : > { %11373 = vmatmul.mubr.f32.gmra.mrb[52].mxu0 %v3454_v42  ;;  %v13199_v42 = vpack.c.bf16 %v4808_v44, %v4807_v43 }
 0x56f   : > { %11375 = vmatprep.mubr.msk.f32.mxu0 %vm14963_vm0, %v16257_v25 }
 0x570   : > { %13200 = vmatpush3.bf16.msra.mxu1 %v13199_v42 }
 0x571   : > { %13201 = vmatprep.subr.bf16.mxu1 %v14962_v0 }
 0x572   : > { %11376 = vmatmul.mubr.f32.gmra.mrb[54].mxu0 %v3455_v46  ;;  %v3895_v46 = vld [vmem:[%s15184_s10 + $0xa6] sm:$0xff] }
 0x573   : > { %11378 = vmatprep.mubr.msk.f32.mxu0 %vm14963_vm0, %v16257_v25 }
 0x576   : > { %11379 = vmatmul.mubr.f32.gmra.mrb[56].mxu0 %v3456_v50  ;;  %v3898_v50 = vld [vmem:[%s15184_s10 + $0xbe] sm:$0xff] }
 0x577   : > { %11381 = vmatprep.mubr.msk.f32.mxu0 %vm14963_vm0, %v16257_v25 }
 0x57a   : > { %11382 = vmatmul.mubr.f32.gmra.mrb[58].mxu0 %v3457_v54  ;;  %v4809_v54 = vld [vmem:[#allocation9 + $0x60] sm:$0xff] }
 0x57b   : > { %11384 = vmatprep.mubr.msk.f32.mxu0 %vm14963_vm0, %v16257_v25  ;;  %v13202_v56 = vpack.c.bf16 %v4810_v55, %v4809_v54  ;;  %v4476_v54 = vpop.permute.xlu1 %4475 }
 0x57d   : > { %13203 = vmatpush3.bf16.msra.mxu1 %v13202_v56 }
 0x57e   : > { %11385 = vmatmul.mubr.f32.gmra.mrb[60].mxu0 %v3458_v57  ;;  %v3901_v57 = vld [vmem:[%s15184_s10 + $0xd6] sm:$0xff]  ;;  %13204 = vmatprep.subr.bf16.mxu1 %v14962_v0 }
 0x57f   : > { %11387 = vmatprep.mubr.msk.f32.mxu0 %vm14963_vm0, %v16257_v25 }
 0x582   : > { %11388 = vmatmul.mubr.f32.gmra.mrb[62].mxu0 %v3459_v60  ;;  %v13205_v60 = vpack.c.bf16 %v4812_v59, %v4811_v58  ;;  %v5219_v59 = vld [vmem:[#allocation9 + $0xe0] sm:$0xff] }
 0x583   : > { %11390 = vmatprep.mubr.msk.f32.mxu0 %vm14963_vm0, %v16257_v25 }
 0x584   : > { %13206 = vmatpush3.bf16.msra.mxu1 %v13205_v60  ;;  %v5220_v60 = vld [vmem:[#allocation9 + $0xe8] sm:$0xff] }
 0x585   : > { %13207 = vmatprep.subr.bf16.mxu1 %v14962_v0 }
 0x586   : > { %11391 = vmatmul.mubr.f32.gmra.mrb[64].mxu0 %v3460_v63  ;;  %v3904_v63 = vld [vmem:[%s15184_s10 + $0xee] sm:$0xff] }
 0x587   : > { %11393 = vmatprep.mubr.msk.f32.mxu0 %vm14963_vm0, %v16257_v25  ;;  %11605 = vmatmul.mubr.f32.vlgmr.msra.gmra.mrb[0].mxu1 %v16257_v25 }
 0x588   : > { %11607 = vmatprep.mubr.msk.f32.mxu1 %vm14963_vm0, %v16257_v25  ;;  %13209 = vmatpush3.bf16.msra.mxu1 %v13208_v5 }
 0x589   : > { %13210 = vmatprep.subr.bf16.mxu1 %v14962_v0 }
 0x58a   : > { %11394 = vmatmul.mubr.f32.gmra.mrb[66].mxu0 %v3461_v4  ;;  %v3905_v4 = vld [vmem:[%s15184_s10 + $0xf6] sm:$0xff] }
 0x58b   : > { %11396 = vmatprep.mubr.msk.f32.mxu0 %vm14963_vm0, %v16257_v25  ;;  %11608 = vmatmul.mubr.f32.gmra.mrb[2].mxu1 %v16257_v25 }
 0x58c   : > { %11610 = vmatprep.mubr.msk.f32.mxu1 %vm14963_vm0, %v16257_v25 }
 0x58e   : > { %11397 = vmatmul.mubr.f32.gmra.mrb[68].mxu0 %v3462_v6  ;;  %v3906_v6 = vld [vmem:[%s15184_s10 + $0xfe] sm:$0xff] }
 0x58f   : > { %11399 = vmatprep.mubr.msk.f32.mxu0 %vm14963_vm0, %v16257_v25 }
 0x592   : > { %11400 = vmatmul.mubr.f32.gmra.mrb[70].mxu0 %v3463_v8  ;;  %v3908_v8 = vld [vmem:[%s15184_s10 + $0x10e] sm:$0xff] }
 0x593   : > { %11402 = vmatprep.mubr.msk.f32.mxu0 %vm14963_vm0, %v16257_v25 }
 0x596   : > { %11403 = vmatmul.mubr.f32.gmra.mrb[72].mxu0 %v3464_v9  ;;  %v3909_v9 = vld [vmem:[%s15184_s10 + $0x116] sm:$0xff] }
 0x597   : > { %11405 = vmatprep.mubr.msk.f32.mxu0 %vm14963_vm0, %v16257_v25 }
 0x59a   : > { %11406 = vmatmul.mubr.f32.gmra.mrb[74].mxu0 %v3465_v10  ;;  %v5209_v10 = vld [vmem:[#allocation9 + $0x90] sm:$0xff] }
 0x59b   : > { %11408 = vmatprep.mubr.msk.f32.mxu0 %vm14963_vm0, %v16257_v25 }
 0x59e   : > { %11409 = vmatmul.mubr.f32.gmra.mrb[76].mxu0 %v3466_v11  ;;  %v5210_v11 = vld [vmem:[#allocation9 + $0x98] sm:$0xff] }
 0x59f   : > { %11411 = vmatprep.mubr.msk.f32.mxu0 %vm14963_vm0, %v16257_v25 }
 0x5a2   : > { %11412 = vmatmul.mubr.f32.gmra.mrb[78].mxu0 %v3467_v13  ;;  %v3910_v13 = vld [vmem:[%s15184_s10 + $0x11e] sm:$0xff] }
 0x5a3   : > { %11414 = vmatprep.mubr.msk.f32.mxu0 %vm14963_vm0, %v16257_v25 }
 0x5a6   : > { %11415 = vmatmul.mubr.f32.gmra.mrb[80].mxu0 %v3468_v14  ;;  %v13211_v14 = vpack.c.bf16 %v5210_v11, %v5209_v10 }
 0x5a7   : > { %11449 = vmatprep.mubr.msk.f32.mxu0 %vm14963_vm0, %v16257_v25 }
 0x5a8   : > { %13212 = vmatpush3.bf16.msra.mxu1 %v13211_v14 }
 0x5a9   : > { %13213 = vmatprep.subr.bf16.mxu1 %v14962_v0 }
 0x5aa   : > { %11450 = vmatmul.mubr.f32.vlgmr.msra.gmra.mrb[0].mxu0 %v3879_v15  ;;  %v3911_v15 = vld [vmem:[%s15184_s10 + $0x126] sm:$0xff] }
 0x5ab   : > { %11452 = vmatprep.mubr.msk.f32.mxu0 %vm14963_vm0, %v16257_v25 }
 0x5ae   : > { %11453 = vmatmul.mubr.f32.gmra.mrb[2].mxu0 %v3880_v12  ;;  %v3912_v12 = vld [vmem:[%s15184_s10 + $0x12e] sm:$0xff] }
 0x5af   : > { %11455 = vmatprep.mubr.msk.f32.mxu0 %vm14963_vm0, %v16257_v25 }
 0x5b2   : > { %11456 = vmatmul.mubr.f32.gmra.mrb[4].mxu0 %v3881_v17  ;;  %v3913_v17 = vld [vmem:[%s15184_s10 + $0x136] sm:$0xff] }
 0x5b3   : > { %11458 = vmatprep.mubr.msk.f32.mxu0 %vm14963_vm0, %v16257_v25 }
 0x5b6   : > { %11459 = vmatmul.mubr.f32.gmra.mrb[6].mxu0 %v3882_v18  ;;  %v3914_v18 = vld [vmem:[%s15184_s10 + $0x13e] sm:$0xff] }
 0x5b7   : > { %11461 = vmatprep.mubr.msk.f32.mxu0 %vm14963_vm0, %v16257_v25 }
 0x5ba   : > { %11462 = vmatmul.mubr.f32.gmra.mrb[8].mxu0 %v3883_v16  ;;  %v5211_v16 = vld [vmem:[#allocation9 + $0xa0] sm:$0xff] }
 0x5bb   : > { %11464 = vmatprep.mubr.msk.f32.mxu0 %vm14963_vm0, %v16257_v25 }
 0x5be   : > { %11465 = vmatmul.mubr.f32.gmra.mrb[10].mxu0 %v3884_v19  ;;  %v5212_v19 = vld [vmem:[#allocation9 + $0xa8] sm:$0xff] }
 0x5bf   : > { %11467 = vmatprep.mubr.msk.f32.mxu0 %vm14963_vm0, %v16257_v25 }
 0x5c2   : > { %11468 = vmatmul.mubr.f32.gmra.mrb[12].mxu0 %v3885_v21  ;;  %v3915_v21 = vld [vmem:[%s15184_s10 + $0x146] sm:$0xff] }
 0x5c3   : > { %11470 = vmatprep.mubr.msk.f32.mxu0 %vm14963_vm0, %v16257_v25 }
 0x5c6   : > { %11471 = vmatmul.mubr.f32.gmra.mrb[14].mxu0 %v3886_v20  ;;  %v13214_v20 = vpack.c.bf16 %v5212_v19, %v5211_v16 }
 0x5c7   : > { %11473 = vmatprep.mubr.msk.f32.mxu0 %vm14963_vm0, %v16257_v25 }
 0x5c8   : > { %13215 = vmatpush3.bf16.msra.mxu1 %v13214_v20 }
 0x5c9   : > { %13216 = vmatprep.subr.bf16.mxu1 %v14962_v0 }
 0x5ca   : > { %11474 = vmatmul.mubr.f32.gmra.mrb[16].mxu0 %v3887_v22  ;;  %v3916_v22 = vld [vmem:[%s15184_s10 + $0x14e] sm:$0xff] }
 0x5cb   : > { %11476 = vmatprep.mubr.msk.f32.mxu0 %vm14963_vm0, %v16257_v25 }
 0x5ce   : > { %11477 = vmatmul.mubr.f32.gmra.mrb[18].mxu0 %v3888_v28  ;;  %v5213_v28 = vld [vmem:[#allocation9 + $0xb0] sm:$0xff] }
 0x5cf   : > { %11479 = vmatprep.mubr.msk.f32.mxu0 %vm14963_vm0, %v16257_v25  ;;  %v13217_v27 = vpack.c.bf16 %v5214_v1, %v5213_v28 }
 0x5d1   : > { %13218 = vmatpush3.bf16.msra.mxu1 %v13217_v27 }
 0x5d2   : > { %11480 = vmatmul.mubr.f32.gmra.mrb[20].mxu0 %v3889_v32  ;;  %13219 = vmatprep.subr.bf16.mxu1 %v14962_v0  ;;  %v5217_v32 = vld [vmem:[#allocation9 + $0xd0] sm:$0xff] }
 0x5d3   : > { %11482 = vmatprep.mubr.msk.f32.mxu0 %vm14963_vm0, %v16257_v25  ;;  %v13223_v34 = vpack.c.bf16 %v5218_v33, %v5217_v32 }
 0x5d5   : > { %13221 = vmatpush3.bf16.msra.mxu1 %v13220_v31 }
 0x5d6   : > { %11483 = vmatmul.mubr.f32.gmra.mrb[22].mxu0 %v3890_v36  ;;  %13222 = vmatprep.subr.bf16.mxu1 %v14962_v0  ;;  %v16771_v36 = vld [vmem:[%s18175_s4 + $0x1] ss:$0 sm:$0xff] }
 0x5d7   : > { %11485 = vmatprep.mubr.msk.f32.mxu0 %vm14963_vm0, %v16257_v25 }
 0x5d9   : > { %13224 = vmatpush3.bf16.msra.mxu1 %v13223_v34 }
 0x5da   : > { %11486 = vmatmul.mubr.f32.gmra.mrb[24].mxu0 %v3891_v40  ;;  %13225 = vmatprep.subr.bf16.mxu1 %v14962_v0  ;;  %v4466_v40 = vpop.permute.xlu0 %4465 }
 0x5db   : > { %11488 = vmatprep.mubr.msk.f32.mxu0 %vm14963_vm0, %v16257_v25 }
 0x5de   : > { %11489 = vmatmul.mubr.f32.gmra.mrb[26].mxu0 %v3892_v45 }
 0x5df   : > { %11491 = vmatprep.mubr.msk.f32.mxu0 %vm14963_vm0, %v16257_v25 }
 0x5e2   : > { %11492 = vmatmul.mubr.f32.gmra.mrb[28].mxu0 %v3893_v47 }
 0x5e3   : > { %11494 = vmatprep.mubr.msk.f32.mxu0 %vm14963_vm0, %v16257_v25 }
 0x5e6   : > { %11495 = vmatmul.mubr.f32.gmra.mrb[30].mxu0 %v3894_v48 }
 0x5e7   : > { %11497 = vmatprep.mubr.msk.f32.mxu0 %vm14963_vm0, %v16257_v25 }
 0x5ea   : > { %11498 = vmatmul.mubr.f32.gmra.mrb[32].mxu0 %v3895_v46 }
 0x5eb   : > { %11500 = vmatprep.mubr.msk.f32.mxu0 %vm14963_vm0, %v16257_v25 }
 0x5ee   : > { %11501 = vmatmul.mubr.f32.gmra.mrb[34].mxu0 %v3896_v49 }
 0x5ef   : > { %11503 = vmatprep.mubr.msk.f32.mxu0 %vm14963_vm0, %v16257_v25 }
 0x5f2   : > { %11504 = vmatmul.mubr.f32.gmra.mrb[36].mxu0 %v3897_v51 }
 0x5f3   : > { %11506 = vmatprep.mubr.msk.f32.mxu0 %vm14963_vm0, %v16257_v25 }
 0x5f6   : > { %11507 = vmatmul.mubr.f32.gmra.mrb[38].mxu0 %v3898_v50  ;;  %v4471_v50 = vpop.permute.xlu0 %4470 }
 0x5f7   : > { %11509 = vmatprep.mubr.msk.f32.mxu0 %vm14963_vm0, %v16257_v25 }
 0x5fa   : > { %11510 = vmatmul.mubr.f32.gmra.mrb[40].mxu0 %v3899_v52 }
 0x5fb   : > { %11512 = vmatprep.mubr.msk.f32.mxu0 %vm14963_vm0, %v16257_v25 }
 0x5fe   : > { %11513 = vmatmul.mubr.f32.gmra.mrb[42].mxu0 %v3900_v53 }
 0x5ff   : > { %11515 = vmatprep.mubr.msk.f32.mxu0 %vm14963_vm0, %v16257_v25 }
 0x602   : > { %11516 = vmatmul.mubr.f32.gmra.mrb[44].mxu0 %v3901_v57 }
 0x603   : > { %11518 = vmatprep.mubr.msk.f32.mxu0 %vm14963_vm0, %v16257_v25 }
 0x606   : > { %11519 = vmatmul.mubr.f32.gmra.mrb[46].mxu0 %v3902_v61  ;;  %v13226_v61 = vpack.c.bf16 %v5220_v60, %v5219_v59 }
 0x607   : > { %11521 = vmatprep.mubr.msk.f32.mxu0 %vm14963_vm0, %v16257_v25 }
 0x608   : > { %13227 = vmatpush3.bf16.msra.mxu1 %v13226_v61 }
 0x609   : > { %13228 = vmatprep.subr.bf16.mxu1 %v14962_v0 }
 0x60a   : > { %11522 = vmatmul.mubr.f32.gmra.mrb[48].mxu0 %v3903_v62 }
 0x60b   : > { %11524 = vmatprep.mubr.msk.f32.mxu0 %vm14963_vm0, %v16257_v25 }
 0x60e   : > { %11525 = vmatmul.mubr.f32.gmra.mrb[50].mxu0 %v3904_v63 }
 0x60f   : > { %11527 = vmatprep.mubr.msk.f32.mxu0 %vm14963_vm0, %v16257_v25 }
 0x612   : > { %11528 = vmatmul.mubr.f32.gmra.mrb[52].mxu0 %v3905_v4 }
 0x613   : > { %11530 = vmatprep.mubr.msk.f32.mxu0 %vm14963_vm0, %v16257_v25 }
 0x616   : > { %11531 = vmatmul.mubr.f32.gmra.mrb[54].mxu0 %v3906_v6 }
 0x617   : > { %11533 = vmatprep.mubr.msk.f32.mxu0 %vm14963_vm0, %v16257_v25 }
 0x61a   : > { %11534 = vmatmul.mubr.f32.gmra.mrb[56].mxu0 %v3907_v7  ;;  %v4481_v7 = vpop.permute.xlu1 %4480 }
 0x61b   : > { %11536 = vmatprep.mubr.msk.f32.mxu0 %vm14963_vm0, %v16257_v25 }
 0x61e   : > { %11537 = vmatmul.mubr.f32.gmra.mrb[58].mxu0 %v3908_v8  ;;  %v16783_v8 = vld [vmem:[#allocation2] sm:$0xff] }
 0x61f   : > { %11539 = vmatprep.mubr.msk.f32.mxu0 %vm14963_vm0, %v16257_v25 }
 0x622   : > { %11540 = vmatmul.mubr.f32.gmra.mrb[60].mxu0 %v3909_v9 }
 0x623   : > { %11542 = vmatprep.mubr.msk.f32.mxu0 %vm14963_vm0, %v16257_v25 }
 0x626   : > { %11543 = vmatmul.mubr.f32.gmra.mrb[62].mxu0 %v3910_v13 }
 0x627   : > { %11545 = vmatprep.mubr.msk.f32.mxu0 %vm14963_vm0, %v16257_v25 }
 0x62a   : > { %11546 = vmatmul.mubr.f32.gmra.mrb[64].mxu0 %v3911_v15 }
 0x62b   : > { %11548 = vmatprep.mubr.msk.f32.mxu0 %vm14963_vm0, %v16257_v25 }
 0x62e   : > { %11549 = vmatmul.mubr.f32.gmra.mrb[66].mxu0 %v3912_v12 }
 0x62f   : > { %11551 = vmatprep.mubr.msk.f32.mxu0 %vm14963_vm0, %v16257_v25 }
 0x632   : > { %11552 = vmatmul.mubr.f32.gmra.mrb[68].mxu0 %v3913_v17  ;;  %v4486_v17 = vpop.permute.xlu0 %4485 }
 0x633   : > { %11554 = vmatprep.mubr.msk.f32.mxu0 %vm14963_vm0, %v16257_v25 }
 0x636   : > { %11555 = vmatmul.mubr.f32.gmra.mrb[70].mxu0 %v3914_v18  ;;  %v4496_v32 = vpop.permute.xlu0 %4495 }
 0x637   : > { %11557 = vmatprep.mubr.msk.f32.mxu0 %vm14963_vm0, %v16257_v25 }
 0x63a   : > { %11558 = vmatmul.mubr.f32.gmra.mrb[72].mxu0 %v3915_v21 }
 0x63b   : > { %11560 = vmatprep.mubr.msk.f32.mxu0 %vm14963_vm0, %v16257_v25 }
 0x63e   : > { %11561 = vmatmul.mubr.f32.gmra.mrb[74].mxu0 %v3916_v22 }
 0x63f   : > { %11563 = vmatprep.mubr.msk.f32.mxu0 %vm14963_vm0, %v16257_v25 }
 0x642   : > { %11564 = vmatmul.mubr.f32.gmra.mrb[76].mxu0 %v3917_v23 }
 0x643   : > { %11566 = vmatprep.mubr.msk.f32.mxu0 %vm14963_vm0, %v16257_v25 }
 0x646   : > { %11567 = vmatmul.mubr.f32.gmra.mrb[78].mxu0 %v3918_v24  ;;  %v4491_v24 = vpop.permute.xlu1 %4490 }
 0x647   : > { %11569 = vmatprep.mubr.msk.f32.mxu0 %vm14963_vm0, %v16257_v25  ;;  %v16766_v25 = vld [vmem:[%s18175_s4] ss:$0 sm:$0xff] }
 0x64a   : > { %11570 = vmatmul.mubr.f32.gmra.mrb[80].mxu0 %v3919_v26 }
 0x67d   : > { %v4003_v35 = vpop.f32.mrb[0].mxu0 }
 0x67e   : > { %v4335_v37 = vmul.f32 %v16766_v25, %v4003_v35  ;;  %v11451_v38 = vpop.f32.mrb[1].mxu0 }
 0x680   : > { %v4381_v39 = vadd.f32 %v16771_v36, %v4335_v37 }
 0x681   : > { %v4008_v41 = vpop.f32.mrb[2].mxu0 }
 0x682   : > { %v4422_v43 = vmax.f32 %v4381_v39, 0.0  ;;  %v4336_v44 = vmul.f32 %v16766_v25, %v4008_v41  ;;  %v11454_v45 = vpop.f32.mrb[3].mxu0  ;;  %v5221_v41 = vld [vmem:[#allocation9 + $0xf0] sm:$0xff] }
 0x684   : > { %v4668_v42 = vmul.f32 %v4466_v40, %v4422_v43  ;;  %v4382_v47 = vadd.f32 %v16771_v36, %v4336_v44  ;;  %v5222_v43 = vld [vmem:[#allocation9 + $0xf8] sm:$0xff]  ;;  %v4501_v44 = vpop.permute.xlu1 %4500 }
 0x685   : > { %v4013_v48 = vpop.f32.mrb[4].mxu0  ;;  %v13229_v45 = vpack.c.bf16 %v5222_v43, %v5221_v41 }
 0x686   : > { %4712 = vst [vmem:[#allocation2 + $0x13] sm:$0xff] %v4668_v42  ;;  %v4423_v46 = vmax.f32 %v4382_v47, 0.0  ;;  %v4337_v49 = vmul.f32 %v16766_v25, %v4013_v48  ;;  %v11457_v51 = vpop.f32.mrb[5].mxu0 }
 0x687   : > { %13230 = vmatpush3.bf16.msra.mxu1 %v13229_v45 }
 0x688   : > { %v4669_v52 = vmul.f32 %v4471_v50, %v4423_v46  ;;  %v4383_v53 = vadd.f32 %v16771_v36, %v4337_v49  ;;  %13231 = vmatprep.subr.bf16.mxu1 %v14962_v0  ;;  %v4511_v60 = vpop.permute.xlu1 %4510 }
 0x689   : > { %v4018_v55 = vpop.f32.mrb[6].mxu0 }
 0x68a   : > { %4713 = vst [vmem:[#allocation2 + $0x1b] sm:$0xff] %v4669_v52  ;;  %v4424_v56 = vmax.f32 %v4383_v53, 0.0  ;;  %v4338_v57 = vmul.f32 %v16766_v25, %v4018_v55  ;;  %v11460_v58 = vpop.f32.mrb[7].mxu0  ;;  %v4506_v52 = vpop.permute.xlu0 %4505 }
 0x68c   : > { %v4670_v62 = vmul.f32 %v4476_v54, %v4424_v56  ;;  %v4384_v63 = vadd.f32 %v16771_v36, %v4338_v57 }
 0x68d   : > { %v4023_v2 = vpop.f32.mrb[8].mxu0  ;;  %v4758_v3 = vld [vmem:[#allocation2 + $0x10] sm:$0xff] }
 0x68e   : > { %4714 = vst [vmem:[#allocation2 + $0x23] sm:$0xff] %v4670_v62  ;;  %v4425_v4 = vmax.f32 %v4384_v63, 0.0  ;;  %v4339_v5 = vmul.f32 %v16766_v25, %v4023_v2  ;;  %v11463_v6 = vpop.f32.mrb[9].mxu0  ;;  %11611 = vmatmul.mubr.f32.gmra.mrb[4].mxu1 %v4758_v3 }
 0x68f   : > { %11613 = vmatprep.mubr.msk.f32.mxu1 %vm14963_vm0, %v16783_v8  ;;  %v4516_v6 = vpop.permute.xlu0 %4515 }
 0x690   : > { %v4671_v9 = vmul.f32 %v4481_v7, %v4425_v4  ;;  %v4385_v10 = vadd.f32 %v16771_v36, %v4339_v5 }
 0x691   : > { %v4028_v11 = vpop.f32.mrb[10].mxu0  ;;  %v4759_v13 = vld [vmem:[#allocation2 + $0x18] sm:$0xff] }
 0x692   : > { %4715 = vst [vmem:[#allocation2 + $0x2b] sm:$0xff] %v4671_v9  ;;  %v4426_v14 = vmax.f32 %v4385_v10, 0.0  ;;  %v4340_v15 = vmul.f32 %v16766_v25, %v4028_v11  ;;  %v11466_v12 = vpop.f32.mrb[11].mxu0  ;;  %11614 = vmatmul.mubr.f32.gmra.mrb[6].mxu1 %v4759_v13 }
 0x693   : > { %11616 = vmatprep.mubr.msk.f32.mxu1 %vm14963_vm0, %v16783_v8  ;;  %v4521_v12 = vpop.permute.xlu1 %4520 }
 0x694   : > { %v4672_v18 = vmul.f32 %v4486_v17, %v4426_v14  ;;  %v4386_v16 = vadd.f32 %v16771_v36, %v4340_v15 }
 0x695   : > { %v4033_v19 = vpop.f32.mrb[12].mxu0  ;;  %v4760_v21 = vld [vmem:[#allocation2 + $0x20] sm:$0xff] }
 0x696   : > { %4716 = vst [vmem:[#allocation2 + $0x33] sm:$0xff] %v4672_v18  ;;  %v4427_v20 = vmax.f32 %v4386_v16, 0.0  ;;  %v4341_v22 = vmul.f32 %v16766_v25, %v4033_v19  ;;  %v11469_v23 = vpop.f32.mrb[13].mxu0  ;;  %11617 = vmatmul.mubr.f32.gmra.mrb[8].mxu1 %v4760_v21 }
 0x697   : > { %11619 = vmatprep.mubr.msk.f32.mxu1 %vm14963_vm0, %v16783_v8  ;;  %v4526_v23 = vpop.permute.xlu0 %4525 }
 0x698   : > { %v4673_v26 = vmul.f32 %v4491_v24, %v4427_v20  ;;  %v4387_v28 = vadd.f32 %v16771_v36, %v4341_v22 }
 0x699   : > { %v4038_v1 = vpop.f32.mrb[14].mxu0  ;;  %v4761_v27 = vld [vmem:[#allocation2 + $0x28] sm:$0xff] }
 0x69a   : > { %4717 = vst [vmem:[#allocation2 + $0x3b] sm:$0xff] %v4673_v26  ;;  %v4428_v29 = vmax.f32 %v4387_v28, 0.0  ;;  %v4342_v30 = vmul.f32 %v16766_v25, %v4038_v1  ;;  %v11472_v31 = vpop.f32.mrb[15].mxu0  ;;  %11620 = vmatmul.mubr.f32.gmra.mrb[10].mxu1 %v4761_v27 }
 0x69b   : > { %11622 = vmatprep.mubr.msk.f32.mxu1 %vm14963_vm0, %v16783_v8  ;;  %v4531_v31 = vpop.permute.xlu1 %4530 }
 0x69c   : > { %v4674_v33 = vmul.f32 %v4496_v32, %v4428_v29  ;;  %v4388_v34 = vadd.f32 %v16771_v36, %v4342_v30 }
 0x69d   : > { %v4043_v35 = vpop.f32.mrb[16].mxu0  ;;  %v4762_v37 = vld [vmem:[#allocation2 + $0x30] sm:$0xff] }
 0x69e   : > { %4718 = vst [vmem:[#allocation2 + $0x43] sm:$0xff] %v4674_v33  ;;  %v4429_v38 = vmax.f32 %v4388_v34, 0.0  ;;  %v4343_v39 = vmul.f32 %v16766_v25, %v4043_v35  ;;  %v11475_v40 = vpop.f32.mrb[17].mxu0  ;;  %11623 = vmatmul.mubr.f32.gmra.mrb[12].mxu1 %v4762_v37 }
 0x69f   : > { %11625 = vmatprep.mubr.msk.f32.mxu1 %vm14963_vm0, %v16783_v8  ;;  %v4536_v40 = vpop.permute.xlu0 %4535 }
 0x6a0   : > { %v4675_v42 = vmul.f32 %v4501_v44, %v4429_v38  ;;  %v4389_v47 = vadd.f32 %v16771_v36, %v4343_v39 }
 0x6a1   : > { %v4048_v48 = vpop.f32.mrb[18].mxu0  ;;  %v4763_v46 = vld [vmem:[#allocation2 + $0x38] sm:$0xff] }
 0x6a2   : > { %4719 = vst [vmem:[#allocation2 + $0x4b] sm:$0xff] %v4675_v42  ;;  %v4430_v49 = vmax.f32 %v4389_v47, 0.0  ;;  %v4344_v51 = vmul.f32 %v16766_v25, %v4048_v48  ;;  %v11478_v50 = vpop.f32.mrb[19].mxu0  ;;  %11626 = vmatmul.mubr.f32.gmra.mrb[14].mxu1 %v4763_v46  ;;  %v4541_v46 = vpop.permute.xlu1 %4540 }
 0x6a3   : > { %11628 = vmatprep.mubr.msk.f32.mxu1 %vm14963_vm0, %v16783_v8 }
 0x6a4   : > { %v4676_v53 = vmul.f32 %v4506_v52, %v4430_v49  ;;  %v4390_v54 = vadd.f32 %v16771_v36, %v4344_v51 }
 0x6a5   : > { %v4053_v55 = vpop.f32.mrb[20].mxu0  ;;  %v4764_v56 = vld [vmem:[#allocation2 + $0x40] sm:$0xff] }
 0x6a6   : > { %4720 = vst [vmem:[#allocation2 + $0x53] sm:$0xff] %v4676_v53  ;;  %v4431_v57 = vmax.f32 %v4390_v54, 0.0  ;;  %v4345_v58 = vmul.f32 %v16766_v25, %v4053_v55  ;;  %v11481_v59 = vpop.f32.mrb[21].mxu0  ;;  %11629 = vmatmul.mubr.f32.gmra.mrb[16].mxu1 %v4764_v56  ;;  %v4546_v56 = vpop.permute.xlu0 %4545 }
 0x6a7   : > { %11631 = vmatprep.mubr.msk.f32.mxu1 %vm14963_vm0, %v16783_v8 }
 0x6a8   : > { %v4677_v61 = vmul.f32 %v4511_v60, %v4431_v57  ;;  %v4391_v62 = vadd.f32 %v16771_v36, %v4345_v58 }
 0x6a9   : > { %v4058_v63 = vpop.f32.mrb[22].mxu0  ;;  %v4765_v2 = vld [vmem:[#allocation2 + $0x48] sm:$0xff] }
 0x6aa   : > { %4721 = vst [vmem:[#allocation2 + $0x5b] sm:$0xff] %v4677_v61  ;;  %v4432_v3 = vmax.f32 %v4391_v62, 0.0  ;;  %v4346_v4 = vmul.f32 %v16766_v25, %v4058_v63  ;;  %v11484_v5 = vpop.f32.mrb[23].mxu0  ;;  %11632 = vmatmul.mubr.f32.gmra.mrb[18].mxu1 %v4765_v2  ;;  %v4551_v2 = vpop.permute.xlu1 %4550 }
 0x6ab   : > { %11634 = vmatprep.mubr.msk.f32.mxu1 %vm14963_vm0, %v16783_v8 }
 0x6ac   : > { %v4678_v7 = vmul.f32 %v4516_v6, %v4432_v3  ;;  %v4392_v9 = vadd.f32 %v16771_v36, %v4346_v4 }
 0x6ad   : > { %v4063_v10 = vpop.f32.mrb[24].mxu0  ;;  %v4766_v11 = vld [vmem:[#allocation2 + $0x50] sm:$0xff] }
 0x6ae   : > { %4722 = vst [vmem:[#allocation2 + $0x63] sm:$0xff] %v4678_v7  ;;  %v4433_v13 = vmax.f32 %v4392_v9, 0.0  ;;  %v4347_v14 = vmul.f32 %v16766_v25, %v4063_v10  ;;  %v11487_v15 = vpop.f32.mrb[25].mxu0  ;;  %11635 = vmatmul.mubr.f32.gmra.mrb[20].mxu1 %v4766_v11  ;;  %v4556_v11 = vpop.permute.xlu0 %4555 }
 0x6af   : > { %11637 = vmatprep.mubr.msk.f32.mxu1 %vm14963_vm0, %v16783_v8 }
 0x6b0   : > { %v4679_v17 = vmul.f32 %v4521_v12, %v4433_v13  ;;  %v4393_v18 = vadd.f32 %v16771_v36, %v4347_v14 }
 0x6b1   : > { %v4068_v16 = vpop.f32.mrb[26].mxu0  ;;  %v4767_v19 = vld [vmem:[#allocation2 + $0x58] sm:$0xff] }
 0x6b2   : > { %4723 = vst [vmem:[#allocation2 + $0x6b] sm:$0xff] %v4679_v17  ;;  %v4434_v21 = vmax.f32 %v4393_v18, 0.0  ;;  %v4348_v20 = vmul.f32 %v16766_v25, %v4068_v16  ;;  %v11490_v22 = vpop.f32.mrb[27].mxu0  ;;  %11638 = vmatmul.mubr.f32.gmra.mrb[22].mxu1 %v4767_v19  ;;  %v4561_v19 = vpop.permute.xlu1 %4560 }
 0x6b3   : > { %11640 = vmatprep.mubr.msk.f32.mxu1 %vm14963_vm0, %v16783_v8 }
 0x6b4   : > { %v4680_v24 = vmul.f32 %v4526_v23, %v4434_v21  ;;  %v4394_v26 = vadd.f32 %v16771_v36, %v4348_v20 }
 0x6b5   : > { %v4073_v28 = vpop.f32.mrb[28].mxu0  ;;  %v4768_v1 = vld [vmem:[#allocation2 + $0x60] sm:$0xff] }
 0x6b6   : > { %4724 = vst [vmem:[#allocation2 + $0x73] sm:$0xff] %v4680_v24  ;;  %v4435_v27 = vmax.f32 %v4394_v26, 0.0  ;;  %v4349_v29 = vmul.f32 %v16766_v25, %v4073_v28  ;;  %v11493_v30 = vpop.f32.mrb[29].mxu0  ;;  %11641 = vmatmul.mubr.f32.gmra.mrb[24].mxu1 %v4768_v1  ;;  %v4566_v1 = vpop.permute.xlu0 %4565 }
 0x6b7   : > { %11643 = vmatprep.mubr.msk.f32.mxu1 %vm14963_vm0, %v16783_v8 }
 0x6b8   : > { %v4681_v32 = vmul.f32 %v4531_v31, %v4435_v27  ;;  %v4395_v33 = vadd.f32 %v16771_v36, %v4349_v29 }
 0x6b9   : > { %v4078_v34 = vpop.f32.mrb[30].mxu0  ;;  %v4769_v35 = vld [vmem:[#allocation2 + $0x68] sm:$0xff] }
 0x6ba   : > { %4725 = vst [vmem:[#allocation2 + $0x7b] sm:$0xff] %v4681_v32  ;;  %v4436_v37 = vmax.f32 %v4395_v33, 0.0  ;;  %v4350_v38 = vmul.f32 %v16766_v25, %v4078_v34  ;;  %v11496_v39 = vpop.f32.mrb[31].mxu0  ;;  %11644 = vmatmul.mubr.f32.gmra.mrb[26].mxu1 %v4769_v35  ;;  %v4571_v35 = vpop.permute.xlu1 %4570 }
 0x6bb   : > { %11646 = vmatprep.mubr.msk.f32.mxu1 %vm14963_vm0, %v16783_v8 }
 0x6bc   : > { %v4682_v41 = vmul.f32 %v4536_v40, %v4436_v37  ;;  %v4396_v43 = vadd.f32 %v16771_v36, %v4350_v38 }
 0x6bd   : > { %v4083_v44 = vpop.f32.mrb[32].mxu0  ;;  %v4770_v45 = vld [vmem:[#allocation2 + $0x70] sm:$0xff] }
 0x6be   : > { %4726 = vst [vmem:[#allocation2 + $0x83] sm:$0xff] %v4682_v41  ;;  %v4437_v42 = vmax.f32 %v4396_v43, 0.0  ;;  %v4351_v47 = vmul.f32 %v16766_v25, %v4083_v44  ;;  %v11499_v48 = vpop.f32.mrb[33].mxu0  ;;  %11647 = vmatmul.mubr.f32.gmra.mrb[28].mxu1 %v4770_v45  ;;  %v4576_v45 = vpop.permute.xlu0 %4575 }
 0x6bf   : > { %11649 = vmatprep.mubr.msk.f32.mxu1 %vm14963_vm0, %v16783_v8 }
 0x6c0   : > { %v4683_v49 = vmul.f32 %v4541_v46, %v4437_v42  ;;  %v4397_v51 = vadd.f32 %v16771_v36, %v4351_v47 }
 0x6c1   : > { %v4088_v50 = vpop.f32.mrb[34].mxu0  ;;  %v4771_v52 = vld [vmem:[#allocation2 + $0x78] sm:$0xff] }
 0x6c2   : > { %4727 = vst [vmem:[#allocation2 + $0x8b] sm:$0xff] %v4683_v49  ;;  %v4438_v53 = vmax.f32 %v4397_v51, 0.0  ;;  %v4352_v54 = vmul.f32 %v16766_v25, %v4088_v50  ;;  %v11502_v55 = vpop.f32.mrb[35].mxu0  ;;  %11650 = vmatmul.mubr.f32.gmra.mrb[30].mxu1 %v4771_v52  ;;  %v4581_v52 = vpop.permute.xlu1 %4580 }
 0x6c3   : > { %11652 = vmatprep.mubr.msk.f32.mxu1 %vm14963_vm0, %v16783_v8 }
 0x6c4   : > { %v4684_v57 = vmul.f32 %v4546_v56, %v4438_v53  ;;  %v4398_v58 = vadd.f32 %v16771_v36, %v4352_v54 }
 0x6c5   : > { %v4093_v59 = vpop.f32.mrb[36].mxu0  ;;  %v4772_v60 = vld [vmem:[#allocation2 + $0x80] sm:$0xff] }
 0x6c6   : > { %4728 = vst [vmem:[#allocation2 + $0x93] sm:$0xff] %v4684_v57  ;;  %v4439_v61 = vmax.f32 %v4398_v58, 0.0  ;;  %v4353_v62 = vmul.f32 %v16766_v25, %v4093_v59  ;;  %v11505_v63 = vpop.f32.mrb[37].mxu0  ;;  %11653 = vmatmul.mubr.f32.gmra.mrb[32].mxu1 %v4772_v60  ;;  %v4586_v60 = vpop.permute.xlu0 %4585 }
 0x6c7   : > { %11655 = vmatprep.mubr.msk.f32.mxu1 %vm14963_vm0, %v16783_v8 }
 0x6c8   : > { %v4685_v3 = vmul.f32 %v4551_v2, %v4439_v61  ;;  %v4399_v4 = vadd.f32 %v16771_v36, %v4353_v62 }
 0x6c9   : > { %v4098_v5 = vpop.f32.mrb[38].mxu0  ;;  %v4773_v6 = vld [vmem:[#allocation2 + $0x88] sm:$0xff] }
 0x6ca   : > { %4729 = vst [vmem:[#allocation2 + $0x9b] sm:$0xff] %v4685_v3  ;;  %v4440_v7 = vmax.f32 %v4399_v4, 0.0  ;;  %v4354_v9 = vmul.f32 %v16766_v25, %v4098_v5  ;;  %v11508_v10 = vpop.f32.mrb[39].mxu0  ;;  %11656 = vmatmul.mubr.f32.gmra.mrb[34].mxu1 %v4773_v6  ;;  %v4591_v6 = vpop.permute.xlu1 %4590 }
 0x6cb   : > { %11658 = vmatprep.mubr.msk.f32.mxu1 %vm14963_vm0, %v16783_v8 }
 0x6cc   : > { %v4686_v13 = vmul.f32 %v4556_v11, %v4440_v7  ;;  %v4400_v14 = vadd.f32 %v16771_v36, %v4354_v9 }
 0x6cd   : > { %v4103_v15 = vpop.f32.mrb[40].mxu0  ;;  %v4774_v12 = vld [vmem:[#allocation2 + $0x90] sm:$0xff] }
 0x6ce   : > { %4730 = vst [vmem:[#allocation2 + $0xa3] sm:$0xff] %v4686_v13  ;;  %v4441_v17 = vmax.f32 %v4400_v14, 0.0  ;;  %v4355_v18 = vmul.f32 %v16766_v25, %v4103_v15  ;;  %v11511_v16 = vpop.f32.mrb[41].mxu0  ;;  %11659 = vmatmul.mubr.f32.gmra.mrb[36].mxu1 %v4774_v12  ;;  %v4596_v12 = vpop.permute.xlu0 %4595 }
 0x6cf   : > { %11661 = vmatprep.mubr.msk.f32.mxu1 %vm14963_vm0, %v16783_v8 }
 0x6d0   : > { %v4687_v21 = vmul.f32 %v4561_v19, %v4441_v17  ;;  %v4401_v20 = vadd.f32 %v16771_v36, %v4355_v18 }
 0x6d1   : > { %v4108_v22 = vpop.f32.mrb[42].mxu0  ;;  %v4775_v23 = vld [vmem:[#allocation2 + $0x98] sm:$0xff] }
 0x6d2   : > { %4731 = vst [vmem:[#allocation2 + $0xab] sm:$0xff] %v4687_v21  ;;  %v4442_v24 = vmax.f32 %v4401_v20, 0.0  ;;  %v4356_v26 = vmul.f32 %v16766_v25, %v4108_v22  ;;  %v11514_v28 = vpop.f32.mrb[43].mxu0  ;;  %11662 = vmatmul.mubr.f32.gmra.mrb[38].mxu1 %v4775_v23  ;;  %v4601_v23 = vpop.permute.xlu1 %4600 }
 0x6d3   : > { %11664 = vmatprep.mubr.msk.f32.mxu1 %vm14963_vm0, %v16783_v8 }
 0x6d4   : > { %v4688_v27 = vmul.f32 %v4566_v1, %v4442_v24  ;;  %v4402_v29 = vadd.f32 %v16771_v36, %v4356_v26 }
 0x6d5   : > { %v4113_v30 = vpop.f32.mrb[44].mxu0  ;;  %v4776_v31 = vld [vmem:[#allocation2 + $0xa0] sm:$0xff] }
 0x6d6   : > { %4732 = vst [vmem:[#allocation2 + $0xb3] sm:$0xff] %v4688_v27  ;;  %v4443_v32 = vmax.f32 %v4402_v29, 0.0  ;;  %v4357_v33 = vmul.f32 %v16766_v25, %v4113_v30  ;;  %v11517_v34 = vpop.f32.mrb[45].mxu0  ;;  %11665 = vmatmul.mubr.f32.gmra.mrb[40].mxu1 %v4776_v31  ;;  %v4606_v31 = vpop.permute.xlu0 %4605 }
 0x6d7   : > { %11667 = vmatprep.mubr.msk.f32.mxu1 %vm14963_vm0, %v16783_v8 }
 0x6d8   : > { %v4689_v37 = vmul.f32 %v4571_v35, %v4443_v32  ;;  %v4403_v38 = vadd.f32 %v16771_v36, %v4357_v33 }
 0x6d9   : > { %v4118_v39 = vpop.f32.mrb[46].mxu0  ;;  %v4777_v40 = vld [vmem:[#allocation2 + $0xa8] sm:$0xff] }
 0x6da   : > { %4733 = vst [vmem:[#allocation2 + $0xbb] sm:$0xff] %v4689_v37  ;;  %v4444_v41 = vmax.f32 %v4403_v38, 0.0  ;;  %v4358_v43 = vmul.f32 %v16766_v25, %v4118_v39  ;;  %v11520_v44 = vpop.f32.mrb[47].mxu0  ;;  %11668 = vmatmul.mubr.f32.gmra.mrb[42].mxu1 %v4777_v40  ;;  %v4611_v40 = vpop.permute.xlu1 %4610 }
 0x6db   : > { %11670 = vmatprep.mubr.msk.f32.mxu1 %vm14963_vm0, %v16783_v8 }
 0x6dc   : > { %v4690_v42 = vmul.f32 %v4576_v45, %v4444_v41  ;;  %v4404_v47 = vadd.f32 %v16771_v36, %v4358_v43 }
 0x6dd   : > { %v4123_v48 = vpop.f32.mrb[48].mxu0  ;;  %v4778_v46 = vld [vmem:[#allocation2 + $0xb0] sm:$0xff] }
 0x6de   : > { %4734 = vst [vmem:[#allocation2 + $0xc3] sm:$0xff] %v4690_v42  ;;  %v4445_v49 = vmax.f32 %v4404_v47, 0.0  ;;  %v4359_v51 = vmul.f32 %v16766_v25, %v4123_v48  ;;  %v11523_v50 = vpop.f32.mrb[49].mxu0  ;;  %11671 = vmatmul.mubr.f32.gmra.mrb[44].mxu1 %v4778_v46  ;;  %v4616_v46 = vpop.permute.xlu0 %4615 }
 0x6df   : > { %11673 = vmatprep.mubr.msk.f32.mxu1 %vm14963_vm0, %v16783_v8 }
 0x6e0   : > { %v4691_v53 = vmul.f32 %v4581_v52, %v4445_v49  ;;  %v4405_v54 = vadd.f32 %v16771_v36, %v4359_v51 }
 0x6e1   : > { %v4128_v55 = vpop.f32.mrb[50].mxu0  ;;  %v4779_v56 = vld [vmem:[#allocation2 + $0xb8] sm:$0xff] }
 0x6e2   : > { %4735 = vst [vmem:[#allocation2 + $0xcb] sm:$0xff] %v4691_v53  ;;  %v4446_v57 = vmax.f32 %v4405_v54, 0.0  ;;  %v4360_v58 = vmul.f32 %v16766_v25, %v4128_v55  ;;  %v11526_v59 = vpop.f32.mrb[51].mxu0  ;;  %11674 = vmatmul.mubr.f32.gmra.mrb[46].mxu1 %v4779_v56  ;;  %v4621_v56 = vpop.permute.xlu1 %4620 }
 0x6e3   : > { %11676 = vmatprep.mubr.msk.f32.mxu1 %vm14963_vm0, %v16783_v8 }
 0x6e4   : > { %v4692_v61 = vmul.f32 %v4586_v60, %v4446_v57  ;;  %v4406_v62 = vadd.f32 %v16771_v36, %v4360_v58 }
 0x6e5   : > { %v4133_v63 = vpop.f32.mrb[52].mxu0  ;;  %v4780_v2 = vld [vmem:[#allocation2 + $0xc0] sm:$0xff] }
 0x6e6   : > { %4736 = vst [vmem:[#allocation2 + $0xd3] sm:$0xff] %v4692_v61  ;;  %v4447_v3 = vmax.f32 %v4406_v62, 0.0  ;;  %v4361_v4 = vmul.f32 %v16766_v25, %v4133_v63  ;;  %v11529_v5 = vpop.f32.mrb[53].mxu0  ;;  %11677 = vmatmul.mubr.f32.gmra.mrb[48].mxu1 %v4780_v2  ;;  %v4626_v2 = vpop.permute.xlu0 %4625 }
 0x6e7   : > { %11679 = vmatprep.mubr.msk.f32.mxu1 %vm14963_vm0, %v16783_v8 }
 0x6e8   : > { %v4693_v7 = vmul.f32 %v4591_v6, %v4447_v3  ;;  %v4407_v9 = vadd.f32 %v16771_v36, %v4361_v4 }
 0x6e9   : > { %v4138_v10 = vpop.f32.mrb[54].mxu0  ;;  %v4781_v11 = vld [vmem:[#allocation2 + $0xc8] sm:$0xff] }
 0x6ea   : > { %4737 = vst [vmem:[#allocation2 + $0xdb] sm:$0xff] %v4693_v7  ;;  %v4448_v13 = vmax.f32 %v4407_v9, 0.0  ;;  %v4362_v14 = vmul.f32 %v16766_v25, %v4138_v10  ;;  %v11532_v15 = vpop.f32.mrb[55].mxu0  ;;  %11680 = vmatmul.mubr.f32.gmra.mrb[50].mxu1 %v4781_v11  ;;  %v4631_v11 = vpop.permute.xlu1 %4630 }
 0x6eb   : > { %11682 = vmatprep.mubr.msk.f32.mxu1 %vm14963_vm0, %v16783_v8 }
 0x6ec   : > { %v4694_v17 = vmul.f32 %v4596_v12, %v4448_v13  ;;  %v4408_v18 = vadd.f32 %v16771_v36, %v4362_v14 }
 0x6ed   : > { %v4143_v16 = vpop.f32.mrb[56].mxu0  ;;  %v4782_v19 = vld [vmem:[#allocation2 + $0xd0] sm:$0xff] }
 0x6ee   : > { %4738 = vst [vmem:[#allocation2 + $0xe3] sm:$0xff] %v4694_v17  ;;  %v4449_v21 = vmax.f32 %v4408_v18, 0.0  ;;  %v4363_v20 = vmul.f32 %v16766_v25, %v4143_v16  ;;  %v11535_v22 = vpop.f32.mrb[57].mxu0  ;;  %11683 = vmatmul.mubr.f32.gmra.mrb[52].mxu1 %v4782_v19  ;;  %v4636_v19 = vpop.permute.xlu0 %4635 }
 0x6ef   : > { %11685 = vmatprep.mubr.msk.f32.mxu1 %vm14963_vm0, %v16783_v8 }
 0x6f0   : > { %v4695_v24 = vmul.f32 %v4601_v23, %v4449_v21  ;;  %v4409_v26 = vadd.f32 %v16771_v36, %v4363_v20 }
 0x6f1   : > { %v4148_v28 = vpop.f32.mrb[58].mxu0  ;;  %v4783_v1 = vld [vmem:[#allocation2 + $0xd8] sm:$0xff] }
 0x6f2   : > { %4739 = vst [vmem:[#allocation2 + $0xeb] sm:$0xff] %v4695_v24  ;;  %v4450_v27 = vmax.f32 %v4409_v26, 0.0  ;;  %v4364_v29 = vmul.f32 %v16766_v25, %v4148_v28  ;;  %v11538_v30 = vpop.f32.mrb[59].mxu0  ;;  %11686 = vmatmul.mubr.f32.gmra.mrb[54].mxu1 %v4783_v1  ;;  %v4641_v1 = vpop.permute.xlu1 %4640 }
 0x6f3   : > { %11688 = vmatprep.mubr.msk.f32.mxu1 %vm14963_vm0, %v16783_v8 }
 0x6f4   : > { %v4696_v32 = vmul.f32 %v4606_v31, %v4450_v27  ;;  %v4410_v33 = vadd.f32 %v16771_v36, %v4364_v29 }
 0x6f5   : > { %v4153_v34 = vpop.f32.mrb[60].mxu0  ;;  %v4784_v35 = vld [vmem:[#allocation2 + $0xe0] sm:$0xff] }
 0x6f6   : > { %4740 = vst [vmem:[#allocation2 + $0xf3] sm:$0xff] %v4696_v32  ;;  %v4451_v37 = vmax.f32 %v4410_v33, 0.0  ;;  %v4365_v38 = vmul.f32 %v16766_v25, %v4153_v34  ;;  %v11541_v39 = vpop.f32.mrb[61].mxu0  ;;  %11689 = vmatmul.mubr.f32.gmra.mrb[56].mxu1 %v4784_v35  ;;  %v4646_v35 = vpop.permute.xlu0 %4645 }
 0x6f7   : > { %11691 = vmatprep.mubr.msk.f32.mxu1 %vm14963_vm0, %v16783_v8 }
 0x6f8   : > { %v4697_v41 = vmul.f32 %v4611_v40, %v4451_v37  ;;  %v4411_v43 = vadd.f32 %v16771_v36, %v4365_v38 }
 0x6f9   : > { %v4158_v44 = vpop.f32.mrb[62].mxu0  ;;  %v4785_v45 = vld [vmem:[#allocation2 + $0xe8] sm:$0xff] }
 0x6fa   : > { %4741 = vst [vmem:[#allocation2 + $0xfb] sm:$0xff] %v4697_v41  ;;  %v4452_v42 = vmax.f32 %v4411_v43, 0.0  ;;  %v4366_v47 = vmul.f32 %v16766_v25, %v4158_v44  ;;  %v11544_v48 = vpop.f32.mrb[63].mxu0  ;;  %11692 = vmatmul.mubr.f32.gmra.mrb[58].mxu1 %v4785_v45  ;;  %v4651_v45 = vpop.permute.xlu1 %4650 }
 0x6fb   : > { %11694 = vmatprep.mubr.msk.f32.mxu1 %vm14963_vm0, %v16783_v8 }
 0x6fc   : > { %v4698_v49 = vmul.f32 %v4616_v46, %v4452_v42  ;;  %v4412_v51 = vadd.f32 %v16771_v36, %v4366_v47 }
 0x6fd   : > { %v4163_v50 = vpop.f32.mrb[64].mxu0  ;;  %v4786_v52 = vld [vmem:[#allocation2 + $0xf0] sm:$0xff] }
 0x6fe   : > { %4742 = vst [vmem:[#allocation2 + $0x103] sm:$0xff] %v4698_v49  ;;  %v4453_v53 = vmax.f32 %v4412_v51, 0.0  ;;  %v4367_v54 = vmul.f32 %v16766_v25, %v4163_v50  ;;  %v11547_v55 = vpop.f32.mrb[65].mxu0  ;;  %11695 = vmatmul.mubr.f32.gmra.mrb[60].mxu1 %v4786_v52  ;;  %v4656_v52 = vpop.permute.xlu0 %4655 }
 0x6ff   : > { %11697 = vmatprep.mubr.msk.f32.mxu1 %vm14963_vm0, %v16783_v8 }
 0x700   : > { %v4699_v57 = vmul.f32 %v4621_v56, %v4453_v53  ;;  %v4413_v58 = vadd.f32 %v16771_v36, %v4367_v54 }
 0x701   : > { %v4168_v59 = vpop.f32.mrb[66].mxu0  ;;  %v4787_v60 = vld [vmem:[#allocation2 + $0xf8] sm:$0xff] }
 0x702   : > { %4743 = vst [vmem:[#allocation2 + $0x10b] sm:$0xff] %v4699_v57  ;;  %v4454_v61 = vmax.f32 %v4413_v58, 0.0  ;;  %v4368_v62 = vmul.f32 %v16766_v25, %v4168_v59  ;;  %v11550_v63 = vpop.f32.mrb[67].mxu0  ;;  %11698 = vmatmul.mubr.f32.gmra.mrb[62].mxu1 %v4787_v60  ;;  %v4661_v60 = vpop.permute.xlu1 %4660 }
 0x703   : > { %11700 = vmatprep.mubr.msk.f32.mxu1 %vm14963_vm0, %v16783_v8 }
 0x704   : > { %v4700_v3 = vmul.f32 %v4626_v2, %v4454_v61  ;;  %v4414_v4 = vadd.f32 %v16771_v36, %v4368_v62 }
 0x705   : > { %v4173_v5 = vpop.f32.mrb[68].mxu0  ;;  %v4788_v6 = vld [vmem:[#allocation2 + $0x100] sm:$0xff] }
 0x706   : > { %4744 = vst [vmem:[#allocation2 + $0x113] sm:$0xff] %v4700_v3  ;;  %v4455_v7 = vmax.f32 %v4414_v4, 0.0  ;;  %v4369_v9 = vmul.f32 %v16766_v25, %v4173_v5  ;;  %v11553_v10 = vpop.f32.mrb[69].mxu0  ;;  %11701 = vmatmul.mubr.f32.gmra.mrb[64].mxu1 %v4788_v6  ;;  %v4666_v3 = vpop.permute.xlu0 %4665  ;;  %v5658_v5 = vld [vmem:[#allocation9 + $0x100] sm:$0xff] }
 0x707   : > { %11703 = vmatprep.mubr.msk.f32.mxu1 %vm14963_vm0, %v16783_v8  ;;  %v5661_v10 = vld [vmem:[#allocation9 + $0x118] sm:$0xff] }
 0x708   : > { %v4701_v13 = vmul.f32 %v4631_v11, %v4455_v7  ;;  %v4415_v14 = vadd.f32 %v16771_v36, %v4369_v9  ;;  %v5165_v7 = vld [vmem:[#allocation2 + $0x1] sm:$0xff]  ;;  %v5166_v11 = vld [vmem:[#allocation2 + $0x9] sm:$0xff] }
 0x709   : > { %v4178_v15 = vpop.f32.mrb[70].mxu0  ;;  %v4789_v12 = vld [vmem:[#allocation2 + $0x108] sm:$0xff] }
 0x70a   : > { %4745 = vst [vmem:[#allocation2 + $0x11b] sm:$0xff] %v4701_v13  ;;  %v4456_v17 = vmax.f32 %v4415_v14, 0.0  ;;  %v4370_v18 = vmul.f32 %v16766_v25, %v4178_v15  ;;  %v11556_v16 = vpop.f32.mrb[71].mxu0  ;;  %11704 = vmatmul.mubr.f32.gmra.mrb[66].mxu1 %v4789_v12  ;;  %v5662_v14 = vld [vmem:[#allocation9 + $0x120] sm:$0xff]  ;;  %v5663_v15 = vld [vmem:[#allocation9 + $0x128] sm:$0xff] }
 0x70b   : > { %11706 = vmatprep.mubr.msk.f32.mxu1 %vm14963_vm0, %v16783_v8  ;;  %v13238_v12 = vpack.c.bf16 %v5663_v15, %v5662_v14  ;;  %v5167_v16 = vld [vmem:[#allocation2 + $0x11] sm:$0xff]  ;;  %v6112_v14 = vld [vmem:[#allocation9 + $0x198] sm:$0xff] }
 0x70c   : > { %v4702_v21 = vmul.f32 %v4636_v19, %v4456_v17  ;;  %v4416_v20 = vadd.f32 %v16771_v36, %v4370_v18  ;;  %v5664_v17 = vld [vmem:[#allocation9 + $0x130] sm:$0xff]  ;;  %v5665_v18 = vld [vmem:[#allocation9 + $0x138] sm:$0xff] }
 0x70d   : > { %v4183_v22 = vpop.f32.mrb[72].mxu0  ;;  %v4790_v23 = vld [vmem:[#allocation2 + $0x110] sm:$0xff]  ;;  %v13241_v19 = vpack.c.bf16 %v5665_v18, %v5664_v17  ;;  %v6114_v18 = vld [vmem:[#allocation9 + $0x1a8] sm:$0xff] }
 0x70e   : > { %4746 = vst [vmem:[#allocation2 + $0x123] sm:$0xff] %v4702_v21  ;;  %v4457_v24 = vmax.f32 %v4416_v20, 0.0  ;;  %v4371_v26 = vmul.f32 %v16766_v25, %v4183_v22  ;;  %v11559_v28 = vpop.f32.mrb[73].mxu0  ;;  %11707 = vmatmul.mubr.f32.gmra.mrb[68].mxu1 %v4790_v23  ;;  %v5666_v21 = vld [vmem:[#allocation9 + $0x140] sm:$0xff]  ;;  %v5667_v20 = vld [vmem:[#allocation9 + $0x148] sm:$0xff] }
 0x70f   : > { %11709 = vmatprep.mubr.msk.f32.mxu1 %vm14963_vm0, %v16783_v8  ;;  %v5168_v22 = vld [vmem:[#allocation2 + $0x19] sm:$0xff]  ;;  %v13244_v23 = vpack.c.bf16 %v5667_v20, %v5666_v21  ;;  %v5169_v28 = vld [vmem:[#allocation2 + $0x21] sm:$0xff]  ;;  %v5617_v15 = vld [vmem:[#allocation2 + $0xa] sm:$0xff] }
 0x710   : > { %v4703_v27 = vmul.f32 %v4641_v1, %v4457_v24  ;;  %v4417_v29 = vadd.f32 %v16771_v36, %v4371_v26  ;;  %v5668_v24 = vld [vmem:[#allocation9 + $0x150] sm:$0xff]  ;;  %v5669_v26 = vld [vmem:[#allocation9 + $0x158] sm:$0xff]  ;;  %v6113_v17 = vld [vmem:[#allocation9 + $0x1a0] sm:$0xff] }
 0x711   : > { %v4188_v30 = vpop.f32.mrb[74].mxu0  ;;  %v4791_v31 = vld [vmem:[#allocation2 + $0x118] sm:$0xff]  ;;  %v13247_v1 = vpack.c.bf16 %v5669_v26, %v5668_v24  ;;  %v6116_v21 = vld [vmem:[#allocation9 + $0x1b8] sm:$0xff] }
 0x712   : > { %4747 = vst [vmem:[#allocation2 + $0x12b] sm:$0xff] %v4703_v27  ;;  %v4458_v32 = vmax.f32 %v4417_v29, 0.0  ;;  %v4372_v33 = vmul.f32 %v16766_v25, %v4188_v30  ;;  %v11562_v34 = vpop.f32.mrb[75].mxu0  ;;  %11710 = vmatmul.mubr.f32.gmra.mrb[70].mxu1 %v4791_v31  ;;  %v5670_v27 = vld [vmem:[#allocation9 + $0x160] sm:$0xff]  ;;  %v5671_v29 = vld [vmem:[#allocation9 + $0x168] sm:$0xff] }
 0x713   : > { %11712 = vmatprep.mubr.msk.f32.mxu1 %vm14963_vm0, %v16783_v8  ;;  %v5170_v30 = vld [vmem:[#allocation2 + $0x29] sm:$0xff]  ;;  %v13250_v31 = vpack.c.bf16 %v5671_v29, %v5670_v27  ;;  %v5171_v34 = vld [vmem:[#allocation2 + $0x31] sm:$0xff]  ;;  %v17041_v26 = vld [vmem:[#allocation2 + $0x1a] sm:$0xff] }
 0x714   : > { %v4704_v37 = vmul.f32 %v4646_v35, %v4458_v32  ;;  %v4418_v38 = vadd.f32 %v16771_v36, %v4372_v33  ;;  %v5672_v32 = vld [vmem:[#allocation9 + $0x170] sm:$0xff]  ;;  %v5673_v33 = vld [vmem:[#allocation9 + $0x178] sm:$0xff]  ;;  %v17035_v20 = vld [vmem:[#allocation2 + $0x12] sm:$0xff] }
 0x715   : > { %v4193_v39 = vpop.f32.mrb[76].mxu0  ;;  %v4792_v40 = vld [vmem:[#allocation2 + $0x120] sm:$0xff]  ;;  %v13253_v35 = vpack.c.bf16 %v5673_v33, %v5672_v32  ;;  %v6118_v24 = vld [vmem:[#allocation9 + $0x1c8] sm:$0xff]  ;;  %v6120_v27 = vld [vmem:[#allocation9 + $0x1d8] sm:$0xff] }
 0x716   : > { %4748 = vst [vmem:[#allocation2 + $0x133] sm:$0xff] %v4704_v37  ;;  %v4459_v41 = vmax.f32 %v4418_v38, 0.0  ;;  %v4373_v43 = vmul.f32 %v16766_v25, %v4193_v39  ;;  %v11565_v44 = vpop.f32.mrb[77].mxu0  ;;  %11713 = vmatmul.mubr.f32.gmra.mrb[72].mxu1 %v4792_v40  ;;  %v5172_v37 = vld [vmem:[#allocation2 + $0x39] sm:$0xff]  ;;  %v5173_v38 = vld [vmem:[#allocation2 + $0x41] sm:$0xff]  ;;  %v5174_v39 = vld [vmem:[#allocation2 + $0x49] sm:$0xff] }
 0x717   : > { %11715 = vmatprep.mubr.msk.f32.mxu1 %vm14963_vm0, %v16783_v8  ;;  %v5175_v40 = vld [vmem:[#allocation2 + $0x51] sm:$0xff]  ;;  %v5178_v44 = vld [vmem:[#allocation2 + $0x69] sm:$0xff] }
 0x718   : > { %v4705_v42 = vmul.f32 %v4651_v45, %v4459_v41  ;;  %v4419_v47 = vadd.f32 %v16771_v36, %v4373_v43  ;;  %v5176_v41 = vld [vmem:[#allocation2 + $0x59] sm:$0xff]  ;;  %v5177_v43 = vld [vmem:[#allocation2 + $0x61] sm:$0xff]  ;;  %v5179_v45 = vld [vmem:[#allocation2 + $0x71] sm:$0xff] }
 0x719   : > { %v4198_v48 = vpop.f32.mrb[78].mxu0  ;;  %v4793_v46 = vld [vmem:[#allocation2 + $0x128] sm:$0xff]  ;;  %v6122_v32 = vld [vmem:[#allocation9 + $0x1e8] sm:$0xff] }
 0x71a   : > { %4749 = vst [vmem:[#allocation2 + $0x13b] sm:$0xff] %v4705_v42  ;;  %v4460_v49 = vmax.f32 %v4419_v47, 0.0  ;;  %v4374_v51 = vmul.f32 %v16766_v25, %v4198_v48  ;;  %v11568_v50 = vpop.f32.mrb[79].mxu0  ;;  %11716 = vmatmul.mubr.f32.gmra.mrb[74].mxu1 %v4793_v46  ;;  %v5180_v42 = vld [vmem:[#allocation2 + $0x79] sm:$0xff]  ;;  %v5181_v47 = vld [vmem:[#allocation2 + $0x81] sm:$0xff]  ;;  %v5182_v48 = vld [vmem:[#allocation2 + $0x89] sm:$0xff] }
 0x71b   : > { %11718 = vmatprep.mubr.msk.f32.mxu1 %vm14963_vm0, %v16783_v8  ;;  %v5183_v46 = vld [vmem:[#allocation2 + $0x91] sm:$0xff]  ;;  %v5185_v50 = vld [vmem:[#allocation2 + $0xa1] sm:$0xff] }
 0x71c   : > { %v4706_v53 = vmul.f32 %v4656_v52, %v4460_v49  ;;  %v4420_v54 = vadd.f32 %v16771_v36, %v4374_v51  ;;  %v5184_v49 = vld [vmem:[#allocation2 + $0x99] sm:$0xff]  ;;  %v5186_v52 = vld [vmem:[#allocation2 + $0xa9] sm:$0xff] }
 0x71d   : > { %v4203_v55 = vpop.f32.mrb[80].mxu0  ;;  %v4794_v56 = vld [vmem:[#allocation2 + $0x130] sm:$0xff]  ;;  %v16983_v51 = vld [vmem:[#allocation2] sm:$0xff] }
 0x71e   : > { %4750 = vst [vmem:[#allocation2 + $0x143] sm:$0xff] %v4706_v53  ;;  %v4461_v57 = vmax.f32 %v4420_v54, 0.0  ;;  %v4375_v58 = vmul.f32 %v16766_v25, %v4203_v55  ;;  %v11571_v59 = vpop.f32.mrb[81].mxu0  ;;  %11719 = vmatmul.mubr.f32.gmra.mrb[76].mxu1 %v4794_v56  ;;  %v5659_v25 = vld [vmem:[#allocation9 + $0x108] sm:$0xff]  ;;  %v5189_v54 = vld [vmem:[#allocation2 + $0xc1] sm:$0xff]  ;;  %v5190_v55 = vld [vmem:[#allocation2 + $0xc9] sm:$0xff] }
 0x71f   : > { %11721 = vmatprep.mubr.msk.f32.mxu1 %vm14963_vm0, %v16783_v8  ;;  %v13232_v9 = vpack.c.bf16 %v5659_v25, %v5658_v5  ;;  %v5187_v53 = vld [vmem:[#allocation2 + $0xb1] sm:$0xff]  ;;  %v5194_v59 = vld [vmem:[#allocation2 + $0xe9] sm:$0xff] }
 0x720   : > { %v4707_v61 = vmul.f32 %v4661_v60, %v4461_v57  ;;  %v4421_v62 = vadd.f32 %v16771_v36, %v4375_v58  ;;  %v5660_v36 = vld [vmem:[#allocation9 + $0x110] sm:$0xff]  ;;  %v5191_v56 = vld [vmem:[#allocation2 + $0xd1] sm:$0xff]  ;;  %v5202_v5 = vld [vmem:[#allocation2 + $0x129] sm:$0xff] }
 0x721   : > { %v4795_v63 = vld [vmem:[#allocation2 + $0x138] sm:$0xff]  ;;  %v13235_v13 = vpack.c.bf16 %v5661_v10, %v5660_v36  ;;  %v5193_v58 = vld [vmem:[#allocation2 + $0xe1] sm:$0xff]  ;;  %v17053_v33 = vld [vmem:[#allocation2 + $0x2a] sm:$0xff] }
 0x722   : > { %4751 = vst [vmem:[#allocation2 + $0x14b] sm:$0xff] %v4707_v61  ;;  %v4462_v2 = vmax.f32 %v4421_v62, 0.0  ;;  %11722 = vmatmul.mubr.f32.gmra.mrb[78].mxu1 %v4795_v63  ;;  %v5192_v57 = vld [vmem:[#allocation2 + $0xd9] sm:$0xff]  ;;  %v5195_v60 = vld [vmem:[#allocation2 + $0xf1] sm:$0xff]  ;;  %v5197_v62 = vld [vmem:[#allocation2 + $0x101] sm:$0xff] }
 0x723   : > { %11724 = vmatprep.mubr.msk.f32.mxu1 %vm14963_vm0, %v16783_v8  ;;  %v5196_v61 = vld [vmem:[#allocation2 + $0xf9] sm:$0xff]  ;;  %v5198_v63 = vld [vmem:[#allocation2 + $0x109] sm:$0xff]  ;;  %v5203_v25 = vld [vmem:[#allocation2 + $0x131] sm:$0xff] }
 0x724   : > { %v4708_v4 = vmul.f32 %v4666_v3, %v4462_v2  ;;  %v5199_v2 = vld [vmem:[#allocation2 + $0x111] sm:$0xff]  ;;  %v5200_v3 = vld [vmem:[#allocation2 + $0x119] sm:$0xff]  ;;  %v5616_v10 = vld [vmem:[#allocation2 + $0x2] sm:$0xff] }
 0x725   : > { %v4796_v6 = vld [vmem:[#allocation2 + $0x140] sm:$0xff] }
 0x726   : > { %4752 = vst [vmem:[#allocation2 + $0x153] sm:$0xff] %v4708_v4  ;;  %11725 = vmatmul.mubr.f32.gmra.mrb[80].mxu1 %v4796_v6  ;;  %v5201_v4 = vld [vmem:[#allocation2 + $0x121] sm:$0xff]  ;;  %v5204_v6 = vld [vmem:[#allocation2 + $0x139] sm:$0xff] }
 0x727   : > { %11759 = vmatprep.mubr.msk.f32.mxu1 %vm14963_vm0, %v16783_v8  ;;  %v5205_v36 = vld [vmem:[#allocation2 + $0x141] sm:$0xff] }
 0x728   : > { %v17047_v29 = vld [vmem:[#allocation2 + $0x22] sm:$0xff] }
 0x72a   : > { %11760 = vmatmul.mubr.f32.vlgmr.msra.gmra.mrb[0].mxu1 %v5165_v7  ;;  %v6109_v7 = vld [vmem:[#allocation9 + $0x180] sm:$0xff] }
 0x72b   : > { %13233 = vmatpush3.bf16.msra.mxu1 %v13232_v9  ;;  %11762 = vmatprep.mubr.msk.f32.mxu1 %vm14963_vm0, %v16783_v8  ;;  %v6110_v9 = vld [vmem:[#allocation9 + $0x188] sm:$0xff] }
 0x72c   : > { %13234 = vmatprep.subr.bf16.mxu1 %v14962_v0 }
 0x72e   : > { %11763 = vmatmul.mubr.f32.gmra.mrb[2].mxu1 %v5166_v11  ;;  %v13256_v11 = vpack.c.bf16 %v6110_v9, %v6109_v7  ;;  %v17216_v7 = vld [vmem:[#allocation2 + $0x12a] sm:$0xff]  ;;  %v17221_v9 = vld [vmem:[#allocation2 + $0x132] sm:$0xff] }
 0x72f   : > { %11765 = vmatprep.mubr.msk.f32.mxu1 %vm14963_vm0, %v16783_v8  ;;  %13236 = vmatpush3.bf16.msra.mxu1 %v13235_v13  ;;  %v6111_v13 = vld [vmem:[#allocation9 + $0x190] sm:$0xff] }
 0x730   : > { %13237 = vmatprep.subr.bf16.mxu1 %v14962_v0 }
 0x732   : > { %11766 = vmatmul.mubr.f32.gmra.mrb[4].mxu1 %v5167_v16  ;;  %v13262_v16 = vpack.c.bf16 %v6114_v18, %v6113_v17  ;;  %v6564_v18 = vld [vmem:[#allocation9 + $0x220] sm:$0xff] }
 0x733   : > { %11768 = vmatprep.mubr.msk.f32.mxu1 %vm14963_vm0, %v16783_v8  ;;  %13239 = vmatpush3.bf16.msra.mxu1 %v13238_v12  ;;  %v13259_v12 = vpack.c.bf16 %v6112_v14, %v6111_v13  ;;  %v17231_v13 = vld [vmem:[#allocation2 + $0x142] sm:$0xff] }
 0x734   : > { %13240 = vmatprep.subr.bf16.mxu1 %v14962_v0 }
 0x736   : > { %11769 = vmatmul.mubr.f32.gmra.mrb[6].mxu1 %v5168_v22 }
 0x737   : > { %11771 = vmatprep.mubr.msk.f32.mxu1 %vm14963_vm0, %v16783_v8  ;;  %13242 = vmatpush3.bf16.msra.mxu1 %v13241_v19  ;;  %v6115_v19 = vld [vmem:[#allocation9 + $0x1b0] sm:$0xff] }
 0x738   : > { %13243 = vmatprep.subr.bf16.mxu1 %v14962_v0  ;;  %v13265_v22 = vpack.c.bf16 %v6116_v21, %v6115_v19  ;;  %v6566_v21 = vld [vmem:[#allocation9 + $0x230] sm:$0xff] }
 0x73a   : > { %11772 = vmatmul.mubr.f32.gmra.mrb[8].mxu1 %v5169_v28 }
 0x73b   : > { %11774 = vmatprep.mubr.msk.f32.mxu1 %vm14963_vm0, %v16783_v8  ;;  %13245 = vmatpush3.bf16.msra.mxu1 %v13244_v23  ;;  %v6117_v23 = vld [vmem:[#allocation9 + $0x1c0] sm:$0xff] }
 0x73c   : > { %13246 = vmatprep.subr.bf16.mxu1 %v14962_v0  ;;  %v13268_v28 = vpack.c.bf16 %v6118_v24, %v6117_v23  ;;  %v6568_v23 = vld [vmem:[#allocation9 + $0x240] sm:$0xff]  ;;  %v6569_v24 = vld [vmem:[#allocation9 + $0x248] sm:$0xff] }
 0x73e   : > { %11775 = vmatmul.mubr.f32.gmra.mrb[10].mxu1 %v5170_v30 }
 0x73f   : > { %11777 = vmatprep.mubr.msk.f32.mxu1 %vm14963_vm0, %v16783_v8  ;;  %13248 = vmatpush3.bf16.msra.mxu1 %v13247_v1  ;;  %v6119_v1 = vld [vmem:[#allocation9 + $0x1d0] sm:$0xff] }
 0x740   : > { %13249 = vmatprep.subr.bf16.mxu1 %v14962_v0  ;;  %v13271_v30 = vpack.c.bf16 %v6120_v27, %v6119_v1  ;;  %v6571_v1 = vld [vmem:[#allocation9 + $0x258] sm:$0xff] }
 0x742   : > { %11778 = vmatmul.mubr.f32.gmra.mrb[12].mxu1 %v5171_v34 }
 0x743   : > { %11780 = vmatprep.mubr.msk.f32.mxu1 %vm14963_vm0, %v16783_v8  ;;  %13251 = vmatpush3.bf16.msra.mxu1 %v13250_v31  ;;  %v6121_v31 = vld [vmem:[#allocation9 + $0x1e0] sm:$0xff] }
 0x744   : > { %13252 = vmatprep.subr.bf16.mxu1 %v14962_v0  ;;  %v13274_v34 = vpack.c.bf16 %v6122_v32, %v6121_v31  ;;  %v6574_v32 = vld [vmem:[#allocation9 + $0x270] sm:$0xff] }
 0x746   : > { %11781 = vmatmul.mubr.f32.gmra.mrb[14].mxu1 %v5172_v37  ;;  %v6124_v37 = vld [vmem:[#allocation9 + $0x1f8] sm:$0xff] }
 0x747   : > { %11783 = vmatprep.mubr.msk.f32.mxu1 %vm14963_vm0, %v16783_v8  ;;  %13254 = vmatpush3.bf16.msra.mxu1 %v13253_v35  ;;  %v6123_v35 = vld [vmem:[#allocation9 + $0x1f0] sm:$0xff] }
 0x748   : > { %13255 = vmatprep.subr.bf16.mxu1 %v14962_v0 }
 0x74a   : > { %11784 = vmatmul.mubr.f32.gmra.mrb[16].mxu1 %v5173_v38  ;;  %v17059_v38 = vld [vmem:[#allocation2 + $0x32] sm:$0xff] }
 0x74b   : > { %11786 = vmatprep.mubr.msk.f32.mxu1 %vm14963_vm0, %v16783_v8 }
 0x74e   : > { %11787 = vmatmul.mubr.f32.gmra.mrb[18].mxu1 %v5174_v39  ;;  %v13277_v39 = vpack.c.bf16 %v6124_v37, %v6123_v35  ;;  %v6106_v35 = vld [vmem:[#allocation2 + $0x14a] sm:$0xff] }
 0x74f   : > { %11789 = vmatprep.mubr.msk.f32.mxu1 %vm14963_vm0, %v16783_v8  ;;  %v7011_v37 = vld [vmem:[#allocation9 + $0x280] sm:$0xff] }
 0x752   : > { %11790 = vmatmul.mubr.f32.gmra.mrb[20].mxu1 %v5175_v40  ;;  %v17065_v40 = vld [vmem:[#allocation2 + $0x3a] sm:$0xff] }
 0x753   : > { %11792 = vmatprep.mubr.msk.f32.mxu1 %vm14963_vm0, %v16783_v8 }
 0x756   : > { %11793 = vmatmul.mubr.f32.gmra.mrb[22].mxu1 %v5176_v41  ;;  %v17071_v41 = vld [vmem:[#allocation2 + $0x42] sm:$0xff] }
 0x757   : > { %11795 = vmatprep.mubr.msk.f32.mxu1 %vm14963_vm0, %v16783_v8 }
 0x75a   : > { %11796 = vmatmul.mubr.f32.gmra.mrb[24].mxu1 %v5177_v43  ;;  %v17076_v43 = vld [vmem:[#allocation2 + $0x4a] sm:$0xff] }
 0x75b   : > { %11798 = vmatprep.mubr.msk.f32.mxu1 %vm14963_vm0, %v16783_v8 }
 0x75e   : > { %11799 = vmatmul.mubr.f32.gmra.mrb[26].mxu1 %v5178_v44  ;;  %v17081_v44 = vld [vmem:[#allocation2 + $0x52] sm:$0xff] }
 0x75f   : > { %11801 = vmatprep.mubr.msk.f32.mxu1 %vm14963_vm0, %v16783_v8 }
 0x762   : > { %11802 = vmatmul.mubr.f32.gmra.mrb[28].mxu1 %v5179_v45  ;;  %v17086_v45 = vld [vmem:[#allocation2 + $0x5a] sm:$0xff] }
 0x763   : > { %11804 = vmatprep.mubr.msk.f32.mxu1 %vm14963_vm0, %v16783_v8 }
 0x766   : > { %11805 = vmatmul.mubr.f32.gmra.mrb[30].mxu1 %v5180_v42  ;;  %v17091_v42 = vld [vmem:[#allocation2 + $0x62] sm:$0xff] }
 0x767   : > { %11807 = vmatprep.mubr.msk.f32.mxu1 %vm14963_vm0, %v16783_v8 }
 0x76a   : > { %11808 = vmatmul.mubr.f32.gmra.mrb[32].mxu1 %v5181_v47  ;;  %v17096_v47 = vld [vmem:[#allocation2 + $0x6a] sm:$0xff] }
 0x76b   : > { %11810 = vmatprep.mubr.msk.f32.mxu1 %vm14963_vm0, %v16783_v8 }
 0x76e   : > { %11811 = vmatmul.mubr.f32.gmra.mrb[34].mxu1 %v5182_v48  ;;  %v17101_v48 = vld [vmem:[#allocation2 + $0x72] sm:$0xff] }
 0x76f   : > { %11813 = vmatprep.mubr.msk.f32.mxu1 %vm14963_vm0, %v16783_v8 }
 0x772   : > { %11814 = vmatmul.mubr.f32.gmra.mrb[36].mxu1 %v5183_v46  ;;  %v17106_v46 = vld [vmem:[#allocation2 + $0x7a] sm:$0xff] }
 0x773   : > { %11816 = vmatprep.mubr.msk.f32.mxu1 %vm14963_vm0, %v16783_v8  ;;  %v5188_v8 = vld [vmem:[#allocation2 + $0xb9] sm:$0xff] }
 0x776   : > { %11817 = vmatmul.mubr.f32.gmra.mrb[38].mxu1 %v5184_v49  ;;  %v17111_v49 = vld [vmem:[#allocation2 + $0x82] sm:$0xff] }
 0x777   : > { %11819 = vmatprep.mubr.msk.f32.mxu1 %vm14963_vm0, %v16983_v51 }
 0x77a   : > { %11820 = vmatmul.mubr.f32.gmra.mrb[40].mxu1 %v5185_v50  ;;  %v17116_v50 = vld [vmem:[#allocation2 + $0x8a] sm:$0xff] }
 0x77b   : > { %11822 = vmatprep.mubr.msk.f32.mxu1 %vm14963_vm0, %v16983_v51 }
 0x77e   : > { %11823 = vmatmul.mubr.f32.gmra.mrb[42].mxu1 %v5186_v52  ;;  %v17121_v52 = vld [vmem:[#allocation2 + $0x92] sm:$0xff] }
 0x77f   : > { %11825 = vmatprep.mubr.msk.f32.mxu1 %vm14963_vm0, %v16983_v51 }
 0x782   : > { %11826 = vmatmul.mubr.f32.gmra.mrb[44].mxu1 %v5187_v53  ;;  %v17126_v53 = vld [vmem:[#allocation2 + $0x9a] sm:$0xff] }
 0x783   : > { %11828 = vmatprep.mubr.msk.f32.mxu1 %vm14963_vm0, %v16983_v51 }
 0x786   : > { %11829 = vmatmul.mubr.f32.gmra.mrb[46].mxu1 %v5188_v8  ;;  %v17131_v8 = vld [vmem:[#allocation2 + $0xa2] sm:$0xff] }
 0x787   : > { %11831 = vmatprep.mubr.msk.f32.mxu1 %vm14963_vm0, %v16983_v51 }
 0x78a   : > { %11832 = vmatmul.mubr.f32.gmra.mrb[48].mxu1 %v5189_v54  ;;  %v17136_v54 = vld [vmem:[#allocation2 + $0xaa] sm:$0xff] }
 0x78b   : > { %11834 = vmatprep.mubr.msk.f32.mxu1 %vm14963_vm0, %v16983_v51 }
 0x78e   : > { %11835 = vmatmul.mubr.f32.gmra.mrb[50].mxu1 %v5190_v55  ;;  %v17141_v55 = vld [vmem:[#allocation2 + $0xb2] sm:$0xff] }
 0x78f   : > { %11837 = vmatprep.mubr.msk.f32.mxu1 %vm14963_vm0, %v16983_v51 }
 0x792   : > { %11838 = vmatmul.mubr.f32.gmra.mrb[52].mxu1 %v5191_v56  ;;  %v17146_v56 = vld [vmem:[#allocation2 + $0xba] sm:$0xff] }
 0x793   : > { %11840 = vmatprep.mubr.msk.f32.mxu1 %vm14963_vm0, %v16983_v51 }
 0x796   : > { %11841 = vmatmul.mubr.f32.gmra.mrb[54].mxu1 %v5192_v57  ;;  %v17151_v57 = vld [vmem:[#allocation2 + $0xc2] sm:$0xff] }
 0x797   : > { %11843 = vmatprep.mubr.msk.f32.mxu1 %vm14963_vm0, %v16983_v51 }
 0x79a   : > { %11844 = vmatmul.mubr.f32.gmra.mrb[56].mxu1 %v5193_v58  ;;  %v17156_v58 = vld [vmem:[#allocation2 + $0xca] sm:$0xff] }
 0x79b   : > { %11846 = vmatprep.mubr.msk.f32.mxu1 %vm14963_vm0, %v16983_v51 }
 0x79e   : > { %11847 = vmatmul.mubr.f32.gmra.mrb[58].mxu1 %v5194_v59  ;;  %v17161_v59 = vld [vmem:[#allocation2 + $0xd2] sm:$0xff] }
 0x79f   : > { %11849 = vmatprep.mubr.msk.f32.mxu1 %vm14963_vm0, %v16983_v51 }
 0x7a2   : > { %11850 = vmatmul.mubr.f32.gmra.mrb[60].mxu1 %v5195_v60  ;;  %v17166_v60 = vld [vmem:[#allocation2 + $0xda] sm:$0xff] }
 0x7a3   : > { %11852 = vmatprep.mubr.msk.f32.mxu1 %vm14963_vm0, %v16983_v51 }
 0x7a6   : > { %11853 = vmatmul.mubr.f32.gmra.mrb[62].mxu1 %v5196_v61  ;;  %v17171_v61 = vld [vmem:[#allocation2 + $0xe2] sm:$0xff] }
 0x7a7   : > { %11855 = vmatprep.mubr.msk.f32.mxu1 %vm14963_vm0, %v16983_v51 }
 0x7aa   : > { %11856 = vmatmul.mubr.f32.gmra.mrb[64].mxu1 %v5197_v62  ;;  %v17176_v62 = vld [vmem:[#allocation2 + $0xea] sm:$0xff] }
 0x7ab   : > { %11858 = vmatprep.mubr.msk.f32.mxu1 %vm14963_vm0, %v16983_v51 }
 0x7ae   : > { %11859 = vmatmul.mubr.f32.gmra.mrb[66].mxu1 %v5198_v63  ;;  %v17181_v63 = vld [vmem:[#allocation2 + $0xf2] sm:$0xff] }
 0x7af   : > { %11861 = vmatprep.mubr.msk.f32.mxu1 %vm14963_vm0, %v16983_v51 }
 0x7b2   : > { %11862 = vmatmul.mubr.f32.gmra.mrb[68].mxu1 %v5199_v2  ;;  %v17186_v2 = vld [vmem:[#allocation2 + $0xfa] sm:$0xff] }
 0x7b3   : > { %11864 = vmatprep.mubr.msk.f32.mxu1 %vm14963_vm0, %v16983_v51 }
 0x7b6   : > { %11865 = vmatmul.mubr.f32.gmra.mrb[70].mxu1 %v5200_v3  ;;  %v17191_v3 = vld [vmem:[#allocation2 + $0x102] sm:$0xff] }
 0x7b7   : > { %11867 = vmatprep.mubr.msk.f32.mxu1 %vm14963_vm0, %v16983_v51 }
 0x7ba   : > { %11868 = vmatmul.mubr.f32.gmra.mrb[72].mxu1 %v5201_v4  ;;  %v17196_v4 = vld [vmem:[#allocation2 + $0x10a] sm:$0xff] }
 0x7bb   : > { %11870 = vmatprep.mubr.msk.f32.mxu1 %vm14963_vm0, %v16983_v51 }
 0x7be   : > { %11871 = vmatmul.mubr.f32.gmra.mrb[74].mxu1 %v5202_v5  ;;  %v17201_v5 = vld [vmem:[#allocation2 + $0x112] sm:$0xff] }
 0x7bf   : > { %11873 = vmatprep.mubr.msk.f32.mxu1 %vm14963_vm0, %v16983_v51 }
 0x7c2   : > { %11874 = vmatmul.mubr.f32.gmra.mrb[76].mxu1 %v5203_v25  ;;  %v17206_v25 = vld [vmem:[#allocation2 + $0x11a] sm:$0xff] }
 0x7c3   : > { %11876 = vmatprep.mubr.msk.f32.mxu1 %vm14963_vm0, %v16983_v51 }
 0x7c6   : > { %11877 = vmatmul.mubr.f32.gmra.mrb[78].mxu1 %v5204_v6  ;;  %v17211_v6 = vld [vmem:[#allocation2 + $0x122] sm:$0xff] }
 0x7c7   : > { %11879 = vmatprep.mubr.msk.f32.mxu1 %vm14963_vm0, %v16983_v51 }
 0x7ca   : > { %11880 = vmatmul.mubr.f32.gmra.mrb[80].mxu1 %v5205_v36  ;;  %v17226_v36 = vld [vmem:[#allocation2 + $0x13a] sm:$0xff] }
 0x7cb   : > { %11914 = vmatprep.mubr.msk.f32.mxu1 %vm14963_vm0, %v16983_v51 }
 0x7ce   : > { %11915 = vmatmul.mubr.f32.vlgmr.msra.gmra.mrb[0].mxu1 %v5616_v10  ;;  %v6560_v10 = vld [vmem:[#allocation9 + $0x200] sm:$0xff] }
 0x7cf   : > { %13257 = vmatpush3.bf16.msra.mxu1 %v13256_v11  ;;  %11917 = vmatprep.mubr.msk.f32.mxu1 %vm14963_vm0, %v16983_v51  ;;  %v6561_v11 = vld [vmem:[#allocation9 + $0x208] sm:$0xff] }
 0x7d0   : > { %13258 = vmatprep.subr.bf16.mxu1 %v14962_v0  ;;  %v13280_v14 = vpack.c.bf16 %v6561_v11, %v6560_v10  ;;  %v6529_v10 = vld [vmem:[#allocation2 + $0x6b] sm:$0xff]  ;;  %v6530_v11 = vld [vmem:[#allocation2 + $0x73] sm:$0xff] }
 0x7d2   : > { %11918 = vmatmul.mubr.f32.gmra.mrb[2].mxu1 %v5617_v15  ;;  %v6562_v15 = vld [vmem:[#allocation9 + $0x210] sm:$0xff] }
 0x7d3   : > { %11920 = vmatprep.mubr.msk.f32.mxu1 %vm14963_vm0, %v16983_v51  ;;  %13260 = vmatpush3.bf16.msra.mxu1 %v13259_v12  ;;  %v6563_v12 = vld [vmem:[#allocation9 + $0x218] sm:$0xff] }
 0x7d4   : > { %13261 = vmatprep.subr.bf16.mxu1 %v14962_v0  ;;  %v13283_v17 = vpack.c.bf16 %v6563_v12, %v6562_v15  ;;  %v6533_v15 = vld [vmem:[#allocation2 + $0x8b] sm:$0xff]  ;;  %v6534_v12 = vld [vmem:[#allocation2 + $0x93] sm:$0xff] }
 0x7d6   : > { %11921 = vmatmul.mubr.f32.gmra.mrb[4].mxu1 %v17035_v20 }
 0x7d7   : > { %11923 = vmatprep.mubr.msk.f32.mxu1 %vm14963_vm0, %v16983_v51  ;;  %13263 = vmatpush3.bf16.msra.mxu1 %v13262_v16  ;;  %v6565_v16 = vld [vmem:[#allocation9 + $0x228] sm:$0xff] }
 0x7d8   : > { %13264 = vmatprep.subr.bf16.mxu1 %v14962_v0  ;;  %v13286_v19 = vpack.c.bf16 %v6565_v16, %v6564_v18  ;;  %v6536_v18 = vld [vmem:[#allocation2 + $0xa3] sm:$0xff]  ;;  %v6537_v16 = vld [vmem:[#allocation2 + $0xab] sm:$0xff] }
 0x7da   : > { %11924 = vmatmul.mubr.f32.gmra.mrb[6].mxu1 %v17041_v26 }
 0x7db   : > { %11926 = vmatprep.mubr.msk.f32.mxu1 %vm14963_vm0, %v16983_v51  ;;  %13266 = vmatpush3.bf16.msra.mxu1 %v13265_v22 }
 0x7dc   : > { %13267 = vmatprep.subr.bf16.mxu1 %v14962_v0 }
 0x7de   : > { %11927 = vmatmul.mubr.f32.gmra.mrb[8].mxu1 %v17047_v29 }
 0x7df   : > { %11929 = vmatprep.mubr.msk.f32.mxu1 %vm14963_vm0, %v16983_v51  ;;  %13269 = vmatpush3.bf16.msra.mxu1 %v13268_v28  ;;  %v6570_v28 = vld [vmem:[#allocation9 + $0x250] sm:$0xff] }
 0x7e0   : > { %13270 = vmatprep.subr.bf16.mxu1 %v14962_v0  ;;  %v13295_v27 = vpack.c.bf16 %v6571_v1, %v6570_v28  ;;  %v6545_v28 = vld [vmem:[#allocation2 + $0xeb] sm:$0xff]  ;;  %v6546_v1 = vld [vmem:[#allocation2 + $0xf3] sm:$0xff] }
 0x7e2   : > { %11930 = vmatmul.mubr.f32.gmra.mrb[10].mxu1 %v17053_v33 }
 0x7e3   : > { %11932 = vmatprep.mubr.msk.f32.mxu1 %vm14963_vm0, %v16983_v51  ;;  %13272 = vmatpush3.bf16.msra.mxu1 %v13271_v30  ;;  %v6573_v30 = vld [vmem:[#allocation9 + $0x268] sm:$0xff] }
 0x7e4   : > { %13273 = vmatprep.subr.bf16.mxu1 %v14962_v0 }
 0x7e6   : > { %11933 = vmatmul.mubr.f32.gmra.mrb[12].mxu1 %v17059_v38 }
 0x7e7   : > { %11935 = vmatprep.mubr.msk.f32.mxu1 %vm14963_vm0, %v16983_v51  ;;  %13275 = vmatpush3.bf16.msra.mxu1 %v13274_v34 }
 0x7e8   : > { %13276 = vmatprep.subr.bf16.mxu1 %v14962_v0 }
 0x7ea   : > { %11936 = vmatmul.mubr.f32.gmra.mrb[14].mxu1 %v17065_v40 }
 0x7eb   : > { %11938 = vmatprep.mubr.msk.f32.mxu1 %vm14963_vm0, %v16983_v51  ;;  %13278 = vmatpush3.bf16.msra.mxu1 %v13277_v39  ;;  %v6107_v39 = vld [vmem:[#allocation2 + $0x152] sm:$0xff] }
 0x7ec   : > { %13279 = vmatprep.subr.bf16.mxu1 %v14962_v0 }
 0x7ee   : > { %11939 = vmatmul.mubr.f32.gmra.mrb[16].mxu1 %v17071_v41 }
 0x7ef   : > { %11941 = vmatprep.mubr.msk.f32.mxu1 %vm14963_vm0, %v16983_v51 }
 0x7f2   : > { %11942 = vmatmul.mubr.f32.gmra.mrb[18].mxu1 %v17076_v43 }
 0x7f3   : > { %11944 = vmatprep.mubr.msk.f32.mxu1 %vm14963_vm0, %v16983_v51 }
 0x7f6   : > { %11945 = vmatmul.mubr.f32.gmra.mrb[20].mxu1 %v17081_v44 }
 0x7f7   : > { %11947 = vmatprep.mubr.msk.f32.mxu1 %vm14963_vm0, %v16983_v51 }
 0x7fa   : > { %11948 = vmatmul.mubr.f32.gmra.mrb[22].mxu1 %v17086_v45 }
 0x7fb   : > { %11950 = vmatprep.mubr.msk.f32.mxu1 %vm14963_vm0, %v16983_v51 }
 0x7fe   : > { %11951 = vmatmul.mubr.f32.gmra.mrb[24].mxu1 %v17091_v42 }
 0x7ff   : > { %11953 = vmatprep.mubr.msk.f32.mxu1 %vm14963_vm0, %v16983_v51 }
 0x802   : > { %11954 = vmatmul.mubr.f32.gmra.mrb[26].mxu1 %v17096_v47 }
 0x803   : > { %11956 = vmatprep.mubr.msk.f32.mxu1 %vm14963_vm0, %v16983_v51 }
 0x806   : > { %11957 = vmatmul.mubr.f32.gmra.mrb[28].mxu1 %v17101_v48 }
 0x807   : > { %11959 = vmatprep.mubr.msk.f32.mxu1 %vm14963_vm0, %v16983_v51 }
 0x80a   : > { %11960 = vmatmul.mubr.f32.gmra.mrb[30].mxu1 %v17106_v46 }
 0x80b   : > { %11962 = vmatprep.mubr.msk.f32.mxu1 %vm14963_vm0, %v16983_v51 }
 0x80e   : > { %11963 = vmatmul.mubr.f32.gmra.mrb[32].mxu1 %v17111_v49 }
 0x80f   : > { %11965 = vmatprep.mubr.msk.f32.mxu1 %vm14963_vm0, %v16983_v51 }
 0x812   : > { %11966 = vmatmul.mubr.f32.gmra.mrb[34].mxu1 %v17116_v50 }
 0x813   : > { %11968 = vmatprep.mubr.msk.f32.mxu1 %vm14963_vm0, %v16983_v51 }
 0x816   : > { %11969 = vmatmul.mubr.f32.gmra.mrb[36].mxu1 %v17121_v52 }
 0x817   : > { %11971 = vmatprep.mubr.msk.f32.mxu1 %vm14963_vm0, %v16983_v51 }
 0x81a   : > { %11972 = vmatmul.mubr.f32.gmra.mrb[38].mxu1 %v17126_v53 }
 0x81b   : > { %11974 = vmatprep.mubr.msk.f32.mxu1 %vm14963_vm0, %v16983_v51 }
 0x81e   : > { %11975 = vmatmul.mubr.f32.gmra.mrb[40].mxu1 %v17131_v8 }
 0x81f   : > { %11977 = vmatprep.mubr.msk.f32.mxu1 %vm14963_vm0, %v16983_v51 }
 0x822   : > { %11978 = vmatmul.mubr.f32.gmra.mrb[42].mxu1 %v17136_v54 }
 0x823   : > { %11980 = vmatprep.mubr.msk.f32.mxu1 %vm14963_vm0, %v16983_v51 }
 0x826   : > { %11981 = vmatmul.mubr.f32.gmra.mrb[44].mxu1 %v17141_v55 }
 0x827   : > { %11983 = vmatprep.mubr.msk.f32.mxu1 %vm14963_vm0, %v16983_v51 }
 0x82a   : > { %11984 = vmatmul.mubr.f32.gmra.mrb[46].mxu1 %v17146_v56 }
 0x82b   : > { %11986 = vmatprep.mubr.msk.f32.mxu1 %vm14963_vm0, %v16983_v51 }
 0x82e   : > { %11987 = vmatmul.mubr.f32.gmra.mrb[48].mxu1 %v17151_v57 }
 0x82f   : > { %11989 = vmatprep.mubr.msk.f32.mxu1 %vm14963_vm0, %v16983_v51 }
 0x832   : > { %11990 = vmatmul.mubr.f32.gmra.mrb[50].mxu1 %v17156_v58 }
 0x833   : > { %11992 = vmatprep.mubr.msk.f32.mxu1 %vm14963_vm0, %v16983_v51 }
 0x836   : > { %11993 = vmatmul.mubr.f32.gmra.mrb[52].mxu1 %v17161_v59 }
 0x837   : > { %11995 = vmatprep.mubr.msk.f32.mxu1 %vm14963_vm0, %v16983_v51 }
 0x83a   : > { %11996 = vmatmul.mubr.f32.gmra.mrb[54].mxu1 %v17166_v60 }
 0x83b   : > { %11998 = vmatprep.mubr.msk.f32.mxu1 %vm14963_vm0, %v16983_v51 }
 0x83e   : > { %11999 = vmatmul.mubr.f32.gmra.mrb[56].mxu1 %v17171_v61 }
 0x83f   : > { %12001 = vmatprep.mubr.msk.f32.mxu1 %vm14963_vm0, %v16983_v51 }
 0x842   : > { %12002 = vmatmul.mubr.f32.gmra.mrb[58].mxu1 %v17176_v62 }
 0x843   : > { %12004 = vmatprep.mubr.msk.f32.mxu1 %vm14963_vm0, %v16983_v51 }
 0x846   : > { %12005 = vmatmul.mubr.f32.gmra.mrb[60].mxu1 %v17181_v63 }
 0x847   : > { %12007 = vmatprep.mubr.msk.f32.mxu1 %vm14963_vm0, %v16983_v51 }
 0x84a   : > { %12008 = vmatmul.mubr.f32.gmra.mrb[62].mxu1 %v17186_v2 }
 0x84b   : > { %12010 = vmatprep.mubr.msk.f32.mxu1 %vm14963_vm0, %v16983_v51 }
 0x84e   : > { %12011 = vmatmul.mubr.f32.gmra.mrb[64].mxu1 %v17191_v3 }
 0x84f   : > { %12013 = vmatprep.mubr.msk.f32.mxu1 %vm14963_vm0, %v16983_v51 }
 0x852   : > { %12014 = vmatmul.mubr.f32.gmra.mrb[66].mxu1 %v17196_v4 }
 0x853   : > { %12016 = vmatprep.mubr.msk.f32.mxu1 %vm14963_vm0, %v16983_v51 }
 0x856   : > { %12017 = vmatmul.mubr.f32.gmra.mrb[68].mxu1 %v17201_v5 }
 0x857   : > { %12019 = vmatprep.mubr.msk.f32.mxu1 %vm14963_vm0, %v16983_v51 }
 0x85a   : > { %12020 = vmatmul.mubr.f32.gmra.mrb[70].mxu1 %v17206_v25 }
 0x85b   : > { %12022 = vmatprep.mubr.msk.f32.mxu1 %vm14963_vm0, %v16983_v51 }
 0x85e   : > { %12023 = vmatmul.mubr.f32.gmra.mrb[72].mxu1 %v17211_v6 }
 0x85f   : > { %12025 = vmatprep.mubr.msk.f32.mxu1 %vm14963_vm0, %v16983_v51 }
 0x862   : > { %12026 = vmatmul.mubr.f32.gmra.mrb[74].mxu1 %v17216_v7 }
 0x863   : > { %12028 = vmatprep.mubr.msk.f32.mxu1 %vm14963_vm0, %v16983_v51 }
 0x866   : > { %12029 = vmatmul.mubr.f32.gmra.mrb[76].mxu1 %v17221_v9 }
 0x867   : > { %12031 = vmatprep.mubr.msk.f32.mxu1 %vm14963_vm0, %v16983_v51 }
 0x86a   : > { %12032 = vmatmul.mubr.f32.gmra.mrb[78].mxu1 %v17226_v36 }
 0x86b   : > { %12034 = vmatprep.mubr.msk.f32.mxu1 %vm14963_vm0, %v16983_v51 }
 0x86e   : > { %12035 = vmatmul.mubr.f32.gmra.mrb[80].mxu1 %v17231_v13 }
 0x86f   : > { %12069 = vmatprep.mubr.msk.f32.mxu1 %vm14963_vm0, %v16983_v51 }
 0x872   : > { %12070 = vmatmul.mubr.f32.vlgmr.msra.gmra.mrb[0].mxu1 %v17035_v20  ;;  %v6567_v20 = vld [vmem:[#allocation9 + $0x238] sm:$0xff] }
 0x873   : > { %13281 = vmatpush3.bf16.msra.mxu1 %v13280_v14  ;;  %12072 = vmatprep.mubr.msk.f32.mxu1 %vm14963_vm0, %v16983_v51  ;;  %v13289_v22 = vpack.c.bf16 %v6567_v20, %v6566_v21  ;;  %v6532_v14 = vld [vmem:[#allocation2 + $0x83] sm:$0xff]  ;;  %v6539_v21 = vld [vmem:[#allocation2 + $0xbb] sm:$0xff] }
 0x874   : > { %13282 = vmatprep.subr.bf16.mxu1 %v14962_v0  ;;  %v6540_v20 = vld [vmem:[#allocation2 + $0xc3] sm:$0xff] }
 0x876   : > { %12073 = vmatmul.mubr.f32.gmra.mrb[2].mxu1 %v17041_v26  ;;  %v13292_v26 = vpack.c.bf16 %v6569_v24, %v6568_v23  ;;  %v6542_v23 = vld [vmem:[#allocation2 + $0xd3] sm:$0xff]  ;;  %v6543_v24 = vld [vmem:[#allocation2 + $0xdb] sm:$0xff] }
 0x877   : > { %12075 = vmatprep.mubr.msk.f32.mxu1 %vm14963_vm0, %v16983_v51  ;;  %13284 = vmatpush3.bf16.msra.mxu1 %v13283_v17  ;;  %v6535_v17 = vld [vmem:[#allocation2 + $0x9b] sm:$0xff] }
 0x878   : > { %13285 = vmatprep.subr.bf16.mxu1 %v14962_v0 }
 0x87a   : > { %12076 = vmatmul.mubr.f32.gmra.mrb[4].mxu1 %v17047_v29  ;;  %v6572_v29 = vld [vmem:[#allocation9 + $0x260] sm:$0xff] }
 0x87b   : > { %12078 = vmatprep.mubr.msk.f32.mxu1 %vm14963_vm0, %v16983_v51  ;;  %13287 = vmatpush3.bf16.msra.mxu1 %v13286_v19  ;;  %v13298_v31 = vpack.c.bf16 %v6573_v30, %v6572_v29  ;;  %v6538_v19 = vld [vmem:[#allocation2 + $0xb3] sm:$0xff]  ;;  %v6548_v29 = vld [vmem:[#allocation2 + $0x103] sm:$0xff]  ;;  %v6549_v30 = vld [vmem:[#allocation2 + $0x10b] sm:$0xff] }
 0x87c   : > { %13288 = vmatprep.subr.bf16.mxu1 %v14962_v0 }
 0x87e   : > { %12079 = vmatmul.mubr.f32.gmra.mrb[6].mxu1 %v17053_v33  ;;  %v6575_v33 = vld [vmem:[#allocation9 + $0x278] sm:$0xff] }
 0x87f   : > { %12081 = vmatprep.mubr.msk.f32.mxu1 %vm14963_vm0, %v16983_v51  ;;  %13290 = vmatpush3.bf16.msra.mxu1 %v13289_v22  ;;  %v13301_v34 = vpack.c.bf16 %v6575_v33, %v6574_v32  ;;  %v6541_v22 = vld [vmem:[#allocation2 + $0xcb] sm:$0xff]  ;;  %v6551_v32 = vld [vmem:[#allocation2 + $0x11b] sm:$0xff]  ;;  %v6552_v33 = vld [vmem:[#allocation2 + $0x123] sm:$0xff] }
 0x880   : > { %13291 = vmatprep.subr.bf16.mxu1 %v14962_v0 }
 0x882   : > { %12082 = vmatmul.mubr.f32.gmra.mrb[8].mxu1 %v17059_v38  ;;  %v7012_v38 = vld [vmem:[#allocation9 + $0x288] sm:$0xff] }
 0x883   : > { %12084 = vmatprep.mubr.msk.f32.mxu1 %vm14963_vm0, %v16983_v51  ;;  %13293 = vmatpush3.bf16.msra.mxu1 %v13292_v26  ;;  %v6544_v26 = vld [vmem:[#allocation2 + $0xe3] sm:$0xff] }
 0x884   : > { %13294 = vmatprep.subr.bf16.mxu1 %v14962_v0 }
 0x886   : > { %12085 = vmatmul.mubr.f32.gmra.mrb[10].mxu1 %v17065_v40  ;;  %v13304_v40 = vpack.c.bf16 %v7012_v38, %v7011_v37  ;;  %v6555_v37 = vld [vmem:[#allocation2 + $0x13b] sm:$0xff]  ;;  %v6556_v38 = vld [vmem:[#allocation2 + $0x143] sm:$0xff] }
 0x887   : > { %12087 = vmatprep.mubr.msk.f32.mxu1 %vm14963_vm0, %v16983_v51  ;;  %13296 = vmatpush3.bf16.msra.mxu1 %v13295_v27  ;;  %v6547_v27 = vld [vmem:[#allocation2 + $0xfb] sm:$0xff] }
 0x888   : > { %13297 = vmatprep.subr.bf16.mxu1 %v14962_v0 }
 0x88a   : > { %12088 = vmatmul.mubr.f32.gmra.mrb[12].mxu1 %v17071_v41  ;;  %v7013_v41 = vld [vmem:[#allocation9 + $0x290] sm:$0xff] }
 0x88b   : > { %12090 = vmatprep.mubr.msk.f32.mxu1 %vm14963_vm0, %v16983_v51  ;;  %13299 = vmatpush3.bf16.msra.mxu1 %v13298_v31  ;;  %v6550_v31 = vld [vmem:[#allocation2 + $0x113] sm:$0xff] }
 0x88c   : > { %13300 = vmatprep.subr.bf16.mxu1 %v14962_v0 }
 0x88e   : > { %12091 = vmatmul.mubr.f32.gmra.mrb[14].mxu1 %v17076_v43  ;;  %v7014_v43 = vld [vmem:[#allocation9 + $0x298] sm:$0xff] }
 0x88f   : > { %12093 = vmatprep.mubr.msk.f32.mxu1 %vm14963_vm0, %v16983_v51  ;;  %13302 = vmatpush3.bf16.msra.mxu1 %v13301_v34  ;;  %v6553_v34 = vld [vmem:[#allocation2 + $0x12b] sm:$0xff] }
 0x890   : > { %13303 = vmatprep.subr.bf16.mxu1 %v14962_v0 }
 0x892   : > { %12094 = vmatmul.mubr.f32.gmra.mrb[16].mxu1 %v17081_v44  ;;  %v6518_v44 = vld [vmem:[#allocation2 + $0x13] sm:$0xff] }
 0x893   : > { %12096 = vmatprep.mubr.msk.f32.mxu1 %vm14963_vm0, %v16983_v51 }
 0x896   : > { %12097 = vmatmul.mubr.f32.gmra.mrb[18].mxu1 %v17086_v45  ;;  %v13307_v45 = vpack.c.bf16 %v7014_v43, %v7013_v41  ;;  %v7463_v41 = vld [vmem:[#allocation9 + $0x308] sm:$0xff] }
 0x897   : > { %12099 = vmatprep.mubr.msk.f32.mxu1 %vm14963_vm0, %v16983_v51  ;;  %v6558_v43 = vld [vmem:[#allocation2 + $0x153] sm:$0xff] }
 0x89a   : > { %12100 = vmatmul.mubr.f32.gmra.mrb[20].mxu1 %v17091_v42  ;;  %v7015_v42 = vld [vmem:[#allocation9 + $0x2a0] sm:$0xff] }
 0x89b   : > { %12102 = vmatprep.mubr.msk.f32.mxu1 %vm14963_vm0, %v16983_v51 }
 0x89e   : > { %12103 = vmatmul.mubr.f32.gmra.mrb[22].mxu1 %v17096_v47  ;;  %v7016_v47 = vld [vmem:[#allocation9 + $0x2a8] sm:$0xff] }
 0x89f   : > { %12105 = vmatprep.mubr.msk.f32.mxu1 %vm14963_vm0, %v16983_v51 }
 0x8a2   : > { %12106 = vmatmul.mubr.f32.gmra.mrb[24].mxu1 %v17101_v48  ;;  %v6519_v48 = vld [vmem:[#allocation2 + $0x1b] sm:$0xff] }
 0x8a3   : > { %12108 = vmatprep.mubr.msk.f32.mxu1 %vm14963_vm0, %v16983_v51 }
 0x8a6   : > { %12109 = vmatmul.mubr.f32.gmra.mrb[26].mxu1 %v17106_v46  ;;  %v13310_v46 = vpack.c.bf16 %v7016_v47, %v7015_v42  ;;  %v7464_v42 = vld [vmem:[#allocation9 + $0x310] sm:$0xff]  ;;  %v7465_v47 = vld [vmem:[#allocation9 + $0x318] sm:$0xff] }
 0x8a7   : > { %12111 = vmatprep.mubr.msk.f32.mxu1 %vm14963_vm0, %v16983_v51 }
 0x8aa   : > { %12112 = vmatmul.mubr.f32.gmra.mrb[28].mxu1 %v17111_v49  ;;  %v7017_v49 = vld [vmem:[#allocation9 + $0x2b0] sm:$0xff] }
 0x8ab   : > { %12114 = vmatprep.mubr.msk.f32.mxu1 %vm14963_vm0, %v16983_v51 }
 0x8ae   : > { %12115 = vmatmul.mubr.f32.gmra.mrb[30].mxu1 %v17116_v50  ;;  %v7018_v50 = vld [vmem:[#allocation9 + $0x2b8] sm:$0xff] }
 0x8af   : > { %12117 = vmatprep.mubr.msk.f32.mxu1 %vm14963_vm0, %v16983_v51 }
 0x8b2   : > { %12118 = vmatmul.mubr.f32.gmra.mrb[32].mxu1 %v17121_v52  ;;  %v6520_v52 = vld [vmem:[#allocation2 + $0x23] sm:$0xff] }
 0x8b3   : > { %12120 = vmatprep.mubr.msk.f32.mxu1 %vm14963_vm0, %v16983_v51 }
 0x8b6   : > { %12121 = vmatmul.mubr.f32.gmra.mrb[34].mxu1 %v17126_v53  ;;  %v13313_v53 = vpack.c.bf16 %v7018_v50, %v7017_v49  ;;  %v7467_v49 = vld [vmem:[#allocation9 + $0x328] sm:$0xff] }
 0x8b7   : > { %12123 = vmatprep.mubr.msk.f32.mxu1 %vm14963_vm0, %v16983_v51  ;;  %v6970_v50 = vld [vmem:[#allocation2 + $0x1c] sm:$0xff] }
 0x8ba   : > { %12124 = vmatmul.mubr.f32.gmra.mrb[36].mxu1 %v17131_v8  ;;  %v7019_v8 = vld [vmem:[#allocation9 + $0x2c0] sm:$0xff] }
 0x8bb   : > { %12126 = vmatprep.mubr.msk.f32.mxu1 %vm14963_vm0, %v16983_v51 }
 0x8be   : > { %12127 = vmatmul.mubr.f32.gmra.mrb[38].mxu1 %v17136_v54  ;;  %v7020_v54 = vld [vmem:[#allocation9 + $0x2c8] sm:$0xff] }
 0x8bf   : > { %12129 = vmatprep.mubr.msk.f32.mxu1 %vm14963_vm0, %v16983_v51 }
 0x8c2   : > { %12130 = vmatmul.mubr.f32.gmra.mrb[40].mxu1 %v17141_v55  ;;  %v6521_v55 = vld [vmem:[#allocation2 + $0x2b] sm:$0xff] }
 0x8c3   : > { %12132 = vmatprep.mubr.msk.f32.mxu1 %vm14963_vm0, %v16983_v51 }
 0x8c6   : > { %12133 = vmatmul.mubr.f32.gmra.mrb[42].mxu1 %v17146_v56  ;;  %v13316_v56 = vpack.c.bf16 %v7020_v54, %v7019_v8  ;;  %v7469_v8 = vld [vmem:[#allocation9 + $0x338] sm:$0xff] }
 0x8c7   : > { %12135 = vmatprep.mubr.msk.f32.mxu1 %vm14963_vm0, %v16983_v51  ;;  %v17463_v54 = vld [vmem:[#allocation2 + $0x24] sm:$0xff] }
 0x8ca   : > { %12136 = vmatmul.mubr.f32.gmra.mrb[44].mxu1 %v17151_v57  ;;  %v7021_v57 = vld [vmem:[#allocation9 + $0x2d0] sm:$0xff] }
 0x8cb   : > { %12138 = vmatprep.mubr.msk.f32.mxu1 %vm14963_vm0, %v16983_v51 }
 0x8ce   : > { %12139 = vmatmul.mubr.f32.gmra.mrb[46].mxu1 %v17156_v58  ;;  %v7022_v58 = vld [vmem:[#allocation9 + $0x2d8] sm:$0xff] }
 0x8cf   : > { %12141 = vmatprep.mubr.msk.f32.mxu1 %vm14963_vm0, %v16983_v51 }
 0x8d2   : > { %12142 = vmatmul.mubr.f32.gmra.mrb[48].mxu1 %v17161_v59  ;;  %v6522_v59 = vld [vmem:[#allocation2 + $0x33] sm:$0xff] }
 0x8d3   : > { %12144 = vmatprep.mubr.msk.f32.mxu1 %vm14963_vm0, %v16983_v51 }
 0x8d6   : > { %12145 = vmatmul.mubr.f32.gmra.mrb[50].mxu1 %v17166_v60  ;;  %v13319_v60 = vpack.c.bf16 %v7022_v58, %v7021_v57  ;;  %v7471_v57 = vld [vmem:[#allocation9 + $0x348] sm:$0xff]  ;;  %v17469_v58 = vld [vmem:[#allocation2 + $0x2c] sm:$0xff] }
 0x8d7   : > { %12147 = vmatprep.mubr.msk.f32.mxu1 %vm14963_vm0, %v16983_v51 }
 0x8da   : > { %12148 = vmatmul.mubr.f32.gmra.mrb[52].mxu1 %v17171_v61  ;;  %v7023_v61 = vld [vmem:[#allocation9 + $0x2e0] sm:$0xff] }
 0x8db   : > { %12150 = vmatprep.mubr.msk.f32.mxu1 %vm14963_vm0, %v16983_v51 }
 0x8de   : > { %12151 = vmatmul.mubr.f32.gmra.mrb[54].mxu1 %v17176_v62  ;;  %v7024_v62 = vld [vmem:[#allocation9 + $0x2e8] sm:$0xff] }
 0x8df   : > { %12153 = vmatprep.mubr.msk.f32.mxu1 %vm14963_vm0, %v16983_v51 }
 0x8e2   : > { %12154 = vmatmul.mubr.f32.gmra.mrb[56].mxu1 %v17181_v63  ;;  %v6523_v63 = vld [vmem:[#allocation2 + $0x3b] sm:$0xff] }
 0x8e3   : > { %12156 = vmatprep.mubr.msk.f32.mxu1 %vm14963_vm0, %v16983_v51 }
 0x8e6   : > { %12157 = vmatmul.mubr.f32.gmra.mrb[58].mxu1 %v17186_v2  ;;  %v13322_v2 = vpack.c.bf16 %v7024_v62, %v7023_v61  ;;  %v7473_v61 = vld [vmem:[#allocation9 + $0x358] sm:$0xff]  ;;  %v17475_v62 = vld [vmem:[#allocation2 + $0x34] sm:$0xff] }
 0x8e7   : > { %12159 = vmatprep.mubr.msk.f32.mxu1 %vm14963_vm0, %v16983_v51 }
 0x8ea   : > { %12160 = vmatmul.mubr.f32.gmra.mrb[60].mxu1 %v17191_v3  ;;  %v7025_v3 = vld [vmem:[#allocation9 + $0x2f0] sm:$0xff] }
 0x8eb   : > { %12162 = vmatprep.mubr.msk.f32.mxu1 %vm14963_vm0, %v16983_v51 }
 0x8ee   : > { %12163 = vmatmul.mubr.f32.gmra.mrb[62].mxu1 %v17196_v4  ;;  %v7026_v4 = vld [vmem:[#allocation9 + $0x2f8] sm:$0xff] }
 0x8ef   : > { %12165 = vmatprep.mubr.msk.f32.mxu1 %vm14963_vm0, %v16983_v51 }
 0x8f2   : > { %12166 = vmatmul.mubr.f32.gmra.mrb[64].mxu1 %v17201_v5  ;;  %v6524_v5 = vld [vmem:[#allocation2 + $0x43] sm:$0xff] }
 0x8f3   : > { %12168 = vmatprep.mubr.msk.f32.mxu1 %vm14963_vm0, %v16983_v51 }
 0x8f6   : > { %12169 = vmatmul.mubr.f32.gmra.mrb[66].mxu1 %v17206_v25  ;;  %v13325_v25 = vpack.c.bf16 %v7026_v4, %v7025_v3  ;;  %v7475_v3 = vld [vmem:[#allocation9 + $0x368] sm:$0xff] }
 0x8f7   : > { %12171 = vmatprep.mubr.msk.f32.mxu1 %vm14963_vm0, %v16983_v51  ;;  %v17481_v4 = vld [vmem:[#allocation2 + $0x3c] sm:$0xff] }
 0x8fa   : > { %12172 = vmatmul.mubr.f32.gmra.mrb[68].mxu1 %v17211_v6  ;;  %v6525_v6 = vld [vmem:[#allocation2 + $0x4b] sm:$0xff] }
 0x8fb   : > { %12174 = vmatprep.mubr.msk.f32.mxu1 %vm14963_vm0, %v16983_v51 }
 0x8fe   : > { %12175 = vmatmul.mubr.f32.gmra.mrb[70].mxu1 %v17216_v7  ;;  %v6526_v7 = vld [vmem:[#allocation2 + $0x53] sm:$0xff] }
 0x8ff   : > { %12177 = vmatprep.mubr.msk.f32.mxu1 %vm14963_vm0, %v16983_v51 }
 0x902   : > { %12178 = vmatmul.mubr.f32.gmra.mrb[72].mxu1 %v17221_v9  ;;  %v6527_v9 = vld [vmem:[#allocation2 + $0x5b] sm:$0xff] }
 0x903   : > { %12180 = vmatprep.mubr.msk.f32.mxu1 %vm14963_vm0, %v16983_v51 }
 0x906   : > { %12181 = vmatmul.mubr.f32.gmra.mrb[74].mxu1 %v17226_v36  ;;  %v6528_v36 = vld [vmem:[#allocation2 + $0x63] sm:$0xff] }
 0x907   : > { %12183 = vmatprep.mubr.msk.f32.mxu1 %vm14963_vm0, %v16983_v51 }
 0x90a   : > { %12184 = vmatmul.mubr.f32.gmra.mrb[76].mxu1 %v17231_v13  ;;  %v6531_v13 = vld [vmem:[#allocation2 + $0x7b] sm:$0xff] }
 0x90b   : > { %12186 = vmatprep.mubr.msk.f32.mxu1 %vm14963_vm0, %v16983_v51 }
 0x90e   : > { %12187 = vmatmul.mubr.f32.gmra.mrb[78].mxu1 %v6106_v35  ;;  %v6554_v35 = vld [vmem:[#allocation2 + $0x133] sm:$0xff] }
 0x90f   : > { %12189 = vmatprep.mubr.msk.f32.mxu1 %vm14963_vm0, %v16983_v51 }
 0x912   : > { %12190 = vmatmul.mubr.f32.gmra.mrb[80].mxu1 %v6107_v39  ;;  %v6557_v39 = vld [vmem:[#allocation2 + $0x14b] sm:$0xff] }
 0x913   : > { %12224 = vmatprep.mubr.msk.f32.mxu1 %vm14963_vm0, %v16983_v51 }
 0x916   : > { %12225 = vmatmul.mubr.f32.vlgmr.msra.gmra.mrb[0].mxu1 %v6518_v44  ;;  %v17453_v44 = vld [vmem:[#allocation2] sm:$0xff] }
 0x917   : > { %13305 = vmatpush3.bf16.msra.mxu1 %v13304_v40  ;;  %12227 = vmatprep.mubr.msk.f32.mxu1 %vm14963_vm0, %v16983_v51  ;;  %v7462_v40 = vld [vmem:[#allocation9 + $0x300] sm:$0xff] }
 0x918   : > { %13306 = vmatprep.subr.bf16.mxu1 %v14962_v0 }
 0x91a   : > { %12228 = vmatmul.mubr.f32.gmra.mrb[2].mxu1 %v6519_v48  ;;  %v6969_v48 = vld [vmem:[#allocation2 + $0x14] sm:$0xff] }
 0x91b   : > { %12230 = vmatprep.mubr.msk.f32.mxu1 %vm14963_vm0, %v16983_v51  ;;  %13308 = vmatpush3.bf16.msra.mxu1 %v13307_v45  ;;  %v13328_v45 = vpack.c.bf16 %v7463_v41, %v7462_v40  ;;  %v17644_v40 = vld [vmem:[#allocation2 + $0x13c] sm:$0xff]  ;;  %v17649_v41 = vld [vmem:[#allocation2 + $0x144] sm:$0xff] }
 0x91c   : > { %13309 = vmatprep.subr.bf16.mxu1 %v14962_v0 }
 0x91e   : > { %12231 = vmatmul.mubr.f32.gmra.mrb[4].mxu1 %v6520_v52 }
 0x91f   : > { %12233 = vmatprep.mubr.msk.f32.mxu1 %vm14963_vm0, %v16983_v51  ;;  %13311 = vmatpush3.bf16.msra.mxu1 %v13310_v46  ;;  %v13331_v46 = vpack.c.bf16 %v7465_v47, %v7464_v42  ;;  %v7914_v42 = vld [vmem:[#allocation9 + $0x388] sm:$0xff] }
 0x920   : > { %13312 = vmatprep.subr.bf16.mxu1 %v14962_v0  ;;  %v17659_v47 = vld [vmem:[#allocation2 + $0x154] sm:$0xff] }
 0x922   : > { %12234 = vmatmul.mubr.f32.gmra.mrb[6].mxu1 %v6521_v55 }
 0x923   : > { %12236 = vmatprep.mubr.msk.f32.mxu1 %vm14963_vm0, %v16983_v51  ;;  %13314 = vmatpush3.bf16.msra.mxu1 %v13313_v53  ;;  %v7468_v53 = vld [vmem:[#allocation9 + $0x330] sm:$0xff] }
 0x924   : > { %13315 = vmatprep.subr.bf16.mxu1 %v14962_v0  ;;  %v13337_v55 = vpack.c.bf16 %v7469_v8, %v7468_v53  ;;  %v7919_v8 = vld [vmem:[#allocation9 + $0x3b0] sm:$0xff] }
 0x926   : > { %12237 = vmatmul.mubr.f32.gmra.mrb[8].mxu1 %v6522_v59 }
 0x927   : > { %12239 = vmatprep.mubr.msk.f32.mxu1 %vm14963_vm0, %v16983_v51  ;;  %13317 = vmatpush3.bf16.msra.mxu1 %v13316_v56  ;;  %v7470_v56 = vld [vmem:[#allocation9 + $0x340] sm:$0xff] }
 0x928   : > { %13318 = vmatprep.subr.bf16.mxu1 %v14962_v0  ;;  %v13340_v59 = vpack.c.bf16 %v7471_v57, %v7470_v56  ;;  %v7921_v56 = vld [vmem:[#allocation9 + $0x3c0] sm:$0xff]  ;;  %v7922_v57 = vld [vmem:[#allocation9 + $0x3c8] sm:$0xff] }
 0x92a   : > { %12240 = vmatmul.mubr.f32.gmra.mrb[10].mxu1 %v6523_v63 }
 0x92b   : > { %12242 = vmatprep.mubr.msk.f32.mxu1 %vm14963_vm0, %v16983_v51  ;;  %13320 = vmatpush3.bf16.msra.mxu1 %v13319_v60  ;;  %v7472_v60 = vld [vmem:[#allocation9 + $0x350] sm:$0xff] }
 0x92c   : > { %13321 = vmatprep.subr.bf16.mxu1 %v14962_v0  ;;  %v13343_v63 = vpack.c.bf16 %v7473_v61, %v7472_v60  ;;  %v7924_v60 = vld [vmem:[#allocation9 + $0x3d8] sm:$0xff] }
 0x92e   : > { %12243 = vmatmul.mubr.f32.gmra.mrb[12].mxu1 %v6524_v5 }
 0x92f   : > { %12245 = vmatprep.mubr.msk.f32.mxu1 %vm14963_vm0, %v16983_v51  ;;  %13323 = vmatpush3.bf16.msra.mxu1 %v13322_v2  ;;  %v7474_v2 = vld [vmem:[#allocation9 + $0x360] sm:$0xff] }
 0x930   : > { %13324 = vmatprep.subr.bf16.mxu1 %v14962_v0  ;;  %v13346_v5 = vpack.c.bf16 %v7475_v3, %v7474_v2  ;;  %v7927_v3 = vld [vmem:[#allocation9 + $0x3f0] sm:$0xff] }
 0x932   : > { %12246 = vmatmul.mubr.f32.gmra.mrb[14].mxu1 %v6525_v6  ;;  %v7477_v6 = vld [vmem:[#allocation9 + $0x378] sm:$0xff] }
 0x933   : > { %12248 = vmatprep.mubr.msk.f32.mxu1 %vm14963_vm0, %v16983_v51  ;;  %13326 = vmatpush3.bf16.msra.mxu1 %v13325_v25  ;;  %v7476_v25 = vld [vmem:[#allocation9 + $0x370] sm:$0xff] }
 0x934   : > { %13327 = vmatprep.subr.bf16.mxu1 %v14962_v0 }
 0x936   : > { %12249 = vmatmul.mubr.f32.gmra.mrb[16].mxu1 %v6526_v7  ;;  %v17487_v7 = vld [vmem:[#allocation2 + $0x44] sm:$0xff] }
 0x937   : > { %12251 = vmatprep.mubr.msk.f32.mxu1 %vm14963_vm0, %v16983_v51 }
 0x93a   : > { %12252 = vmatmul.mubr.f32.gmra.mrb[18].mxu1 %v6527_v9  ;;  %v13349_v9 = vpack.c.bf16 %v7477_v6, %v7476_v25  ;;  %v7459_v25 = vld [vmem:[#allocation2 + $0x15c] sm:$0xff]  ;;  %v7460_v6 = vld [vmem:[#allocation2 + $0x164] sm:$0xff] }
 0x93b   : > { %12254 = vmatprep.mubr.msk.f32.mxu1 %vm14963_vm0, %v16983_v51 }
 0x93e   : > { %12255 = vmatmul.mubr.f32.gmra.mrb[20].mxu1 %v6528_v36  ;;  %v17493_v36 = vld [vmem:[#allocation2 + $0x4c] sm:$0xff] }
 0x93f   : > { %12257 = vmatprep.mubr.msk.f32.mxu1 %vm14963_vm0, %v16983_v51 }
 0x942   : > { %12258 = vmatmul.mubr.f32.gmra.mrb[22].mxu1 %v6529_v10  ;;  %v17499_v10 = vld [vmem:[#allocation2 + $0x54] sm:$0xff] }
 0x943   : > { %12260 = vmatprep.mubr.msk.f32.mxu1 %vm14963_vm0, %v16983_v51 }
 0x946   : > { %12261 = vmatmul.mubr.f32.gmra.mrb[24].mxu1 %v6530_v11  ;;  %v17504_v11 = vld [vmem:[#allocation2 + $0x5c] sm:$0xff] }
 0x947   : > { %12263 = vmatprep.mubr.msk.f32.mxu1 %vm14963_vm0, %v16983_v51 }
 0x94a   : > { %12264 = vmatmul.mubr.f32.gmra.mrb[26].mxu1 %v6531_v13  ;;  %v17509_v13 = vld [vmem:[#allocation2 + $0x64] sm:$0xff] }
 0x94b   : > { %12266 = vmatprep.mubr.msk.f32.mxu1 %vm14963_vm0, %v16983_v51 }
 0x94e   : > { %12267 = vmatmul.mubr.f32.gmra.mrb[28].mxu1 %v6532_v14  ;;  %v17514_v14 = vld [vmem:[#allocation2 + $0x6c] sm:$0xff] }
 0x94f   : > { %12269 = vmatprep.mubr.msk.f32.mxu1 %vm14963_vm0, %v16983_v51 }
 0x952   : > { %12270 = vmatmul.mubr.f32.gmra.mrb[30].mxu1 %v6533_v15  ;;  %v17519_v15 = vld [vmem:[#allocation2 + $0x74] sm:$0xff] }
 0x953   : > { %12272 = vmatprep.mubr.msk.f32.mxu1 %vm14963_vm0, %v16983_v51 }
 0x956   : > { %12273 = vmatmul.mubr.f32.gmra.mrb[32].mxu1 %v6534_v12  ;;  %v17524_v12 = vld [vmem:[#allocation2 + $0x7c] sm:$0xff] }
 0x957   : > { %12275 = vmatprep.mubr.msk.f32.mxu1 %vm14963_vm0, %v16983_v51 }
 0x95a   : > { %12276 = vmatmul.mubr.f32.gmra.mrb[34].mxu1 %v6535_v17  ;;  %v17529_v17 = vld [vmem:[#allocation2 + $0x84] sm:$0xff] }
 0x95b   : > { %12278 = vmatprep.mubr.msk.f32.mxu1 %vm14963_vm0, %v16983_v51 }
 0x95e   : > { %12279 = vmatmul.mubr.f32.gmra.mrb[36].mxu1 %v6536_v18  ;;  %v17534_v18 = vld [vmem:[#allocation2 + $0x8c] sm:$0xff] }
 0x95f   : > { %12281 = vmatprep.mubr.msk.f32.mxu1 %vm14963_vm0, %v16983_v51 }
 0x962   : > { %12282 = vmatmul.mubr.f32.gmra.mrb[38].mxu1 %v6537_v16  ;;  %v17539_v16 = vld [vmem:[#allocation2 + $0x94] sm:$0xff] }
 0x963   : > { %12284 = vmatprep.mubr.msk.f32.mxu1 %vm14963_vm0, %v16983_v51 }
 0x966   : > { %12285 = vmatmul.mubr.f32.gmra.mrb[40].mxu1 %v6538_v19  ;;  %v17544_v19 = vld [vmem:[#allocation2 + $0x9c] sm:$0xff] }
 0x967   : > { %12287 = vmatprep.mubr.msk.f32.mxu1 %vm14963_vm0, %v16983_v51 }
 0x96a   : > { %12288 = vmatmul.mubr.f32.gmra.mrb[42].mxu1 %v6539_v21  ;;  %v17549_v21 = vld [vmem:[#allocation2 + $0xa4] sm:$0xff] }
 0x96b   : > { %12290 = vmatprep.mubr.msk.f32.mxu1 %vm14963_vm0, %v16983_v51 }
 0x96e   : > { %12291 = vmatmul.mubr.f32.gmra.mrb[44].mxu1 %v6540_v20  ;;  %v17554_v20 = vld [vmem:[#allocation2 + $0xac] sm:$0xff] }
 0x96f   : > { %12293 = vmatprep.mubr.msk.f32.mxu1 %vm14963_vm0, %v16983_v51 }
 0x972   : > { %12294 = vmatmul.mubr.f32.gmra.mrb[46].mxu1 %v6541_v22  ;;  %v17559_v22 = vld [vmem:[#allocation2 + $0xb4] sm:$0xff] }
 0x973   : > { %12296 = vmatprep.mubr.msk.f32.mxu1 %vm14963_vm0, %v16983_v51 }
 0x976   : > { %12297 = vmatmul.mubr.f32.gmra.mrb[48].mxu1 %v6542_v23  ;;  %v17564_v23 = vld [vmem:[#allocation2 + $0xbc] sm:$0xff] }
 0x977   : > { %12299 = vmatprep.mubr.msk.f32.mxu1 %vm14963_vm0, %v16983_v51 }
 0x97a   : > { %12300 = vmatmul.mubr.f32.gmra.mrb[50].mxu1 %v6543_v24  ;;  %v17569_v24 = vld [vmem:[#allocation2 + $0xc4] sm:$0xff] }
 0x97b   : > { %12302 = vmatprep.mubr.msk.f32.mxu1 %vm14963_vm0, %v16983_v51 }
 0x97e   : > { %12303 = vmatmul.mubr.f32.gmra.mrb[52].mxu1 %v6544_v26  ;;  %v17574_v26 = vld [vmem:[#allocation2 + $0xcc] sm:$0xff] }
 0x97f   : > { %12305 = vmatprep.mubr.msk.f32.mxu1 %vm14963_vm0, %v16983_v51 }
 0x982   : > { %12306 = vmatmul.mubr.f32.gmra.mrb[54].mxu1 %v6545_v28  ;;  %v17579_v28 = vld [vmem:[#allocation2 + $0xd4] sm:$0xff] }
 0x983   : > { %12308 = vmatprep.mubr.msk.f32.mxu1 %vm14963_vm0, %v16983_v51 }
 0x986   : > { %12309 = vmatmul.mubr.f32.gmra.mrb[56].mxu1 %v6546_v1  ;;  %v17584_v1 = vld [vmem:[#allocation2 + $0xdc] sm:$0xff] }
 0x987   : > { %12311 = vmatprep.mubr.msk.f32.mxu1 %vm14963_vm0, %v16983_v51 }
 0x98a   : > { %12312 = vmatmul.mubr.f32.gmra.mrb[58].mxu1 %v6547_v27  ;;  %v17589_v27 = vld [vmem:[#allocation2 + $0xe4] sm:$0xff] }
 0x98b   : > { %12314 = vmatprep.mubr.msk.f32.mxu1 %vm14963_vm0, %v16983_v51 }
 0x98e   : > { %12315 = vmatmul.mubr.f32.gmra.mrb[60].mxu1 %v6548_v29  ;;  %v17594_v29 = vld [vmem:[#allocation2 + $0xec] sm:$0xff] }
 0x98f   : > { %12317 = vmatprep.mubr.msk.f32.mxu1 %vm14963_vm0, %v16983_v51 }
 0x992   : > { %12318 = vmatmul.mubr.f32.gmra.mrb[62].mxu1 %v6549_v30  ;;  %v17599_v30 = vld [vmem:[#allocation2 + $0xf4] sm:$0xff] }
 0x993   : > { %12320 = vmatprep.mubr.msk.f32.mxu1 %vm14963_vm0, %v16983_v51 }
 0x996   : > { %12321 = vmatmul.mubr.f32.gmra.mrb[64].mxu1 %v6550_v31  ;;  %v17604_v31 = vld [vmem:[#allocation2 + $0xfc] sm:$0xff] }
 0x997   : > { %12323 = vmatprep.mubr.msk.f32.mxu1 %vm14963_vm0, %v16983_v51 }
 0x99a   : > { %12324 = vmatmul.mubr.f32.gmra.mrb[66].mxu1 %v6551_v32  ;;  %v17609_v32 = vld [vmem:[#allocation2 + $0x104] sm:$0xff] }
 0x99b   : > { %12326 = vmatprep.mubr.msk.f32.mxu1 %vm14963_vm0, %v16983_v51 }
 0x99e   : > { %12327 = vmatmul.mubr.f32.gmra.mrb[68].mxu1 %v6552_v33  ;;  %v17614_v33 = vld [vmem:[#allocation2 + $0x10c] sm:$0xff] }
 0x99f   : > { %12329 = vmatprep.mubr.msk.f32.mxu1 %vm14963_vm0, %v16983_v51 }
 0x9a2   : > { %12330 = vmatmul.mubr.f32.gmra.mrb[70].mxu1 %v6553_v34  ;;  %v17619_v34 = vld [vmem:[#allocation2 + $0x114] sm:$0xff] }
 0x9a3   : > { %12332 = vmatprep.mubr.msk.f32.mxu1 %vm14963_vm0, %v16983_v51 }
 0x9a6   : > { %12333 = vmatmul.mubr.f32.gmra.mrb[72].mxu1 %v6554_v35  ;;  %v17624_v35 = vld [vmem:[#allocation2 + $0x11c] sm:$0xff] }
 0x9a7   : > { %12335 = vmatprep.mubr.msk.f32.mxu1 %vm14963_vm0, %v16983_v51 }
 0x9aa   : > { %12336 = vmatmul.mubr.f32.gmra.mrb[74].mxu1 %v6555_v37  ;;  %v17629_v37 = vld [vmem:[#allocation2 + $0x124] sm:$0xff] }
 0x9ab   : > { %12338 = vmatprep.mubr.msk.f32.mxu1 %vm14963_vm0, %v16983_v51 }
 0x9ae   : > { %12339 = vmatmul.mubr.f32.gmra.mrb[76].mxu1 %v6556_v38  ;;  %v17634_v38 = vld [vmem:[#allocation2 + $0x12c] sm:$0xff] }
 0x9af   : > { %12341 = vmatprep.mubr.msk.f32.mxu1 %vm14963_vm0, %v16983_v51 }
 0x9b2   : > { %12342 = vmatmul.mubr.f32.gmra.mrb[78].mxu1 %v6557_v39  ;;  %v17639_v39 = vld [vmem:[#allocation2 + $0x134] sm:$0xff] }
 0x9b3   : > { %12344 = vmatprep.mubr.msk.f32.mxu1 %vm14963_vm0, %v16983_v51  ;;  %v7466_v51 = vld [vmem:[#allocation9 + $0x320] sm:$0xff] }
 0x9b4   : > { %v13334_v52 = vpack.c.bf16 %v7467_v49, %v7466_v51  ;;  %v7916_v51 = vld [vmem:[#allocation9 + $0x398] sm:$0xff] }
 0x9b6   : > { %12345 = vmatmul.mubr.f32.gmra.mrb[80].mxu1 %v6558_v43  ;;  %v17654_v43 = vld [vmem:[#allocation2 + $0x14c] sm:$0xff] }
 0x9b7   : > { %12379 = vmatprep.mubr.msk.f32.mxu1 %vm14963_vm0, %v17453_v44 }
 0x9ba   : > { %12380 = vmatmul.mubr.f32.vlgmr.msra.gmra.mrb[0].mxu1 %v6969_v48 }
 0x9bb   : > { %13329 = vmatpush3.bf16.msra.mxu1 %v13328_v45  ;;  %12382 = vmatprep.mubr.msk.f32.mxu1 %vm14963_vm0, %v17453_v44  ;;  %v7913_v45 = vld [vmem:[#allocation9 + $0x380] sm:$0xff] }
 0x9bc   : > { %13330 = vmatprep.subr.bf16.mxu1 %v14962_v0  ;;  %v13352_v48 = vpack.c.bf16 %v7914_v42, %v7913_v45  ;;  %v7883_v45 = vld [vmem:[#allocation2 + $0x85] sm:$0xff]  ;;  %v7884_v42 = vld [vmem:[#allocation2 + $0x8d] sm:$0xff] }
 0x9be   : > { %12383 = vmatmul.mubr.f32.gmra.mrb[2].mxu1 %v6970_v50  ;;  %v7917_v50 = vld [vmem:[#allocation9 + $0x3a0] sm:$0xff] }
 0x9bf   : > { %12385 = vmatprep.mubr.msk.f32.mxu1 %vm14963_vm0, %v17453_v44  ;;  %13332 = vmatpush3.bf16.msra.mxu1 %v13331_v46  ;;  %v7915_v46 = vld [vmem:[#allocation9 + $0x390] sm:$0xff] }
 0x9c0   : > { %13333 = vmatprep.subr.bf16.mxu1 %v14962_v0  ;;  %v13355_v49 = vpack.c.bf16 %v7916_v51, %v7915_v46  ;;  %v7887_v46 = vld [vmem:[#allocation2 + $0xa5] sm:$0xff]  ;;  %v7888_v51 = vld [vmem:[#allocation2 + $0xad] sm:$0xff] }
 0x9c2   : > { %12386 = vmatmul.mubr.f32.gmra.mrb[4].mxu1 %v17463_v54 }
 0x9c3   : > { %12388 = vmatprep.mubr.msk.f32.mxu1 %vm14963_vm0, %v17453_v44  ;;  %13335 = vmatpush3.bf16.msra.mxu1 %v13334_v52  ;;  %v7918_v52 = vld [vmem:[#allocation9 + $0x3a8] sm:$0xff] }
 0x9c4   : > { %13336 = vmatprep.subr.bf16.mxu1 %v14962_v0  ;;  %v13358_v53 = vpack.c.bf16 %v7918_v52, %v7917_v50  ;;  %v7890_v50 = vld [vmem:[#allocation2 + $0xbd] sm:$0xff]  ;;  %v7891_v52 = vld [vmem:[#allocation2 + $0xc5] sm:$0xff] }
 0x9c6   : > { %12389 = vmatmul.mubr.f32.gmra.mrb[6].mxu1 %v17469_v58 }
 0x9c7   : > { %12391 = vmatprep.mubr.msk.f32.mxu1 %vm14963_vm0, %v17453_v44  ;;  %13338 = vmatpush3.bf16.msra.mxu1 %v13337_v55 }
 0x9c8   : > { %13339 = vmatprep.subr.bf16.mxu1 %v14962_v0 }
 0x9ca   : > { %12392 = vmatmul.mubr.f32.gmra.mrb[8].mxu1 %v17475_v62 }
 0x9cb   : > { %12394 = vmatprep.mubr.msk.f32.mxu1 %vm14963_vm0, %v17453_v44  ;;  %13341 = vmatpush3.bf16.msra.mxu1 %v13340_v59  ;;  %v7923_v59 = vld [vmem:[#allocation9 + $0x3d0] sm:$0xff] }
 0x9cc   : > { %13342 = vmatprep.subr.bf16.mxu1 %v14962_v0  ;;  %v13367_v61 = vpack.c.bf16 %v7924_v60, %v7923_v59  ;;  %v7899_v59 = vld [vmem:[#allocation2 + $0x105] sm:$0xff]  ;;  %v7900_v60 = vld [vmem:[#allocation2 + $0x10d] sm:$0xff] }
 0x9ce   : > { %12395 = vmatmul.mubr.f32.gmra.mrb[10].mxu1 %v17481_v4 }
 0x9cf   : > { %12397 = vmatprep.mubr.msk.f32.mxu1 %vm14963_vm0, %v17453_v44  ;;  %13344 = vmatpush3.bf16.msra.mxu1 %v13343_v63  ;;  %v7926_v63 = vld [vmem:[#allocation9 + $0x3e8] sm:$0xff] }
 0x9d0   : > { %13345 = vmatprep.subr.bf16.mxu1 %v14962_v0 }
 0x9d2   : > { %12398 = vmatmul.mubr.f32.gmra.mrb[12].mxu1 %v17487_v7 }
 0x9d3   : > { %12400 = vmatprep.mubr.msk.f32.mxu1 %vm14963_vm0, %v17453_v44  ;;  %13347 = vmatpush3.bf16.msra.mxu1 %v13346_v5 }
 0x9d4   : > { %13348 = vmatprep.subr.bf16.mxu1 %v14962_v0 }
 0x9d6   : > { %12401 = vmatmul.mubr.f32.gmra.mrb[14].mxu1 %v17493_v36 }
 0x9d7   : > { %12403 = vmatprep.mubr.msk.f32.mxu1 %vm14963_vm0, %v17453_v44  ;;  %13350 = vmatpush3.bf16.msra.mxu1 %v13349_v9  ;;  %v8365_v9 = vld [vmem:[#allocation9 + $0x408] sm:$0xff] }
 0x9d8   : > { %13351 = vmatprep.subr.bf16.mxu1 %v14962_v0 }
 0x9da   : > { %12404 = vmatmul.mubr.f32.gmra.mrb[16].mxu1 %v17499_v10 }
 0x9db   : > { %12406 = vmatprep.mubr.msk.f32.mxu1 %vm14963_vm0, %v17453_v44 }
 0x9de   : > { %12407 = vmatmul.mubr.f32.gmra.mrb[18].mxu1 %v17504_v11 }
 0x9df   : > { %12409 = vmatprep.mubr.msk.f32.mxu1 %vm14963_vm0, %v17453_v44 }
 0x9e2   : > { %12410 = vmatmul.mubr.f32.gmra.mrb[20].mxu1 %v17509_v13 }
 0x9e3   : > { %12412 = vmatprep.mubr.msk.f32.mxu1 %vm14963_vm0, %v17453_v44 }
 0x9e6   : > { %12413 = vmatmul.mubr.f32.gmra.mrb[22].mxu1 %v17514_v14 }
 0x9e7   : > { %12415 = vmatprep.mubr.msk.f32.mxu1 %vm14963_vm0, %v17453_v44 }
 0x9ea   : > { %12416 = vmatmul.mubr.f32.gmra.mrb[24].mxu1 %v17519_v15 }
 0x9eb   : > { %12418 = vmatprep.mubr.msk.f32.mxu1 %vm14963_vm0, %v17453_v44 }
 0x9ee   : > { %12419 = vmatmul.mubr.f32.gmra.mrb[26].mxu1 %v17524_v12 }
 0x9ef   : > { %12421 = vmatprep.mubr.msk.f32.mxu1 %vm14963_vm0, %v17453_v44 }
 0x9f2   : > { %12422 = vmatmul.mubr.f32.gmra.mrb[28].mxu1 %v17529_v17 }
 0x9f3   : > { %12424 = vmatprep.mubr.msk.f32.mxu1 %vm14963_vm0, %v17453_v44 }
 0x9f6   : > { %12425 = vmatmul.mubr.f32.gmra.mrb[30].mxu1 %v17534_v18 }
 0x9f7   : > { %12427 = vmatprep.mubr.msk.f32.mxu1 %vm14963_vm0, %v17453_v44 }
 0x9fa   : > { %12428 = vmatmul.mubr.f32.gmra.mrb[32].mxu1 %v17539_v16 }
 0x9fb   : > { %12430 = vmatprep.mubr.msk.f32.mxu1 %vm14963_vm0, %v17453_v44 }
 0x9fe   : > { %12431 = vmatmul.mubr.f32.gmra.mrb[34].mxu1 %v17544_v19 }
 0x9ff   : > { %12433 = vmatprep.mubr.msk.f32.mxu1 %vm14963_vm0, %v17453_v44 }
 0xa02   : > { %12434 = vmatmul.mubr.f32.gmra.mrb[36].mxu1 %v17549_v21 }
 0xa03   : > { %12436 = vmatprep.mubr.msk.f32.mxu1 %vm14963_vm0, %v17453_v44 }
 0xa06   : > { %12437 = vmatmul.mubr.f32.gmra.mrb[38].mxu1 %v17554_v20 }
 0xa07   : > { %12439 = vmatprep.mubr.msk.f32.mxu1 %vm14963_vm0, %v17453_v44 }
 0xa0a   : > { %12440 = vmatmul.mubr.f32.gmra.mrb[40].mxu1 %v17559_v22 }
 0xa0b   : > { %12442 = vmatprep.mubr.msk.f32.mxu1 %vm14963_vm0, %v17453_v44 }
 0xa0e   : > { %12443 = vmatmul.mubr.f32.gmra.mrb[42].mxu1 %v17564_v23 }
 0xa0f   : > { %12445 = vmatprep.mubr.msk.f32.mxu1 %vm14963_vm0, %v17453_v44 }
 0xa12   : > { %12446 = vmatmul.mubr.f32.gmra.mrb[44].mxu1 %v17569_v24 }
 0xa13   : > { %12448 = vmatprep.mubr.msk.f32.mxu1 %vm14963_vm0, %v17453_v44 }
 0xa16   : > { %12449 = vmatmul.mubr.f32.gmra.mrb[46].mxu1 %v17574_v26 }
 0xa17   : > { %12451 = vmatprep.mubr.msk.f32.mxu1 %vm14963_vm0, %v17453_v44 }
 0xa1a   : > { %12452 = vmatmul.mubr.f32.gmra.mrb[48].mxu1 %v17579_v28 }
 0xa1b   : > { %12454 = vmatprep.mubr.msk.f32.mxu1 %vm14963_vm0, %v17453_v44 }
 0xa1e   : > { %12455 = vmatmul.mubr.f32.gmra.mrb[50].mxu1 %v17584_v1 }
 0xa1f   : > { %12457 = vmatprep.mubr.msk.f32.mxu1 %vm14963_vm0, %v17453_v44 }
 0xa22   : > { %12458 = vmatmul.mubr.f32.gmra.mrb[52].mxu1 %v17589_v27 }
 0xa23   : > { %12460 = vmatprep.mubr.msk.f32.mxu1 %vm14963_vm0, %v17453_v44 }
 0xa26   : > { %12461 = vmatmul.mubr.f32.gmra.mrb[54].mxu1 %v17594_v29 }
 0xa27   : > { %12463 = vmatprep.mubr.msk.f32.mxu1 %vm14963_vm0, %v17453_v44 }
 0xa2a   : > { %12464 = vmatmul.mubr.f32.gmra.mrb[56].mxu1 %v17599_v30 }
 0xa2b   : > { %12466 = vmatprep.mubr.msk.f32.mxu1 %vm14963_vm0, %v17453_v44 }
 0xa2e   : > { %12467 = vmatmul.mubr.f32.gmra.mrb[58].mxu1 %v17604_v31 }
 0xa2f   : > { %12469 = vmatprep.mubr.msk.f32.mxu1 %vm14963_vm0, %v17453_v44 }
 0xa32   : > { %12470 = vmatmul.mubr.f32.gmra.mrb[60].mxu1 %v17609_v32 }
 0xa33   : > { %12472 = vmatprep.mubr.msk.f32.mxu1 %vm14963_vm0, %v17453_v44 }
 0xa36   : > { %12473 = vmatmul.mubr.f32.gmra.mrb[62].mxu1 %v17614_v33 }
 0xa37   : > { %12475 = vmatprep.mubr.msk.f32.mxu1 %vm14963_vm0, %v17453_v44 }
 0xa3a   : > { %12476 = vmatmul.mubr.f32.gmra.mrb[64].mxu1 %v17619_v34 }
 0xa3b   : > { %12478 = vmatprep.mubr.msk.f32.mxu1 %vm14963_vm0, %v17453_v44 }
 0xa3e   : > { %12479 = vmatmul.mubr.f32.gmra.mrb[66].mxu1 %v17624_v35 }
 0xa3f   : > { %12481 = vmatprep.mubr.msk.f32.mxu1 %vm14963_vm0, %v17453_v44 }
 0xa42   : > { %12482 = vmatmul.mubr.f32.gmra.mrb[68].mxu1 %v17629_v37 }
 0xa43   : > { %12484 = vmatprep.mubr.msk.f32.mxu1 %vm14963_vm0, %v17453_v44 }
 0xa46   : > { %12485 = vmatmul.mubr.f32.gmra.mrb[70].mxu1 %v17634_v38 }
 0xa47   : > { %12487 = vmatprep.mubr.msk.f32.mxu1 %vm14963_vm0, %v17453_v44 }
 0xa4a   : > { %12488 = vmatmul.mubr.f32.gmra.mrb[72].mxu1 %v17639_v39 }
 0xa4b   : > { %12490 = vmatprep.mubr.msk.f32.mxu1 %vm14963_vm0, %v17453_v44 }
 0xa4e   : > { %12491 = vmatmul.mubr.f32.gmra.mrb[74].mxu1 %v17644_v40 }
 0xa4f   : > { %12493 = vmatprep.mubr.msk.f32.mxu1 %vm14963_vm0, %v17453_v44 }
 0xa52   : > { %12494 = vmatmul.mubr.f32.gmra.mrb[76].mxu1 %v17649_v41 }
 0xa53   : > { %12496 = vmatprep.mubr.msk.f32.mxu1 %vm14963_vm0, %v17453_v44 }
 0xa56   : > { %12497 = vmatmul.mubr.f32.gmra.mrb[78].mxu1 %v17654_v43 }
 0xa57   : > { %12499 = vmatprep.mubr.msk.f32.mxu1 %vm14963_vm0, %v17453_v44 }
 0xa5a   : > { %12500 = vmatmul.mubr.f32.gmra.mrb[80].mxu1 %v17659_v47 }
 0xa5b   : > { %12534 = vmatprep.mubr.msk.f32.mxu1 %vm14963_vm0, %v17453_v44 }
 0xa5e   : > { %12535 = vmatmul.mubr.f32.vlgmr.msra.gmra.mrb[0].mxu1 %v17463_v54  ;;  %v7920_v54 = vld [vmem:[#allocation9 + $0x3b8] sm:$0xff] }
 0xa5f   : > { %13353 = vmatpush3.bf16.msra.mxu1 %v13352_v48  ;;  %12537 = vmatprep.mubr.msk.f32.mxu1 %vm14963_vm0, %v17453_v44  ;;  %v13361_v55 = vpack.c.bf16 %v7920_v54, %v7919_v8  ;;  %v7886_v48 = vld [vmem:[#allocation2 + $0x9d] sm:$0xff]  ;;  %v7893_v8 = vld [vmem:[#allocation2 + $0xd5] sm:$0xff] }
 0xa60   : > { %13354 = vmatprep.subr.bf16.mxu1 %v14962_v0  ;;  %v7894_v54 = vld [vmem:[#allocation2 + $0xdd] sm:$0xff] }
 0xa62   : > { %12538 = vmatmul.mubr.f32.gmra.mrb[2].mxu1 %v17469_v58  ;;  %v13364_v58 = vpack.c.bf16 %v7922_v57, %v7921_v56  ;;  %v7896_v56 = vld [vmem:[#allocation2 + $0xed] sm:$0xff]  ;;  %v7897_v57 = vld [vmem:[#allocation2 + $0xf5] sm:$0xff] }
 0xa63   : > { %12540 = vmatprep.mubr.msk.f32.mxu1 %vm14963_vm0, %v17453_v44  ;;  %13356 = vmatpush3.bf16.msra.mxu1 %v13355_v49  ;;  %v7889_v49 = vld [vmem:[#allocation2 + $0xb5] sm:$0xff] }
 0xa64   : > { %13357 = vmatprep.subr.bf16.mxu1 %v14962_v0 }
 0xa66   : > { %12541 = vmatmul.mubr.f32.gmra.mrb[4].mxu1 %v17475_v62  ;;  %v7925_v62 = vld [vmem:[#allocation9 + $0x3e0] sm:$0xff] }
 0xa67   : > { %12543 = vmatprep.mubr.msk.f32.mxu1 %vm14963_vm0, %v17453_v44  ;;  %13359 = vmatpush3.bf16.msra.mxu1 %v13358_v53  ;;  %v13370_v2 = vpack.c.bf16 %v7926_v63, %v7925_v62  ;;  %v7892_v53 = vld [vmem:[#allocation2 + $0xcd] sm:$0xff]  ;;  %v7902_v62 = vld [vmem:[#allocation2 + $0x11d] sm:$0xff]  ;;  %v7903_v63 = vld [vmem:[#allocation2 + $0x125] sm:$0xff] }
 0xa68   : > { %13360 = vmatprep.subr.bf16.mxu1 %v14962_v0 }
 0xa6a   : > { %12544 = vmatmul.mubr.f32.gmra.mrb[6].mxu1 %v17481_v4  ;;  %v7928_v4 = vld [vmem:[#allocation9 + $0x3f8] sm:$0xff] }
 0xa6b   : > { %12546 = vmatprep.mubr.msk.f32.mxu1 %vm14963_vm0, %v17453_v44  ;;  %13362 = vmatpush3.bf16.msra.mxu1 %v13361_v55  ;;  %v13373_v5 = vpack.c.bf16 %v7928_v4, %v7927_v3  ;;  %v7895_v55 = vld [vmem:[#allocation2 + $0xe5] sm:$0xff]  ;;  %v7905_v3 = vld [vmem:[#allocation2 + $0x135] sm:$0xff]  ;;  %v7906_v4 = vld [vmem:[#allocation2 + $0x13d] sm:$0xff] }
 0xa6c   : > { %13363 = vmatprep.subr.bf16.mxu1 %v14962_v0 }
 0xa6e   : > { %12547 = vmatmul.mubr.f32.gmra.mrb[8].mxu1 %v17487_v7  ;;  %v8364_v7 = vld [vmem:[#allocation9 + $0x400] sm:$0xff] }
 0xa6f   : > { %12549 = vmatprep.mubr.msk.f32.mxu1 %vm14963_vm0, %v17453_v44  ;;  %13365 = vmatpush3.bf16.msra.mxu1 %v13364_v58  ;;  %v7898_v58 = vld [vmem:[#allocation2 + $0xfd] sm:$0xff] }
 0xa70   : > { %13366 = vmatprep.subr.bf16.mxu1 %v14962_v0 }
 0xa72   : > { %12550 = vmatmul.mubr.f32.gmra.mrb[10].mxu1 %v17493_v36  ;;  %v13376_v36 = vpack.c.bf16 %v8365_v9, %v8364_v7  ;;  %v7910_v7 = vld [vmem:[#allocation2 + $0x15d] sm:$0xff]  ;;  %v7911_v9 = vld [vmem:[#allocation2 + $0x165] sm:$0xff] }
 0xa73   : > { %12552 = vmatprep.mubr.msk.f32.mxu1 %vm14963_vm0, %v17453_v44  ;;  %13368 = vmatpush3.bf16.msra.mxu1 %v13367_v61  ;;  %v7901_v61 = vld [vmem:[#allocation2 + $0x115] sm:$0xff] }
 0xa74   : > { %13369 = vmatprep.subr.bf16.mxu1 %v14962_v0 }
 0xa76   : > { %12553 = vmatmul.mubr.f32.gmra.mrb[12].mxu1 %v17499_v10  ;;  %v8366_v10 = vld [vmem:[#allocation9 + $0x410] sm:$0xff] }
 0xa77   : > { %12555 = vmatprep.mubr.msk.f32.mxu1 %vm14963_vm0, %v17453_v44  ;;  %13371 = vmatpush3.bf16.msra.mxu1 %v13370_v2  ;;  %v7904_v2 = vld [vmem:[#allocation2 + $0x12d] sm:$0xff] }
 0xa78   : > { %13372 = vmatprep.subr.bf16.mxu1 %v14962_v0 }
 0xa7a   : > { %12556 = vmatmul.mubr.f32.gmra.mrb[14].mxu1 %v17504_v11  ;;  %v8367_v11 = vld [vmem:[#allocation9 + $0x418] sm:$0xff] }
 0xa7b   : > { %12558 = vmatprep.mubr.msk.f32.mxu1 %vm14963_vm0, %v17453_v44  ;;  %13374 = vmatpush3.bf16.msra.mxu1 %v13373_v5  ;;  %v7907_v5 = vld [vmem:[#allocation2 + $0x145] sm:$0xff] }
 0xa7c   : > { %13375 = vmatprep.subr.bf16.mxu1 %v14962_v0 }
 0xa7e   : > { %12559 = vmatmul.mubr.f32.gmra.mrb[16].mxu1 %v17509_v13  ;;  %v7871_v13 = vld [vmem:[#allocation2 + $0x25] sm:$0xff] }
 0xa7f   : > { %12561 = vmatprep.mubr.msk.f32.mxu1 %vm14963_vm0, %v17453_v44 }
 0xa82   : > { %12562 = vmatmul.mubr.f32.gmra.mrb[18].mxu1 %v17514_v14  ;;  %v13379_v14 = vpack.c.bf16 %v8367_v11, %v8366_v10  ;;  %v8323_v10 = vld [vmem:[#allocation2 + $0x2e] sm:$0xff]  ;;  %v8324_v11 = vld [vmem:[#allocation2 + $0x36] sm:$0xff] }
 0xa83   : > { %12564 = vmatprep.mubr.msk.f32.mxu1 %vm14963_vm0, %v17453_v44 }
 0xa86   : > { %12565 = vmatmul.mubr.f32.gmra.mrb[20].mxu1 %v17519_v15  ;;  %v8368_v15 = vld [vmem:[#allocation9 + $0x420] sm:$0xff] }
 0xa87   : > { %12567 = vmatprep.mubr.msk.f32.mxu1 %vm14963_vm0, %v17453_v44 }
 0xa8a   : > { %12568 = vmatmul.mubr.f32.gmra.mrb[22].mxu1 %v17524_v12  ;;  %v8369_v12 = vld [vmem:[#allocation9 + $0x428] sm:$0xff] }
 0xa8b   : > { %12570 = vmatprep.mubr.msk.f32.mxu1 %vm14963_vm0, %v17453_v44 }
 0xa8e   : > { %12571 = vmatmul.mubr.f32.gmra.mrb[24].mxu1 %v17529_v17  ;;  %v7872_v17 = vld [vmem:[#allocation2 + $0x2d] sm:$0xff] }
 0xa8f   : > { %12573 = vmatprep.mubr.msk.f32.mxu1 %vm14963_vm0, %v17453_v44 }
 0xa92   : > { %12574 = vmatmul.mubr.f32.gmra.mrb[26].mxu1 %v17534_v18  ;;  %v13382_v18 = vpack.c.bf16 %v8369_v12, %v8368_v15  ;;  %v8327_v15 = vld [vmem:[#allocation2 + $0x4e] sm:$0xff]  ;;  %v8328_v12 = vld [vmem:[#allocation2 + $0x56] sm:$0xff] }
 0xa93   : > { %12576 = vmatprep.mubr.msk.f32.mxu1 %vm14963_vm0, %v17453_v44 }
 0xa96   : > { %12577 = vmatmul.mubr.f32.gmra.mrb[28].mxu1 %v17539_v16  ;;  %v8370_v16 = vld [vmem:[#allocation9 + $0x430] sm:$0xff] }
 0xa97   : > { %12579 = vmatprep.mubr.msk.f32.mxu1 %vm14963_vm0, %v17453_v44 }
 0xa9a   : > { %12580 = vmatmul.mubr.f32.gmra.mrb[30].mxu1 %v17544_v19  ;;  %v8371_v19 = vld [vmem:[#allocation9 + $0x438] sm:$0xff] }
 0xa9b   : > { %12582 = vmatprep.mubr.msk.f32.mxu1 %vm14963_vm0, %v17453_v44 }
 0xa9e   : > { %12583 = vmatmul.mubr.f32.gmra.mrb[32].mxu1 %v17549_v21  ;;  %v7873_v21 = vld [vmem:[#allocation2 + $0x35] sm:$0xff] }
 0xa9f   : > { %12585 = vmatprep.mubr.msk.f32.mxu1 %vm14963_vm0, %v17453_v44 }
 0xaa2   : > { %12586 = vmatmul.mubr.f32.gmra.mrb[34].mxu1 %v17554_v20  ;;  %v13385_v20 = vpack.c.bf16 %v8371_v19, %v8370_v16  ;;  %v8331_v16 = vld [vmem:[#allocation2 + $0x6e] sm:$0xff]  ;;  %v8332_v19 = vld [vmem:[#allocation2 + $0x76] sm:$0xff] }
 0xaa3   : > { %12588 = vmatprep.mubr.msk.f32.mxu1 %vm14963_vm0, %v17453_v44 }
 0xaa6   : > { %12589 = vmatmul.mubr.f32.gmra.mrb[36].mxu1 %v17559_v22  ;;  %v8372_v22 = vld [vmem:[#allocation9 + $0x440] sm:$0xff] }
 0xaa7   : > { %12591 = vmatprep.mubr.msk.f32.mxu1 %vm14963_vm0, %v17453_v44 }
 0xaaa   : > { %12592 = vmatmul.mubr.f32.gmra.mrb[38].mxu1 %v17564_v23  ;;  %v8373_v23 = vld [vmem:[#allocation9 + $0x448] sm:$0xff] }
 0xaab   : > { %12594 = vmatprep.mubr.msk.f32.mxu1 %vm14963_vm0, %v17453_v44 }
 0xaae   : > { %12595 = vmatmul.mubr.f32.gmra.mrb[40].mxu1 %v17569_v24  ;;  %v7874_v24 = vld [vmem:[#allocation2 + $0x3d] sm:$0xff] }
 0xaaf   : > { %12597 = vmatprep.mubr.msk.f32.mxu1 %vm14963_vm0, %v17453_v44 }
 0xab2   : > { %12598 = vmatmul.mubr.f32.gmra.mrb[42].mxu1 %v17574_v26  ;;  %v13388_v26 = vpack.c.bf16 %v8373_v23, %v8372_v22  ;;  %v8335_v22 = vld [vmem:[#allocation2 + $0x8e] sm:$0xff]  ;;  %v8336_v23 = vld [vmem:[#allocation2 + $0x96] sm:$0xff] }
 0xab3   : > { %12600 = vmatprep.mubr.msk.f32.mxu1 %vm14963_vm0, %v17453_v44 }
 0xab6   : > { %12601 = vmatmul.mubr.f32.gmra.mrb[44].mxu1 %v17579_v28  ;;  %v8374_v28 = vld [vmem:[#allocation9 + $0x450] sm:$0xff] }
 0xab7   : > { %12603 = vmatprep.mubr.msk.f32.mxu1 %vm14963_vm0, %v17453_v44 }
 0xaba   : > { %12604 = vmatmul.mubr.f32.gmra.mrb[46].mxu1 %v17584_v1  ;;  %v8375_v1 = vld [vmem:[#allocation9 + $0x458] sm:$0xff] }
 0xabb   : > { %12606 = vmatprep.mubr.msk.f32.mxu1 %vm14963_vm0, %v17453_v44 }
 0xabe   : > { %12607 = vmatmul.mubr.f32.gmra.mrb[48].mxu1 %v17589_v27  ;;  %v7875_v27 = vld [vmem:[#allocation2 + $0x45] sm:$0xff] }
 0xabf   : > { %12609 = vmatprep.mubr.msk.f32.mxu1 %vm14963_vm0, %v17453_v44 }
 0xac2   : > { %12610 = vmatmul.mubr.f32.gmra.mrb[50].mxu1 %v17594_v29  ;;  %v13391_v29 = vpack.c.bf16 %v8375_v1, %v8374_v28  ;;  %v8339_v28 = vld [vmem:[#allocation2 + $0xae] sm:$0xff]  ;;  %v8340_v1 = vld [vmem:[#allocation2 + $0xb6] sm:$0xff] }
 0xac3   : > { %12612 = vmatprep.mubr.msk.f32.mxu1 %vm14963_vm0, %v17453_v44 }
 0xac6   : > { %12613 = vmatmul.mubr.f32.gmra.mrb[52].mxu1 %v17599_v30  ;;  %v8376_v30 = vld [vmem:[#allocation9 + $0x460] sm:$0xff] }
 0xac7   : > { %12615 = vmatprep.mubr.msk.f32.mxu1 %vm14963_vm0, %v17453_v44 }
 0xaca   : > { %12616 = vmatmul.mubr.f32.gmra.mrb[54].mxu1 %v17604_v31  ;;  %v8377_v31 = vld [vmem:[#allocation9 + $0x468] sm:$0xff] }
 0xacb   : > { %12618 = vmatprep.mubr.msk.f32.mxu1 %vm14963_vm0, %v17453_v44 }
 0xace   : > { %12619 = vmatmul.mubr.f32.gmra.mrb[56].mxu1 %v17609_v32  ;;  %v7876_v32 = vld [vmem:[#allocation2 + $0x4d] sm:$0xff] }
 0xacf   : > { %12621 = vmatprep.mubr.msk.f32.mxu1 %vm14963_vm0, %v17453_v44 }
 0xad2   : > { %12622 = vmatmul.mubr.f32.gmra.mrb[58].mxu1 %v17614_v33  ;;  %v13394_v33 = vpack.c.bf16 %v8377_v31, %v8376_v30  ;;  %v8343_v30 = vld [vmem:[#allocation2 + $0xce] sm:$0xff]  ;;  %v14798_v31 = vld [vmem:[#allocation2] sm:$0xff] }
 0xad3   : > { %12624 = vmatprep.mubr.msk.f32.mxu1 %vm14963_vm0, %v17453_v44 }
 0xad6   : > { %12625 = vmatmul.mubr.f32.gmra.mrb[60].mxu1 %v17619_v34  ;;  %v8378_v34 = vld [vmem:[#allocation9 + $0x470] sm:$0xff] }
 0xad7   : > { %12627 = vmatprep.mubr.msk.f32.mxu1 %vm14963_vm0, %v17453_v44 }
 0xada   : > { %12628 = vmatmul.mubr.f32.gmra.mrb[62].mxu1 %v17624_v35  ;;  %v8379_v35 = vld [vmem:[#allocation9 + $0x478] sm:$0xff] }
 0xadb   : > { %12630 = vmatprep.mubr.msk.f32.mxu1 %vm14963_vm0, %v17453_v44 }
 0xade   : > { %12631 = vmatmul.mubr.f32.gmra.mrb[64].mxu1 %v17629_v37  ;;  %v7877_v37 = vld [vmem:[#allocation2 + $0x55] sm:$0xff] }
 0xadf   : > { %12633 = vmatprep.mubr.msk.f32.mxu1 %vm14963_vm0, %v17453_v44 }
 0xae2   : > { %12634 = vmatmul.mubr.f32.gmra.mrb[66].mxu1 %v17634_v38  ;;  %v13397_v38 = vpack.c.bf16 %v8379_v35, %v8378_v34  ;;  %v8346_v34 = vld [vmem:[#allocation2 + $0xe6] sm:$0xff]  ;;  %v8347_v35 = vld [vmem:[#allocation2 + $0xee] sm:$0xff] }
 0xae3   : > { %12636 = vmatprep.mubr.msk.f32.mxu1 %vm14963_vm0, %v17453_v44 }
 0xae6   : > { %12637 = vmatmul.mubr.f32.gmra.mrb[68].mxu1 %v17639_v39  ;;  %v7878_v39 = vld [vmem:[#allocation2 + $0x5d] sm:$0xff] }
 0xae7   : > { %12639 = vmatprep.mubr.msk.f32.mxu1 %vm14963_vm0, %v17453_v44 }
 0xaea   : > { %12640 = vmatmul.mubr.f32.gmra.mrb[70].mxu1 %v17644_v40  ;;  %v7879_v40 = vld [vmem:[#allocation2 + $0x65] sm:$0xff] }
 0xaeb   : > { %12642 = vmatprep.mubr.msk.f32.mxu1 %vm14963_vm0, %v17453_v44 }
 0xaee   : > { %12643 = vmatmul.mubr.f32.gmra.mrb[72].mxu1 %v17649_v41  ;;  %v7880_v41 = vld [vmem:[#allocation2 + $0x6d] sm:$0xff] }
 0xaef   : > { %12645 = vmatprep.mubr.msk.f32.mxu1 %vm14963_vm0, %v17453_v44 }
 0xaf2   : > { %12646 = vmatmul.mubr.f32.gmra.mrb[74].mxu1 %v17654_v43  ;;  %v7881_v43 = vld [vmem:[#allocation2 + $0x75] sm:$0xff] }
 0xaf3   : > { %12648 = vmatprep.mubr.msk.f32.mxu1 %vm14963_vm0, %v17453_v44 }
 0xaf6   : > { %12649 = vmatmul.mubr.f32.gmra.mrb[76].mxu1 %v17659_v47  ;;  %v7885_v47 = vld [vmem:[#allocation2 + $0x95] sm:$0xff] }
 0xaf7   : > { %12651 = vmatprep.mubr.msk.f32.mxu1 %vm14963_vm0, %v17453_v44 }
 0xafa   : > { %12652 = vmatmul.mubr.f32.gmra.mrb[78].mxu1 %v7459_v25  ;;  %v7908_v25 = vld [vmem:[#allocation2 + $0x14d] sm:$0xff] }
 0xafb   : > { %12654 = vmatprep.mubr.msk.f32.mxu1 %vm14963_vm0, %v17453_v44 }
 0xafe   : > { %12655 = vmatmul.mubr.f32.gmra.mrb[80].mxu1 %v7460_v6  ;;  %v7909_v6 = vld [vmem:[#allocation2 + $0x155] sm:$0xff] }
 0xaff   : > { %12689 = vmatprep.mubr.msk.f32.mxu1 %vm14963_vm0, %v17453_v44 }
 0xb02   : > { %12690 = vmatmul.mubr.f32.vlgmr.msra.gmra.mrb[0].mxu1 %v7871_v13  ;;  %v8325_v13 = vld [vmem:[#allocation2 + $0x3e] sm:$0xff] }
 0xb03   : > { %13377 = vmatpush3.bf16.msra.mxu1 %v13376_v36  ;;  %12692 = vmatprep.mubr.msk.f32.mxu1 %vm14963_vm0, %v17453_v44  ;;  %v8322_v36 = vld [vmem:[#allocation2 + $0x26] sm:$0xff] }
 0xb04   : > { %13378 = vmatprep.subr.bf16.mxu1 %v14962_v0 }
 0xb06   : > { %12693 = vmatmul.mubr.f32.gmra.mrb[2].mxu1 %v7872_v17  ;;  %v8329_v17 = vld [vmem:[#allocation2 + $0x5e] sm:$0xff] }
 0xb07   : > { %12695 = vmatprep.mubr.msk.f32.mxu1 %vm14963_vm0, %v17453_v44  ;;  %13380 = vmatpush3.bf16.msra.mxu1 %v13379_v14  ;;  %v8326_v14 = vld [vmem:[#allocation2 + $0x46] sm:$0xff] }
 0xb08   : > { %13381 = vmatprep.subr.bf16.mxu1 %v14962_v0 }
 0xb0a   : > { %12696 = vmatmul.mubr.f32.gmra.mrb[4].mxu1 %v7873_v21  ;;  %v8333_v21 = vld [vmem:[#allocation2 + $0x7e] sm:$0xff] }
 0xb0b   : > { %12698 = vmatprep.mubr.msk.f32.mxu1 %vm14963_vm0, %v17453_v44  ;;  %13383 = vmatpush3.bf16.msra.mxu1 %v13382_v18  ;;  %v8330_v18 = vld [vmem:[#allocation2 + $0x66] sm:$0xff] }
 0xb0c   : > { %13384 = vmatprep.subr.bf16.mxu1 %v14962_v0 }
 0xb0e   : > { %12699 = vmatmul.mubr.f32.gmra.mrb[6].mxu1 %v7874_v24  ;;  %v8337_v24 = vld [vmem:[#allocation2 + $0x9e] sm:$0xff] }
 0xb0f   : > { %12701 = vmatprep.mubr.msk.f32.mxu1 %vm14963_vm0, %v17453_v44  ;;  %13386 = vmatpush3.bf16.msra.mxu1 %v13385_v20  ;;  %v8334_v20 = vld [vmem:[#allocation2 + $0x86] sm:$0xff] }
 0xb10   : > { %13387 = vmatprep.subr.bf16.mxu1 %v14962_v0 }
 0xb12   : > { %12702 = vmatmul.mubr.f32.gmra.mrb[8].mxu1 %v7875_v27  ;;  %v8341_v27 = vld [vmem:[#allocation2 + $0xbe] sm:$0xff] }
 0xb13   : > { %12704 = vmatprep.mubr.msk.f32.mxu1 %vm14963_vm0, %v17453_v44  ;;  %13389 = vmatpush3.bf16.msra.mxu1 %v13388_v26  ;;  %v8338_v26 = vld [vmem:[#allocation2 + $0xa6] sm:$0xff] }
 0xb14   : > { %13390 = vmatprep.subr.bf16.mxu1 %v14962_v0 }
 0xb16   : > { %12705 = vmatmul.mubr.f32.gmra.mrb[10].mxu1 %v7876_v32  ;;  %v8344_v32 = vld [vmem:[#allocation2 + $0xd6] sm:$0xff] }
 0xb17   : > { %12707 = vmatprep.mubr.msk.f32.mxu1 %vm14963_vm0, %v17453_v44  ;;  %13392 = vmatpush3.bf16.msra.mxu1 %v13391_v29  ;;  %v8342_v29 = vld [vmem:[#allocation2 + $0xc6] sm:$0xff] }
 0xb18   : > { %13393 = vmatprep.subr.bf16.mxu1 %v14962_v0 }
 0xb1a   : > { %12708 = vmatmul.mubr.f32.gmra.mrb[12].mxu1 %v7877_v37  ;;  %v8349_v37 = vld [vmem:[#allocation2 + $0xfe] sm:$0xff] }
 0xb1b   : > { %12710 = vmatprep.mubr.msk.f32.mxu1 %vm14963_vm0, %v17453_v44  ;;  %13395 = vmatpush3.bf16.msra.mxu1 %v13394_v33  ;;  %v8345_v33 = vld [vmem:[#allocation2 + $0xde] sm:$0xff] }
 0xb1c   : > { %13396 = vmatprep.subr.bf16.mxu1 %v14962_v0  ;;  %v7882_v0 = vld [vmem:[#allocation2 + $0x7d] sm:$0xff] }
 0xb1e   : > { %12711 = vmatmul.mubr.f32.gmra.mrb[14].mxu1 %v7878_v39  ;;  %v8351_v39 = vld [vmem:[#allocation2 + $0x10e] sm:$0xff] }
 0xb1f   : > { %12713 = vmatprep.mubr.msk.f32.mxu1 %vm14963_vm0, %v17453_v44  ;;  %13398 = vmatpush3.bf16.msra.mxu1 %v13397_v38  ;;  %v8350_v38 = vld [vmem:[#allocation2 + $0x106] sm:$0xff] }
 0xb22   : > { %12714 = vmatmul.mubr.f32.gmra.mrb[16].mxu1 %v7879_v40  ;;  %v8352_v40 = vld [vmem:[#allocation2 + $0x116] sm:$0xff] }
 0xb23   : > { %12716 = vmatprep.mubr.msk.f32.mxu1 %vm14963_vm0, %v17453_v44 }
 0xb26   : > { %12717 = vmatmul.mubr.f32.gmra.mrb[18].mxu1 %v7880_v41  ;;  %v8353_v41 = vld [vmem:[#allocation2 + $0x11e] sm:$0xff] }
 0xb27   : > { %12719 = vmatprep.mubr.msk.f32.mxu1 %vm14963_vm0, %v17453_v44 }
 0xb2a   : > { %12720 = vmatmul.mubr.f32.gmra.mrb[20].mxu1 %v7881_v43  ;;  %v8354_v43 = vld [vmem:[#allocation2 + $0x126] sm:$0xff] }
 0xb2b   : > { %12722 = vmatprep.mubr.msk.f32.mxu1 %vm14963_vm0, %v17453_v44 }
 0xb2e   : > { %12723 = vmatmul.mubr.f32.gmra.mrb[22].mxu1 %v7882_v0  ;;  %v8355_v0 = vld [vmem:[#allocation2 + $0x12e] sm:$0xff] }
 0xb2f   : > { %12725 = vmatprep.mubr.msk.f32.mxu1 %vm14963_vm0, %v17453_v44 }
 0xb32   : > { %12726 = vmatmul.mubr.f32.gmra.mrb[24].mxu1 %v7883_v45  ;;  %v8356_v45 = vld [vmem:[#allocation2 + $0x136] sm:$0xff] }
 0xb33   : > { %12728 = vmatprep.mubr.msk.f32.mxu1 %vm14963_vm0, %v17453_v44 }
 0xb36   : > { %12729 = vmatmul.mubr.f32.gmra.mrb[26].mxu1 %v7884_v42  ;;  %v8357_v42 = vld [vmem:[#allocation2 + $0x13e] sm:$0xff] }
 0xb37   : > { %12731 = vmatprep.mubr.msk.f32.mxu1 %vm14963_vm0, %v17453_v44 }
 0xb3a   : > { %12732 = vmatmul.mubr.f32.gmra.mrb[28].mxu1 %v7885_v47  ;;  %v8358_v47 = vld [vmem:[#allocation2 + $0x146] sm:$0xff] }
 0xb3b   : > { %12734 = vmatprep.mubr.msk.f32.mxu1 %vm14963_vm0, %v17453_v44 }
 0xb3e   : > { %12735 = vmatmul.mubr.f32.gmra.mrb[30].mxu1 %v7886_v48  ;;  %v8359_v48 = vld [vmem:[#allocation2 + $0x14e] sm:$0xff] }
 0xb3f   : > { %12737 = vmatprep.mubr.msk.f32.mxu1 %vm14963_vm0, %v17453_v44 }
 0xb42   : > { %12738 = vmatmul.mubr.f32.gmra.mrb[32].mxu1 %v7887_v46  ;;  %v8360_v46 = vld [vmem:[#allocation2 + $0x156] sm:$0xff] }
 0xb43   : > { %12740 = vmatprep.mubr.msk.f32.mxu1 %vm14963_vm0, %v17453_v44 }
 0xb46   : > { %12741 = vmatmul.mubr.f32.gmra.mrb[34].mxu1 %v7888_v51  ;;  %v8361_v51 = vld [vmem:[#allocation2 + $0x15e] sm:$0xff] }
 0xb47   : > { %12743 = vmatprep.mubr.msk.f32.mxu1 %vm14963_vm0, %v17453_v44 }
 0xb4a   : > { %12744 = vmatmul.mubr.f32.gmra.mrb[36].mxu1 %v7889_v49  ;;  %v8362_v49 = vld [vmem:[#allocation2 + $0x166] sm:$0xff] }
 0xb4b   : > { %12746 = vmatprep.mubr.msk.f32.mxu1 %vm14963_vm0, %v17453_v44 }
 0xb4e   : > { %12747 = vmatmul.mubr.f32.gmra.mrb[38].mxu1 %v7890_v50  ;;  %v17946_v50 = vld [vmem:[%s18175_s4 + $0x2] ss:$0 sm:$0xff] }
 0xb4f   : > { %12749 = vmatprep.mubr.msk.f32.mxu1 %vm14963_vm0, %v17453_v44 }
 0xb52   : > { %12750 = vmatmul.mubr.f32.gmra.mrb[40].mxu1 %v7891_v52 }
 0xb53   : > { %12752 = vmatprep.mubr.msk.f32.mxu1 %vm14963_vm0, %v17453_v44 }
 0xb56   : > { %12753 = vmatmul.mubr.f32.gmra.mrb[42].mxu1 %v7892_v53  ;;  %v17951_v53 = vld [vmem:[%s18175_s4 + $0x3] ss:$0 sm:$0xff] }
 0xb57   : > { %12755 = vmatprep.mubr.msk.f32.mxu1 %vm14963_vm0, %v17453_v44 }
 0xb5a   : > { %12756 = vmatmul.mubr.f32.gmra.mrb[44].mxu1 %v7893_v8 }
 0xb5b   : > { %12758 = vmatprep.mubr.msk.f32.mxu1 %vm14963_vm0, %v17453_v44 }
 0xb5e   : > { %12759 = vmatmul.mubr.f32.gmra.mrb[46].mxu1 %v7894_v54 }
 0xb5f   : > { %12761 = vmatprep.mubr.msk.f32.mxu1 %vm14963_vm0, %v17453_v44 }
 0xb62   : > { %12762 = vmatmul.mubr.f32.gmra.mrb[48].mxu1 %v7895_v55  ;;  %v8865_v55 = vld [vmem:[%s15184_s10 + $0x13] sm:$0xff] }
 0xb63   : > { %12764 = vmatprep.mubr.msk.f32.mxu1 %vm14963_vm0, %v17453_v44 }
 0xb66   : > { %12765 = vmatmul.mubr.f32.gmra.mrb[50].mxu1 %v7896_v56 }
 0xb67   : > { %12767 = vmatprep.mubr.msk.f32.mxu1 %vm14963_vm0, %v17453_v44 }
 0xb6a   : > { %12768 = vmatmul.mubr.f32.gmra.mrb[52].mxu1 %v7897_v57 }
 0xb6b   : > { %12770 = vmatprep.mubr.msk.f32.mxu1 %vm14963_vm0, %v17453_v44 }
 0xb6e   : > { %12771 = vmatmul.mubr.f32.gmra.mrb[54].mxu1 %v7898_v58 }
 0xb6f   : > { %12773 = vmatprep.mubr.msk.f32.mxu1 %vm14963_vm0, %v17453_v44 }
 0xb72   : > { %12774 = vmatmul.mubr.f32.gmra.mrb[56].mxu1 %v7899_v59 }
 0xb73   : > { %12776 = vmatprep.mubr.msk.f32.mxu1 %vm14963_vm0, %v17453_v44 }
 0xb76   : > { %12777 = vmatmul.mubr.f32.gmra.mrb[58].mxu1 %v7900_v60 }
 0xb77   : > { %12779 = vmatprep.mubr.msk.f32.mxu1 %vm14963_vm0, %v17453_v44 }
 0xb7a   : > { %12780 = vmatmul.mubr.f32.gmra.mrb[60].mxu1 %v7901_v61  ;;  %v8866_v61 = vld [vmem:[%s15184_s10 + $0x1b] sm:$0xff] }
 0xb7b   : > { %12782 = vmatprep.mubr.msk.f32.mxu1 %vm14963_vm0, %v17453_v44 }
 0xb7e   : > { %12783 = vmatmul.mubr.f32.gmra.mrb[62].mxu1 %v7902_v62 }
 0xb7f   : > { %12785 = vmatprep.mubr.msk.f32.mxu1 %vm14963_vm0, %v17453_v44 }
 0xb82   : > { %12786 = vmatmul.mubr.f32.gmra.mrb[64].mxu1 %v7903_v63 }
 0xb83   : > { %12788 = vmatprep.mubr.msk.f32.mxu1 %vm14963_vm0, %v17453_v44 }
 0xb86   : > { %12789 = vmatmul.mubr.f32.gmra.mrb[66].mxu1 %v7904_v2 }
 0xb87   : > { %12791 = vmatprep.mubr.msk.f32.mxu1 %vm14963_vm0, %v17453_v44 }
 0xb8a   : > { %12792 = vmatmul.mubr.f32.gmra.mrb[68].mxu1 %v7905_v3 }
 0xb8b   : > { %12794 = vmatprep.mubr.msk.f32.mxu1 %vm14963_vm0, %v17453_v44 }
 0xb8e   : > { %12795 = vmatmul.mubr.f32.gmra.mrb[70].mxu1 %v7906_v4 }
 0xb8f   : > { %12797 = vmatprep.mubr.msk.f32.mxu1 %vm14963_vm0, %v17453_v44 }
 0xb92   : > { %12798 = vmatmul.mubr.f32.gmra.mrb[72].mxu1 %v7907_v5 }
 0xb93   : > { %12800 = vmatprep.mubr.msk.f32.mxu1 %vm14963_vm0, %v17453_v44 }
 0xb96   : > { %12801 = vmatmul.mubr.f32.gmra.mrb[74].mxu1 %v7908_v25  ;;  %v8867_v25 = vld [vmem:[%s15184_s10 + $0x23] sm:$0xff] }
 0xb97   : > { %12803 = vmatprep.mubr.msk.f32.mxu1 %vm14963_vm0, %v17453_v44 }
 0xb9a   : > { %12804 = vmatmul.mubr.f32.gmra.mrb[76].mxu1 %v7909_v6 }
 0xb9b   : > { %12806 = vmatprep.mubr.msk.f32.mxu1 %vm14963_vm0, %v17453_v44 }
 0xb9e   : > { %12807 = vmatmul.mubr.f32.gmra.mrb[78].mxu1 %v7910_v7 }
 0xb9f   : > { %12809 = vmatprep.mubr.msk.f32.mxu1 %vm14963_vm0, %v17453_v44 }
 0xba2   : > { %12810 = vmatmul.mubr.f32.gmra.mrb[80].mxu1 %v7911_v9 }
 0xba3   : > { %12844 = vmatprep.mubr.msk.f32.mxu1 %vm14963_vm0, %v17453_v44 }
 0xba6   : > { %12845 = vmatmul.mubr.f32.vlgmr.msra.gmra.mrb[0].mxu1 %v8322_v36 }
 0xba7   : > { %12847 = vmatprep.mubr.msk.f32.mxu1 %vm14963_vm0, %v17453_v44 }
 0xbaa   : > { %12848 = vmatmul.mubr.f32.gmra.mrb[2].mxu1 %v8323_v10 }
 0xbab   : > { %12850 = vmatprep.mubr.msk.f32.mxu1 %vm14963_vm0, %v17453_v44 }
 0xbae   : > { %12851 = vmatmul.mubr.f32.gmra.mrb[4].mxu1 %v8324_v11 }
 0xbaf   : > { %12853 = vmatprep.mubr.msk.f32.mxu1 %vm14963_vm0, %v17453_v44 }
 0xbb2   : > { %12854 = vmatmul.mubr.f32.gmra.mrb[6].mxu1 %v8325_v13  ;;  %v8868_v13 = vld [vmem:[%s15184_s10 + $0x2b] sm:$0xff] }
 0xbb3   : > { %12856 = vmatprep.mubr.msk.f32.mxu1 %vm14963_vm0, %v17453_v44 }
 0xbb6   : > { %12857 = vmatmul.mubr.f32.gmra.mrb[8].mxu1 %v8326_v14 }
 0xbb7   : > { %12859 = vmatprep.mubr.msk.f32.mxu1 %vm14963_vm0, %v17453_v44 }
 0xbba   : > { %12860 = vmatmul.mubr.f32.gmra.mrb[10].mxu1 %v8327_v15 }
 0xbbb   : > { %12862 = vmatprep.mubr.msk.f32.mxu1 %vm14963_vm0, %v17453_v44 }
 0xbbe   : > { %12863 = vmatmul.mubr.f32.gmra.mrb[12].mxu1 %v8328_v12 }
 0xbbf   : > { %12865 = vmatprep.mubr.msk.f32.mxu1 %vm14963_vm0, %v17453_v44 }
 0xbc2   : > { %12866 = vmatmul.mubr.f32.gmra.mrb[14].mxu1 %v8329_v17 }
 0xbc3   : > { %12868 = vmatprep.mubr.msk.f32.mxu1 %vm14963_vm0, %v17453_v44 }
 0xbc6   : > { %12869 = vmatmul.mubr.f32.gmra.mrb[16].mxu1 %v8330_v18 }
 0xbc7   : > { %12871 = vmatprep.mubr.msk.f32.mxu1 %vm14963_vm0, %v17453_v44 }
 0xbca   : > { %12872 = vmatmul.mubr.f32.gmra.mrb[18].mxu1 %v8331_v16 }
 0xbcb   : > { %12874 = vmatprep.mubr.msk.f32.mxu1 %vm14963_vm0, %v17453_v44 }
 0xbce   : > { %12875 = vmatmul.mubr.f32.gmra.mrb[20].mxu1 %v8332_v19  ;;  %v8869_v19 = vld [vmem:[%s15184_s10 + $0x33] sm:$0xff] }
 0xbcf   : > { %12877 = vmatprep.mubr.msk.f32.mxu1 %vm14963_vm0, %v17453_v44 }
 0xbd2   : > { %12878 = vmatmul.mubr.f32.gmra.mrb[22].mxu1 %v8333_v21 }
 0xbd3   : > { %12880 = vmatprep.mubr.msk.f32.mxu1 %vm14963_vm0, %v17453_v44 }
 0xbd6   : > { %12881 = vmatmul.mubr.f32.gmra.mrb[24].mxu1 %v8334_v20 }
 0xbd7   : > { %12883 = vmatprep.mubr.msk.f32.mxu1 %vm14963_vm0, %v17453_v44 }
 0xbda   : > { %12884 = vmatmul.mubr.f32.gmra.mrb[26].mxu1 %v8335_v22 }
 0xbdb   : > { %12886 = vmatprep.mubr.msk.f32.mxu1 %vm14963_vm0, %v17453_v44 }
 0xbde   : > { %12887 = vmatmul.mubr.f32.gmra.mrb[28].mxu1 %v8336_v23 }
 0xbdf   : > { %12889 = vmatprep.mubr.msk.f32.mxu1 %vm14963_vm0, %v17453_v44 }
 0xbe2   : > { %12890 = vmatmul.mubr.f32.gmra.mrb[30].mxu1 %v8337_v24 }
 0xbe3   : > { %12892 = vmatprep.mubr.msk.f32.mxu1 %vm14963_vm0, %v17453_v44 }
 0xbe6   : > { %12893 = vmatmul.mubr.f32.gmra.mrb[32].mxu1 %v8338_v26 }
 0xbe7   : > { %12895 = vmatprep.mubr.msk.f32.mxu1 %vm14963_vm0, %v17453_v44 }
 0xbea   : > { %12896 = vmatmul.mubr.f32.gmra.mrb[34].mxu1 %v8339_v28  ;;  %v8870_v28 = vld [vmem:[%s15184_s10 + $0x3b] sm:$0xff] }
 0xbeb   : > { %12898 = vmatprep.mubr.msk.f32.mxu1 %vm14963_vm0, %v17453_v44 }
 0xbee   : > { %12899 = vmatmul.mubr.f32.gmra.mrb[36].mxu1 %v8340_v1 }
 0xbef   : > { %12901 = vmatprep.mubr.msk.f32.mxu1 %vm14963_vm0, %v17453_v44 }
 0xbf2   : > { %12902 = vmatmul.mubr.f32.gmra.mrb[38].mxu1 %v8341_v27 }
 0xbf3   : > { %12904 = vmatprep.mubr.msk.f32.mxu1 %vm14963_vm0, %v17453_v44 }
 0xbf6   : > { %12905 = vmatmul.mubr.f32.gmra.mrb[40].mxu1 %v8342_v29 }
 0xbf7   : > { %12907 = vmatprep.mubr.msk.f32.mxu1 %vm14963_vm0, %v17453_v44  ;;  %v8348_v44 = vld [vmem:[#allocation2 + $0xf6] sm:$0xff] }
 0xbfa   : > { %12908 = vmatmul.mubr.f32.gmra.mrb[42].mxu1 %v8343_v30 }
 0xbfb   : > { %12910 = vmatprep.mubr.msk.f32.mxu1 %vm14963_vm0, %v14798_v31 }
 0xbfe   : > { %12911 = vmatmul.mubr.f32.gmra.mrb[44].mxu1 %v8344_v32 }
 0xbff   : > { %12913 = vmatprep.mubr.msk.f32.mxu1 %vm14963_vm0, %v14798_v31 }
 0xc02   : > { %12914 = vmatmul.mubr.f32.gmra.mrb[46].mxu1 %v8345_v33  ;;  %v8871_v33 = vld [vmem:[%s15184_s10 + $0x43] sm:$0xff] }
 0xc03   : > { %12916 = vmatprep.mubr.msk.f32.mxu1 %vm14963_vm0, %v14798_v31 }
 0xc06   : > { %12917 = vmatmul.mubr.f32.gmra.mrb[48].mxu1 %v8346_v34 }
 0xc07   : > { %12919 = vmatprep.mubr.msk.f32.mxu1 %vm14963_vm0, %v14798_v31 }
 0xc0a   : > { %12920 = vmatmul.mubr.f32.gmra.mrb[50].mxu1 %v8347_v35 }
 0xc0b   : > { %12922 = vmatprep.mubr.msk.f32.mxu1 %vm14963_vm0, %v14798_v31 }
 0xc0e   : > { %12923 = vmatmul.mubr.f32.gmra.mrb[52].mxu1 %v8348_v44 }
 0xc0f   : > { %12925 = vmatprep.mubr.msk.f32.mxu1 %vm14963_vm0, %v14798_v31 }
 0xc12   : > { %12926 = vmatmul.mubr.f32.gmra.mrb[54].mxu1 %v8349_v37 }
 0xc13   : > { %12928 = vmatprep.mubr.msk.f32.mxu1 %vm14963_vm0, %v14798_v31 }
 0xc16   : > { %12929 = vmatmul.mubr.f32.gmra.mrb[56].mxu1 %v8350_v38 }
 0xc17   : > { %12931 = vmatprep.mubr.msk.f32.mxu1 %vm14963_vm0, %v14798_v31 }
 0xc1a   : > { %12932 = vmatmul.mubr.f32.gmra.mrb[58].mxu1 %v8351_v39 }
 0xc1b   : > { %12934 = vmatprep.mubr.msk.f32.mxu1 %vm14963_vm0, %v14798_v31 }
 0xc1e   : > { %12935 = vmatmul.mubr.f32.gmra.mrb[60].mxu1 %v8352_v40  ;;  %v8872_v40 = vld [vmem:[%s15184_s10 + $0x4b] sm:$0xff] }
 0xc1f   : > { %12937 = vmatprep.mubr.msk.f32.mxu1 %vm14963_vm0, %v14798_v31 }
 0xc22   : > { %12938 = vmatmul.mubr.f32.gmra.mrb[62].mxu1 %v8353_v41 }
 0xc23   : > { %12940 = vmatprep.mubr.msk.f32.mxu1 %vm14963_vm0, %v14798_v31 }
 0xc26   : > { %12941 = vmatmul.mubr.f32.gmra.mrb[64].mxu1 %v8354_v43 }
 0xc27   : > { %12943 = vmatprep.mubr.msk.f32.mxu1 %vm14963_vm0, %v14798_v31 }
 0xc2a   : > { %12944 = vmatmul.mubr.f32.gmra.mrb[66].mxu1 %v8355_v0 }
 0xc2b   : > { %12946 = vmatprep.mubr.msk.f32.mxu1 %vm14963_vm0, %v14798_v31 }
 0xc2e   : > { %12947 = vmatmul.mubr.f32.gmra.mrb[68].mxu1 %v8356_v45 }
 0xc2f   : > { %12949 = vmatprep.mubr.msk.f32.mxu1 %vm14963_vm0, %v14798_v31 }
 0xc32   : > { %12950 = vmatmul.mubr.f32.gmra.mrb[70].mxu1 %v8357_v42 }
 0xc33   : > { %12952 = vmatprep.mubr.msk.f32.mxu1 %vm14963_vm0, %v14798_v31 }
 0xc36   : > { %12953 = vmatmul.mubr.f32.gmra.mrb[72].mxu1 %v8358_v47 }
 0xc37   : > { %12955 = vmatprep.mubr.msk.f32.mxu1 %vm14963_vm0, %v14798_v31 }
 0xc3a   : > { %12956 = vmatmul.mubr.f32.gmra.mrb[74].mxu1 %v8359_v48  ;;  %v8873_v48 = vld [vmem:[%s15184_s10 + $0x53] sm:$0xff] }
 0xc3b   : > { %12958 = vmatprep.mubr.msk.f32.mxu1 %vm14963_vm0, %v14798_v31 }
 0xc3e   : > { %12959 = vmatmul.mubr.f32.gmra.mrb[76].mxu1 %v8360_v46 }
 0xc3f   : > { %12961 = vmatprep.mubr.msk.f32.mxu1 %vm14963_vm0, %v14798_v31 }
 0xc42   : > { %12962 = vmatmul.mubr.f32.gmra.mrb[78].mxu1 %v8361_v51 }
 0xc43   : > { %12964 = vmatprep.mubr.msk.f32.mxu1 %vm14963_vm0, %v14798_v31 }
 0xc46   : > { %12965 = vmatmul.mubr.f32.gmra.mrb[80].mxu1 %v8362_v49 }
 0xc79   : > { %v8446_v52 = vpop.f32.mrb[0].mxu1 }
 0xc7a   : > { %v8778_v8 = vmul.f32 %v17946_v50, %v8446_v52  ;;  %v12846_v54 = vpop.f32.mrb[1].mxu1 }
 0xc7c   : > { %v8824_v56 = vadd.f32 %v17951_v53, %v8778_v8 }
 0xc7d   : > { %v8451_v57 = vpop.f32.mrb[2].mxu1 }
 0xc7e   : > { %v8906_v58 = vadd.f32 %v8865_v55, %v8824_v56  ;;  %v8779_v59 = vmul.f32 %v17946_v50, %v8451_v57  ;;  %v12849_v60 = vpop.f32.mrb[3].mxu1  ;;  %v8874_v55 = vld [vmem:[%s15184_s10 + $0x5b] sm:$0xff] }
 0xc80   : > { %v8947_v62 = vmax.f32 %v8906_v58, 0.0  ;;  %v8825_v63 = vadd.f32 %v17951_v53, %v8779_v59 }
 0xc81   : > { %v8456_v2 = vpop.f32.mrb[4].mxu1 }
 0xc82   : > { %8988 = vst [vmem:[%s17960_s30] sm:$0xff] %v8947_v62  ;;  %v8907_v3 = vadd.f32 %v8866_v61, %v8825_v63  ;;  %v8780_v4 = vmul.f32 %v17946_v50, %v8456_v2  ;;  %v12852_v5 = vpop.f32.mrb[5].mxu1  ;;  %v8875_v62 = vld [vmem:[%s15184_s10 + $0x63] sm:$0xff] }
 0xc84   : > { %v8948_v6 = vmax.f32 %v8907_v3, 0.0  ;;  %v8826_v7 = vadd.f32 %v17951_v53, %v8780_v4 }
 0xc85   : > { %v8461_v9 = vpop.f32.mrb[6].mxu1 }
 0xc86   : > { %8989 = vst [vmem:[%s17960_s30 + $0x8] sm:$0xff] %v8948_v6  ;;  %v8908_v36 = vadd.f32 %v8867_v25, %v8826_v7  ;;  %v8781_v10 = vmul.f32 %v17946_v50, %v8461_v9  ;;  %v12855_v11 = vpop.f32.mrb[7].mxu1  ;;  %v8876_v6 = vld [vmem:[%s15184_s10 + $0x6b] sm:$0xff] }
 0xc88   : > { %v8949_v14 = vmax.f32 %v8908_v36, 0.0  ;;  %v8827_v15 = vadd.f32 %v17951_v53, %v8781_v10 }
 0xc89   : > { %v8466_v12 = vpop.f32.mrb[8].mxu1 }
 0xc8a   : > { %8990 = vst [vmem:[%s17960_s30 + $0x10] sm:$0xff] %v8949_v14  ;;  %v8909_v17 = vadd.f32 %v8868_v13, %v8827_v15  ;;  %v8782_v18 = vmul.f32 %v17946_v50, %v8466_v12  ;;  %v12858_v16 = vpop.f32.mrb[9].mxu1  ;;  %v8877_v14 = vld [vmem:[%s15184_s10 + $0x73] sm:$0xff] }
 0xc8c   : > { %v8950_v21 = vmax.f32 %v8909_v17, 0.0  ;;  %v8828_v20 = vadd.f32 %v17951_v53, %v8782_v18 }
 0xc8d   : > { %v8471_v22 = vpop.f32.mrb[10].mxu1 }
 0xc8e   : > { %8991 = vst [vmem:[%s17960_s30 + $0x18] sm:$0xff] %v8950_v21  ;;  %v8910_v23 = vadd.f32 %v8869_v19, %v8828_v20  ;;  %v8783_v24 = vmul.f32 %v17946_v50, %v8471_v22  ;;  %v12861_v26 = vpop.f32.mrb[11].mxu1  ;;  %v8878_v21 = vld [vmem:[%s15184_s10 + $0x7b] sm:$0xff] }
 0xc90   : > { %v8951_v1 = vmax.f32 %v8910_v23, 0.0  ;;  %v8829_v27 = vadd.f32 %v17951_v53, %v8783_v24 }
 0xc91   : > { %v8476_v29 = vpop.f32.mrb[12].mxu1 }
 0xc92   : > { %8992 = vst [vmem:[%s17960_s30 + $0x20] sm:$0xff] %v8951_v1  ;;  %v8911_v30 = vadd.f32 %v8870_v28, %v8829_v27  ;;  %v8784_v31 = vmul.f32 %v17946_v50, %v8476_v29  ;;  %v12864_v32 = vpop.f32.mrb[13].mxu1  ;;  %v8879_v1 = vld [vmem:[%s15184_s10 + $0x83] sm:$0xff] }
 0xc94   : > { %v8952_v34 = vmax.f32 %v8911_v30, 0.0  ;;  %v8830_v35 = vadd.f32 %v17951_v53, %v8784_v31 }
 0xc95   : > { %v8481_v44 = vpop.f32.mrb[14].mxu1 }
 0xc96   : > { %8993 = vst [vmem:[%s17960_s30 + $0x28] sm:$0xff] %v8952_v34  ;;  %v8912_v37 = vadd.f32 %v8871_v33, %v8830_v35  ;;  %v8785_v38 = vmul.f32 %v17946_v50, %v8481_v44  ;;  %v12867_v39 = vpop.f32.mrb[15].mxu1  ;;  %v8880_v34 = vld [vmem:[%s15184_s10 + $0x8b] sm:$0xff] }
 0xc98   : > { %v8953_v41 = vmax.f32 %v8912_v37, 0.0  ;;  %v8831_v43 = vadd.f32 %v17951_v53, %v8785_v38 }
 0xc99   : > { %v8486_v0 = vpop.f32.mrb[16].mxu1 }
 0xc9a   : > { %8994 = vst [vmem:[%s17960_s30 + $0x30] sm:$0xff] %v8953_v41  ;;  %v8913_v45 = vadd.f32 %v8872_v40, %v8831_v43  ;;  %v8786_v42 = vmul.f32 %v17946_v50, %v8486_v0  ;;  %v12870_v47 = vpop.f32.mrb[17].mxu1  ;;  %v8881_v41 = vld [vmem:[%s15184_s10 + $0x93] sm:$0xff] }
 0xc9c   : > { %v8954_v46 = vmax.f32 %v8913_v45, 0.0  ;;  %v8832_v51 = vadd.f32 %v17951_v53, %v8786_v42 }
 0xc9d   : > { %v8491_v49 = vpop.f32.mrb[18].mxu1 }
 0xc9e   : > { %8995 = vst [vmem:[%s17960_s30 + $0x38] sm:$0xff] %v8954_v46  ;;  %v8914_v52 = vadd.f32 %v8873_v48, %v8832_v51  ;;  %v8787_v8 = vmul.f32 %v17946_v50, %v8491_v49  ;;  %v12873_v54 = vpop.f32.mrb[19].mxu1  ;;  %v8882_v46 = vld [vmem:[%s15184_s10 + $0x9b] sm:$0xff] }
 0xca0   : > { %v8955_v56 = vmax.f32 %v8914_v52, 0.0  ;;  %v8833_v57 = vadd.f32 %v17951_v53, %v8787_v8 }
 0xca1   : > { %v8496_v58 = vpop.f32.mrb[20].mxu1 }
 0xca2   : > { %8996 = vst [vmem:[%s17960_s30 + $0x40] sm:$0xff] %v8955_v56  ;;  %v8915_v59 = vadd.f32 %v8874_v55, %v8833_v57  ;;  %v8788_v60 = vmul.f32 %v17946_v50, %v8496_v58  ;;  %v12876_v61 = vpop.f32.mrb[21].mxu1  ;;  %v8883_v56 = vld [vmem:[%s15184_s10 + $0xa3] sm:$0xff] }
 0xca4   : > { %v8956_v63 = vmax.f32 %v8915_v59, 0.0  ;;  %v8834_v2 = vadd.f32 %v17951_v53, %v8788_v60 }
 0xca5   : > { %v8501_v3 = vpop.f32.mrb[22].mxu1 }
 0xca6   : > { %8997 = vst [vmem:[%s17960_s30 + $0x48] sm:$0xff] %v8956_v63  ;;  %v8916_v4 = vadd.f32 %v8875_v62, %v8834_v2  ;;  %v8789_v5 = vmul.f32 %v17946_v50, %v8501_v3  ;;  %v12879_v25 = vpop.f32.mrb[23].mxu1  ;;  %v8884_v63 = vld [vmem:[%s15184_s10 + $0xab] sm:$0xff] }
 0xca8   : > { %v8957_v7 = vmax.f32 %v8916_v4, 0.0  ;;  %v8835_v9 = vadd.f32 %v17951_v53, %v8789_v5 }
 0xca9   : > { %v8506_v36 = vpop.f32.mrb[24].mxu1 }
 0xcaa   : > { %8998 = vst [vmem:[%s17960_s30 + $0x50] sm:$0xff] %v8957_v7  ;;  %v8917_v10 = vadd.f32 %v8876_v6, %v8835_v9  ;;  %v8790_v11 = vmul.f32 %v17946_v50, %v8506_v36  ;;  %v12882_v13 = vpop.f32.mrb[25].mxu1  ;;  %v8885_v7 = vld [vmem:[%s15184_s10 + $0xb3] sm:$0xff] }
 0xcac   : > { %v8958_v15 = vmax.f32 %v8917_v10, 0.0  ;;  %v8836_v12 = vadd.f32 %v17951_v53, %v8790_v11 }
 0xcad   : > { %v8511_v17 = vpop.f32.mrb[26].mxu1 }
 0xcae   : > { %8999 = vst [vmem:[%s17960_s30 + $0x58] sm:$0xff] %v8958_v15  ;;  %v8918_v18 = vadd.f32 %v8877_v14, %v8836_v12  ;;  %v8791_v16 = vmul.f32 %v17946_v50, %v8511_v17  ;;  %v12885_v19 = vpop.f32.mrb[27].mxu1  ;;  %v8886_v15 = vld [vmem:[%s15184_s10 + $0xbb] sm:$0xff] }
 0xcb0   : > { %v8959_v20 = vmax.f32 %v8918_v18, 0.0  ;;  %v8837_v22 = vadd.f32 %v17951_v53, %v8791_v16 }
 0xcb1   : > { %v8516_v23 = vpop.f32.mrb[28].mxu1 }
 0xcb2   : > { %9000 = vst [vmem:[%s17960_s30 + $0x60] sm:$0xff] %v8959_v20  ;;  %v8919_v24 = vadd.f32 %v8878_v21, %v8837_v22  ;;  %v8792_v26 = vmul.f32 %v17946_v50, %v8516_v23  ;;  %v12888_v28 = vpop.f32.mrb[29].mxu1  ;;  %v8887_v20 = vld [vmem:[%s15184_s10 + $0xc3] sm:$0xff] }
 0xcb4   : > { %v8960_v27 = vmax.f32 %v8919_v24, 0.0  ;;  %v8838_v29 = vadd.f32 %v17951_v53, %v8792_v26 }
 0xcb5   : > { %v8521_v30 = vpop.f32.mrb[30].mxu1 }
 0xcb6   : > { %9001 = vst [vmem:[%s17960_s30 + $0x68] sm:$0xff] %v8960_v27  ;;  %v8920_v31 = vadd.f32 %v8879_v1, %v8838_v29  ;;  %v8793_v32 = vmul.f32 %v17946_v50, %v8521_v30  ;;  %v12891_v33 = vpop.f32.mrb[31].mxu1  ;;  %v8888_v27 = vld [vmem:[%s15184_s10 + $0xcb] sm:$0xff] }
 0xcb8   : > { %v8961_v35 = vmax.f32 %v8920_v31, 0.0  ;;  %v8839_v44 = vadd.f32 %v17951_v53, %v8793_v32 }
 0xcb9   : > { %v8526_v37 = vpop.f32.mrb[32].mxu1 }
 0xcba   : > { %9002 = vst [vmem:[%s17960_s30 + $0x70] sm:$0xff] %v8961_v35  ;;  %v8921_v38 = vadd.f32 %v8880_v34, %v8839_v44  ;;  %v8794_v39 = vmul.f32 %v17946_v50, %v8526_v37  ;;  %v12894_v40 = vpop.f32.mrb[33].mxu1  ;;  %v8889_v35 = vld [vmem:[%s15184_s10 + $0xd3] sm:$0xff] }
 0xcbc   : > { %v8962_v43 = vmax.f32 %v8921_v38, 0.0  ;;  %v8840_v0 = vadd.f32 %v17951_v53, %v8794_v39 }
 0xcbd   : > { %v8531_v45 = vpop.f32.mrb[34].mxu1 }
 0xcbe   : > { %9003 = vst [vmem:[%s17960_s30 + $0x78] sm:$0xff] %v8962_v43  ;;  %v8922_v42 = vadd.f32 %v8881_v41, %v8840_v0  ;;  %v8795_v47 = vmul.f32 %v17946_v50, %v8531_v45  ;;  %v12897_v48 = vpop.f32.mrb[35].mxu1  ;;  %v8890_v43 = vld [vmem:[%s15184_s10 + $0xdb] sm:$0xff] }
 0xcc0   : > { %v8963_v51 = vmax.f32 %v8922_v42, 0.0  ;;  %v8841_v49 = vadd.f32 %v17951_v53, %v8795_v47 }
 0xcc1   : > { %v8536_v52 = vpop.f32.mrb[36].mxu1 }
 0xcc2   : > { %9004 = vst [vmem:[%s17960_s30 + $0x80] sm:$0xff] %v8963_v51  ;;  %v8923_v8 = vadd.f32 %v8882_v46, %v8841_v49  ;;  %v8796_v54 = vmul.f32 %v17946_v50, %v8536_v52  ;;  %v12900_v55 = vpop.f32.mrb[37].mxu1  ;;  %v8891_v51 = vld [vmem:[%s15184_s10 + $0xe3] sm:$0xff] }
 0xcc4   : > { %v8964_v57 = vmax.f32 %v8923_v8, 0.0  ;;  %v8842_v58 = vadd.f32 %v17951_v53, %v8796_v54 }
 0xcc5   : > { %v8541_v59 = vpop.f32.mrb[38].mxu1 }
 0xcc6   : > { %9005 = vst [vmem:[%s17960_s30 + $0x88] sm:$0xff] %v8964_v57  ;;  %v8924_v60 = vadd.f32 %v8883_v56, %v8842_v58  ;;  %v8797_v61 = vmul.f32 %v17946_v50, %v8541_v59  ;;  %v12903_v62 = vpop.f32.mrb[39].mxu1  ;;  %v8892_v57 = vld [vmem:[%s15184_s10 + $0xeb] sm:$0xff] }
 0xcc8   : > { %v8965_v2 = vmax.f32 %v8924_v60, 0.0  ;;  %v8843_v3 = vadd.f32 %v17951_v53, %v8797_v61 }
 0xcc9   : > { %v8546_v4 = vpop.f32.mrb[40].mxu1 }
 0xcca   : > { %9006 = vst [vmem:[%s17960_s30 + $0x90] sm:$0xff] %v8965_v2  ;;  %v8925_v5 = vadd.f32 %v8884_v63, %v8843_v3  ;;  %v8798_v25 = vmul.f32 %v17946_v50, %v8546_v4  ;;  %v12906_v6 = vpop.f32.mrb[41].mxu1  ;;  %v8893_v2 = vld [vmem:[%s15184_s10 + $0xf3] sm:$0xff] }
 0xccc   : > { %v8966_v9 = vmax.f32 %v8925_v5, 0.0  ;;  %v8844_v36 = vadd.f32 %v17951_v53, %v8798_v25 }
 0xccd   : > { %v8551_v10 = vpop.f32.mrb[42].mxu1 }
 0xcce   : > { %9007 = vst [vmem:[%s17960_s30 + $0x98] sm:$0xff] %v8966_v9  ;;  %v8926_v11 = vadd.f32 %v8885_v7, %v8844_v36  ;;  %v8799_v13 = vmul.f32 %v17946_v50, %v8551_v10  ;;  %v12909_v14 = vpop.f32.mrb[43].mxu1  ;;  %v8894_v9 = vld [vmem:[%s15184_s10 + $0xfb] sm:$0xff] }
 0xcd0   : > { %v8967_v12 = vmax.f32 %v8926_v11, 0.0  ;;  %v8845_v17 = vadd.f32 %v17951_v53, %v8799_v13 }
 0xcd1   : > { %v8556_v18 = vpop.f32.mrb[44].mxu1 }
 0xcd2   : > { %9008 = vst [vmem:[%s17960_s30 + $0xa0] sm:$0xff] %v8967_v12  ;;  %v8927_v16 = vadd.f32 %v8886_v15, %v8845_v17  ;;  %v8800_v19 = vmul.f32 %v17946_v50, %v8556_v18  ;;  %v12912_v21 = vpop.f32.mrb[45].mxu1  ;;  %v8895_v12 = vld [vmem:[%s15184_s10 + $0x103] sm:$0xff] }
 0xcd4   : > { %v8968_v22 = vmax.f32 %v8927_v16, 0.0  ;;  %v8846_v23 = vadd.f32 %v17951_v53, %v8800_v19 }
 0xcd5   : > { %v8561_v24 = vpop.f32.mrb[46].mxu1 }
 0xcd6   : > { %9009 = vst [vmem:[%s17960_s30 + $0xa8] sm:$0xff] %v8968_v22  ;;  %v8928_v26 = vadd.f32 %v8887_v20, %v8846_v23  ;;  %v8801_v28 = vmul.f32 %v17946_v50, %v8561_v24  ;;  %v12915_v1 = vpop.f32.mrb[47].mxu1  ;;  %v8896_v22 = vld [vmem:[%s15184_s10 + $0x10b] sm:$0xff] }
 0xcd8   : > { %v8969_v29 = vmax.f32 %v8928_v26, 0.0  ;;  %v8847_v30 = vadd.f32 %v17951_v53, %v8801_v28 }
 0xcd9   : > { %v8566_v31 = vpop.f32.mrb[48].mxu1 }
 0xcda   : > { %9010 = vst [vmem:[%s17960_s30 + $0xb0] sm:$0xff] %v8969_v29  ;;  %v8929_v32 = vadd.f32 %v8888_v27, %v8847_v30  ;;  %v8802_v33 = vmul.f32 %v17946_v50, %v8566_v31  ;;  %v12918_v34 = vpop.f32.mrb[49].mxu1  ;;  %v8897_v29 = vld [vmem:[%s15184_s10 + $0x113] sm:$0xff] }
 0xcdc   : > { %v8970_v44 = vmax.f32 %v8929_v32, 0.0  ;;  %v8848_v37 = vadd.f32 %v17951_v53, %v8802_v33 }
 0xcdd   : > { %v8571_v38 = vpop.f32.mrb[50].mxu1 }
 0xcde   : > { %9011 = vst [vmem:[%s17960_s30 + $0xb8] sm:$0xff] %v8970_v44  ;;  %v8930_v39 = vadd.f32 %v8889_v35, %v8848_v37  ;;  %v8803_v40 = vmul.f32 %v17946_v50, %v8571_v38  ;;  %v12921_v41 = vpop.f32.mrb[51].mxu1  ;;  %v8898_v44 = vld [vmem:[%s15184_s10 + $0x11b] sm:$0xff] }
 0xce0   : > { %v8971_v0 = vmax.f32 %v8930_v39, 0.0  ;;  %v8849_v45 = vadd.f32 %v17951_v53, %v8803_v40 }
 0xce1   : > { %v8576_v42 = vpop.f32.mrb[52].mxu1 }
 0xce2   : > { %9012 = vst [vmem:[%s17960_s30 + $0xc0] sm:$0xff] %v8971_v0  ;;  %v8931_v47 = vadd.f32 %v8890_v43, %v8849_v45  ;;  %v8804_v48 = vmul.f32 %v17946_v50, %v8576_v42  ;;  %v12924_v46 = vpop.f32.mrb[53].mxu1  ;;  %v8899_v0 = vld [vmem:[%s15184_s10 + $0x123] sm:$0xff] }
 0xce4   : > { %v8972_v49 = vmax.f32 %v8931_v47, 0.0  ;;  %v8850_v52 = vadd.f32 %v17951_v53, %v8804_v48 }
 0xce5   : > { %v8581_v8 = vpop.f32.mrb[54].mxu1 }
 0xce6   : > { %9013 = vst [vmem:[%s17960_s30 + $0xc8] sm:$0xff] %v8972_v49  ;;  %v8932_v54 = vadd.f32 %v8891_v51, %v8850_v52  ;;  %v8805_v55 = vmul.f32 %v17946_v50, %v8581_v8  ;;  %v12927_v56 = vpop.f32.mrb[55].mxu1  ;;  %v8900_v49 = vld [vmem:[%s15184_s10 + $0x12b] sm:$0xff] }
 0xce8   : > { %v8973_v58 = vmax.f32 %v8932_v54, 0.0  ;;  %v8851_v59 = vadd.f32 %v17951_v53, %v8805_v55 }
 0xce9   : > { %v8586_v60 = vpop.f32.mrb[56].mxu1 }
 0xcea   : > { %9014 = vst [vmem:[%s17960_s30 + $0xd0] sm:$0xff] %v8973_v58  ;;  %v8933_v61 = vadd.f32 %v8892_v57, %v8851_v59  ;;  %v8806_v62 = vmul.f32 %v17946_v50, %v8586_v60  ;;  %v12930_v63 = vpop.f32.mrb[57].mxu1  ;;  %v8901_v58 = vld [vmem:[%s15184_s10 + $0x133] sm:$0xff] }
 0xcec   : > { %v8974_v3 = vmax.f32 %v8933_v61, 0.0  ;;  %v8852_v4 = vadd.f32 %v17951_v53, %v8806_v62 }
 0xced   : > { %v8591_v5 = vpop.f32.mrb[58].mxu1 }
 0xcee   : > { %9015 = vst [vmem:[%s17960_s30 + $0xd8] sm:$0xff] %v8974_v3  ;;  %v8934_v25 = vadd.f32 %v8893_v2, %v8852_v4  ;;  %v8807_v6 = vmul.f32 %v17946_v50, %v8591_v5  ;;  %v12933_v7 = vpop.f32.mrb[59].mxu1  ;;  %v8902_v3 = vld [vmem:[%s15184_s10 + $0x13b] sm:$0xff] }
 0xcf0   : > { %v8975_v36 = vmax.f32 %v8934_v25, 0.0  ;;  %v8853_v10 = vadd.f32 %v17951_v53, %v8807_v6 }
 0xcf1   : > { %v8596_v11 = vpop.f32.mrb[60].mxu1 }
 0xcf2   : > { %9016 = vst [vmem:[%s17960_s30 + $0xe0] sm:$0xff] %v8975_v36  ;;  %v8935_v13 = vadd.f32 %v8894_v9, %v8853_v10  ;;  %v8808_v14 = vmul.f32 %v17946_v50, %v8596_v11  ;;  %v12936_v15 = vpop.f32.mrb[61].mxu1  ;;  %v8903_v36 = vld [vmem:[%s15184_s10 + $0x143] sm:$0xff] }
 0xcf4   : > { %v8976_v17 = vmax.f32 %v8935_v13, 0.0  ;;  %v8854_v18 = vadd.f32 %v17951_v53, %v8808_v14 }
 0xcf5   : > { %v8601_v16 = vpop.f32.mrb[62].mxu1 }
 0xcf6   : > { %9017 = vst [vmem:[%s17960_s30 + $0xe8] sm:$0xff] %v8976_v17  ;;  %v8936_v19 = vadd.f32 %v8895_v12, %v8854_v18  ;;  %v8809_v21 = vmul.f32 %v17946_v50, %v8601_v16  ;;  %v12939_v20 = vpop.f32.mrb[63].mxu1  ;;  %v8904_v17 = vld [vmem:[%s15184_s10 + $0x14b] sm:$0xff] }
 0xcf8   : > { %v8977_v23 = vmax.f32 %v8936_v19, 0.0  ;;  %v8855_v24 = vadd.f32 %v17951_v53, %v8809_v21 }
 0xcf9   : > { %v8606_v26 = vpop.f32.mrb[64].mxu1 }
 0xcfa   : > { %9018 = vst [vmem:[%s17960_s30 + $0xf0] sm:$0xff] %v8977_v23  ;;  %v8937_v28 = vadd.f32 %v8896_v22, %v8855_v24  ;;  %v8810_v1 = vmul.f32 %v17946_v50, %v8606_v26  ;;  %v12942_v27 = vpop.f32.mrb[65].mxu1  ;;  %v8905_v23 = vld [vmem:[%s15184_s10 + $0x153] sm:$0xff]  ;;  %s9030_s10 = scalar_lea.sflag [#allocation6], %s15180_s17 }
 0xcfc   : > { %v8978_v30 = vmax.f32 %v8937_v28, 0.0  ;;  %v8856_v31 = vadd.f32 %v17951_v53, %v8810_v1 }
 0xcfd   : > { %v8611_v32 = vpop.f32.mrb[66].mxu1 }
 0xcfe   : > { %9019 = vst [vmem:[%s17960_s30 + $0xf8] sm:$0xff] %v8978_v30  ;;  %v8938_v33 = vadd.f32 %v8897_v29, %v8856_v31  ;;  %v8811_v34 = vmul.f32 %v17946_v50, %v8611_v32  ;;  %v12945_v35 = vpop.f32.mrb[67].mxu1 }
 0xd00   : > { %v8979_v37 = vmax.f32 %v8938_v33, 0.0  ;;  %v8857_v38 = vadd.f32 %v17951_v53, %v8811_v34 }
 0xd01   : > { %v8616_v39 = vpop.f32.mrb[68].mxu1 }
 0xd02   : > { %9020 = vst [vmem:[%s17960_s30 + $0x100] sm:$0xff] %v8979_v37  ;;  %v8939_v40 = vadd.f32 %v8898_v44, %v8857_v38  ;;  %v8812_v41 = vmul.f32 %v17946_v50, %v8616_v39  ;;  %v12948_v43 = vpop.f32.mrb[69].mxu1 }
 0xd04   : > { %v8980_v45 = vmax.f32 %v8939_v40, 0.0  ;;  %v8858_v42 = vadd.f32 %v17951_v53, %v8812_v41 }
 0xd05   : > { %v8621_v47 = vpop.f32.mrb[70].mxu1 }
 0xd06   : > { %9021 = vst [vmem:[%s17960_s30 + $0x108] sm:$0xff] %v8980_v45  ;;  %v8940_v48 = vadd.f32 %v8899_v0, %v8858_v42  ;;  %v8813_v46 = vmul.f32 %v17946_v50, %v8621_v47  ;;  %v12951_v51 = vpop.f32.mrb[71].mxu1 }
 0xd08   : > { %v8981_v52 = vmax.f32 %v8940_v48, 0.0  ;;  %v8859_v8 = vadd.f32 %v17951_v53, %v8813_v46 }
 0xd09   : > { %v8626_v54 = vpop.f32.mrb[72].mxu1 }
 0xd0a   : > { %9022 = vst [vmem:[%s17960_s30 + $0x110] sm:$0xff] %v8981_v52  ;;  %v8941_v55 = vadd.f32 %v8900_v49, %v8859_v8  ;;  %v8814_v56 = vmul.f32 %v17946_v50, %v8626_v54  ;;  %v12954_v57 = vpop.f32.mrb[73].mxu1 }
 0xd0c   : > { %v8982_v59 = vmax.f32 %v8941_v55, 0.0  ;;  %v8860_v60 = vadd.f32 %v17951_v53, %v8814_v56 }
 0xd0d   : > { %v8631_v61 = vpop.f32.mrb[74].mxu1 }
 0xd0e   : > { %9023 = vst [vmem:[%s17960_s30 + $0x118] sm:$0xff] %v8982_v59  ;;  %v8942_v62 = vadd.f32 %v8901_v58, %v8860_v60  ;;  %v8815_v63 = vmul.f32 %v17946_v50, %v8631_v61  ;;  %v12957_v2 = vpop.f32.mrb[75].mxu1 }
 0xd10   : > { %v8983_v4 = vmax.f32 %v8942_v62, 0.0  ;;  %v8861_v5 = vadd.f32 %v17951_v53, %v8815_v63 }
 0xd11   : > { %v8636_v25 = vpop.f32.mrb[76].mxu1 }
 0xd12   : > { %9024 = vst [vmem:[%s17960_s30 + $0x120] sm:$0xff] %v8983_v4  ;;  %v8943_v6 = vadd.f32 %v8902_v3, %v8861_v5  ;;  %v8816_v7 = vmul.f32 %v17946_v50, %v8636_v25  ;;  %v12960_v9 = vpop.f32.mrb[77].mxu1 }
 0xd14   : > { %v8984_v10 = vmax.f32 %v8943_v6, 0.0  ;;  %v8862_v11 = vadd.f32 %v17951_v53, %v8816_v7 }
 0xd15   : > { %v8641_v13 = vpop.f32.mrb[78].mxu1 }
 0xd16   : > { %9025 = vst [vmem:[%s17960_s30 + $0x128] sm:$0xff] %v8984_v10  ;;  %v8944_v14 = vadd.f32 %v8903_v36, %v8862_v11  ;;  %v8817_v15 = vmul.f32 %v17946_v50, %v8641_v13  ;;  %v12963_v12 = vpop.f32.mrb[79].mxu1 }
 0xd18   : > { %v8985_v18 = vmax.f32 %v8944_v14, 0.0  ;;  %v8863_v16 = vadd.f32 %v17951_v53, %v8817_v15 }
 0xd19   : > { %v8646_v19 = vpop.f32.mrb[80].mxu1 }
 0xd1a   : > { %9026 = vst [vmem:[%s17960_s30 + $0x130] sm:$0xff] %v8985_v18  ;;  %v8945_v21 = vadd.f32 %v8904_v17, %v8863_v16  ;;  %v8818_v20 = vmul.f32 %v17946_v50, %v8646_v19  ;;  %v12966_v22 = vpop.f32.mrb[81].mxu1 }
 0xd1c   : > { %v8986_v24 = vmax.f32 %v8945_v21, 0.0  ;;  %v8864_v26 = vadd.f32 %v17951_v53, %v8818_v20 }
 0xd1e   : > { %9027 = vst [vmem:[%s17960_s30 + $0x138] sm:$0xff] %v8986_v24  ;;  %v8946_v28 = vadd.f32 %v8905_v23, %v8864_v26 }
 0xd20   : > { %v8987_v1 = vmax.f32 %v8946_v28, 0.0 }
 0xd22   : > { %9028 = vst [vmem:[%s17960_s30 + $0x140] sm:$0xff] %v8987_v1 }
 0xd23   : > { %14898 = shalt.err (!%p14895_p1)
}
 0xd24   : > { %s14899_s16 = scalar_lea.hbm %s18124_s6, 5248  ;;  %s14903_s12 = scalar_lea.hbm %s18176_s5, 10496 }
 0xd25   : > { %p14900_p13 = scmp.ne.s32.totalorder %s18124_s6, %s14899_s16  ;;  %p14904_p4 = scmp.lt.u32.totalorder %s18124_s6, %s18176_s5 }
 0xd26   : > { %p14905_p5 = scmp.lt.u32.totalorder %s14903_s12, %s14899_s16  ;;  %p14907_p11 = scmp.lt.u32.totalorder %s14899_s16, %s18124_s6 }
 0xd27   : > { %p14901_p6 = pnand %p14900_p13, %p18192_p0 }
 0xd28   : > { %p14906_p8 = por %p14905_p5, %p14904_p4 }
 0xd29   : > { %p14902_p10 = pneg %p14901_p6 }
 0xd2a   : > { %p14908_p2 = por %p14907_p11, %p14906_p8 }
 0xd2c   : > { %p14909_p3 = pnand %p14908_p2, %p14902_p10 }
 0xd2e   : > { %14912 = shalt.err (!%p14909_p3)
}
 0xd2f   : > { %s14967_s7 = smov 128   ;;  %s14968_s15 = smov 8  }
 0xd30   : > { %14726 = dma.vmem_to_hbm [thread:$0]  (%p18192_p0), %s18126_s28, 5248, %s18124_s6, %s9030_s10, %s14967_s7, %s14967_s7, %s14968_s15  }
 0xd31 PF: > { %s9058_s14 = sand.u32 1, %s14943_s18   ;;  %p18193_p7 = scmp.ne.s32.totalorder %s18182_s25, 0 }
 0xd32   : > { %p18194_p9 = scmp.ge.s32.totalorder %s14955_s21, 2  ;;  %s9059_s22 = scalar_lea.sflag [#allocation6], %s9058_s14 }
 0xd34   : > { %p14740_p12 = pnand %p18194_p9, %p18193_p7 }
 0xd36   : > { %14938 = dma.done.wait (!%p14740_p12), %s9059_s22, 5248  }
 0xd37   : > { %14940 = vsyncadd (!%p14740_p12), %s9059_s22, 4294962048  ;;  %p19_p1 = scmp.ge.s32.totalorder %s15115_s29, 4   ;;  %s18195_s18 = smov %s14947_s19 }
 0xd38   : > { %s18196_s19 = smov %s14951_s20  ;;  %s18197_s20 = smov %s15131_s27 }
 0xd39   : > { %s18198_s21 = smov %s15115_s29  ;;  %21 = sbr.rel (!%p19_p1) target bundleno = 6 (0x6), region = 109 }
 0xd40   :  { %9064 = vsyncpa [#allocation5], 1 }
 0xd41   :  { %9066 = vsyncpa [#allocation5 + $0x1], 1 }
 0xd42   :  { %9067 = vsyncpa [#allocation8], 1 }
 0xd43   :  { %9068 = vsyncpa [#allocation6], 1 }
 0xd44   :  { %9070 = vsyncpa [#allocation6 + $0x1], 1 }

</bundles_post_ra>
